<compile_context>
chip_gen: v7x
topology: tpu7x:2x2x1
jax: 0.10.0
libtpu: 0.0.40
codegen_flags: <defaults>
</compile_context>

<pallas_src>
import jax
import jax.numpy as jnp
from jax.experimental import pallas as pl
from jax.experimental.pallas import tpu as pltpu


def _gconv_attn_kernel(adj_ref, feat_src_ref, feat_dst_ref, inv_deg_ref,
                       emb_ref, wq_ref, wk_ref, wv_ref, wa_ref, wp_ref, bp_ref,
                       out_ref, acc_ref):
    R, TM, TK = adj_ref.shape
    D = feat_src_ref.shape[1]
    H = wq_ref.shape[1]
    RT = R * TM
    k_id = pl.program_id(1)

    @pl.when(k_id == 0)
    def _init():
        acc_ref[...] = jnp.zeros_like(acc_ref)

    # Reduction over source tiles: one batched bf16 MXU call for all R relations.
    adj2d = adj_ref[...].reshape(RT, TK)                          # bf16 [R*TM, TK]
    acc_ref[...] += jnp.dot(adj2d, feat_src_ref[...],
                            preferred_element_type=jnp.float32)

    @pl.when(k_id == pl.num_programs(1) - 1)
    def _finalize():
        feat_dst = feat_dst_ref[...]                              # [TM, D] f32

        # key[r] = (adj[r] @ feat) * emb[r] / max(deg, 1)
        # (u_mul_e + fn.mean; 1/deg precomputed exactly in f32 upstream)
        key2 = (acc_ref[...].reshape(R, TM, D)
                * emb_ref[...][:, None, :]
                * inv_deg_ref[...]
                ).astype(jnp.bfloat16).reshape(RT, D)             # bf16 [RT, D]

        # Batched projections over all relations at once (bf16 operands, f32 acc).
        q = jnp.dot(feat_dst.astype(jnp.bfloat16), wq_ref[...],
                    preferred_element_type=jnp.float32)           # [TM, H]
        k_all = jnp.dot(key2, wk_ref[...],
                        preferred_element_type=jnp.float32)       # [RT, H]
        v_all = jnp.dot(key2, wv_ref[...],
                        preferred_element_type=jnp.float32)       # [RT, H]

        diff = (q[None, :, :] - k_all.reshape(R, TM, H)
                ).astype(jnp.bfloat16).reshape(RT, H)
        # NOTE: attn_fc bias is constant across the relation axis and cancels
        # exactly in the softmax over relations, so it is dropped here.
        s3 = jnp.dot(diff, wa_ref[...],
                     preferred_element_type=jnp.float32).reshape(R, TM, H)

        # Softmax over the relation axis (R leading -> pure VPU, exact divide).
        m = jnp.max(s3, axis=0, keepdims=True)
        e = jnp.exp(s3 - m)
        a = e / jnp.sum(e, axis=0, keepdims=True)
        o = jnp.sum(a * v_all.reshape(R, TM, H), axis=0)          # [TM, H] f32

        out = (jnp.dot(o.astype(jnp.bfloat16), wp_ref[...],
                       preferred_element_type=jnp.float32)
               + bp_ref[...] + feat_dst)                          # post_fc + residual
        out_ref[...] = out.astype(out_ref.dtype)


def preprocess_graph(adj):
    """One-time graph preprocessing (kept OUT of the per-call hot path).

    Returns:
      adj_bf16:  [R, N, N] bf16   0/1 adjacency (exact in bf16)
      inv_deg:   [R, N, 1] f32    exact 1 / max(in-degree, 1)   (fn.mean parity)
    """
    adj32 = adj.astype(jnp.float32)
    deg = jnp.sum(adj32, axis=2, keepdims=True)                   # [R, N, 1]
    inv_deg = 1.0 / jnp.maximum(deg, 1.0)                         # exact f32 divide
    return adj32.astype(jnp.bfloat16), inv_deg


def gconv_attn(feat, emb, adj_bf16, inv_deg, wq, wk, wv, wa, ba, wp, bp,
               *, tm=256, tk=1024):
    """Per-call hot path. `adj_bf16` / `inv_deg` come from preprocess_graph()."""
    del ba  # attn_fc bias cancels exactly in the softmax over relations.
    N, D = feat.shape
    R = emb.shape[0]
    H = wq.shape[1]
    assert adj_bf16.shape == (R, N, N)
    assert inv_deg.shape == (R, N, 1)

    tm = min(tm, N)
    tk = min(tk, N)
    # Keep >= 2 dst tiles when possible so the "parallel" axis can shard across
    # the 2 TensorCores on v7x (harmless on single-TC parts).
    if N // tm < 2 and N % 16 == 0:
        tm = N // 2
    assert N % tm == 0 and N % tk == 0, "demo requires N divisible by tile sizes"

    # Small per-call casts only (adj is carried in bf16 upstream; no extra
    # O(R*N^2) HBM pass here).
    feat_bf = feat.astype(jnp.bfloat16)      # source-side operand of adj @ feat
    feat32 = feat.astype(jnp.float32)        # dst-side (q input, residual)
    emb32 = emb.astype(jnp.float32)
    wq_bf = wq.astype(jnp.bfloat16)
    wk_bf = wk.astype(jnp.bfloat16)
    wv_bf = wv.astype(jnp.bfloat16)
    wa_bf = wa.astype(jnp.bfloat16)
    wp_bf = wp.astype(jnp.bfloat16)
    bp32 = bp.astype(jnp.float32)

    grid = (N // tm, N // tk)                # (dst tiles, src reduction tiles)

    grid_spec = pltpu.PrefetchScalarGridSpec(
        num_scalar_prefetch=0,
        grid=grid,
        in_specs=[
            pl.BlockSpec((R, tm, tk), lambda i, k: (0, i, k)),   # adj (bf16)
            pl.BlockSpec((tk, D), lambda i, k: (k, 0)),          # feat src (bf16)
            pl.BlockSpec((tm, D), lambda i, k: (i, 0)),          # feat dst (f32)
            pl.BlockSpec((R, tm, 1), lambda i, k: (0, i, 0)),    # 1/deg (f32)
            pl.BlockSpec((R, D), lambda i, k: (0, 0)),           # emb
            pl.BlockSpec((D, H), lambda i, k: (0, 0)),           # wq (bf16)
            pl.BlockSpec((D, H), lambda i, k: (0, 0)),           # wk (bf16)
            pl.BlockSpec((D, H), lambda i, k: (0, 0)),           # wv (bf16)
            pl.BlockSpec((H, H), lambda i, k: (0, 0)),           # wa (bf16)
            pl.BlockSpec((H, D), lambda i, k: (0, 0)),           # wp (bf16)
            pl.BlockSpec((1, D), lambda i, k: (0, 0)),           # bp (f32)
        ],
        out_specs=pl.BlockSpec((tm, D), lambda i, k: (i, 0)),
        scratch_shapes=[
            pltpu.VMEM((R * tm, D), jnp.float32),   # adj @ feat accumulator
        ],
    )

    return pl.pallas_call(
        _gconv_attn_kernel,
        out_shape=jax.ShapeDtypeStruct((N, D), jnp.float32),
        grid_spec=grid_spec,
        compiler_params=pltpu.CompilerParams(
            dimension_semantics=("parallel", "arbitrary")),
    )(adj_bf16, feat_bf, feat32, inv_deg, emb32,
      wq_bf, wk_bf, wv_bf, wa_bf, wp_bf, bp32)


def gconv_attn_reference(feat, emb, adj, wq, wk, wv, wa, ba, wp, bp):
    """Pure-JAX f32 reference mirroring the PyTorch/DGL forward."""
    deg = jnp.sum(adj, axis=2, keepdims=True)                    # [R, N, 1]
    msg = feat[None, :, :] * emb[:, None, :]                     # [R, N, D]
    key = jnp.matmul(adj, msg) / jnp.maximum(deg, 1.0)           # [R, N, D]
    key = jnp.transpose(key, (1, 0, 2))                          # [N, R, D]

    q = feat @ wq                                                # [N, H]
    k = key @ wk                                                 # [N, R, H]
    v = key @ wv                                                 # [N, R, H]
    s = (q[:, None, :] - k) @ wa + ba[0]                         # [N, R, H]
    a = jax.nn.softmax(s, axis=1)
    o = jnp.sum(a * v, axis=1)                                   # [N, H]
    return o @ wp + bp[0] + feat


if __name__ == "__main__":
    # nodes, feature dim, hidden dim, edge types (lane-dense D/H)
    N, D, H, R = 512, 128, 128, 3

    key = jax.random.PRNGKey(0)
    ks = jax.random.split(key, 10)

    feat = jax.random.normal(ks[0], (N, D), jnp.float32)
    emb = jax.random.normal(ks[1], (R, D), jnp.float32)
    adj = jax.random.bernoulli(ks[2], 0.3, (R, N, N)).astype(jnp.float32)

    # Linear weights pre-transposed to [in, out]; biases kept 2D for TPU layout.
    wq = jax.random.normal(ks[3], (D, H), jnp.float32) * 0.1
    wk = jax.random.normal(ks[4], (D, H), jnp.float32) * 0.1
    wv = jax.random.normal(ks[5], (D, H), jnp.float32) * 0.1
    wa = jax.random.normal(ks[6], (H, H), jnp.float32) * 0.1
    ba = jax.random.normal(ks[7], (1, H), jnp.float32) * 0.1
    wp = jax.random.normal(ks[8], (H, D), jnp.float32) * 0.1
    bp = jax.random.normal(ks[9], (1, D), jnp.float32) * 0.1

    # One-time graph preprocessing (bf16 adjacency + exact f32 1/deg),
    # kept out of the per-call hot path.
    adj_bf16, inv_deg = preprocess_graph(adj)

    # tm/tk here are smaller than the performance defaults (tm=256, tk=1024)
    # purely so the tiny demo exercises the 2-step reduction (init/accumulate/
    # finalize) AND the 2-tile parallel dst axis: grid = (2, 2).
    out = gconv_attn(feat, emb, adj_bf16, inv_deg,
                     wq, wk, wv, wa, ba, wp, bp, tm=256, tk=256)
    out = jax.block_until_ready(out)

    ref = gconv_attn_reference(feat, emb, adj, wq, wk, wv, wa, ba, wp, bp)
    assert out.shape == (N, D)
    # bf16 adjacency/feat stream + bf16 epilogue matmuls (f32 accumulation,
    # exact softmax divide, exact 1/deg) -> low-1e-2-level error vs f32 ref.
    err = jnp.max(jnp.abs(out - ref))
    assert jnp.allclose(out, ref, rtol=2e-2, atol=2e-2), f"max abs err = {err}"

    print("KERNEL_OK")
</pallas_src>

<mosaic_0001>
module attributes {stable_mosaic.version = 11 : i64} {
  func.func @_gconv_attn_kernel(%arg0: i32, %arg1: i32, %arg2: memref<3x256x256xbf16, #tpu.memory_space<vmem>>, %arg3: memref<256x128xbf16, #tpu.memory_space<vmem>>, %arg4: memref<256x128xf32, #tpu.memory_space<vmem>>, %arg5: memref<3x256x1xf32, #tpu.memory_space<vmem>>, %arg6: memref<3x128xf32, #tpu.memory_space<vmem>>, %arg7: memref<128x128xbf16, #tpu.memory_space<vmem>>, %arg8: memref<128x128xbf16, #tpu.memory_space<vmem>>, %arg9: memref<128x128xbf16, #tpu.memory_space<vmem>>, %arg10: memref<128x128xbf16, #tpu.memory_space<vmem>>, %arg11: memref<128x128xbf16, #tpu.memory_space<vmem>>, %arg12: memref<1x128xf32, #tpu.memory_space<vmem>>, %arg13: memref<256x128xf32, #tpu.memory_space<vmem>>, %arg14: memref<768x128xf32, #tpu.memory_space<vmem>>) attributes {dimension_semantics = [#tpu.dimension_semantics<parallel>, #tpu.dimension_semantics<arbitrary>], iteration_bounds = array<i64: 2, 2>, scalar_prefetch = 0 : i64, scratch_operands = 1 : i64, tpu.core_type = #tpu.core_type<tc>, window_params = [{transform_indices = @transform_0, window_bounds = array<i64: 3, 256, 256>}, {transform_indices = @transform_1, window_bounds = array<i64: 256, 128>}, {transform_indices = @transform_2, window_bounds = array<i64: 256, 128>}, {transform_indices = @transform_3, window_bounds = array<i64: 3, 256, 1>}, {pipeline_mode = #tpu.pipeline_mode<synchronous>, transform_indices = @transform_4, window_bounds = array<i64: 3, 128>}, {pipeline_mode = #tpu.pipeline_mode<synchronous>, transform_indices = @transform_5, window_bounds = array<i64: 128, 128>}, {pipeline_mode = #tpu.pipeline_mode<synchronous>, transform_indices = @transform_6, window_bounds = array<i64: 128, 128>}, {pipeline_mode = #tpu.pipeline_mode<synchronous>, transform_indices = @transform_7, window_bounds = array<i64: 128, 128>}, {pipeline_mode = #tpu.pipeline_mode<synchronous>, transform_indices = @transform_8, window_bounds = array<i64: 128, 128>}, {pipeline_mode = #tpu.pipeline_mode<synchronous>, transform_indices = @transform_9, window_bounds = array<i64: 128, 128>}, {pipeline_mode = #tpu.pipeline_mode<synchronous>, transform_indices = @transform_10, window_bounds = array<i64: 1, 128>}, {transform_indices = @transform_11, window_bounds = array<i64: 256, 128>}]} {
    %c0_i32 = arith.constant 0 : i32
    %0 = arith.cmpi eq, %arg1, %c0_i32 : i32
    %1 = arith.extui %0 : i1 to i32
    %c0_i32_0 = arith.constant 0 : i32
    %2 = arith.cmpi ne, %1, %c0_i32_0 : i32
    scf.if %2 {
      %cst_10 = arith.constant 0.000000e+00 : f32
      %13 = vector.broadcast %cst_10 : f32 to vector<768x128xf32>
      %c0_11 = arith.constant 0 : index
      %c0_12 = arith.constant 0 : index
      %14 = vector.load %arg14[%c0_11, %c0_12] : memref<768x128xf32, #tpu.memory_space<vmem>>, vector<768x128xf32>
      tpu.vector_store %arg14[%c0_11, %c0_12], %13 {strides = array<i32>} : memref<768x128xf32, #tpu.memory_space<vmem>>, vector<768x128xf32>,
    } else {
    }
    %c0 = arith.constant 0 : index
    %c0_1 = arith.constant 0 : index
    %c0_2 = arith.constant 0 : index
    %3 = vector.load %arg2[%c0, %c0_1, %c0_2] : memref<3x256x256xbf16, #tpu.memory_space<vmem>>, vector<3x256x256xbf16>
    %4 = vector.shape_cast %3 : vector<3x256x256xbf16> to vector<768x256xbf16>
    %c0_3 = arith.constant 0 : index
    %c0_4 = arith.constant 0 : index
    %5 = vector.load %arg14[%c0_3, %c0_4] : memref<768x128xf32, #tpu.memory_space<vmem>>, vector<768x128xf32>
    %c0_5 = arith.constant 0 : index
    %c0_6 = arith.constant 0 : index
    %6 = vector.load %arg3[%c0_5, %c0_6] : memref<256x128xbf16, #tpu.memory_space<vmem>>, vector<256x128xbf16>
    %cst = arith.constant dense<0.000000e+00> : vector<768x128xf32>
    %7 = tpu.matmul %4, %6, %cst {dimension_numbers = #tpu.dot_dimension_numbers<[1], [0], [0], [1], [0, 0, 1, 1], [], []>} : vector<768x256xbf16>, vector<256x128xbf16>, vector<768x128xf32> -> vector<768x128xf32>
    %8 = arith.addf %5, %7 : vector<768x128xf32>
    %c0_7 = arith.constant 0 : index
    %c0_8 = arith.constant 0 : index
    %9 = vector.load %arg14[%c0_7, %c0_8] : memref<768x128xf32, #tpu.memory_space<vmem>>, vector<768x128xf32>
    tpu.vector_store %arg14[%c0_7, %c0_8], %8 {strides = array<i32>} : memref<768x128xf32, #tpu.memory_space<vmem>>, vector<768x128xf32>,
    %c1_i32 = arith.constant 1 : i32
    %10 = arith.cmpi eq, %arg1, %c1_i32 : i32
    %11 = arith.extui %10 : i1 to i32
    %c0_i32_9 = arith.constant 0 : i32
    %12 = arith.cmpi ne, %11, %c0_i32_9 : i32
    scf.if %12 {
      %c0_10 = arith.constant 0 : index
      %c0_11 = arith.constant 0 : index
      %13 = vector.load %arg4[%c0_10, %c0_11] : memref<256x128xf32, #tpu.memory_space<vmem>>, vector<256x128xf32>
      %c0_12 = arith.constant 0 : index
      %c0_13 = arith.constant 0 : index
      %14 = vector.load %arg14[%c0_12, %c0_13] : memref<768x128xf32, #tpu.memory_space<vmem>>, vector<768x128xf32>
      %15 = vector.shape_cast %14 : vector<768x128xf32> to vector<3x256x128xf32>
      %c0_14 = arith.constant 0 : index
      %c0_15 = arith.constant 0 : index
      %16 = vector.load %arg6[%c0_14, %c0_15] : memref<3x128xf32, #tpu.memory_space<vmem>>, vector<3x128xf32>
      %17 = vector.shape_cast %16 : vector<3x128xf32> to vector<3x1x128xf32>
      %18 = vector.broadcast %17 : vector<3x1x128xf32> to vector<3x256x128xf32>
      %19 = arith.mulf %15, %18 : vector<3x256x128xf32>
      %c0_16 = arith.constant 0 : index
      %c0_17 = arith.constant 0 : index
      %c0_18 = arith.constant 0 : index
      %20 = vector.load %arg5[%c0_16, %c0_17, %c0_18] : memref<3x256x1xf32, #tpu.memory_space<vmem>>, vector<3x256x1xf32>
      %21 = vector.broadcast %20 : vector<3x256x1xf32> to vector<3x256x128xf32>
      %22 = arith.mulf %19, %21 : vector<3x256x128xf32>
      %23 = arith.truncf %22 : vector<3x256x128xf32> to vector<3x256x128xbf16>
      %24 = vector.shape_cast %23 : vector<3x256x128xbf16> to vector<768x128xbf16>
      %25 = arith.truncf %13 : vector<256x128xf32> to vector<256x128xbf16>
      %c0_19 = arith.constant 0 : index
      %c0_20 = arith.constant 0 : index
      %26 = vector.load %arg7[%c0_19, %c0_20] : memref<128x128xbf16, #tpu.memory_space<vmem>>, vector<128x128xbf16>
      %cst_21 = arith.constant dense<0.000000e+00> : vector<256x128xf32>
      %27 = tpu.matmul %25, %26, %cst_21 {dimension_numbers = #tpu.dot_dimension_numbers<[1], [0], [0], [1], [0, 0, 1, 1], [], []>} : vector<256x128xbf16>, vector<128x128xbf16>, vector<256x128xf32> -> vector<256x128xf32>
      %c0_22 = arith.constant 0 : index
      %c0_23 = arith.constant 0 : index
      %28 = vector.load %arg8[%c0_22, %c0_23] : memref<128x128xbf16, #tpu.memory_space<vmem>>, vector<128x128xbf16>
      %cst_24 = arith.constant dense<0.000000e+00> : vector<768x128xf32>
      %29 = tpu.matmul %24, %28, %cst_24 {dimension_numbers = #tpu.dot_dimension_numbers<[1], [0], [0], [1], [0, 0, 1, 1], [], []>} : vector<768x128xbf16>, vector<128x128xbf16>, vector<768x128xf32> -> vector<768x128xf32>
      %c0_25 = arith.constant 0 : index
      %c0_26 = arith.constant 0 : index
      %30 = vector.load %arg9[%c0_25, %c0_26] : memref<128x128xbf16, #tpu.memory_space<vmem>>, vector<128x128xbf16>
      %cst_27 = arith.constant dense<0.000000e+00> : vector<768x128xf32>
      %31 = tpu.matmul %24, %30, %cst_27 {dimension_numbers = #tpu.dot_dimension_numbers<[1], [0], [0], [1], [0, 0, 1, 1], [], []>} : vector<768x128xbf16>, vector<128x128xbf16>, vector<768x128xf32> -> vector<768x128xf32>
      %32 = vector.shape_cast %27 : vector<256x128xf32> to vector<1x256x128xf32>
      %33 = vector.shape_cast %29 : vector<768x128xf32> to vector<3x256x128xf32>
      %34 = vector.broadcast %32 : vector<1x256x128xf32> to vector<3x256x128xf32>
      %35 = arith.subf %34, %33 : vector<3x256x128xf32>
      %36 = arith.truncf %35 : vector<3x256x128xf32> to vector<3x256x128xbf16>
      %37 = vector.shape_cast %36 : vector<3x256x128xbf16> to vector<768x128xbf16>
      %c0_28 = arith.constant 0 : index
      %c0_29 = arith.constant 0 : index
      %38 = vector.load %arg10[%c0_28, %c0_29] : memref<128x128xbf16, #tpu.memory_space<vmem>>, vector<128x128xbf16>
      %cst_30 = arith.constant dense<0.000000e+00> : vector<768x128xf32>
      %39 = tpu.matmul %37, %38, %cst_30 {dimension_numbers = #tpu.dot_dimension_numbers<[1], [0], [0], [1], [0, 0, 1, 1], [], []>} : vector<768x128xbf16>, vector<128x128xbf16>, vector<768x128xf32> -> vector<768x128xf32>
      %40 = vector.shape_cast %39 : vector<768x128xf32> to vector<3x256x128xf32>
      %cst_31 = arith.constant dense<0xFF800000> : vector<256x128xf32>
      %41 = vector.multi_reduction <maximumf>, %40, %cst_31 [0] : vector<3x256x128xf32> to vector<256x128xf32>
      %42 = vector.shape_cast %41 : vector<256x128xf32> to vector<1x256x128xf32>
      %43 = vector.broadcast %42 : vector<1x256x128xf32> to vector<3x256x128xf32>
      %44 = arith.subf %40, %43 : vector<3x256x128xf32>
      %45 = math.exp %44 : vector<3x256x128xf32>
      %cst_32 = arith.constant dense<0.000000e+00> : vector<256x128xf32>
      %46 = vector.multi_reduction <add>, %45, %cst_32 [0] : vector<3x256x128xf32> to vector<256x128xf32>
      %47 = vector.shape_cast %46 : vector<256x128xf32> to vector<1x256x128xf32>
      %48 = vector.broadcast %47 : vector<1x256x128xf32> to vector<3x256x128xf32>
      %49 = arith.divf %45, %48 : vector<3x256x128xf32>
      %50 = vector.shape_cast %31 : vector<768x128xf32> to vector<3x256x128xf32>
      %51 = arith.mulf %49, %50 : vector<3x256x128xf32>
      %cst_33 = arith.constant dense<0.000000e+00> : vector<256x128xf32>
      %52 = vector.multi_reduction <add>, %51, %cst_33 [0] : vector<3x256x128xf32> to vector<256x128xf32>
      %53 = arith.truncf %52 : vector<256x128xf32> to vector<256x128xbf16>
      %c0_34 = arith.constant 0 : index
      %c0_35 = arith.constant 0 : index
      %54 = vector.load %arg11[%c0_34, %c0_35] : memref<128x128xbf16, #tpu.memory_space<vmem>>, vector<128x128xbf16>
      %cst_36 = arith.constant dense<0.000000e+00> : vector<256x128xf32>
      %55 = tpu.matmul %53, %54, %cst_36 {dimension_numbers = #tpu.dot_dimension_numbers<[1], [0], [0], [1], [0, 0, 1, 1], [], []>} : vector<256x128xbf16>, vector<128x128xbf16>, vector<256x128xf32> -> vector<256x128xf32>
      %c0_37 = arith.constant 0 : index
      %c0_38 = arith.constant 0 : index
      %56 = vector.load %arg12[%c0_37, %c0_38] : memref<1x128xf32, #tpu.memory_space<vmem>>, vector<1x128xf32>
      %57 = vector.broadcast %56 : vector<1x128xf32> to vector<256x128xf32>
      %58 = arith.addf %55, %57 : vector<256x128xf32>
      %59 = arith.addf %58, %13 : vector<256x128xf32>
      %c0_39 = arith.constant 0 : index
      %c0_40 = arith.constant 0 : index
      %60 = vector.load %arg13[%c0_39, %c0_40] : memref<256x128xf32, #tpu.memory_space<vmem>>, vector<256x128xf32>
      tpu.vector_store %arg13[%c0_39, %c0_40], %59 {strides = array<i32>} : memref<256x128xf32, #tpu.memory_space<vmem>>, vector<256x128xf32>,
    } else {
    }
    return
  }
  func.func @transform_0(%arg0: i32, %arg1: i32) -> (i32, i32, i32) {
    %c0_i32 = arith.constant 0 : i32
    %c0_i32_0 = arith.constant 0 : i32
    return %c0_i32, %arg0, %arg1 : i32, i32, i32
  }
  func.func @transform_1(%arg0: i32, %arg1: i32) -> (i32, i32) {
    %c0_i32 = arith.constant 0 : i32
    %c0_i32_0 = arith.constant 0 : i32
    return %arg1, %c0_i32 : i32, i32
  }
  func.func @transform_2(%arg0: i32, %arg1: i32) -> (i32, i32) {
    %c0_i32 = arith.constant 0 : i32
    %c0_i32_0 = arith.constant 0 : i32
    return %arg0, %c0_i32 : i32, i32
  }
  func.func @transform_3(%arg0: i32, %arg1: i32) -> (i32, i32, i32) {
    %c0_i32 = arith.constant 0 : i32
    %c0_i32_0 = arith.constant 0 : i32
    %c0_i32_1 = arith.constant 0 : i32
    return %c0_i32, %arg0, %c0_i32_0 : i32, i32, i32
  }
  func.func @transform_4(%arg0: i32, %arg1: i32) -> (i32, i32) {
    %c0_i32 = arith.constant 0 : i32
    %c0_i32_0 = arith.constant 0 : i32
    %c0_i32_1 = arith.constant 0 : i32
    return %c0_i32, %c0_i32_0 : i32, i32
  }
  func.func @transform_5(%arg0: i32, %arg1: i32) -> (i32, i32) {
    %c0_i32 = arith.constant 0 : i32
    %c0_i32_0 = arith.constant 0 : i32
    %c0_i32_1 = arith.constant 0 : i32
    return %c0_i32, %c0_i32_0 : i32, i32
  }
  func.func @transform_6(%arg0: i32, %arg1: i32) -> (i32, i32) {
    %c0_i32 = arith.constant 0 : i32
    %c0_i32_0 = arith.constant 0 : i32
    %c0_i32_1 = arith.constant 0 : i32
    return %c0_i32, %c0_i32_0 : i32, i32
  }
  func.func @transform_7(%arg0: i32, %arg1: i32) -> (i32, i32) {
    %c0_i32 = arith.constant 0 : i32
    %c0_i32_0 = arith.constant 0 : i32
    %c0_i32_1 = arith.constant 0 : i32
    return %c0_i32, %c0_i32_0 : i32, i32
  }
  func.func @transform_8(%arg0: i32, %arg1: i32) -> (i32, i32) {
    %c0_i32 = arith.constant 0 : i32
    %c0_i32_0 = arith.constant 0 : i32
    %c0_i32_1 = arith.constant 0 : i32
    return %c0_i32, %c0_i32_0 : i32, i32
  }
  func.func @transform_9(%arg0: i32, %arg1: i32) -> (i32, i32) {
    %c0_i32 = arith.constant 0 : i32
    %c0_i32_0 = arith.constant 0 : i32
    %c0_i32_1 = arith.constant 0 : i32
    return %c0_i32, %c0_i32_0 : i32, i32
  }
  func.func @transform_10(%arg0: i32, %arg1: i32) -> (i32, i32) {
    %c0_i32 = arith.constant 0 : i32
    %c0_i32_0 = arith.constant 0 : i32
    %c0_i32_1 = arith.constant 0 : i32
    return %c0_i32, %c0_i32_0 : i32, i32
  }
  func.func @transform_11(%arg0: i32, %arg1: i32) -> (i32, i32) {
    %c0_i32 = arith.constant 0 : i32
    %c0_i32_0 = arith.constant 0 : i32
    return %arg0, %c0_i32 : i32, i32
  }
}

</mosaic_0001>

<bundles_post_ra>
// kernel: tpu_custom_call.1
= control target key start
LH: loop header
LB: loop body
LE: loop exit
PB: predicated region body
PF: predicated region fallthrough
CT: control target
= control target key end

     0   :  { %s11949_s0 = inlined_call_operand.hbm [shape: bf16[3,512,512], index: 0, kind: input, shape index: {}]   ;;  %s11950_s1 = inlined_call_operand.hbm [shape: bf16[512,128], index: 1, kind: input, shape index: {}]   ;;  %s11951_s2 = inlined_call_operand.hbm [shape: f32[512,128], index: 2, kind: input, shape index: {}]   ;;  %s11952_s3 = inlined_call_operand.vmem [shape: f32[3,512,1], index: 3, kind: input, shape index: {}]   ;;  %s11953_s4 = inlined_call_operand.hbm [shape: f32[3,128], index: 4, kind: input, shape index: {}]   ;;  %s11954_s5 = inlined_call_operand.hbm [shape: bf16[128,128], index: 5, kind: input, shape index: {}]   ;;  %s11955_s6 = inlined_call_operand.hbm [shape: bf16[128,128], index: 6, kind: input, shape index: {}]   ;;  %s11956_s7 = inlined_call_operand.hbm [shape: bf16[128,128], index: 7, kind: input, shape index: {}]   ;;  %s11957_s8 = inlined_call_operand.hbm [shape: bf16[128,128], index: 8, kind: input, shape index: {}]   ;;  %s11958_s9 = inlined_call_operand.hbm [shape: bf16[128,128], index: 9, kind: input, shape index: {}]   ;;  %s11959_s10 = inlined_call_operand.hbm [shape: f32[1,128], index: 10, kind: input, shape index: {}]   ;;  %s11960_s11 = inlined_call_operand.hbm [shape: f32[512,128], index: 11, kind: output, shape index: {}]  }
   0x1   :  { %12091 = sst [smem:[#allocation196_spill]] %s11950_s1 }
   0x2   :  { %12092 = sst [smem:[#allocation197_spill]] %s11951_s2 }
   0x3   :  { %12093 = sst [smem:[#allocation198_spill]] %s11952_s3 }
   0x4   :  { %12094 = sst [smem:[#allocation199_spill]] %s11953_s4 }
   0x5   :  { %12095 = sst [smem:[#allocation200_spill]] %s11955_s6 }
   0x6   :  { %12096 = sst [smem:[#allocation201_spill]] %s11960_s11 }
   0x7   :  { %16 = vsyncpa [#allocation4], 0 }
   0x8   :  { %18 = vsyncpa [#allocation4 + $0x1], 0 }
   0x9   :  { %19 = vsyncpa [#allocation7], 0 }
   0xa   :  { %21 = vsyncpa [#allocation7 + $0x1], 0 }
   0xb   :  { %22 = vsyncpa [#allocation11], 0 }
   0xc   :  { %23 = vsyncpa [#allocation14], 0 }
   0xd   :  { %24 = vsyncpa [#allocation17], 0 }
   0xe   :  { %25 = vsyncpa [#allocation20], 0 }
   0xf   :  { %26 = vsyncpa [#allocation5], 0 }
  0x10   :  { %28 = vsyncpa [#allocation5 + $0x1], 0  ;;  %s8761_s17 = smov 0   ;;  %s8763_s18 = smov 0  }
  0x11   :  { %s8765_s19 = smov 0   ;;  %s8767_s20 = smov 0  }
  0x12   :  { %s8769_s21 = smov 0   ;;  %s8771_s22 = smov 0  }
  0x13   :  { %s8773_s23 = smov 0   ;;  %s8775_s24 = smov 0  }
  0x14   :  { %s8777_s25 = smov 0   ;;  %s8779_s26 = smov 0  }
  0x15   :  { %s8781_s27 = smov 0   ;;  %s8783_s28 = smov 0  }
  0x16   :  { %s8785_s29 = smov 0   ;;  %s8787_s30 = smov 0  }
  0x17 LB: > { %12097 = sst [smem:[#allocation33_spill]] %s8618_s17  ;;  %s8830_s12 = sadd.s32 4294967295, %s8670_s30   ;;  %s8670_s30 = sphi %s8787_s30, %s34_s30   ;;  %s8666_s29 = sphi %s8785_s29, %s12559_s29   ;;  %s8662_s28 = sphi %s8783_s28, %s12558_s28   ;;  %s8658_s27 = sphi %s8781_s27, %s12557_s27   ;;  %s8654_s26 = sphi %s8779_s26, %s12556_s26   ;;  %s8650_s25 = sphi %s8777_s25, %s12555_s25   ;;  %s8646_s24 = sphi %s8775_s24, %s12554_s24   ;;  %s8642_s23 = sphi %s8773_s23, %s12546_s23   ;;  %s8638_s22 = sphi %s8771_s22, %s12553_s22   ;;  %s8634_s21 = sphi %s8769_s21, %s12552_s21   ;;  %s8630_s20 = sphi %s8767_s20, %s12544_s20   ;;  %s8626_s19 = sphi %s8765_s19, %s12551_s19   ;;  %s8622_s18 = sphi %s8763_s18, %s12550_s18   ;;  %s8618_s17 = sphi %s8761_s17, %s12542_s17  }
  0x18   : > { %12098 = sst [smem:[#allocation34_spill]] %s8622_s18  ;;  %s43_s14 = sadd.s32 1, %s8662_s28 }
  0x19   : > { %12099 = sst [smem:[#allocation35_spill]] %s8634_s21  ;;  %s46_s15 = sadd.s32 1, %s8666_s29 }
  0x1a   : > { %12100 = sst [smem:[#allocation36_spill]] %s8646_s24  ;;  %p44_p0 = scmp.ge.s32.totalorder %s43_s14, 2 }
  0x1b   : > { %12101 = sst [smem:[#allocation37_spill]] %s8654_s26  ;;  %s55_s16 = sadd.s32 1, %s8650_s25 }
  0x1c   : > { %12102 = sst [smem:[#allocation38_spill]] %s8658_s27  ;;  %p62_p1 = scmp.ne.s32.totalorder %s8650_s25, %s8646_s24 }
  0x1d   : > { %12103 = sst [smem:[#allocation39_spill]] %s8830_s12  ;;  %p63_p2 = scmp.eq.s32.totalorder %s8670_s30, 0 }
  0x1e   : > { %s12561_s14 = smov (%p44_p0, %s43_s14), 0  ;;  %s12563_s15 = smov (!%p44_p0, %s46_s15), %s8666_s29 }
  0x1f   : > { %12104 = sst [smem:[#allocation40_spill]] %s12561_s14  ;;  %s51_s13 = ssub.s32 %s8662_s28, %s12561_s14 }
  0x20   : > { %p8846_p3 = por %p63_p2, %p62_p1  ;;  %p48_p4 = scmp.ge.s32.totalorder %s12563_s15, 2 }
  0x21   : > { %p68_p5 = scmp.ne.s32.totalorder %s8646_s24, %s8642_s23  ;;  %p11969_p6 = scmp.eq.s32.totalorder %s8830_s12, 0 }
  0x22   : > { %s12105_s11 = scalar_select %p8846_p3, 1, 0 }
  0x23   : > { %p79_p7 = scmp.eq.s32.totalorder %s51_s13, 0  ;;  %s12565_s15 = smov (%p48_p4, %s12563_s15), 0 }
  0x24   : > { %12106 = sst [smem:[#allocation41_spill]] %s12565_s15  ;;  %p8856_p8 = por %p11969_p6, %p68_p5 }
  0x25   : > { %s81_s27 = sadd.s32 1, %s8638_s22  ;;  %s50_s23 = ssub.s32 %s8666_s29, %s12565_s15 }
  0x26   : > { %s12107_s14 = scalar_select %p8856_p8, 1, 0 }
  0x27   : > { %p88_p9 = scmp.ne.s32.totalorder %s8638_s22, %s8634_s21  ;;  %s52_s26 = sor.u32 %s51_s13, %s50_s23 }
  0x28   : > { %12108 = sst [smem:[#allocation42_spill]] %s12107_s14  ;;  %p94_p10 = scmp.ne.s32.totalorder %s8634_s21, %s8630_s20 }
  0x29   : > { %p53_p11 = scmp.eq.s32.totalorder %s52_s26, 0  ;;  %p8869_p12 = por %p88_p9, %p63_p2 }
  0x2a   : > { %s8874_s3 = scalar_select %p79_p7, %s8638_s22, %s81_s27  }
  0x2b   : > { %s12109_s24 = scalar_select %p8869_p12, 1, 0 }
  0x2c   : > { %12110 = sst [smem:[#allocation43_spill]] %s8874_s3  ;;  %p8881_p13 = por %p94_p10, %p11969_p6 }
  0x2d   : > { %s8877_s14 = scalar_select %p53_p11, %s8650_s25, %s55_s16  }
  0x2e   : > { %s12112_s15 = scalar_select %p8881_p13, 1, 0 }
  0x2f   : > { %12111 = sst [smem:[#allocation44_spill]] %s8877_s14  ;;  %p105_p0 = scmp.eq.s32.totalorder %s50_s23, 0 }
  0x30   : > { %12113 = sst [smem:[#allocation45_spill]] %s12112_s15  ;;  %s107_s13 = sadd.s32 1, %s8626_s19 }
  0x31   : > { %p114_p1 = scmp.ne.s32.totalorder %s8626_s19, %s8622_s18  ;;  %p120_p5 = scmp.ne.s32.totalorder %s8622_s18, %s8618_s17 }
  0x32   : > { %s8889_s20 = scalar_select %p105_p0, %s8626_s19, %s107_s13  }
  0x33   : > { %p8893_p4 = por %p114_p1, %p63_p2  ;;  %p317_p7 = scmp.eq.s32.totalorder %s8830_s12, 3 }
  0x34   : > { %12114 = sst [smem:[#allocation46_spill]] %s8889_s20  ;;  %s12117_s27 = sadd.s32 4294967294, %s8670_s30  }
  0x35   : > { %s12115_s26 = scalar_select %p8893_p4, 1, 0 }
  0x36   : > { %p323_p9 = scmp.eq.s32.totalorder %s12117_s27, 3  ;;  %p8904_p10 = por %p120_p5, %p11969_p6 }
  0x37   : > { %12116 = sst [smem:[#allocation47_spill]] %s12115_s26  ;;  %p6636_p11 = scmp.ge.s32.totalorder %s8670_s30, 1 }
  0x38   : > { %s12118_s16 = scalar_select %p8904_p10, 1, 0 }
  0x39   : > { %p8909_p13 = por %p317_p7, %p114_p1  ;;  %p8913_p0 = por %p323_p9, %p120_p5 }
  0x3a   : > { %12119 = sst [smem:[#allocation48_spill]] %s12118_s16  ;;  %p330_p2 = scmp.lt.s32.totalorder %s8670_s30, 5 }
  0x3b   : > { %s12120_s23 = scalar_select %p8909_p13, 1, 0 }
  0x3c   : > { %s12122_s13 = scalar_select %p8913_p0, 1, 0 }
  0x3d   : > { %12121 = sst [smem:[#allocation49_spill]] %s12120_s23  ;;  %p8918_p8 = pnand %p6636_p11, %p330_p2 }
  0x3e   : > { %12123 = sst [smem:[#allocation50_spill]] %s12122_s13  ;;  %s8672_s27 = smov [#allocation10]  }
  0x3f   : > { %s12124_s14 = scalar_select %p8918_p8, 1, 0 }
  0x40   : > { %s343_s3 = sshll.u32 %s8672_s27, 4  ;;  %p7579_p6 = pneg %p8918_p8  ;;  %s344_s3 = int_to_ptr.vmem [resolvable:$true] %s343_s3 }
  0x41   : > { %12125 = sst [smem:[#allocation51_spill]] %s12124_s14  ;;  %s8673_s20 = smov [#allocation13]  }
  0x42   : > { %s366_s17 = sshll.u32 %s8673_s20, 4  ;;  %p12126_p1 = scmp.eq.s32.totalorder %s8830_s12, 0  ;;  %s8930_s17 = int_to_ptr.vmem [resolvable:$true] %s366_s17 }
  0x43   : > { %s8674_s13 = smov [#allocation16]   ;;  %s12128_s4 = sld [smem:[#allocation199_spill]] }
  0x44   : > { %p8926_p7 = pnand %p7579_p6, %p12126_p1  ;;  %s392_s16 = sshll.u32 %s8674_s13, 4  ;;  %s8932_s16 = int_to_ptr.vmem [resolvable:$true] %s392_s16 }
  0x46   : > { %p8942_p6 = pneg %p8926_p7 }
  0x49   : > { %s8248_s27 = scalar_lea.hbm %s12128_s4, 64 }
  0x4a   : > { %p8249_p5 = scmp.ne.s32.totalorder %s12128_s4, %s8248_s27  ;;  %p8255_p2 = scmp.lt.u32.totalorder %s8248_s27, %s12128_s4 }
  0x4c   : > { %p8251_p9 = pnand %p8942_p6, %p8249_p5 }
  0x4e   : > { %p8252_p11 = pneg %p8251_p9 }
  0x50   : > { %p8257_p1 = pnand %p8255_p2, %p8252_p11 }
  0x52   : > { %8260 = shalt.err (!%p8257_p1)
}
  0x53   : > { %s8261_s18 = scalar_lea.vmem %s344_s3, 64  ;;  %p8269_p8 = scmp.lt.s32.totalorder %s344_s3, %s344_s3 }
  0x54   : > { %p8262_p0 = scmp.ne.s32.totalorder %s344_s3, %s8261_s18  ;;  %p8270_p4 = scmp.lt.s32.totalorder %s8261_s18, %s8261_s18 }
  0x56   : > { %p8264_p13 = pnand %p8262_p0, %p8942_p6  ;;  %p8271_p12 = por %p8270_p4, %p8269_p8 }
  0x58   : > { %p8265_p10 = pneg %p8264_p13 }
  0x5a   : > { %p8272_p3 = pnand %p8271_p12, %p8265_p10 }
  0x5c   : > { %8275 = shalt.err (!%p8272_p3)
}
  0x5d   : > { %7582 = dma.hbm_to_vmem [thread:$0]  (!%p8926_p7), %s12128_s4, 64, %s344_s3, [#allocation11]  }
  0x5e   : > { %s12130_s6 = sld [smem:[#allocation200_spill]] }
  0x64   : > { %s8276_s27 = scalar_lea.hbm %s12130_s6, 1024 }
  0x65   : > { %p8277_p13 = scmp.ne.s32.totalorder %s12130_s6, %s8276_s27  ;;  %p8283_p3 = scmp.lt.u32.totalorder %s8276_s27, %s12130_s6 }
  0x67   : > { %p8279_p0 = pnand %p8277_p13, %p8942_p6 }
  0x69   : > { %p8280_p8 = pneg %p8279_p0 }
  0x6b   : > { %p8285_p12 = pnand %p8283_p3, %p8280_p8 }
  0x6d   : > { %8288 = shalt.err (!%p8285_p12)
}
  0x6e   : > { %s8289_s3 = scalar_lea.vmem %s8930_s17, 1024  ;;  %p8297_p9 = scmp.lt.s32.totalorder %s8930_s17, %s8930_s17 }
  0x6f   : > { %p8290_p4 = scmp.ne.s32.totalorder %s8930_s17, %s8289_s3  ;;  %p8298_p11 = scmp.lt.s32.totalorder %s8289_s3, %s8289_s3 }
  0x71   : > { %p8292_p10 = pnand %p8290_p4, %p8942_p6  ;;  %p8299_p2 = por %p8298_p11, %p8297_p9 }
  0x73   : > { %p8293_p5 = pneg %p8292_p10 }
  0x75   : > { %p8300_p1 = pnand %p8299_p2, %p8293_p5 }
  0x77   : > { %8303 = shalt.err (!%p8300_p1)
}
  0x78   : > { %s8675_s2 = smov 64   ;;  %s8676_s26 = smov 4  }
  0x79   : > { %7588 = dma.hbm_to_vmem [thread:$0]  (!%p8926_p7), %s12130_s6, 1024, %s8930_s17, [#allocation14], %s8675_s2, %s8675_s2, %s8676_s26  }
  0x7a   : > { %s8304_s27 = scalar_lea.hbm %s11957_s8, 1024 }
  0x7b   : > { %p8305_p13 = scmp.ne.s32.totalorder %s11957_s8, %s8304_s27  ;;  %p8311_p3 = scmp.lt.u32.totalorder %s8304_s27, %s11957_s8 }
  0x7d   : > { %p8307_p0 = pnand %p8305_p13, %p8942_p6 }
  0x7f   : > { %p8308_p8 = pneg %p8307_p0 }
  0x81   : > { %p8313_p12 = pnand %p8311_p3, %p8308_p8 }
  0x83   : > { %8316 = shalt.err (!%p8313_p12)
}
  0x84   : > { %s8317_s17 = scalar_lea.vmem %s8932_s16, 1024  ;;  %p8325_p9 = scmp.lt.s32.totalorder %s8932_s16, %s8932_s16 }
  0x85   : > { %p8318_p4 = scmp.ne.s32.totalorder %s8932_s16, %s8317_s17  ;;  %p8326_p11 = scmp.lt.s32.totalorder %s8317_s17, %s8317_s17 }
  0x87   : > { %p8320_p10 = pnand %p8318_p4, %p8942_p6  ;;  %p8327_p2 = por %p8326_p11, %p8325_p9 }
  0x89   : > { %p8321_p5 = pneg %p8320_p10 }
  0x8b   : > { %p8328_p1 = pnand %p8327_p2, %p8321_p5 }
  0x8d   : > { %8331 = shalt.err (!%p8328_p1)
}
  0x8e   : > { %7594 = dma.hbm_to_vmem [thread:$0]  (!%p8926_p7), %s11957_s8, 1024, %s8932_s16, [#allocation17], %s8675_s2, %s8675_s2, %s8676_s26  }
  0x8f   : > { %s8677_s14 = smov [#allocation12]   ;;  %s8678_s15 = smov [#allocation15]  }
  0x90   : > { %s353_s12 = sshll.u32 %s8677_s14, 4  ;;  %s379_s27 = sshll.u32 %s8678_s15, 4  ;;  %s354_s12 = int_to_ptr.vmem [resolvable:$true] %s353_s12  ;;  %s380_s27 = int_to_ptr.vmem [resolvable:$true] %s379_s27 }
  0x91   : > { %s8332_s3 = scalar_lea.hbm %s11954_s5, 1024 }
  0x92   : > { %p8333_p13 = scmp.ne.s32.totalorder %s11954_s5, %s8332_s3  ;;  %p8339_p3 = scmp.lt.u32.totalorder %s8332_s3, %s11954_s5 }
  0x94   : > { %p8335_p0 = pnand %p8333_p13, %p8942_p6 }
  0x96   : > { %p8336_p8 = pneg %p8335_p0 }
  0x98   : > { %p8341_p12 = pnand %p8339_p3, %p8336_p8 }
  0x9a   : > { %8344 = shalt.err (!%p8341_p12)
}
  0x9b   : > { %s8345_s16 = scalar_lea.vmem %s354_s12, 1024  ;;  %p8353_p9 = scmp.lt.s32.totalorder %s354_s12, %s354_s12 }
  0x9c   : > { %p8346_p4 = scmp.ne.s32.totalorder %s354_s12, %s8345_s16  ;;  %p8354_p11 = scmp.lt.s32.totalorder %s8345_s16, %s8345_s16 }
  0x9e   : > { %p8348_p10 = pnand %p8346_p4, %p8942_p6  ;;  %p8355_p2 = por %p8354_p11, %p8353_p9 }
  0xa0   : > { %p8349_p5 = pneg %p8348_p10 }
  0xa2   : > { %p8356_p1 = pnand %p8355_p2, %p8349_p5 }
  0xa4   : > { %8359 = shalt.err (!%p8356_p1)
}
  0xa5   : > { %7585 = dma.hbm_to_vmem [thread:$0]  (!%p8926_p7), %s11954_s5, 1024, %s354_s12, [#allocation11], %s8675_s2, %s8675_s2, %s8676_s26  }
  0xa6   : > { %s8360_s15 = scalar_lea.hbm %s11956_s7, 1024 }
  0xa7   : > { %p8361_p13 = scmp.ne.s32.totalorder %s11956_s7, %s8360_s15  ;;  %p8367_p3 = scmp.lt.u32.totalorder %s8360_s15, %s11956_s7 }
  0xa9   : > { %p8363_p0 = pnand %p8361_p13, %p8942_p6 }
  0xab   : > { %p8364_p8 = pneg %p8363_p0 }
  0xad   : > { %p8369_p12 = pnand %p8367_p3, %p8364_p8 }
  0xaf   : > { %8372 = shalt.err (!%p8369_p12)
}
  0xb0   : > { %s8373_s4 = scalar_lea.vmem %s380_s27, 1024  ;;  %p8381_p9 = scmp.lt.s32.totalorder %s380_s27, %s380_s27 }
  0xb1   : > { %p8374_p4 = scmp.ne.s32.totalorder %s380_s27, %s8373_s4  ;;  %p8382_p11 = scmp.lt.s32.totalorder %s8373_s4, %s8373_s4 }
  0xb3   : > { %p8376_p10 = pnand %p8374_p4, %p8942_p6  ;;  %p8383_p2 = por %p8382_p11, %p8381_p9 }
  0xb5   : > { %p8377_p5 = pneg %p8376_p10 }
  0xb7   : > { %p8384_p1 = pnand %p8383_p2, %p8377_p5 }
  0xb9   : > { %8387 = shalt.err (!%p8384_p1)
}
  0xba   : > { %7591 = dma.hbm_to_vmem [thread:$0]  (!%p8926_p7), %s11956_s7, 1024, %s380_s27, [#allocation14], %s8675_s2, %s8675_s2, %s8676_s26  }
  0xbb   : > { %s8679_s1 = smov [#allocation18]   ;;  %s8680_s21 = smov [#allocation19]  }
  0xbc   : > { %s405_s6 = sshll.u32 %s8679_s1, 4  ;;  %s419_s14 = sshll.u32 %s8680_s21, 4  ;;  %s406_s6 = int_to_ptr.vmem [resolvable:$true] %s405_s6  ;;  %s420_s14 = int_to_ptr.vmem [resolvable:$true] %s419_s14 }
  0xbd   : > { %s8388_s18 = scalar_lea.hbm %s11958_s9, 1024 }
  0xbe   : > { %p8389_p13 = scmp.ne.s32.totalorder %s11958_s9, %s8388_s18  ;;  %p8395_p3 = scmp.lt.u32.totalorder %s8388_s18, %s11958_s9 }
  0xc0   : > { %p8391_p0 = pnand %p8389_p13, %p8942_p6 }
  0xc2   : > { %p8392_p8 = pneg %p8391_p0 }
  0xc4   : > { %p8397_p12 = pnand %p8395_p3, %p8392_p8 }
  0xc6   : > { %8400 = shalt.err (!%p8397_p12)
}
  0xc7   : > { %s8401_s27 = scalar_lea.vmem %s406_s6, 1024  ;;  %p8409_p9 = scmp.lt.s32.totalorder %s406_s6, %s406_s6 }
  0xc8   : > { %p8402_p4 = scmp.ne.s32.totalorder %s406_s6, %s8401_s27  ;;  %p8410_p11 = scmp.lt.s32.totalorder %s8401_s27, %s8401_s27 }
  0xca   : > { %p8404_p10 = pnand %p8402_p4, %p8942_p6  ;;  %p8411_p2 = por %p8410_p11, %p8409_p9 }
  0xcc   : > { %p8405_p5 = pneg %p8404_p10 }
  0xce   : > { %p8412_p1 = pnand %p8411_p2, %p8405_p5 }
  0xd0   : > { %8415 = shalt.err (!%p8412_p1)
}
  0xd1   : > { %7597 = dma.hbm_to_vmem [thread:$0]  (!%p8926_p7), %s11958_s9, 1024, %s406_s6, [#allocation17], %s8675_s2, %s8675_s2, %s8676_s26  }
  0xd2   : > { %s8416_s13 = scalar_lea.hbm %s11959_s10, 16 }
  0xd3   : > { %p8417_p13 = scmp.ne.s32.totalorder %s11959_s10, %s8416_s13  ;;  %p8423_p3 = scmp.lt.u32.totalorder %s8416_s13, %s11959_s10 }
  0xd5   : > { %p8419_p0 = pnand %p8417_p13, %p8942_p6 }
  0xd7   : > { %p8420_p8 = pneg %p8419_p0 }
  0xd9   : > { %p8425_p12 = pnand %p8423_p3, %p8420_p8 }
  0xdb   : > { %8428 = shalt.err (!%p8425_p12)
}
  0xdc   : > { %s8429_s12 = scalar_lea.vmem %s420_s14, 16  ;;  %s8436_s2 = scalar_lea.vmem %s420_s14, 32 }
  0xdd   : > { %p8430_p4 = scmp.ne.s32.totalorder %s420_s14, %s8429_s12  ;;  %p8437_p9 = scmp.lt.s32.totalorder %s420_s14, %s420_s14 }
  0xde   : > { %p8438_p11 = scmp.lt.s32.totalorder %s8436_s2, %s8429_s12 }
  0xdf   : > { %p8432_p10 = pnand %p8430_p4, %p8942_p6 }
  0xe0   : > { %p8439_p2 = por %p8438_p11, %p8437_p9 }
  0xe1   : > { %p8433_p5 = pneg %p8432_p10 }
  0xe3   : > { %p8440_p1 = pnand %p8439_p2, %p8433_p5 }
  0xe5   : > { %8443 = shalt.err (!%p8440_p1)
}
  0xe6   : > { %7600 = dma.hbm_to_vmem [thread:$0]  (!%p8926_p7), %s11959_s10, 16, %s420_s14, [#allocation20]  }
  0xe7   : > { %p6644_p13 = scmp.ge.s32.totalorder %s8670_s30, 4 }
  0xe9   : > { %426 = sbr.rel (%p6644_p13) target bundleno = 374 (0x176), region = 44 }
  0xf0   : > { %s430_s20 = sand.u32 1, %s8650_s25   ;;  %s6646_s27 = sshll.u32 %s8662_s28, 1 }
  0xf1   : > { %s7532_s16 = smul.u32 768, %s430_s20  ;;  %s6831_s1 = sshll.u32 %s8666_s29, 7 }
  0xf2   : > { %s441_s23 = sadd.s32 %s6831_s1, %s6646_s27  ;;  %p12131_p7 = scmp.ne.s32.totalorder %s12105_s11, 0 }
  0xf3   : > { %s6648_s21 = sshll.u32 %s441_s23, 6  ;;  %s434_s18 = scalar_lea.vmem [#allocation3], %s7532_s16 }
  0xf4   : > { %s443_s14 = scalar_lea.hbm %s11949_s0, %s6648_s21  ;;  %s456_s3 = sshll.u32 %s434_s18, 4  ;;  %s457_s3 = int_to_ptr.vmem [resolvable:$true] %s456_s3 }
  0xf5   : > { %s7550_s17 = scalar_select %p12131_p7, [#allocation0], [#allocation24] }
  0xf6   : > { %s8681_s4 = smov 16384   ;;  %s8682_s2 = smov 4096  }
  0xf7   : > { %7551 = sst [smem:[#allocation23]] (%p12131_p7), %s8681_s4  ;;  %s8683_s26 = smov 32  }
  0xf8   : > { %s448_s12 = sld [smem:[%s7550_s17]]   ;;  %s8684_s6 = smov 256  }
  0xf9   : > { %7552 = sst [smem:[#allocation23 + $0x1]] (%p12131_p7), %s8682_s2  ;;  %s8685_s27 = smov 128  }
  0xfa   : > { %7553 = sst [smem:[#allocation23 + $0x2]] (%p12131_p7), %s8683_s26  ;;  %s8686_s16 = smov 8  }
  0xfb   : > { %7554 = sst [smem:[#allocation23 + $0x3]] (%p12131_p7), %s8684_s6  ;;  %s431_s21 = scalar_lea.sflag [#allocation4], %s430_s20 }
  0xfc   : > { %7555 = sst [smem:[#allocation23 + $0x4]] (%p12131_p7), %s8685_s27  ;;  %s8687_s15 = smov [#allocation22]  }
  0xfd   : > { %7556 = sst [smem:[#allocation23 + $0x5]] (%p12131_p7), %s8686_s16  ;;  %s479_s13 = sand.u32 1, %s8670_s30  }
  0xfe   : > { %s6649_s1 = sshll.u32 %s448_s12, 26  ;;  %s481_s18 = sand.u32 1, %s8638_s22  }
  0xff   : > { %s6650_s23 = sadd.s32 134217728, %s6649_s1  ;;  %s6651_s17 = sshll.u32 %s481_s18, 7 }
 0x100   : > { %7557 = dma.general (%p12131_p7), %s443_s14, 12288, %s457_s3, %s431_s21, %s8687_s15, [#allocation23], %s6650_s23, 0  }
 0x101   : > { %s6832_s4 = sshll.u32 %s8662_s28, 11  ;;  %s12132_s6 = sld [smem:[#allocation196_spill]] }
 0x102   : > { %s483_s11 = scalar_lea.vmem [#allocation6], %s6651_s17  ;;  %s502_s14 = sand.u32 1, %s8626_s19  }
 0x103   : > { %s490_s20 = sshll.u32 %s483_s11, 4  ;;  %s9125_s3 = scalar_lea.sflag [#allocation7], %s479_s13  ;;  %s9122_s20 = int_to_ptr.vmem [resolvable:$true] %s490_s20 }
 0x104   : > { %p12133_p0 = scmp.ne.s32.totalorder %s12109_s24, 0 }
 0x107   : > { %s9120_s27 = scalar_lea.hbm %s12132_s6, %s6832_s4  ;;  %s8448_s23 = scalar_lea.hbm %s12132_s6, 4096 }
 0x108   : > { %s8444_s12 = scalar_lea.hbm %s9120_s27, 2048  ;;  %p8449_p12 = scmp.lt.u32.totalorder %s9120_s27, %s12132_s6 }
 0x109   : > { %p8445_p6 = scmp.ne.s32.totalorder %s9120_s27, %s8444_s12  ;;  %p8450_p4 = scmp.lt.u32.totalorder %s8448_s23, %s8444_s12 }
 0x10a   : > { %p8452_p5 = scmp.lt.u32.totalorder %s8444_s12, %s9120_s27 }
 0x10b   : > { %p8446_p8 = pnand %p8445_p6, %p12133_p0  ;;  %p8451_p10 = por %p8450_p4, %p8449_p12 }
 0x10d   : > { %p8447_p3 = pneg %p8446_p8  ;;  %p8453_p9 = por %p8452_p5, %p8451_p10 }
 0x10f   : > { %p8454_p11 = pnand %p8453_p9, %p8447_p3 }
 0x111   : > { %8457 = shalt.err (!%p8454_p11)
}
 0x112   : > { %s8458_s13 = scalar_lea.vmem %s9122_s20, 2048  ;;  %s8688_s18 = smov [#allocation6]  }
 0x113   : > { %p8459_p2 = scmp.ne.s32.totalorder %s9122_s20, %s8458_s13  ;;  %s8462_s17 = sshll.u32 %s8688_s18, 4  ;;  %s8463_s17 = int_to_ptr.vmem [resolvable:$false] %s8462_s17 }
 0x114   : > { %s8464_s4 = scalar_lea.vmem %s8463_s17, 4096  ;;  %p8465_p7 = scmp.lt.s32.totalorder %s9122_s20, %s8463_s17 }
 0x115   : > { %p8460_p1 = pnand %p8459_p2, %p12133_p0  ;;  %p8466_p6 = scmp.lt.s32.totalorder %s8464_s4, %s8458_s13 }
 0x117   : > { %p8461_p13 = pneg %p8460_p1  ;;  %p8467_p8 = por %p8466_p6, %p8465_p7 }
 0x119   : > { %p8468_p12 = pnand %p8467_p8, %p8461_p13 }
 0x11b   : > { %8471 = shalt.err (!%p8468_p12)
}
 0x11c   : > { %s8689_s2 = smov 64   ;;  %s12134_s26 = sld [smem:[#allocation47_spill]] }
 0x11d   : > { %s8690_s11 = smov 4   ;;  %s6654_s12 = sshll.u32 %s502_s14, 8 }
 0x11e   : > { %7558 = dma.hbm_to_vmem [thread:$0]  (%p12133_p0), %s9120_s27, 2048, %s9122_s20, %s9125_s3, %s8689_s2, %s8689_s2, %s8690_s11  }
 0x11f   : > { %s6833_s16 = sshll.u32 %s8666_s29, 12  ;;  %s12135_s21 = sld [smem:[#allocation197_spill]] }
 0x120   : > { %s504_s18 = scalar_lea.vmem [#allocation8], %s6654_s12 }
 0x121   : > { %s511_s17 = sshll.u32 %s504_s18, 4  ;;  %s9157_s17 = int_to_ptr.vmem [resolvable:$true] %s511_s17 }
 0x122   : > { %p12137_p4 = scmp.ne.s32.totalorder %s12134_s26, 0 }
 0x125   : > { %s12136_s15 = smov %s12135_s21  ;;  %s9155_s13 = scalar_lea.hbm %s12135_s21, %s6833_s16 }
 0x126   : > { %s8472_s4 = scalar_lea.hbm %s9155_s13, 4096  ;;  %s8476_s20 = scalar_lea.hbm %s12136_s15, 8192 }
 0x127   : > { %p8473_p3 = scmp.ne.s32.totalorder %s9155_s13, %s8472_s4  ;;  %p8477_p5 = scmp.lt.u32.totalorder %s9155_s13, %s12136_s15 }
 0x128   : > { %p8478_p9 = scmp.lt.u32.totalorder %s8476_s20, %s8472_s4  ;;  %p8480_p2 = scmp.lt.u32.totalorder %s8472_s4, %s9155_s13 }
 0x129   : > { %p8474_p0 = pnand %p8473_p3, %p12137_p4 }
 0x12a   : > { %p8479_p11 = por %p8478_p9, %p8477_p5 }
 0x12b   : > { %p8475_p10 = pneg %p8474_p0 }
 0x12c   : > { %p8481_p1 = por %p8480_p2, %p8479_p11 }
 0x12e   : > { %p8482_p13 = pnand %p8481_p1, %p8475_p10 }
 0x130   : > { %8485 = shalt.err (!%p8482_p13)
}
 0x131   : > { %s8486_s12 = scalar_lea.vmem %s9157_s17, 4096  ;;  %s8691_s16 = smov [#allocation8]  }
 0x132   : > { %p8487_p7 = scmp.ne.s32.totalorder %s9157_s17, %s8486_s12  ;;  %s8490_s1 = sshll.u32 %s8691_s16, 4  ;;  %s8491_s1 = int_to_ptr.vmem [resolvable:$false] %s8490_s1 }
 0x133   : > { %s8492_s23 = scalar_lea.vmem %s8491_s1, 8192  ;;  %p8493_p12 = scmp.lt.s32.totalorder %s9157_s17, %s8491_s1 }
 0x134   : > { %p8488_p6 = pnand %p8487_p7, %p12137_p4  ;;  %p8494_p3 = scmp.lt.s32.totalorder %s8492_s23, %s8486_s12 }
 0x136   : > { %p8489_p8 = pneg %p8488_p6  ;;  %p8495_p0 = por %p8494_p3, %p8493_p12 }
 0x138   : > { %p8496_p5 = pnand %p8495_p0, %p8489_p8 }
 0x13a   : > { %8499 = shalt.err (!%p8496_p5)
}
 0x13b   : > { %s8692_s21 = smov 128   ;;  %s8693_s18 = smov 8  }
 0x13c   : > { %7559 = dma.hbm_to_vmem [thread:$0]  (%p12137_p4), %s9155_s13, 4096, %s9157_s17, %s9125_s3, %s8692_s21, %s8692_s21, %s8693_s18  }
 0x13d   : > { %520 = sbr.rel (!%p12137_p4) target bundleno = 374 (0x176), region = 60  ;;  %s6834_s24 = sshll.u32 (%p12137_p4), %s8666_s29, 8 }
 0x13e   : > { %s7533_s4 = smul.u32 (%p12137_p4), 768, %s502_s14  ;;  %s12138_s2 = sld [smem:[#allocation198_spill]] (%p12137_p4) }
 0x140   : > { %s9194_s3 = scalar_lea.vmem (%p12137_p4), [#allocation9], %s7533_s4 }
 0x144   : > { %s9189_s11 = scalar_lea.vmem %s12138_s2, %s6834_s24 }
 0x145   : > { %v745_v0 = vld [vmem:[%s9189_s11] sm:$0xff]  ;;  %v747_v1 = vld [vmem:[%s9189_s11 + $0x8] sm:$0xff]  ;;  %v749_v2 = vld [vmem:[%s9189_s11 + $0x10] sm:$0xff] }
 0x146   : > { %746 = vst [vmem:[%s9194_s3] sm:$0xff] %v745_v0  ;;  %748 = vst [vmem:[%s9194_s3 + $0x8] sm:$0xff] %v747_v1  ;;  %v751_v3 = vld [vmem:[%s9189_s11 + $0x18] sm:$0xff]  ;;  %v753_v4 = vld [vmem:[%s9189_s11 + $0x20] sm:$0xff] }
 0x147   : > { %750 = vst [vmem:[%s9194_s3 + $0x10] sm:$0xff] %v749_v2  ;;  %v755_v5 = vld [vmem:[%s9189_s11 + $0x28] sm:$0xff]  ;;  %752 = vst [vmem:[%s9194_s3 + $0x18] sm:$0xff] %v751_v3  ;;  %v757_v6 = vld [vmem:[%s9189_s11 + $0x30] sm:$0xff] }
 0x148   : > { %754 = vst [vmem:[%s9194_s3 + $0x20] sm:$0xff] %v753_v4  ;;  %756 = vst [vmem:[%s9194_s3 + $0x28] sm:$0xff] %v755_v5  ;;  %v759_v7 = vld [vmem:[%s9189_s11 + $0x38] sm:$0xff]  ;;  %v761_v8 = vld [vmem:[%s9189_s11 + $0x40] sm:$0xff] }
 0x149   : > { %758 = vst [vmem:[%s9194_s3 + $0x30] sm:$0xff] %v757_v6  ;;  %760 = vst [vmem:[%s9194_s3 + $0x38] sm:$0xff] %v759_v7  ;;  %v763_v9 = vld [vmem:[%s9189_s11 + $0x48] sm:$0xff]  ;;  %v765_v10 = vld [vmem:[%s9189_s11 + $0x50] sm:$0xff] }
 0x14a   : > { %762 = vst [vmem:[%s9194_s3 + $0x40] sm:$0xff] %v761_v8  ;;  %v767_v11 = vld [vmem:[%s9189_s11 + $0x58] sm:$0xff]  ;;  %764 = vst [vmem:[%s9194_s3 + $0x48] sm:$0xff] %v763_v9  ;;  %v769_v12 = vld [vmem:[%s9189_s11 + $0x60] sm:$0xff] }
 0x14b   : > { %766 = vst [vmem:[%s9194_s3 + $0x50] sm:$0xff] %v765_v10  ;;  %768 = vst [vmem:[%s9194_s3 + $0x58] sm:$0xff] %v767_v11  ;;  %v771_v13 = vld [vmem:[%s9189_s11 + $0x68] sm:$0xff]  ;;  %v773_v14 = vld [vmem:[%s9189_s11 + $0x70] sm:$0xff] }
 0x14c   : > { %770 = vst [vmem:[%s9194_s3 + $0x60] sm:$0xff] %v769_v12  ;;  %772 = vst [vmem:[%s9194_s3 + $0x68] sm:$0xff] %v771_v13  ;;  %v775_v15 = vld [vmem:[%s9189_s11 + $0x78] sm:$0xff]  ;;  %v777_v16 = vld [vmem:[%s9189_s11 + $0x80] sm:$0xff] }
 0x14d   : > { %774 = vst [vmem:[%s9194_s3 + $0x70] sm:$0xff] %v773_v14  ;;  %v779_v17 = vld [vmem:[%s9189_s11 + $0x88] sm:$0xff]  ;;  %776 = vst [vmem:[%s9194_s3 + $0x78] sm:$0xff] %v775_v15  ;;  %v781_v18 = vld [vmem:[%s9189_s11 + $0x90] sm:$0xff] }
 0x14e   : > { %778 = vst [vmem:[%s9194_s3 + $0x80] sm:$0xff] %v777_v16  ;;  %780 = vst [vmem:[%s9194_s3 + $0x88] sm:$0xff] %v779_v17  ;;  %v783_v19 = vld [vmem:[%s9189_s11 + $0x98] sm:$0xff]  ;;  %v785_v20 = vld [vmem:[%s9189_s11 + $0xa0] sm:$0xff] }
 0x14f   : > { %782 = vst [vmem:[%s9194_s3 + $0x90] sm:$0xff] %v781_v18  ;;  %784 = vst [vmem:[%s9194_s3 + $0x98] sm:$0xff] %v783_v19  ;;  %v787_v21 = vld [vmem:[%s9189_s11 + $0xa8] sm:$0xff]  ;;  %v789_v22 = vld [vmem:[%s9189_s11 + $0xb0] sm:$0xff] }
 0x150   : > { %786 = vst [vmem:[%s9194_s3 + $0xa0] sm:$0xff] %v785_v20  ;;  %v791_v23 = vld [vmem:[%s9189_s11 + $0xb8] sm:$0xff]  ;;  %788 = vst [vmem:[%s9194_s3 + $0xa8] sm:$0xff] %v787_v21  ;;  %v793_v24 = vld [vmem:[%s9189_s11 + $0xc0] sm:$0xff] }
 0x151   : > { %790 = vst [vmem:[%s9194_s3 + $0xb0] sm:$0xff] %v789_v22  ;;  %792 = vst [vmem:[%s9194_s3 + $0xb8] sm:$0xff] %v791_v23  ;;  %v795_v25 = vld [vmem:[%s9189_s11 + $0xc8] sm:$0xff]  ;;  %v797_v26 = vld [vmem:[%s9189_s11 + $0xd0] sm:$0xff] }
 0x152   : > { %794 = vst [vmem:[%s9194_s3 + $0xc0] sm:$0xff] %v793_v24  ;;  %796 = vst [vmem:[%s9194_s3 + $0xc8] sm:$0xff] %v795_v25  ;;  %v799_v27 = vld [vmem:[%s9189_s11 + $0xd8] sm:$0xff]  ;;  %v801_v28 = vld [vmem:[%s9189_s11 + $0xe0] sm:$0xff] }
 0x153   : > { %798 = vst [vmem:[%s9194_s3 + $0xd0] sm:$0xff] %v797_v26  ;;  %v803_v29 = vld [vmem:[%s9189_s11 + $0xe8] sm:$0xff]  ;;  %800 = vst [vmem:[%s9194_s3 + $0xd8] sm:$0xff] %v799_v27  ;;  %v805_v30 = vld [vmem:[%s9189_s11 + $0xf0] sm:$0xff] }
 0x154   : > { %802 = vst [vmem:[%s9194_s3 + $0xe0] sm:$0xff] %v801_v28  ;;  %804 = vst [vmem:[%s9194_s3 + $0xe8] sm:$0xff] %v803_v29  ;;  %v807_v31 = vld [vmem:[%s9189_s11 + $0xf8] sm:$0xff]  ;;  %v809_v32 = vld [vmem:[%s9189_s11 + $0x200] sm:$0xff] }
 0x155   : > { %806 = vst [vmem:[%s9194_s3 + $0xf0] sm:$0xff] %v805_v30  ;;  %808 = vst [vmem:[%s9194_s3 + $0xf8] sm:$0xff] %v807_v31  ;;  %v811_v33 = vld [vmem:[%s9189_s11 + $0x208] sm:$0xff]  ;;  %v813_v34 = vld [vmem:[%s9189_s11 + $0x210] sm:$0xff] }
 0x156   : > { %810 = vst [vmem:[%s9194_s3 + $0x100] sm:$0xff] %v809_v32  ;;  %v815_v35 = vld [vmem:[%s9189_s11 + $0x218] sm:$0xff]  ;;  %812 = vst [vmem:[%s9194_s3 + $0x108] sm:$0xff] %v811_v33  ;;  %v817_v36 = vld [vmem:[%s9189_s11 + $0x220] sm:$0xff] }
 0x157   : > { %814 = vst [vmem:[%s9194_s3 + $0x110] sm:$0xff] %v813_v34  ;;  %816 = vst [vmem:[%s9194_s3 + $0x118] sm:$0xff] %v815_v35  ;;  %v819_v37 = vld [vmem:[%s9189_s11 + $0x228] sm:$0xff]  ;;  %v821_v38 = vld [vmem:[%s9189_s11 + $0x230] sm:$0xff] }
 0x158   : > { %818 = vst [vmem:[%s9194_s3 + $0x120] sm:$0xff] %v817_v36  ;;  %820 = vst [vmem:[%s9194_s3 + $0x128] sm:$0xff] %v819_v37  ;;  %v823_v39 = vld [vmem:[%s9189_s11 + $0x238] sm:$0xff]  ;;  %v825_v40 = vld [vmem:[%s9189_s11 + $0x240] sm:$0xff] }
 0x159   : > { %822 = vst [vmem:[%s9194_s3 + $0x130] sm:$0xff] %v821_v38  ;;  %v827_v41 = vld [vmem:[%s9189_s11 + $0x248] sm:$0xff]  ;;  %824 = vst [vmem:[%s9194_s3 + $0x138] sm:$0xff] %v823_v39  ;;  %v829_v42 = vld [vmem:[%s9189_s11 + $0x250] sm:$0xff] }
 0x15a   : > { %826 = vst [vmem:[%s9194_s3 + $0x140] sm:$0xff] %v825_v40  ;;  %828 = vst [vmem:[%s9194_s3 + $0x148] sm:$0xff] %v827_v41  ;;  %v831_v43 = vld [vmem:[%s9189_s11 + $0x258] sm:$0xff]  ;;  %v833_v44 = vld [vmem:[%s9189_s11 + $0x260] sm:$0xff] }
 0x15b   : > { %830 = vst [vmem:[%s9194_s3 + $0x150] sm:$0xff] %v829_v42  ;;  %832 = vst [vmem:[%s9194_s3 + $0x158] sm:$0xff] %v831_v43  ;;  %v835_v45 = vld [vmem:[%s9189_s11 + $0x268] sm:$0xff]  ;;  %v837_v46 = vld [vmem:[%s9189_s11 + $0x270] sm:$0xff] }
 0x15c   : > { %834 = vst [vmem:[%s9194_s3 + $0x160] sm:$0xff] %v833_v44  ;;  %v839_v47 = vld [vmem:[%s9189_s11 + $0x278] sm:$0xff]  ;;  %836 = vst [vmem:[%s9194_s3 + $0x168] sm:$0xff] %v835_v45  ;;  %v841_v48 = vld [vmem:[%s9189_s11 + $0x280] sm:$0xff] }
 0x15d   : > { %838 = vst [vmem:[%s9194_s3 + $0x170] sm:$0xff] %v837_v46  ;;  %840 = vst [vmem:[%s9194_s3 + $0x178] sm:$0xff] %v839_v47  ;;  %v843_v49 = vld [vmem:[%s9189_s11 + $0x288] sm:$0xff]  ;;  %v845_v50 = vld [vmem:[%s9189_s11 + $0x290] sm:$0xff] }
 0x15e   : > { %842 = vst [vmem:[%s9194_s3 + $0x180] sm:$0xff] %v841_v48  ;;  %844 = vst [vmem:[%s9194_s3 + $0x188] sm:$0xff] %v843_v49  ;;  %v847_v51 = vld [vmem:[%s9189_s11 + $0x298] sm:$0xff]  ;;  %v849_v52 = vld [vmem:[%s9189_s11 + $0x2a0] sm:$0xff] }
 0x15f   : > { %846 = vst [vmem:[%s9194_s3 + $0x190] sm:$0xff] %v845_v50  ;;  %v851_v53 = vld [vmem:[%s9189_s11 + $0x2a8] sm:$0xff]  ;;  %848 = vst [vmem:[%s9194_s3 + $0x198] sm:$0xff] %v847_v51  ;;  %v853_v54 = vld [vmem:[%s9189_s11 + $0x2b0] sm:$0xff] }
 0x160   : > { %850 = vst [vmem:[%s9194_s3 + $0x1a0] sm:$0xff] %v849_v52  ;;  %852 = vst [vmem:[%s9194_s3 + $0x1a8] sm:$0xff] %v851_v53  ;;  %v855_v55 = vld [vmem:[%s9189_s11 + $0x2b8] sm:$0xff]  ;;  %v857_v56 = vld [vmem:[%s9189_s11 + $0x2c0] sm:$0xff] }
 0x161   : > { %854 = vst [vmem:[%s9194_s3 + $0x1b0] sm:$0xff] %v853_v54  ;;  %856 = vst [vmem:[%s9194_s3 + $0x1b8] sm:$0xff] %v855_v55  ;;  %v859_v57 = vld [vmem:[%s9189_s11 + $0x2c8] sm:$0xff]  ;;  %v861_v58 = vld [vmem:[%s9189_s11 + $0x2d0] sm:$0xff] }
 0x162   : > { %858 = vst [vmem:[%s9194_s3 + $0x1c0] sm:$0xff] %v857_v56  ;;  %v863_v59 = vld [vmem:[%s9189_s11 + $0x2d8] sm:$0xff]  ;;  %860 = vst [vmem:[%s9194_s3 + $0x1c8] sm:$0xff] %v859_v57  ;;  %v865_v60 = vld [vmem:[%s9189_s11 + $0x2e0] sm:$0xff] }
 0x163   : > { %862 = vst [vmem:[%s9194_s3 + $0x1d0] sm:$0xff] %v861_v58  ;;  %864 = vst [vmem:[%s9194_s3 + $0x1d8] sm:$0xff] %v863_v59  ;;  %v867_v61 = vld [vmem:[%s9189_s11 + $0x2e8] sm:$0xff]  ;;  %v869_v62 = vld [vmem:[%s9189_s11 + $0x2f0] sm:$0xff] }
 0x164   : > { %866 = vst [vmem:[%s9194_s3 + $0x1e0] sm:$0xff] %v865_v60  ;;  %868 = vst [vmem:[%s9194_s3 + $0x1e8] sm:$0xff] %v867_v61  ;;  %v871_v63 = vld [vmem:[%s9189_s11 + $0x2f8] sm:$0xff]  ;;  %v873_v0 = vld [vmem:[%s9189_s11 + $0x400] sm:$0xff] }
 0x165   : > { %870 = vst [vmem:[%s9194_s3 + $0x1f0] sm:$0xff] %v869_v62  ;;  %v875_v1 = vld [vmem:[%s9189_s11 + $0x408] sm:$0xff]  ;;  %872 = vst [vmem:[%s9194_s3 + $0x1f8] sm:$0xff] %v871_v63  ;;  %v877_v2 = vld [vmem:[%s9189_s11 + $0x410] sm:$0xff] }
 0x166   : > { %874 = vst [vmem:[%s9194_s3 + $0x200] sm:$0xff] %v873_v0  ;;  %876 = vst [vmem:[%s9194_s3 + $0x208] sm:$0xff] %v875_v1  ;;  %v879_v3 = vld [vmem:[%s9189_s11 + $0x418] sm:$0xff]  ;;  %v881_v4 = vld [vmem:[%s9189_s11 + $0x420] sm:$0xff] }
 0x167   : > { %878 = vst [vmem:[%s9194_s3 + $0x210] sm:$0xff] %v877_v2  ;;  %880 = vst [vmem:[%s9194_s3 + $0x218] sm:$0xff] %v879_v3  ;;  %v883_v5 = vld [vmem:[%s9189_s11 + $0x428] sm:$0xff]  ;;  %v885_v6 = vld [vmem:[%s9189_s11 + $0x430] sm:$0xff] }
 0x168   : > { %882 = vst [vmem:[%s9194_s3 + $0x220] sm:$0xff] %v881_v4  ;;  %v887_v7 = vld [vmem:[%s9189_s11 + $0x438] sm:$0xff]  ;;  %884 = vst [vmem:[%s9194_s3 + $0x228] sm:$0xff] %v883_v5  ;;  %v889_v8 = vld [vmem:[%s9189_s11 + $0x440] sm:$0xff] }
 0x169   : > { %886 = vst [vmem:[%s9194_s3 + $0x230] sm:$0xff] %v885_v6  ;;  %888 = vst [vmem:[%s9194_s3 + $0x238] sm:$0xff] %v887_v7  ;;  %v891_v9 = vld [vmem:[%s9189_s11 + $0x448] sm:$0xff]  ;;  %v893_v10 = vld [vmem:[%s9189_s11 + $0x450] sm:$0xff] }
 0x16a   : > { %890 = vst [vmem:[%s9194_s3 + $0x240] sm:$0xff] %v889_v8  ;;  %892 = vst [vmem:[%s9194_s3 + $0x248] sm:$0xff] %v891_v9  ;;  %v895_v11 = vld [vmem:[%s9189_s11 + $0x458] sm:$0xff]  ;;  %v897_v12 = vld [vmem:[%s9189_s11 + $0x460] sm:$0xff] }
 0x16b   : > { %894 = vst [vmem:[%s9194_s3 + $0x250] sm:$0xff] %v893_v10  ;;  %v899_v13 = vld [vmem:[%s9189_s11 + $0x468] sm:$0xff]  ;;  %896 = vst [vmem:[%s9194_s3 + $0x258] sm:$0xff] %v895_v11  ;;  %v901_v14 = vld [vmem:[%s9189_s11 + $0x470] sm:$0xff] }
 0x16c   : > { %898 = vst [vmem:[%s9194_s3 + $0x260] sm:$0xff] %v897_v12  ;;  %900 = vst [vmem:[%s9194_s3 + $0x268] sm:$0xff] %v899_v13  ;;  %v903_v15 = vld [vmem:[%s9189_s11 + $0x478] sm:$0xff]  ;;  %v905_v16 = vld [vmem:[%s9189_s11 + $0x480] sm:$0xff] }
 0x16d   : > { %902 = vst [vmem:[%s9194_s3 + $0x270] sm:$0xff] %v901_v14  ;;  %904 = vst [vmem:[%s9194_s3 + $0x278] sm:$0xff] %v903_v15  ;;  %v907_v17 = vld [vmem:[%s9189_s11 + $0x488] sm:$0xff]  ;;  %v909_v18 = vld [vmem:[%s9189_s11 + $0x490] sm:$0xff] }
 0x16e   : > { %906 = vst [vmem:[%s9194_s3 + $0x280] sm:$0xff] %v905_v16  ;;  %v911_v19 = vld [vmem:[%s9189_s11 + $0x498] sm:$0xff]  ;;  %908 = vst [vmem:[%s9194_s3 + $0x288] sm:$0xff] %v907_v17  ;;  %v913_v20 = vld [vmem:[%s9189_s11 + $0x4a0] sm:$0xff] }
 0x16f   : > { %910 = vst [vmem:[%s9194_s3 + $0x290] sm:$0xff] %v909_v18  ;;  %912 = vst [vmem:[%s9194_s3 + $0x298] sm:$0xff] %v911_v19  ;;  %v915_v21 = vld [vmem:[%s9189_s11 + $0x4a8] sm:$0xff]  ;;  %v917_v22 = vld [vmem:[%s9189_s11 + $0x4b0] sm:$0xff] }
 0x170   : > { %914 = vst [vmem:[%s9194_s3 + $0x2a0] sm:$0xff] %v913_v20  ;;  %916 = vst [vmem:[%s9194_s3 + $0x2a8] sm:$0xff] %v915_v21  ;;  %v919_v23 = vld [vmem:[%s9189_s11 + $0x4b8] sm:$0xff]  ;;  %v921_v24 = vld [vmem:[%s9189_s11 + $0x4c0] sm:$0xff] }
 0x171   : > { %918 = vst [vmem:[%s9194_s3 + $0x2b0] sm:$0xff] %v917_v22  ;;  %v923_v25 = vld [vmem:[%s9189_s11 + $0x4c8] sm:$0xff]  ;;  %920 = vst [vmem:[%s9194_s3 + $0x2b8] sm:$0xff] %v919_v23  ;;  %v925_v26 = vld [vmem:[%s9189_s11 + $0x4d0] sm:$0xff] }
 0x172   : > { %922 = vst [vmem:[%s9194_s3 + $0x2c0] sm:$0xff] %v921_v24  ;;  %924 = vst [vmem:[%s9194_s3 + $0x2c8] sm:$0xff] %v923_v25  ;;  %v927_v27 = vld [vmem:[%s9189_s11 + $0x4d8] sm:$0xff]  ;;  %v929_v28 = vld [vmem:[%s9189_s11 + $0x4e0] sm:$0xff] }
 0x173   : > { %926 = vst [vmem:[%s9194_s3 + $0x2d0] sm:$0xff] %v925_v26  ;;  %928 = vst [vmem:[%s9194_s3 + $0x2d8] sm:$0xff] %v927_v27  ;;  %v931_v29 = vld [vmem:[%s9189_s11 + $0x4e8] sm:$0xff]  ;;  %v933_v30 = vld [vmem:[%s9189_s11 + $0x4f0] sm:$0xff] }
 0x174   : > { %930 = vst [vmem:[%s9194_s3 + $0x2e0] sm:$0xff] %v929_v28  ;;  %v935_v31 = vld [vmem:[%s9189_s11 + $0x4f8] sm:$0xff]  ;;  %932 = vst [vmem:[%s9194_s3 + $0x2e8] sm:$0xff] %v931_v29 }
 0x175   : > { %934 = vst [vmem:[%s9194_s3 + $0x2f0] sm:$0xff] %v933_v30  ;;  %936 = vst [vmem:[%s9194_s3 + $0x2f8] sm:$0xff] %v935_v31 }
 0x176 PF: > { %s12139_s14 = sld [smem:[#allocation51_spill]] }
 0x17c   : > { %p12140_p4 = scmp.ne.s32.totalorder %s12139_s14, 0 }
 0x17d   : > { %s12141_s26 = sld [smem:[#allocation36_spill]] (!%p12140_p4)  ;;  %s12142_s13 = sld [smem:[#allocation42_spill]] (!%p12140_p4) }
 0x17e   : > { %945 = sbr.rel (%p12140_p4) target bundleno = 2090 (0x82a), region = 98 }
 0x183   : > { %s947_s17 = sand.u32 (!%p12140_p4), 1, %s12141_s26   ;;  %p12143_p10 = scmp.ne.s32.totalorder (!%p12140_p4), %s12142_s13, 0 }
 0x184   : > { %s7534_s12 = smul.u32 (!%p12140_p4), 768, %s947_s17  ;;  %s948_s16 = scalar_lea.sflag (!%p12140_p4), [#allocation4], %s947_s17 }
 0x186   : > { %s9388_s1 = scalar_lea.vmem [#allocation3], %s7534_s12 }
 0x187   : > { %8585 = dma.done.wait (%p12143_p10), %s948_s16, 12288  }
 0x188   : > { %8587 = vsyncadd (%p12143_p10), %s948_s16, 4294955008  ;;  %s12144_s23 = sld [smem:[#allocation39_spill]]  ;;  %s12145_s21 = sld [smem:[#allocation35_spill]] }
 0x189   : > { %s12146_s18 = sld [smem:[#allocation45_spill]] }
 0x18e   : > { %s956_s4 = sand.u32 1, %s12144_s23   ;;  %s958_s24 = sand.u32 1, %s12145_s21  }
 0x18f   : > { %s6660_s27 = sshll.u32 %s958_s24, 7  ;;  %s957_s20 = scalar_lea.sflag [#allocation7], %s956_s4 }
 0x190   : > { %s9396_s2 = scalar_lea.vmem [#allocation6], %s6660_s27  ;;  %p12147_p9 = scmp.ne.s32.totalorder %s12146_s18, 0 }
 0x192   : > { %8589 = dma.done.wait (%p12147_p9), %s957_s20, 2048  }
 0x193   : > { %8591 = vsyncadd (%p12147_p9), %s957_s20, 4294965248  ;;  %s12148_s11 = sld [smem:[#allocation34_spill]]  ;;  %s12149_s3 = sld [smem:[#allocation48_spill]] }
 0x199   : > { %s9403_s14 = sand.u32 1, %s12148_s11   ;;  %p12150_p11 = scmp.ne.s32.totalorder %s12149_s3, 0 }
 0x19a   : > { %s6661_s26 = sshll.u32 %s9403_s14, 8 }
 0x19b   : > { %s9406_s13 = scalar_lea.vmem [#allocation8], %s6661_s26 }
 0x19c   : > { %8593 = dma.done.wait (%p12150_p11), %s957_s20, 4096  }
 0x19d   : > { %8595 = vsyncadd (%p12150_p11), %s957_s20, 4294963200  ;;  %s7535_s17 = smul.u32 768, %s9403_s14  ;;  %p12151_p2 = scmp.eq.s32.totalorder %s12144_s23, 0 }
 0x19f   : > { %s9413_s12 = scalar_lea.vmem [#allocation9], %s7535_s17 }
 0x1a0   : > { %8597 = dma.done.wait (%p12151_p2), [#allocation11], 1088   ;;  %p12152_p1 = pmov %p12151_p2 }
 0x1a2   : > { %8599 = vsyncadd (%p12152_p1), [#allocation11], 4294966208  ;;  %p12153_p13 = pmov %p12152_p1 }
 0x1a3   : > { %p12154_p7 = pmov %p12152_p1 }
 0x1a4   : > { %8601 = dma.done.wait (%p12153_p13), [#allocation14], 2048  }
 0x1a5   : > { %8603 = vsyncadd (%p12154_p7), [#allocation14], 4294965248  ;;  %p12155_p6 = pmov %p12152_p1 }
 0x1a6   : > { %p12156_p8 = pmov %p12152_p1 }
 0x1a7   : > { %8605 = dma.done.wait (%p12155_p6), [#allocation17], 2048  }
 0x1a8   : > { %8607 = vsyncadd (%p12156_p8), [#allocation17], 4294965248  ;;  %p12157_p12 = pmov %p12152_p1 }
 0x1a9   : > { %p12158_p3 = pmov %p12152_p1 }
 0x1aa   : > { %8609 = dma.done.wait (%p12157_p12), [#allocation20], 16  }
 0x1ab   : > { %8611 = vsyncadd (%p12158_p3), [#allocation20], 4294967280  ;;  %s9431_s16 = scalar_lea.vmem [#allocation21], %s6661_s26  ;;  %s12159_s21 = sld [smem:[#allocation37_spill]] }
 0x1b1   : > { %p6670_p0 = scmp.ne.s32.totalorder %s12159_s21, 0 }
 0x1b2   : > { %v8694_v32 = vmov (!%p6670_p0), 0.0  }
 0x1b3   : > { %1067 = sbr.rel (%p6670_p0) target bundleno = 483 (0x1e3), region = 146  ;;  %1068 = vst [vmem:[#allocation2] sm:$0xff] (!%p6670_p0), %v8694_v32  ;;  %1069 = vst [vmem:[#allocation2 + $0x8] sm:$0xff] (!%p6670_p0), %v8694_v32 }
 0x1b4   : > { %1070 = vst [vmem:[#allocation2 + $0x10] sm:$0xff] (!%p6670_p0), %v8694_v32  ;;  %1071 = vst [vmem:[#allocation2 + $0x18] sm:$0xff] (!%p6670_p0), %v8694_v32 }
 0x1b5   : > { %1072 = vst [vmem:[#allocation2 + $0x20] sm:$0xff] (!%p6670_p0), %v8694_v32  ;;  %1073 = vst [vmem:[#allocation2 + $0x28] sm:$0xff] (!%p6670_p0), %v8694_v32 }
 0x1b6   : > { %1074 = vst [vmem:[#allocation2 + $0x30] sm:$0xff] (!%p6670_p0), %v8694_v32  ;;  %1075 = vst [vmem:[#allocation2 + $0x38] sm:$0xff] (!%p6670_p0), %v8694_v32 }
 0x1b7   : > { %1076 = vst [vmem:[#allocation2 + $0x40] sm:$0xff] (!%p6670_p0), %v8694_v32  ;;  %1077 = vst [vmem:[#allocation2 + $0x48] sm:$0xff] (!%p6670_p0), %v8694_v32 }
 0x1b8   : > { %1078 = vst [vmem:[#allocation2 + $0x50] sm:$0xff] (!%p6670_p0), %v8694_v32  ;;  %1079 = vst [vmem:[#allocation2 + $0x58] sm:$0xff] (!%p6670_p0), %v8694_v32 }
 0x1b9   : > { %1080 = vst [vmem:[#allocation2 + $0x60] sm:$0xff] (!%p6670_p0), %v8694_v32  ;;  %1081 = vst [vmem:[#allocation2 + $0x68] sm:$0xff] (!%p6670_p0), %v8694_v32 }
 0x1ba   : > { %1082 = vst [vmem:[#allocation2 + $0x70] sm:$0xff] %v8694_v32  ;;  %1083 = vst [vmem:[#allocation2 + $0x78] sm:$0xff] %v8694_v32 }
 0x1bb   : > { %1084 = vst [vmem:[#allocation2 + $0x80] sm:$0xff] %v8694_v32  ;;  %1085 = vst [vmem:[#allocation2 + $0x88] sm:$0xff] %v8694_v32 }
 0x1bc   : > { %1086 = vst [vmem:[#allocation2 + $0x90] sm:$0xff] %v8694_v32  ;;  %1087 = vst [vmem:[#allocation2 + $0x98] sm:$0xff] %v8694_v32 }
 0x1bd   : > { %1088 = vst [vmem:[#allocation2 + $0xa0] sm:$0xff] %v8694_v32  ;;  %1089 = vst [vmem:[#allocation2 + $0xa8] sm:$0xff] %v8694_v32 }
 0x1be   : > { %1090 = vst [vmem:[#allocation2 + $0xb0] sm:$0xff] %v8694_v32  ;;  %1091 = vst [vmem:[#allocation2 + $0xb8] sm:$0xff] %v8694_v32 }
 0x1bf   : > { %1092 = vst [vmem:[#allocation2 + $0xc0] sm:$0xff] %v8694_v32  ;;  %1093 = vst [vmem:[#allocation2 + $0xc8] sm:$0xff] %v8694_v32 }
 0x1c0   : > { %1094 = vst [vmem:[#allocation2 + $0xd0] sm:$0xff] %v8694_v32  ;;  %1095 = vst [vmem:[#allocation2 + $0xd8] sm:$0xff] %v8694_v32 }
 0x1c1   : > { %1096 = vst [vmem:[#allocation2 + $0xe0] sm:$0xff] %v8694_v32  ;;  %1097 = vst [vmem:[#allocation2 + $0xe8] sm:$0xff] %v8694_v32 }
 0x1c2   : > { %1098 = vst [vmem:[#allocation2 + $0xf0] sm:$0xff] %v8694_v32  ;;  %1099 = vst [vmem:[#allocation2 + $0xf8] sm:$0xff] %v8694_v32 }
 0x1c3   : > { %1100 = vst [vmem:[#allocation2 + $0x100] sm:$0xff] %v8694_v32  ;;  %1101 = vst [vmem:[#allocation2 + $0x108] sm:$0xff] %v8694_v32 }
 0x1c4   : > { %1102 = vst [vmem:[#allocation2 + $0x110] sm:$0xff] %v8694_v32  ;;  %1103 = vst [vmem:[#allocation2 + $0x118] sm:$0xff] %v8694_v32 }
 0x1c5   : > { %1104 = vst [vmem:[#allocation2 + $0x120] sm:$0xff] %v8694_v32  ;;  %1105 = vst [vmem:[#allocation2 + $0x128] sm:$0xff] %v8694_v32 }
 0x1c6   : > { %1106 = vst [vmem:[#allocation2 + $0x130] sm:$0xff] %v8694_v32  ;;  %1107 = vst [vmem:[#allocation2 + $0x138] sm:$0xff] %v8694_v32 }
 0x1c7   : > { %1108 = vst [vmem:[#allocation2 + $0x140] sm:$0xff] %v8694_v32  ;;  %1109 = vst [vmem:[#allocation2 + $0x148] sm:$0xff] %v8694_v32 }
 0x1c8   : > { %1110 = vst [vmem:[#allocation2 + $0x150] sm:$0xff] %v8694_v32  ;;  %1111 = vst [vmem:[#allocation2 + $0x158] sm:$0xff] %v8694_v32 }
 0x1c9   : > { %1112 = vst [vmem:[#allocation2 + $0x160] sm:$0xff] %v8694_v32  ;;  %1113 = vst [vmem:[#allocation2 + $0x168] sm:$0xff] %v8694_v32 }
 0x1ca   : > { %1114 = vst [vmem:[#allocation2 + $0x170] sm:$0xff] %v8694_v32  ;;  %1115 = vst [vmem:[#allocation2 + $0x178] sm:$0xff] %v8694_v32 }
 0x1cb   : > { %1116 = vst [vmem:[#allocation2 + $0x180] sm:$0xff] %v8694_v32  ;;  %1117 = vst [vmem:[#allocation2 + $0x188] sm:$0xff] %v8694_v32 }
 0x1cc   : > { %1118 = vst [vmem:[#allocation2 + $0x190] sm:$0xff] %v8694_v32  ;;  %1119 = vst [vmem:[#allocation2 + $0x198] sm:$0xff] %v8694_v32 }
 0x1cd   : > { %1120 = vst [vmem:[#allocation2 + $0x1a0] sm:$0xff] %v8694_v32  ;;  %1121 = vst [vmem:[#allocation2 + $0x1a8] sm:$0xff] %v8694_v32 }
 0x1ce   : > { %1122 = vst [vmem:[#allocation2 + $0x1b0] sm:$0xff] %v8694_v32  ;;  %1123 = vst [vmem:[#allocation2 + $0x1b8] sm:$0xff] %v8694_v32 }
 0x1cf   : > { %1124 = vst [vmem:[#allocation2 + $0x1c0] sm:$0xff] %v8694_v32  ;;  %1125 = vst [vmem:[#allocation2 + $0x1c8] sm:$0xff] %v8694_v32 }
 0x1d0   : > { %1126 = vst [vmem:[#allocation2 + $0x1d0] sm:$0xff] %v8694_v32  ;;  %1127 = vst [vmem:[#allocation2 + $0x1d8] sm:$0xff] %v8694_v32 }
 0x1d1   : > { %1128 = vst [vmem:[#allocation2 + $0x1e0] sm:$0xff] %v8694_v32  ;;  %1129 = vst [vmem:[#allocation2 + $0x1e8] sm:$0xff] %v8694_v32 }
 0x1d2   : > { %1130 = vst [vmem:[#allocation2 + $0x1f0] sm:$0xff] %v8694_v32  ;;  %1131 = vst [vmem:[#allocation2 + $0x1f8] sm:$0xff] %v8694_v32 }
 0x1d3   : > { %1132 = vst [vmem:[#allocation2 + $0x200] sm:$0xff] %v8694_v32  ;;  %1133 = vst [vmem:[#allocation2 + $0x208] sm:$0xff] %v8694_v32 }
 0x1d4   : > { %1134 = vst [vmem:[#allocation2 + $0x210] sm:$0xff] %v8694_v32  ;;  %1135 = vst [vmem:[#allocation2 + $0x218] sm:$0xff] %v8694_v32 }
 0x1d5   : > { %1136 = vst [vmem:[#allocation2 + $0x220] sm:$0xff] %v8694_v32  ;;  %1137 = vst [vmem:[#allocation2 + $0x228] sm:$0xff] %v8694_v32 }
 0x1d6   : > { %1138 = vst [vmem:[#allocation2 + $0x230] sm:$0xff] %v8694_v32  ;;  %1139 = vst [vmem:[#allocation2 + $0x238] sm:$0xff] %v8694_v32 }
 0x1d7   : > { %1140 = vst [vmem:[#allocation2 + $0x240] sm:$0xff] %v8694_v32  ;;  %1141 = vst [vmem:[#allocation2 + $0x248] sm:$0xff] %v8694_v32 }
 0x1d8   : > { %1142 = vst [vmem:[#allocation2 + $0x250] sm:$0xff] %v8694_v32  ;;  %1143 = vst [vmem:[#allocation2 + $0x258] sm:$0xff] %v8694_v32 }
 0x1d9   : > { %1144 = vst [vmem:[#allocation2 + $0x260] sm:$0xff] %v8694_v32  ;;  %1145 = vst [vmem:[#allocation2 + $0x268] sm:$0xff] %v8694_v32 }
 0x1da   : > { %1146 = vst [vmem:[#allocation2 + $0x270] sm:$0xff] %v8694_v32  ;;  %1147 = vst [vmem:[#allocation2 + $0x278] sm:$0xff] %v8694_v32 }
 0x1db   : > { %1148 = vst [vmem:[#allocation2 + $0x280] sm:$0xff] %v8694_v32  ;;  %1149 = vst [vmem:[#allocation2 + $0x288] sm:$0xff] %v8694_v32 }
 0x1dc   : > { %1150 = vst [vmem:[#allocation2 + $0x290] sm:$0xff] %v8694_v32  ;;  %1151 = vst [vmem:[#allocation2 + $0x298] sm:$0xff] %v8694_v32 }
 0x1dd   : > { %1152 = vst [vmem:[#allocation2 + $0x2a0] sm:$0xff] %v8694_v32  ;;  %1153 = vst [vmem:[#allocation2 + $0x2a8] sm:$0xff] %v8694_v32 }
 0x1de   : > { %1154 = vst [vmem:[#allocation2 + $0x2b0] sm:$0xff] %v8694_v32  ;;  %1155 = vst [vmem:[#allocation2 + $0x2b8] sm:$0xff] %v8694_v32 }
 0x1df   : > { %1156 = vst [vmem:[#allocation2 + $0x2c0] sm:$0xff] %v8694_v32  ;;  %1157 = vst [vmem:[#allocation2 + $0x2c8] sm:$0xff] %v8694_v32 }
 0x1e0   : > { %1158 = vst [vmem:[#allocation2 + $0x2d0] sm:$0xff] %v8694_v32  ;;  %1159 = vst [vmem:[#allocation2 + $0x2d8] sm:$0xff] %v8694_v32 }
 0x1e1   : > { %1160 = vst [vmem:[#allocation2 + $0x2e0] sm:$0xff] %v8694_v32  ;;  %1161 = vst [vmem:[#allocation2 + $0x2e8] sm:$0xff] %v8694_v32 }
 0x1e2   : > { %1162 = vst [vmem:[#allocation2 + $0x2f0] sm:$0xff] %v8694_v32  ;;  %1163 = vst [vmem:[#allocation2 + $0x2f8] sm:$0xff] %v8694_v32 }
 0x1e3 PF: > { %v7758_v33 = vld [vmem:[%s9396_s2] sm:$0xff]   ;;  %v8695_v34 = vmov 0   ;;  %v7759_v35 = vld [vmem:[%s9396_s2 + $0x8] sm:$0xff]   ;;  %v7760_v36 = vld [vmem:[%s9396_s2 + $0x10] sm:$0xff]  }
 0x1e4   : > { %1964 = vmatprep.subr.bf16.mxu0 %v8695_v34  ;;  %7484 = vmatprep.subr.bf16.mxu1 %v8695_v34  ;;  %v7761_v37 = vld [vmem:[%s9396_s2 + $0x18] sm:$0xff]   ;;  %v7762_v38 = vld [vmem:[%s9396_s2 + $0x20] sm:$0xff]   ;;  %v7763_v40 = vld [vmem:[%s9396_s2 + $0x28] sm:$0xff]  }
 0x1e5   : > { %1965 = vmatpush1.bf16.msra.mxu0 %v7758_v33  ;;  %7500 = vmatpush1.bf16.msra.mxu1 %v7758_v33  ;;  %v7776_v39 = vld [vmem:[%s9388_s1 + $0x4] ss:$8 sps:$4 sm:$0xff]   ;;  %v7764_v42 = vld [vmem:[%s9396_s2 + $0x30] sm:$0xff]   ;;  %v7765_v43 = vld [vmem:[%s9396_s2 + $0x38] sm:$0xff]  }
 0x1e6   : > { %1966 = vmatprep.subr.bf16.mxu0 %v8695_v34  ;;  %7485 = vmatprep.subr.bf16.mxu1 %v8695_v34  ;;  %v7779_v41 = vld [vmem:[%s9388_s1 + $0x184] ss:$8 sps:$4 sm:$0xff]   ;;  %v7768_v46 = vld [vmem:[%s9396_s2 + $0x50] sm:$0xff]   ;;  %v7769_v47 = vld [vmem:[%s9396_s2 + $0x58] sm:$0xff]  }
 0x1e7   : > { %1996 = vmatprep.mubr.bf16.mxu0 %v7776_v39  ;;  %2188 = vmatprep.mubr.bf16.mxu1 %v7779_v41  ;;  %v7766_v44 = vld [vmem:[%s9396_s2 + $0x40] sm:$0xff]   ;;  %v7767_v45 = vld [vmem:[%s9396_s2 + $0x48] sm:$0xff]   ;;  %v7772_v50 = vld [vmem:[%s9396_s2 + $0x70] sm:$0xff]  }
 0x1e8   : > { %v7770_v48 = vld [vmem:[%s9396_s2 + $0x60] sm:$0xff]   ;;  %v7771_v49 = vld [vmem:[%s9396_s2 + $0x68] sm:$0xff]   ;;  %v7773_v51 = vld [vmem:[%s9396_s2 + $0x78] sm:$0xff]  }
 0x1e9   : > { %1967 = vmatpush1.bf16.msra.mxu0 %v7759_v35  ;;  %7501 = vmatpush1.bf16.msra.mxu1 %v7759_v35  ;;  %v7774_v52 = vld [vmem:[%s9388_s1] ss:$8 sps:$4 sm:$0xff]   ;;  %v7780_v54 = vld [vmem:[%s9388_s1 + $0x14] ss:$8 sps:$4 sm:$0xff]   ;;  %v7784_v56 = vld [vmem:[%s9388_s1 + $0x10] ss:$8 sps:$4 sm:$0xff]  }
 0x1ea   : > { %1968 = vmatprep.subr.bf16.mxu0 %v8695_v34  ;;  %7486 = vmatprep.subr.bf16.mxu1 %v8695_v34  ;;  %v7777_v53 = vld [vmem:[%s9388_s1 + $0x180] ss:$8 sps:$4 sm:$0xff]   ;;  %v7782_v55 = vld [vmem:[%s9388_s1 + $0x194] ss:$8 sps:$4 sm:$0xff]   ;;  %v7785_v57 = vld [vmem:[%s9388_s1 + $0x190] ss:$8 sps:$4 sm:$0xff]  }
 0x1eb   : > { %v7786_v58 = vld [vmem:[%s9388_s1 + $0x24] ss:$8 sps:$4 sm:$0xff]   ;;  %v7790_v60 = vld [vmem:[%s9388_s1 + $0x20] ss:$8 sps:$4 sm:$0xff]   ;;  %v7792_v62 = vld [vmem:[%s9388_s1 + $0x34] ss:$8 sps:$4 sm:$0xff]  }
 0x1ec   : > { %v7788_v59 = vld [vmem:[%s9388_s1 + $0x1a4] ss:$8 sps:$4 sm:$0xff]   ;;  %v7791_v61 = vld [vmem:[%s9388_s1 + $0x1a0] ss:$8 sps:$4 sm:$0xff]   ;;  %v7794_v63 = vld [vmem:[%s9388_s1 + $0x1b4] ss:$8 sps:$4 sm:$0xff]  }
 0x1ed   : > { %1969 = vmatpush1.bf16.msra.mxu0 %v7760_v36  ;;  %7502 = vmatpush1.bf16.msra.mxu1 %v7760_v36  ;;  %v7796_v0 = vld [vmem:[%s9388_s1 + $0x30] ss:$8 sps:$4 sm:$0xff]   ;;  %v7798_v2 = vld [vmem:[%s9388_s1 + $0x44] ss:$8 sps:$4 sm:$0xff]   ;;  %v7802_v4 = vld [vmem:[%s9388_s1 + $0x40] ss:$8 sps:$4 sm:$0xff]  }
 0x1ee   : > { %1970 = vmatprep.subr.bf16.mxu0 %v8695_v34  ;;  %7487 = vmatprep.subr.bf16.mxu1 %v8695_v34  ;;  %v7797_v1 = vld [vmem:[%s9388_s1 + $0x1b0] ss:$8 sps:$4 sm:$0xff]   ;;  %v7800_v3 = vld [vmem:[%s9388_s1 + $0x1c4] ss:$8 sps:$4 sm:$0xff]   ;;  %v7803_v5 = vld [vmem:[%s9388_s1 + $0x1c0] ss:$8 sps:$4 sm:$0xff]  }
 0x1ef   : > { %v7804_v6 = vld [vmem:[%s9388_s1 + $0x54] ss:$8 sps:$4 sm:$0xff]   ;;  %v7808_v8 = vld [vmem:[%s9388_s1 + $0x50] ss:$8 sps:$4 sm:$0xff]   ;;  %v7810_v10 = vld [vmem:[%s9388_s1 + $0x64] ss:$8 sps:$4 sm:$0xff]  }
 0x1f0   : > { %v7806_v7 = vld [vmem:[%s9388_s1 + $0x1d4] ss:$8 sps:$4 sm:$0xff]   ;;  %v7809_v9 = vld [vmem:[%s9388_s1 + $0x1d0] ss:$8 sps:$4 sm:$0xff]   ;;  %v7812_v11 = vld [vmem:[%s9388_s1 + $0x1e4] ss:$8 sps:$4 sm:$0xff]  }
 0x1f1   : > { %1971 = vmatpush1.bf16.msra.mxu0 %v7761_v37  ;;  %7503 = vmatpush1.bf16.msra.mxu1 %v7761_v37  ;;  %v7814_v12 = vld [vmem:[%s9388_s1 + $0x60] ss:$8 sps:$4 sm:$0xff]   ;;  %v7816_v14 = vld [vmem:[%s9388_s1 + $0x74] ss:$8 sps:$4 sm:$0xff]   ;;  %v7820_v16 = vld [vmem:[%s9388_s1 + $0x70] ss:$8 sps:$4 sm:$0xff]  }
 0x1f2   : > { %1972 = vmatprep.subr.bf16.mxu0 %v8695_v34  ;;  %7488 = vmatprep.subr.bf16.mxu1 %v8695_v34  ;;  %v7815_v13 = vld [vmem:[%s9388_s1 + $0x1e0] ss:$8 sps:$4 sm:$0xff]   ;;  %v7818_v15 = vld [vmem:[%s9388_s1 + $0x1f4] ss:$8 sps:$4 sm:$0xff]   ;;  %v7821_v17 = vld [vmem:[%s9388_s1 + $0x1f0] ss:$8 sps:$4 sm:$0xff]  }
 0x1f3   : > { %v7822_v18 = vld [vmem:[%s9388_s1 + $0x84] ss:$8 sps:$4 sm:$0xff]   ;;  %v7826_v20 = vld [vmem:[%s9388_s1 + $0x80] ss:$8 sps:$4 sm:$0xff]   ;;  %v7828_v22 = vld [vmem:[%s9388_s1 + $0x94] ss:$8 sps:$4 sm:$0xff]  }
 0x1f4   : > { %v7824_v19 = vld [vmem:[%s9388_s1 + $0x204] ss:$8 sps:$4 sm:$0xff]   ;;  %v7827_v21 = vld [vmem:[%s9388_s1 + $0x200] ss:$8 sps:$4 sm:$0xff]   ;;  %v7830_v23 = vld [vmem:[%s9388_s1 + $0x214] ss:$8 sps:$4 sm:$0xff]  }
 0x1f5   : > { %1973 = vmatpush1.bf16.msra.mxu0 %v7762_v38  ;;  %7504 = vmatpush1.bf16.msra.mxu1 %v7762_v38  ;;  %v7832_v24 = vld [vmem:[%s9388_s1 + $0x90] ss:$8 sps:$4 sm:$0xff]   ;;  %v7834_v26 = vld [vmem:[%s9388_s1 + $0xa4] ss:$8 sps:$4 sm:$0xff]   ;;  %v7838_v28 = vld [vmem:[%s9388_s1 + $0xa0] ss:$8 sps:$4 sm:$0xff]  }
 0x1f6   : > { %1974 = vmatprep.subr.bf16.mxu0 %v8695_v34  ;;  %7489 = vmatprep.subr.bf16.mxu1 %v8695_v34  ;;  %v7833_v25 = vld [vmem:[%s9388_s1 + $0x210] ss:$8 sps:$4 sm:$0xff]   ;;  %v7836_v27 = vld [vmem:[%s9388_s1 + $0x224] ss:$8 sps:$4 sm:$0xff]   ;;  %v7839_v29 = vld [vmem:[%s9388_s1 + $0x220] ss:$8 sps:$4 sm:$0xff]  }
 0x1f7   : > { %v7840_v30 = vld [vmem:[%s9388_s1 + $0xb4] ss:$8 sps:$4 sm:$0xff]   ;;  %v7844_v32 = vld [vmem:[%s9388_s1 + $0xb0] ss:$8 sps:$4 sm:$0xff]   ;;  %v7848_v35 = vld [vmem:[%s9388_s1 + $0x244] ss:$8 sps:$4 sm:$0xff]  }
 0x1f8   : > { %v7842_v31 = vld [vmem:[%s9388_s1 + $0x234] ss:$8 sps:$4 sm:$0xff]   ;;  %v7845_v33 = vld [vmem:[%s9388_s1 + $0x230] ss:$8 sps:$4 sm:$0xff]   ;;  %v7850_v36 = vld [vmem:[%s9388_s1 + $0xc0] ss:$8 sps:$4 sm:$0xff]  }
 0x1f9   : > { %1975 = vmatpush1.bf16.msra.mxu0 %v7763_v40  ;;  %7505 = vmatpush1.bf16.msra.mxu1 %v7763_v40  ;;  %v7851_v37 = vld [vmem:[%s9388_s1 + $0x240] ss:$8 sps:$4 sm:$0xff]   ;;  %v7852_v38 = vld [vmem:[%s9388_s1 + $0xd4] ss:$8 sps:$4 sm:$0xff]   ;;  %v7856_v40 = vld [vmem:[%s9388_s1 + $0xd0] ss:$8 sps:$4 sm:$0xff]  }
 0x1fa   : > { %1976 = vmatprep.subr.bf16.mxu0 %v8695_v34  ;;  %7490 = vmatprep.subr.bf16.mxu1 %v8695_v34  ;;  %v7854_v39 = vld [vmem:[%s9388_s1 + $0x254] ss:$8 sps:$4 sm:$0xff]   ;;  %v7857_v41 = vld [vmem:[%s9388_s1 + $0x250] ss:$8 sps:$4 sm:$0xff]  }
 0x1fd   : > { %1977 = vmatpush1.bf16.msra.mxu0 %v7764_v42  ;;  %7506 = vmatpush1.bf16.msra.mxu1 %v7764_v42  ;;  %v7858_v42 = vld [vmem:[%s9388_s1 + $0xe4] ss:$8 sps:$4 sm:$0xff]  }
 0x1fe   : > { %1978 = vmatprep.subr.bf16.mxu0 %v8695_v34  ;;  %7491 = vmatprep.subr.bf16.mxu1 %v8695_v34 }
 0x201   : > { %1979 = vmatpush1.bf16.msra.mxu0 %v7765_v43  ;;  %7507 = vmatpush1.bf16.msra.mxu1 %v7765_v43  ;;  %v7860_v43 = vld [vmem:[%s9388_s1 + $0x264] ss:$8 sps:$4 sm:$0xff]  }
 0x202   : > { %1980 = vmatprep.subr.bf16.mxu0 %v8695_v34  ;;  %7492 = vmatprep.subr.bf16.mxu1 %v8695_v34 }
 0x205   : > { %1981 = vmatpush1.bf16.msra.mxu0 %v7766_v44  ;;  %7508 = vmatpush1.bf16.msra.mxu1 %v7766_v44  ;;  %v7862_v44 = vld [vmem:[%s9388_s1 + $0xe0] ss:$8 sps:$4 sm:$0xff]  }
 0x206   : > { %1982 = vmatprep.subr.bf16.mxu0 %v8695_v34  ;;  %7493 = vmatprep.subr.bf16.mxu1 %v8695_v34 }
 0x209   : > { %1983 = vmatpush1.bf16.msra.mxu0 %v7767_v45  ;;  %7509 = vmatpush1.bf16.msra.mxu1 %v7767_v45  ;;  %v7863_v45 = vld [vmem:[%s9388_s1 + $0x260] ss:$8 sps:$4 sm:$0xff]  }
 0x20a   : > { %1984 = vmatprep.subr.bf16.mxu0 %v8695_v34  ;;  %7494 = vmatprep.subr.bf16.mxu1 %v8695_v34 }
 0x20d   : > { %1985 = vmatpush1.bf16.msra.mxu0 %v7768_v46  ;;  %7510 = vmatpush1.bf16.msra.mxu1 %v7768_v46  ;;  %v7864_v46 = vld [vmem:[%s9388_s1 + $0xf4] ss:$8 sps:$4 sm:$0xff]  }
 0x20e   : > { %1986 = vmatprep.subr.bf16.mxu0 %v8695_v34  ;;  %7495 = vmatprep.subr.bf16.mxu1 %v8695_v34 }
 0x211   : > { %1987 = vmatpush1.bf16.msra.mxu0 %v7769_v47  ;;  %7511 = vmatpush1.bf16.msra.mxu1 %v7769_v47  ;;  %v7866_v47 = vld [vmem:[%s9388_s1 + $0x274] ss:$8 sps:$4 sm:$0xff]  }
 0x212   : > { %1988 = vmatprep.subr.bf16.mxu0 %v8695_v34  ;;  %7496 = vmatprep.subr.bf16.mxu1 %v8695_v34 }
 0x215   : > { %1989 = vmatpush1.bf16.msra.mxu0 %v7770_v48  ;;  %7512 = vmatpush1.bf16.msra.mxu1 %v7770_v48  ;;  %v7868_v48 = vld [vmem:[%s9388_s1 + $0xf0] ss:$8 sps:$4 sm:$0xff]  }
 0x216   : > { %1990 = vmatprep.subr.bf16.mxu0 %v8695_v34  ;;  %7497 = vmatprep.subr.bf16.mxu1 %v8695_v34 }
 0x219   : > { %1991 = vmatpush1.bf16.msra.mxu0 %v7771_v49  ;;  %7513 = vmatpush1.bf16.msra.mxu1 %v7771_v49  ;;  %v7869_v49 = vld [vmem:[%s9388_s1 + $0x270] ss:$8 sps:$4 sm:$0xff]  }
 0x21a   : > { %1992 = vmatprep.subr.bf16.mxu0 %v8695_v34  ;;  %7498 = vmatprep.subr.bf16.mxu1 %v8695_v34 }
 0x21d   : > { %1993 = vmatpush1.bf16.msra.mxu0 %v7772_v50  ;;  %7514 = vmatpush1.bf16.msra.mxu1 %v7772_v50  ;;  %v7870_v50 = vld [vmem:[%s9388_s1 + $0x104] ss:$8 sps:$4 sm:$0xff]  }
 0x21e   : > { %1994 = vmatprep.subr.bf16.mxu0 %v8695_v34  ;;  %7499 = vmatprep.subr.bf16.mxu1 %v8695_v34  ;;  %v7846_v34 = vld [vmem:[%s9388_s1 + $0xc4] ss:$8 sps:$4 sm:$0xff]  }
 0x221   : > { %1995 = vmatpush1.bf16.msra.mxu0 %v7773_v51  ;;  %7515 = vmatpush1.bf16.msra.mxu1 %v7773_v51  ;;  %v7872_v51 = vld [vmem:[%s9388_s1 + $0x284] ss:$8 sps:$4 sm:$0xff]  }
 0x224   : > { %1997 = vmatmul.mubr.bf16.vlgmr.msra.gmra.mrb[0].mxu0 %v7774_v52  ;;  %2189 = vmatmul.mubr.bf16.vlgmr.msra.gmra.mrb[0].mxu1 %v7777_v53  ;;  %v7874_v52 = vld [vmem:[%s9388_s1 + $0x100] ss:$8 sps:$4 sm:$0xff]  }
 0x225   : > { %2004 = vmatprep.mubr.bf16.mxu0 %v7780_v54  ;;  %2196 = vmatprep.mubr.bf16.mxu1 %v7782_v55  ;;  %v7875_v53 = vld [vmem:[%s9388_s1 + $0x280] ss:$8 sps:$4 sm:$0xff]   ;;  %v7876_v54 = vld [vmem:[%s9388_s1 + $0x114] ss:$8 sps:$4 sm:$0xff]  }
 0x226   : > { %v7878_v55 = vld [vmem:[%s9388_s1 + $0x294] ss:$8 sps:$4 sm:$0xff]  }
 0x22c   : > { %2005 = vmatmul.mubr.bf16.gmra.mrb[4].mxu0 %v7784_v56  ;;  %2197 = vmatmul.mubr.bf16.gmra.mrb[4].mxu1 %v7785_v57  ;;  %v7880_v56 = vld [vmem:[%s9388_s1 + $0x110] ss:$8 sps:$4 sm:$0xff]  }
 0x22d   : > { %2012 = vmatprep.mubr.bf16.mxu0 %v7786_v58  ;;  %2204 = vmatprep.mubr.bf16.mxu1 %v7788_v59  ;;  %v7881_v57 = vld [vmem:[%s9388_s1 + $0x290] ss:$8 sps:$4 sm:$0xff]   ;;  %v7882_v58 = vld [vmem:[%s9388_s1 + $0x124] ss:$8 sps:$4 sm:$0xff]  }
 0x22e   : > { %v7884_v59 = vld [vmem:[%s9388_s1 + $0x2a4] ss:$8 sps:$4 sm:$0xff]  }
 0x234   : > { %2013 = vmatmul.mubr.bf16.gmra.mrb[8].mxu0 %v7790_v60  ;;  %2205 = vmatmul.mubr.bf16.gmra.mrb[8].mxu1 %v7791_v61  ;;  %v7886_v60 = vld [vmem:[%s9388_s1 + $0x120] ss:$8 sps:$4 sm:$0xff]  }
 0x235   : > { %2020 = vmatprep.mubr.bf16.mxu0 %v7792_v62  ;;  %2212 = vmatprep.mubr.bf16.mxu1 %v7794_v63  ;;  %v7887_v61 = vld [vmem:[%s9388_s1 + $0x2a0] ss:$8 sps:$4 sm:$0xff]   ;;  %v7888_v62 = vld [vmem:[%s9388_s1 + $0x134] ss:$8 sps:$4 sm:$0xff]  }
 0x236   : > { %v7890_v63 = vld [vmem:[%s9388_s1 + $0x2b4] ss:$8 sps:$4 sm:$0xff]  }
 0x23c   : > { %2021 = vmatmul.mubr.bf16.gmra.mrb[12].mxu0 %v7796_v0  ;;  %2213 = vmatmul.mubr.bf16.gmra.mrb[12].mxu1 %v7797_v1  ;;  %v7892_v0 = vld [vmem:[%s9388_s1 + $0x130] ss:$8 sps:$4 sm:$0xff]  }
 0x23d   : > { %2028 = vmatprep.mubr.bf16.mxu0 %v7798_v2  ;;  %2220 = vmatprep.mubr.bf16.mxu1 %v7800_v3  ;;  %v7893_v1 = vld [vmem:[%s9388_s1 + $0x2b0] ss:$8 sps:$4 sm:$0xff]   ;;  %v7894_v2 = vld [vmem:[%s9388_s1 + $0x144] ss:$8 sps:$4 sm:$0xff]  }
 0x23e   : > { %v7896_v3 = vld [vmem:[%s9388_s1 + $0x2c4] ss:$8 sps:$4 sm:$0xff]  }
 0x244   : > { %2029 = vmatmul.mubr.bf16.gmra.mrb[16].mxu0 %v7802_v4  ;;  %2221 = vmatmul.mubr.bf16.gmra.mrb[16].mxu1 %v7803_v5  ;;  %v7898_v4 = vld [vmem:[%s9388_s1 + $0x140] ss:$8 sps:$4 sm:$0xff]  }
 0x245   : > { %2036 = vmatprep.mubr.bf16.mxu0 %v7804_v6  ;;  %2228 = vmatprep.mubr.bf16.mxu1 %v7806_v7  ;;  %v7899_v5 = vld [vmem:[%s9388_s1 + $0x2c0] ss:$8 sps:$4 sm:$0xff]   ;;  %v7900_v6 = vld [vmem:[%s9388_s1 + $0x154] ss:$8 sps:$4 sm:$0xff]  }
 0x246   : > { %v7902_v7 = vld [vmem:[%s9388_s1 + $0x2d4] ss:$8 sps:$4 sm:$0xff]  }
 0x24c   : > { %2037 = vmatmul.mubr.bf16.gmra.mrb[20].mxu0 %v7808_v8  ;;  %2229 = vmatmul.mubr.bf16.gmra.mrb[20].mxu1 %v7809_v9  ;;  %v7904_v8 = vld [vmem:[%s9388_s1 + $0x150] ss:$8 sps:$4 sm:$0xff]  }
 0x24d   : > { %2044 = vmatprep.mubr.bf16.mxu0 %v7810_v10  ;;  %2236 = vmatprep.mubr.bf16.mxu1 %v7812_v11  ;;  %v7905_v9 = vld [vmem:[%s9388_s1 + $0x2d0] ss:$8 sps:$4 sm:$0xff]   ;;  %v7906_v10 = vld [vmem:[%s9388_s1 + $0x164] ss:$8 sps:$4 sm:$0xff]  }
 0x24e   : > { %v7908_v11 = vld [vmem:[%s9388_s1 + $0x2e4] ss:$8 sps:$4 sm:$0xff]  }
 0x254   : > { %2045 = vmatmul.mubr.bf16.gmra.mrb[24].mxu0 %v7814_v12  ;;  %2237 = vmatmul.mubr.bf16.gmra.mrb[24].mxu1 %v7815_v13  ;;  %v7910_v12 = vld [vmem:[%s9388_s1 + $0x160] ss:$8 sps:$4 sm:$0xff]  }
 0x255   : > { %2052 = vmatprep.mubr.bf16.mxu0 %v7816_v14  ;;  %2244 = vmatprep.mubr.bf16.mxu1 %v7818_v15  ;;  %v7911_v13 = vld [vmem:[%s9388_s1 + $0x2e0] ss:$8 sps:$4 sm:$0xff]   ;;  %v7912_v14 = vld [vmem:[%s9388_s1 + $0x174] ss:$8 sps:$4 sm:$0xff]  }
 0x256   : > { %v7914_v15 = vld [vmem:[%s9388_s1 + $0x2f4] ss:$8 sps:$4 sm:$0xff]  }
 0x25c   : > { %2053 = vmatmul.mubr.bf16.gmra.mrb[28].mxu0 %v7820_v16  ;;  %2245 = vmatmul.mubr.bf16.gmra.mrb[28].mxu1 %v7821_v17  ;;  %v7916_v16 = vld [vmem:[%s9388_s1 + $0x170] ss:$8 sps:$4 sm:$0xff]  }
 0x25d   : > { %2060 = vmatprep.mubr.bf16.mxu0 %v7822_v18  ;;  %2252 = vmatprep.mubr.bf16.mxu1 %v7824_v19  ;;  %v7917_v17 = vld [vmem:[%s9388_s1 + $0x2f0] ss:$8 sps:$4 sm:$0xff]   ;;  %v1260_v18 = vld [vmem:[#allocation2] sm:$0xff]  ;;  %s12160_s1 = sld [smem:[#allocation37_spill]] }
 0x25e   : > { %v1308_v19 = vld [vmem:[#allocation2 + $0x180] sm:$0xff] }
 0x263   : > { %p6783_p5 = scmp.ne.s32.totalorder %s12160_s1, 1 }
 0x264   : > { %2061 = vmatmul.mubr.bf16.gmra.mrb[32].mxu0 %v7826_v20  ;;  %2253 = vmatmul.mubr.bf16.gmra.mrb[32].mxu1 %v7827_v21 }
 0x265   : > { %2068 = vmatprep.mubr.bf16.mxu0 %v7828_v22  ;;  %2260 = vmatprep.mubr.bf16.mxu1 %v7830_v23  ;;  %v1261_v22 = vld [vmem:[#allocation2 + $0x8] sm:$0xff] }
 0x266   : > { %v1309_v23 = vld [vmem:[#allocation2 + $0x188] sm:$0xff] }
 0x26c   : > { %2069 = vmatmul.mubr.bf16.gmra.mrb[36].mxu0 %v7832_v24  ;;  %2261 = vmatmul.mubr.bf16.gmra.mrb[36].mxu1 %v7833_v25 }
 0x26d   : > { %2076 = vmatprep.mubr.bf16.mxu0 %v7834_v26  ;;  %2268 = vmatprep.mubr.bf16.mxu1 %v7836_v27 }
 0x274   : > { %2077 = vmatmul.mubr.bf16.gmra.mrb[40].mxu0 %v7838_v28  ;;  %2269 = vmatmul.mubr.bf16.gmra.mrb[40].mxu1 %v7839_v29 }
 0x275   : > { %2084 = vmatprep.mubr.bf16.mxu0 %v7840_v30  ;;  %2276 = vmatprep.mubr.bf16.mxu1 %v7842_v31 }
 0x27c   : > { %2085 = vmatmul.mubr.bf16.gmra.mrb[44].mxu0 %v7844_v32  ;;  %2277 = vmatmul.mubr.bf16.gmra.mrb[44].mxu1 %v7845_v33 }
 0x27d   : > { %2092 = vmatprep.mubr.bf16.mxu0 %v7846_v34  ;;  %2284 = vmatprep.mubr.bf16.mxu1 %v7848_v35  ;;  %v1262_v34 = vld [vmem:[#allocation2 + $0x10] sm:$0xff] }
 0x27e   : > { %v1310_v35 = vld [vmem:[#allocation2 + $0x190] sm:$0xff] }
 0x284   : > { %2093 = vmatmul.mubr.bf16.gmra.mrb[48].mxu0 %v7850_v36  ;;  %2285 = vmatmul.mubr.bf16.gmra.mrb[48].mxu1 %v7851_v37 }
 0x285   : > { %2100 = vmatprep.mubr.bf16.mxu0 %v7852_v38  ;;  %2292 = vmatprep.mubr.bf16.mxu1 %v7854_v39  ;;  %v1263_v38 = vld [vmem:[#allocation2 + $0x18] sm:$0xff] }
 0x286   : > { %v1311_v39 = vld [vmem:[#allocation2 + $0x198] sm:$0xff] }
 0x28c   : > { %2101 = vmatmul.mubr.bf16.gmra.mrb[52].mxu0 %v7856_v40  ;;  %2293 = vmatmul.mubr.bf16.gmra.mrb[52].mxu1 %v7857_v41 }
 0x28d   : > { %2108 = vmatprep.mubr.bf16.mxu0 %v7858_v42  ;;  %2300 = vmatprep.mubr.bf16.mxu1 %v7860_v43 }
 0x294   : > { %2109 = vmatmul.mubr.bf16.gmra.mrb[56].mxu0 %v7862_v44  ;;  %2301 = vmatmul.mubr.bf16.gmra.mrb[56].mxu1 %v7863_v45 }
 0x295   : > { %2116 = vmatprep.mubr.bf16.mxu0 %v7864_v46  ;;  %2308 = vmatprep.mubr.bf16.mxu1 %v7866_v47 }
 0x29c   : > { %2117 = vmatmul.mubr.bf16.gmra.mrb[60].mxu0 %v7868_v48  ;;  %2309 = vmatmul.mubr.bf16.gmra.mrb[60].mxu1 %v7869_v49 }
 0x29d   : > { %2124 = vmatprep.mubr.bf16.mxu0 %v7870_v50  ;;  %2316 = vmatprep.mubr.bf16.mxu1 %v7872_v51  ;;  %v1264_v50 = vld [vmem:[#allocation2 + $0x20] sm:$0xff] }
 0x29e   : > { %v1312_v51 = vld [vmem:[#allocation2 + $0x1a0] sm:$0xff] }
 0x2a4   : > { %2125 = vmatmul.mubr.bf16.gmra.mrb[64].mxu0 %v7874_v52  ;;  %2317 = vmatmul.mubr.bf16.gmra.mrb[64].mxu1 %v7875_v53 }
 0x2a5   : > { %2132 = vmatprep.mubr.bf16.mxu0 %v7876_v54  ;;  %2324 = vmatprep.mubr.bf16.mxu1 %v7878_v55  ;;  %v1265_v54 = vld [vmem:[#allocation2 + $0x28] sm:$0xff] }
 0x2a6   : > { %v1313_v55 = vld [vmem:[#allocation2 + $0x1a8] sm:$0xff] }
 0x2ac   : > { %2133 = vmatmul.mubr.bf16.gmra.mrb[68].mxu0 %v7880_v56  ;;  %2325 = vmatmul.mubr.bf16.gmra.mrb[68].mxu1 %v7881_v57 }
 0x2ad   : > { %2140 = vmatprep.mubr.bf16.mxu0 %v7882_v58  ;;  %2332 = vmatprep.mubr.bf16.mxu1 %v7884_v59 }
 0x2b4   : > { %2141 = vmatmul.mubr.bf16.gmra.mrb[72].mxu0 %v7886_v60  ;;  %2333 = vmatmul.mubr.bf16.gmra.mrb[72].mxu1 %v7887_v61 }
 0x2b5   : > { %2148 = vmatprep.mubr.bf16.mxu0 %v7888_v62  ;;  %2340 = vmatprep.mubr.bf16.mxu1 %v7890_v63 }
 0x2bc   : > { %2149 = vmatmul.mubr.bf16.gmra.mrb[76].mxu0 %v7892_v0  ;;  %2341 = vmatmul.mubr.bf16.gmra.mrb[76].mxu1 %v7893_v1 }
 0x2bd   : > { %2156 = vmatprep.mubr.bf16.mxu0 %v7894_v2  ;;  %2348 = vmatprep.mubr.bf16.mxu1 %v7896_v3  ;;  %v1266_v2 = vld [vmem:[#allocation2 + $0x30] sm:$0xff] }
 0x2be   : > { %v1314_v3 = vld [vmem:[#allocation2 + $0x1b0] sm:$0xff] }
 0x2c4   : > { %2157 = vmatmul.mubr.bf16.gmra.mrb[80].mxu0 %v7898_v4  ;;  %2349 = vmatmul.mubr.bf16.gmra.mrb[80].mxu1 %v7899_v5 }
 0x2c5   : > { %2164 = vmatprep.mubr.bf16.mxu0 %v7900_v6  ;;  %2356 = vmatprep.mubr.bf16.mxu1 %v7902_v7  ;;  %v1267_v6 = vld [vmem:[#allocation2 + $0x38] sm:$0xff] }
 0x2c6   : > { %v1315_v7 = vld [vmem:[#allocation2 + $0x1b8] sm:$0xff] }
 0x2cc   : > { %2165 = vmatmul.mubr.bf16.gmra.mrb[84].mxu0 %v7904_v8  ;;  %2357 = vmatmul.mubr.bf16.gmra.mrb[84].mxu1 %v7905_v9 }
 0x2cd   : > { %2172 = vmatprep.mubr.bf16.mxu0 %v7906_v10  ;;  %2364 = vmatprep.mubr.bf16.mxu1 %v7908_v11 }
 0x2d4   : > { %2173 = vmatmul.mubr.bf16.gmra.mrb[88].mxu0 %v7910_v12  ;;  %2365 = vmatmul.mubr.bf16.gmra.mrb[88].mxu1 %v7911_v13 }
 0x2d5   : > { %2180 = vmatprep.mubr.bf16.mxu0 %v7912_v14  ;;  %2372 = vmatprep.mubr.bf16.mxu1 %v7914_v15 }
 0x2dc   : > { %2181 = vmatmul.mubr.bf16.gmra.mrb[92].mxu0 %v7916_v16  ;;  %2373 = vmatmul.mubr.bf16.gmra.mrb[92].mxu1 %v7917_v17 }
 0x2f7   : > { %v1998_v20 = vpop.f32.mrb[0].mxu0  ;;  %v2190_v21 = vpop.f32.mrb[0].mxu1 }
 0x2f8   : > { %v2381_v24 = vadd.f32 %v1998_v20, %v1260_v18  ;;  %v2429_v25 = vadd.f32 %v2190_v21, %v1308_v19  ;;  %v2000_v26 = vpop.f32.mrb[1].mxu0  ;;  %v2192_v27 = vpop.f32.mrb[1].mxu1  ;;  %v1268_v18 = vld [vmem:[#allocation2 + $0x40] sm:$0xff] }
 0x2f9   : > { %v2001_v28 = vpop.f32.mrb[2].mxu0  ;;  %v2193_v29 = vpop.f32.mrb[2].mxu1  ;;  %v1316_v19 = vld [vmem:[#allocation2 + $0x1c0] sm:$0xff] }
 0x2fa   : > { %2477 = vst [vmem:[#allocation2] sm:$0xff] %v2381_v24  ;;  %2525 = vst [vmem:[#allocation2 + $0x180] sm:$0xff] %v2429_v25  ;;  %v2382_v30 = vadd.f32 %v2001_v28, %v1261_v22  ;;  %v2430_v31 = vadd.f32 %v2193_v29, %v1309_v23  ;;  %v2003_v32 = vpop.f32.mrb[3].mxu0  ;;  %v2195_v33 = vpop.f32.mrb[3].mxu1  ;;  %v1269_v22 = vld [vmem:[#allocation2 + $0x48] sm:$0xff] }
 0x2fb   : > { %v1317_v23 = vld [vmem:[#allocation2 + $0x1c8] sm:$0xff] }
 0x2fc   : > { %2478 = vst [vmem:[#allocation2 + $0x8] sm:$0xff] %v2382_v30  ;;  %2526 = vst [vmem:[#allocation2 + $0x188] sm:$0xff] %v2430_v31 }
 0x2ff   : > { %v2006_v36 = vpop.f32.mrb[4].mxu0  ;;  %v2198_v37 = vpop.f32.mrb[4].mxu1 }
 0x300   : > { %v2383_v40 = vadd.f32 %v2006_v36, %v1262_v34  ;;  %v2431_v41 = vadd.f32 %v2198_v37, %v1310_v35  ;;  %v2008_v42 = vpop.f32.mrb[5].mxu0  ;;  %v2200_v43 = vpop.f32.mrb[5].mxu1  ;;  %v1270_v34 = vld [vmem:[#allocation2 + $0x50] sm:$0xff] }
 0x301   : > { %v2009_v44 = vpop.f32.mrb[6].mxu0  ;;  %v2201_v45 = vpop.f32.mrb[6].mxu1  ;;  %v1318_v35 = vld [vmem:[#allocation2 + $0x1d0] sm:$0xff] }
 0x302   : > { %2479 = vst [vmem:[#allocation2 + $0x10] sm:$0xff] %v2383_v40  ;;  %2527 = vst [vmem:[#allocation2 + $0x190] sm:$0xff] %v2431_v41  ;;  %v2384_v46 = vadd.f32 %v2009_v44, %v1263_v38  ;;  %v2432_v47 = vadd.f32 %v2201_v45, %v1311_v39  ;;  %v2011_v48 = vpop.f32.mrb[7].mxu0  ;;  %v2203_v49 = vpop.f32.mrb[7].mxu1  ;;  %v1271_v38 = vld [vmem:[#allocation2 + $0x58] sm:$0xff] }
 0x303   : > { %v1319_v39 = vld [vmem:[#allocation2 + $0x1d8] sm:$0xff] }
 0x304   : > { %2480 = vst [vmem:[#allocation2 + $0x18] sm:$0xff] %v2384_v46  ;;  %2528 = vst [vmem:[#allocation2 + $0x198] sm:$0xff] %v2432_v47 }
 0x307   : > { %v2014_v52 = vpop.f32.mrb[8].mxu0  ;;  %v2206_v53 = vpop.f32.mrb[8].mxu1 }
 0x308   : > { %v2385_v56 = vadd.f32 %v2014_v52, %v1264_v50  ;;  %v2433_v57 = vadd.f32 %v2206_v53, %v1312_v51  ;;  %v2016_v58 = vpop.f32.mrb[9].mxu0  ;;  %v2208_v59 = vpop.f32.mrb[9].mxu1  ;;  %v1272_v50 = vld [vmem:[#allocation2 + $0x60] sm:$0xff] }
 0x309   : > { %v2017_v60 = vpop.f32.mrb[10].mxu0  ;;  %v2209_v61 = vpop.f32.mrb[10].mxu1  ;;  %v1320_v51 = vld [vmem:[#allocation2 + $0x1e0] sm:$0xff] }
 0x30a   : > { %2481 = vst [vmem:[#allocation2 + $0x20] sm:$0xff] %v2385_v56  ;;  %2529 = vst [vmem:[#allocation2 + $0x1a0] sm:$0xff] %v2433_v57  ;;  %v2386_v62 = vadd.f32 %v2017_v60, %v1265_v54  ;;  %v2434_v63 = vadd.f32 %v2209_v61, %v1313_v55  ;;  %v2019_v0 = vpop.f32.mrb[11].mxu0  ;;  %v2211_v1 = vpop.f32.mrb[11].mxu1  ;;  %v1273_v54 = vld [vmem:[#allocation2 + $0x68] sm:$0xff] }
 0x30b   : > { %v1321_v55 = vld [vmem:[#allocation2 + $0x1e8] sm:$0xff] }
 0x30c   : > { %2482 = vst [vmem:[#allocation2 + $0x28] sm:$0xff] %v2386_v62  ;;  %2530 = vst [vmem:[#allocation2 + $0x1a8] sm:$0xff] %v2434_v63 }
 0x30f   : > { %v2022_v4 = vpop.f32.mrb[12].mxu0  ;;  %v2214_v5 = vpop.f32.mrb[12].mxu1 }
 0x310   : > { %v2387_v8 = vadd.f32 %v2022_v4, %v1266_v2  ;;  %v2435_v9 = vadd.f32 %v2214_v5, %v1314_v3  ;;  %v2024_v10 = vpop.f32.mrb[13].mxu0  ;;  %v2216_v11 = vpop.f32.mrb[13].mxu1  ;;  %v1274_v2 = vld [vmem:[#allocation2 + $0x70] sm:$0xff] }
 0x311   : > { %v2025_v12 = vpop.f32.mrb[14].mxu0  ;;  %v2217_v13 = vpop.f32.mrb[14].mxu1  ;;  %v1322_v3 = vld [vmem:[#allocation2 + $0x1f0] sm:$0xff] }
 0x312   : > { %2483 = vst [vmem:[#allocation2 + $0x30] sm:$0xff] %v2387_v8  ;;  %2531 = vst [vmem:[#allocation2 + $0x1b0] sm:$0xff] %v2435_v9  ;;  %v2388_v14 = vadd.f32 %v2025_v12, %v1267_v6  ;;  %v2436_v15 = vadd.f32 %v2217_v13, %v1315_v7  ;;  %v2027_v16 = vpop.f32.mrb[15].mxu0  ;;  %v2219_v17 = vpop.f32.mrb[15].mxu1  ;;  %v1275_v6 = vld [vmem:[#allocation2 + $0x78] sm:$0xff] }
 0x313   : > { %v1323_v7 = vld [vmem:[#allocation2 + $0x1f8] sm:$0xff] }
 0x314   : > { %2484 = vst [vmem:[#allocation2 + $0x38] sm:$0xff] %v2388_v14  ;;  %2532 = vst [vmem:[#allocation2 + $0x1b8] sm:$0xff] %v2436_v15 }
 0x317   : > { %v2030_v20 = vpop.f32.mrb[16].mxu0  ;;  %v2222_v21 = vpop.f32.mrb[16].mxu1 }
 0x318   : > { %v2389_v24 = vadd.f32 %v2030_v20, %v1268_v18  ;;  %v2437_v25 = vadd.f32 %v2222_v21, %v1316_v19  ;;  %v2032_v26 = vpop.f32.mrb[17].mxu0  ;;  %v2224_v27 = vpop.f32.mrb[17].mxu1  ;;  %v1276_v18 = vld [vmem:[#allocation2 + $0x80] sm:$0xff] }
 0x319   : > { %v2033_v28 = vpop.f32.mrb[18].mxu0  ;;  %v2225_v29 = vpop.f32.mrb[18].mxu1  ;;  %v1324_v19 = vld [vmem:[#allocation2 + $0x200] sm:$0xff] }
 0x31a   : > { %2485 = vst [vmem:[#allocation2 + $0x40] sm:$0xff] %v2389_v24  ;;  %2533 = vst [vmem:[#allocation2 + $0x1c0] sm:$0xff] %v2437_v25  ;;  %v2390_v30 = vadd.f32 %v2033_v28, %v1269_v22  ;;  %v2438_v31 = vadd.f32 %v2225_v29, %v1317_v23  ;;  %v2035_v32 = vpop.f32.mrb[19].mxu0  ;;  %v2227_v33 = vpop.f32.mrb[19].mxu1  ;;  %v1277_v22 = vld [vmem:[#allocation2 + $0x88] sm:$0xff] }
 0x31b   : > { %v1325_v23 = vld [vmem:[#allocation2 + $0x208] sm:$0xff] }
 0x31c   : > { %2486 = vst [vmem:[#allocation2 + $0x48] sm:$0xff] %v2390_v30  ;;  %2534 = vst [vmem:[#allocation2 + $0x1c8] sm:$0xff] %v2438_v31 }
 0x31f   : > { %v2038_v36 = vpop.f32.mrb[20].mxu0  ;;  %v2230_v37 = vpop.f32.mrb[20].mxu1 }
 0x320   : > { %v2391_v40 = vadd.f32 %v2038_v36, %v1270_v34  ;;  %v2439_v41 = vadd.f32 %v2230_v37, %v1318_v35  ;;  %v2040_v42 = vpop.f32.mrb[21].mxu0  ;;  %v2232_v43 = vpop.f32.mrb[21].mxu1  ;;  %v1278_v34 = vld [vmem:[#allocation2 + $0x90] sm:$0xff] }
 0x321   : > { %v2041_v44 = vpop.f32.mrb[22].mxu0  ;;  %v2233_v45 = vpop.f32.mrb[22].mxu1  ;;  %v1326_v35 = vld [vmem:[#allocation2 + $0x210] sm:$0xff] }
 0x322   : > { %2487 = vst [vmem:[#allocation2 + $0x50] sm:$0xff] %v2391_v40  ;;  %2535 = vst [vmem:[#allocation2 + $0x1d0] sm:$0xff] %v2439_v41  ;;  %v2392_v46 = vadd.f32 %v2041_v44, %v1271_v38  ;;  %v2440_v47 = vadd.f32 %v2233_v45, %v1319_v39  ;;  %v2043_v48 = vpop.f32.mrb[23].mxu0  ;;  %v2235_v49 = vpop.f32.mrb[23].mxu1  ;;  %v1279_v38 = vld [vmem:[#allocation2 + $0x98] sm:$0xff] }
 0x323   : > { %v1327_v39 = vld [vmem:[#allocation2 + $0x218] sm:$0xff] }
 0x324   : > { %2488 = vst [vmem:[#allocation2 + $0x58] sm:$0xff] %v2392_v46  ;;  %2536 = vst [vmem:[#allocation2 + $0x1d8] sm:$0xff] %v2440_v47 }
 0x327   : > { %v2046_v52 = vpop.f32.mrb[24].mxu0  ;;  %v2238_v53 = vpop.f32.mrb[24].mxu1 }
 0x328   : > { %v2393_v56 = vadd.f32 %v2046_v52, %v1272_v50  ;;  %v2441_v57 = vadd.f32 %v2238_v53, %v1320_v51  ;;  %v2048_v58 = vpop.f32.mrb[25].mxu0  ;;  %v2240_v59 = vpop.f32.mrb[25].mxu1  ;;  %v1280_v50 = vld [vmem:[#allocation2 + $0xa0] sm:$0xff] }
 0x329   : > { %v2049_v60 = vpop.f32.mrb[26].mxu0  ;;  %v2241_v61 = vpop.f32.mrb[26].mxu1  ;;  %v1328_v51 = vld [vmem:[#allocation2 + $0x220] sm:$0xff] }
 0x32a   : > { %2489 = vst [vmem:[#allocation2 + $0x60] sm:$0xff] %v2393_v56  ;;  %2537 = vst [vmem:[#allocation2 + $0x1e0] sm:$0xff] %v2441_v57  ;;  %v2394_v62 = vadd.f32 %v2049_v60, %v1273_v54  ;;  %v2442_v63 = vadd.f32 %v2241_v61, %v1321_v55  ;;  %v2051_v0 = vpop.f32.mrb[27].mxu0  ;;  %v2243_v1 = vpop.f32.mrb[27].mxu1  ;;  %v1281_v54 = vld [vmem:[#allocation2 + $0xa8] sm:$0xff] }
 0x32b   : > { %v1329_v55 = vld [vmem:[#allocation2 + $0x228] sm:$0xff] }
 0x32c   : > { %2490 = vst [vmem:[#allocation2 + $0x68] sm:$0xff] %v2394_v62  ;;  %2538 = vst [vmem:[#allocation2 + $0x1e8] sm:$0xff] %v2442_v63 }
 0x32f   : > { %v2054_v4 = vpop.f32.mrb[28].mxu0  ;;  %v2246_v5 = vpop.f32.mrb[28].mxu1 }
 0x330   : > { %v2395_v8 = vadd.f32 %v2054_v4, %v1274_v2  ;;  %v2443_v9 = vadd.f32 %v2246_v5, %v1322_v3  ;;  %v2056_v10 = vpop.f32.mrb[29].mxu0  ;;  %v2248_v11 = vpop.f32.mrb[29].mxu1  ;;  %v1282_v2 = vld [vmem:[#allocation2 + $0xb0] sm:$0xff] }
 0x331   : > { %v2057_v12 = vpop.f32.mrb[30].mxu0  ;;  %v2249_v13 = vpop.f32.mrb[30].mxu1  ;;  %v1330_v3 = vld [vmem:[#allocation2 + $0x230] sm:$0xff] }
 0x332   : > { %2491 = vst [vmem:[#allocation2 + $0x70] sm:$0xff] %v2395_v8  ;;  %2539 = vst [vmem:[#allocation2 + $0x1f0] sm:$0xff] %v2443_v9  ;;  %v2396_v14 = vadd.f32 %v2057_v12, %v1275_v6  ;;  %v2444_v15 = vadd.f32 %v2249_v13, %v1323_v7  ;;  %v2059_v16 = vpop.f32.mrb[31].mxu0  ;;  %v2251_v17 = vpop.f32.mrb[31].mxu1  ;;  %v1283_v6 = vld [vmem:[#allocation2 + $0xb8] sm:$0xff] }
 0x333   : > { %v1331_v7 = vld [vmem:[#allocation2 + $0x238] sm:$0xff] }
 0x334   : > { %2492 = vst [vmem:[#allocation2 + $0x78] sm:$0xff] %v2396_v14  ;;  %2540 = vst [vmem:[#allocation2 + $0x1f8] sm:$0xff] %v2444_v15 }
 0x337   : > { %v2062_v20 = vpop.f32.mrb[32].mxu0  ;;  %v2254_v21 = vpop.f32.mrb[32].mxu1 }
 0x338   : > { %v2397_v24 = vadd.f32 %v2062_v20, %v1276_v18  ;;  %v2445_v25 = vadd.f32 %v2254_v21, %v1324_v19  ;;  %v2064_v26 = vpop.f32.mrb[33].mxu0  ;;  %v2256_v27 = vpop.f32.mrb[33].mxu1  ;;  %v1284_v18 = vld [vmem:[#allocation2 + $0xc0] sm:$0xff] }
 0x339   : > { %v2065_v28 = vpop.f32.mrb[34].mxu0  ;;  %v2257_v29 = vpop.f32.mrb[34].mxu1  ;;  %v1332_v19 = vld [vmem:[#allocation2 + $0x240] sm:$0xff] }
 0x33a   : > { %2493 = vst [vmem:[#allocation2 + $0x80] sm:$0xff] %v2397_v24  ;;  %2541 = vst [vmem:[#allocation2 + $0x200] sm:$0xff] %v2445_v25  ;;  %v2398_v30 = vadd.f32 %v2065_v28, %v1277_v22  ;;  %v2446_v31 = vadd.f32 %v2257_v29, %v1325_v23  ;;  %v2067_v32 = vpop.f32.mrb[35].mxu0  ;;  %v2259_v33 = vpop.f32.mrb[35].mxu1  ;;  %v1285_v22 = vld [vmem:[#allocation2 + $0xc8] sm:$0xff] }
 0x33b   : > { %v1333_v23 = vld [vmem:[#allocation2 + $0x248] sm:$0xff] }
 0x33c   : > { %2494 = vst [vmem:[#allocation2 + $0x88] sm:$0xff] %v2398_v30  ;;  %2542 = vst [vmem:[#allocation2 + $0x208] sm:$0xff] %v2446_v31 }
 0x33f   : > { %v2070_v36 = vpop.f32.mrb[36].mxu0  ;;  %v2262_v37 = vpop.f32.mrb[36].mxu1 }
 0x340   : > { %v2399_v40 = vadd.f32 %v2070_v36, %v1278_v34  ;;  %v2447_v41 = vadd.f32 %v2262_v37, %v1326_v35  ;;  %v2072_v42 = vpop.f32.mrb[37].mxu0  ;;  %v2264_v43 = vpop.f32.mrb[37].mxu1  ;;  %v1286_v34 = vld [vmem:[#allocation2 + $0xd0] sm:$0xff] }
 0x341   : > { %v2073_v44 = vpop.f32.mrb[38].mxu0  ;;  %v2265_v45 = vpop.f32.mrb[38].mxu1  ;;  %v1334_v35 = vld [vmem:[#allocation2 + $0x250] sm:$0xff] }
 0x342   : > { %2495 = vst [vmem:[#allocation2 + $0x90] sm:$0xff] %v2399_v40  ;;  %2543 = vst [vmem:[#allocation2 + $0x210] sm:$0xff] %v2447_v41  ;;  %v2400_v46 = vadd.f32 %v2073_v44, %v1279_v38  ;;  %v2448_v47 = vadd.f32 %v2265_v45, %v1327_v39  ;;  %v2075_v48 = vpop.f32.mrb[39].mxu0  ;;  %v2267_v49 = vpop.f32.mrb[39].mxu1  ;;  %v1287_v38 = vld [vmem:[#allocation2 + $0xd8] sm:$0xff] }
 0x343   : > { %v1335_v39 = vld [vmem:[#allocation2 + $0x258] sm:$0xff] }
 0x344   : > { %2496 = vst [vmem:[#allocation2 + $0x98] sm:$0xff] %v2400_v46  ;;  %2544 = vst [vmem:[#allocation2 + $0x218] sm:$0xff] %v2448_v47 }
 0x347   : > { %v2078_v52 = vpop.f32.mrb[40].mxu0  ;;  %v2270_v53 = vpop.f32.mrb[40].mxu1 }
 0x348   : > { %v2401_v56 = vadd.f32 %v2078_v52, %v1280_v50  ;;  %v2449_v57 = vadd.f32 %v2270_v53, %v1328_v51  ;;  %v2080_v58 = vpop.f32.mrb[41].mxu0  ;;  %v2272_v59 = vpop.f32.mrb[41].mxu1  ;;  %v1288_v50 = vld [vmem:[#allocation2 + $0xe0] sm:$0xff] }
 0x349   : > { %v2081_v60 = vpop.f32.mrb[42].mxu0  ;;  %v2273_v61 = vpop.f32.mrb[42].mxu1  ;;  %v1336_v51 = vld [vmem:[#allocation2 + $0x260] sm:$0xff] }
 0x34a   : > { %2497 = vst [vmem:[#allocation2 + $0xa0] sm:$0xff] %v2401_v56  ;;  %2545 = vst [vmem:[#allocation2 + $0x220] sm:$0xff] %v2449_v57  ;;  %v2402_v62 = vadd.f32 %v2081_v60, %v1281_v54  ;;  %v2450_v63 = vadd.f32 %v2273_v61, %v1329_v55  ;;  %v2083_v0 = vpop.f32.mrb[43].mxu0  ;;  %v2275_v1 = vpop.f32.mrb[43].mxu1  ;;  %v1289_v54 = vld [vmem:[#allocation2 + $0xe8] sm:$0xff] }
 0x34b   : > { %v1337_v55 = vld [vmem:[#allocation2 + $0x268] sm:$0xff] }
 0x34c   : > { %2498 = vst [vmem:[#allocation2 + $0xa8] sm:$0xff] %v2402_v62  ;;  %2546 = vst [vmem:[#allocation2 + $0x228] sm:$0xff] %v2450_v63 }
 0x34f   : > { %v2086_v4 = vpop.f32.mrb[44].mxu0  ;;  %v2278_v5 = vpop.f32.mrb[44].mxu1 }
 0x350   : > { %v2403_v8 = vadd.f32 %v2086_v4, %v1282_v2  ;;  %v2451_v9 = vadd.f32 %v2278_v5, %v1330_v3  ;;  %v2088_v10 = vpop.f32.mrb[45].mxu0  ;;  %v2280_v11 = vpop.f32.mrb[45].mxu1  ;;  %v1290_v2 = vld [vmem:[#allocation2 + $0xf0] sm:$0xff] }
 0x351   : > { %v2089_v12 = vpop.f32.mrb[46].mxu0  ;;  %v2281_v13 = vpop.f32.mrb[46].mxu1  ;;  %v1338_v3 = vld [vmem:[#allocation2 + $0x270] sm:$0xff] }
 0x352   : > { %2499 = vst [vmem:[#allocation2 + $0xb0] sm:$0xff] %v2403_v8  ;;  %2547 = vst [vmem:[#allocation2 + $0x230] sm:$0xff] %v2451_v9  ;;  %v2404_v14 = vadd.f32 %v2089_v12, %v1283_v6  ;;  %v2452_v15 = vadd.f32 %v2281_v13, %v1331_v7  ;;  %v2091_v16 = vpop.f32.mrb[47].mxu0  ;;  %v2283_v17 = vpop.f32.mrb[47].mxu1  ;;  %v1291_v6 = vld [vmem:[#allocation2 + $0xf8] sm:$0xff] }
 0x353   : > { %v1339_v7 = vld [vmem:[#allocation2 + $0x278] sm:$0xff] }
 0x354   : > { %2500 = vst [vmem:[#allocation2 + $0xb8] sm:$0xff] %v2404_v14  ;;  %2548 = vst [vmem:[#allocation2 + $0x238] sm:$0xff] %v2452_v15 }
 0x357   : > { %v2094_v20 = vpop.f32.mrb[48].mxu0  ;;  %v2286_v21 = vpop.f32.mrb[48].mxu1 }
 0x358   : > { %v2405_v24 = vadd.f32 %v2094_v20, %v1284_v18  ;;  %v2453_v25 = vadd.f32 %v2286_v21, %v1332_v19  ;;  %v2096_v26 = vpop.f32.mrb[49].mxu0  ;;  %v2288_v27 = vpop.f32.mrb[49].mxu1  ;;  %v1292_v18 = vld [vmem:[#allocation2 + $0x100] sm:$0xff] }
 0x359   : > { %v2097_v28 = vpop.f32.mrb[50].mxu0  ;;  %v2289_v29 = vpop.f32.mrb[50].mxu1  ;;  %v1340_v19 = vld [vmem:[#allocation2 + $0x280] sm:$0xff] }
 0x35a   : > { %2501 = vst [vmem:[#allocation2 + $0xc0] sm:$0xff] %v2405_v24  ;;  %2549 = vst [vmem:[#allocation2 + $0x240] sm:$0xff] %v2453_v25  ;;  %v2406_v30 = vadd.f32 %v2097_v28, %v1285_v22  ;;  %v2454_v31 = vadd.f32 %v2289_v29, %v1333_v23  ;;  %v2099_v32 = vpop.f32.mrb[51].mxu0  ;;  %v2291_v33 = vpop.f32.mrb[51].mxu1  ;;  %v1293_v22 = vld [vmem:[#allocation2 + $0x108] sm:$0xff] }
 0x35b   : > { %v1341_v23 = vld [vmem:[#allocation2 + $0x288] sm:$0xff] }
 0x35c   : > { %2502 = vst [vmem:[#allocation2 + $0xc8] sm:$0xff] %v2406_v30  ;;  %2550 = vst [vmem:[#allocation2 + $0x248] sm:$0xff] %v2454_v31 }
 0x35f   : > { %v2102_v36 = vpop.f32.mrb[52].mxu0  ;;  %v2294_v37 = vpop.f32.mrb[52].mxu1 }
 0x360   : > { %v2407_v40 = vadd.f32 %v2102_v36, %v1286_v34  ;;  %v2455_v41 = vadd.f32 %v2294_v37, %v1334_v35  ;;  %v2104_v42 = vpop.f32.mrb[53].mxu0  ;;  %v2296_v43 = vpop.f32.mrb[53].mxu1  ;;  %v1294_v34 = vld [vmem:[#allocation2 + $0x110] sm:$0xff] }
 0x361   : > { %v2105_v44 = vpop.f32.mrb[54].mxu0  ;;  %v2297_v45 = vpop.f32.mrb[54].mxu1  ;;  %v1342_v35 = vld [vmem:[#allocation2 + $0x290] sm:$0xff] }
 0x362   : > { %2503 = vst [vmem:[#allocation2 + $0xd0] sm:$0xff] %v2407_v40  ;;  %2551 = vst [vmem:[#allocation2 + $0x250] sm:$0xff] %v2455_v41  ;;  %v2408_v46 = vadd.f32 %v2105_v44, %v1287_v38  ;;  %v2456_v47 = vadd.f32 %v2297_v45, %v1335_v39  ;;  %v2107_v48 = vpop.f32.mrb[55].mxu0  ;;  %v2299_v49 = vpop.f32.mrb[55].mxu1  ;;  %v1295_v38 = vld [vmem:[#allocation2 + $0x118] sm:$0xff] }
 0x363   : > { %v1343_v39 = vld [vmem:[#allocation2 + $0x298] sm:$0xff] }
 0x364   : > { %2504 = vst [vmem:[#allocation2 + $0xd8] sm:$0xff] %v2408_v46  ;;  %2552 = vst [vmem:[#allocation2 + $0x258] sm:$0xff] %v2456_v47 }
 0x367   : > { %v2110_v52 = vpop.f32.mrb[56].mxu0  ;;  %v2302_v53 = vpop.f32.mrb[56].mxu1 }
 0x368   : > { %v2409_v56 = vadd.f32 %v2110_v52, %v1288_v50  ;;  %v2457_v57 = vadd.f32 %v2302_v53, %v1336_v51  ;;  %v2112_v58 = vpop.f32.mrb[57].mxu0  ;;  %v2304_v59 = vpop.f32.mrb[57].mxu1  ;;  %v1296_v50 = vld [vmem:[#allocation2 + $0x120] sm:$0xff] }
 0x369   : > { %v2113_v60 = vpop.f32.mrb[58].mxu0  ;;  %v2305_v61 = vpop.f32.mrb[58].mxu1  ;;  %v1344_v51 = vld [vmem:[#allocation2 + $0x2a0] sm:$0xff] }
 0x36a   : > { %2505 = vst [vmem:[#allocation2 + $0xe0] sm:$0xff] %v2409_v56  ;;  %2553 = vst [vmem:[#allocation2 + $0x260] sm:$0xff] %v2457_v57  ;;  %v2410_v62 = vadd.f32 %v2113_v60, %v1289_v54  ;;  %v2458_v63 = vadd.f32 %v2305_v61, %v1337_v55  ;;  %v2115_v0 = vpop.f32.mrb[59].mxu0  ;;  %v2307_v1 = vpop.f32.mrb[59].mxu1  ;;  %v1297_v54 = vld [vmem:[#allocation2 + $0x128] sm:$0xff] }
 0x36b   : > { %v1345_v55 = vld [vmem:[#allocation2 + $0x2a8] sm:$0xff] }
 0x36c   : > { %2506 = vst [vmem:[#allocation2 + $0xe8] sm:$0xff] %v2410_v62  ;;  %2554 = vst [vmem:[#allocation2 + $0x268] sm:$0xff] %v2458_v63 }
 0x36f   : > { %v2118_v4 = vpop.f32.mrb[60].mxu0  ;;  %v2310_v5 = vpop.f32.mrb[60].mxu1 }
 0x370   : > { %v2411_v8 = vadd.f32 %v2118_v4, %v1290_v2  ;;  %v2459_v9 = vadd.f32 %v2310_v5, %v1338_v3  ;;  %v2120_v10 = vpop.f32.mrb[61].mxu0  ;;  %v2312_v11 = vpop.f32.mrb[61].mxu1  ;;  %v1298_v2 = vld [vmem:[#allocation2 + $0x130] sm:$0xff] }
 0x371   : > { %v2121_v12 = vpop.f32.mrb[62].mxu0  ;;  %v2313_v13 = vpop.f32.mrb[62].mxu1  ;;  %v1346_v3 = vld [vmem:[#allocation2 + $0x2b0] sm:$0xff] }
 0x372   : > { %2507 = vst [vmem:[#allocation2 + $0xf0] sm:$0xff] %v2411_v8  ;;  %2555 = vst [vmem:[#allocation2 + $0x270] sm:$0xff] %v2459_v9  ;;  %v2412_v14 = vadd.f32 %v2121_v12, %v1291_v6  ;;  %v2460_v15 = vadd.f32 %v2313_v13, %v1339_v7  ;;  %v2123_v16 = vpop.f32.mrb[63].mxu0  ;;  %v2315_v17 = vpop.f32.mrb[63].mxu1  ;;  %v1299_v6 = vld [vmem:[#allocation2 + $0x138] sm:$0xff] }
 0x373   : > { %v1347_v7 = vld [vmem:[#allocation2 + $0x2b8] sm:$0xff] }
 0x374   : > { %2508 = vst [vmem:[#allocation2 + $0xf8] sm:$0xff] %v2412_v14  ;;  %2556 = vst [vmem:[#allocation2 + $0x278] sm:$0xff] %v2460_v15 }
 0x377   : > { %v2126_v20 = vpop.f32.mrb[64].mxu0  ;;  %v2318_v21 = vpop.f32.mrb[64].mxu1 }
 0x378   : > { %v2413_v24 = vadd.f32 %v2126_v20, %v1292_v18  ;;  %v2461_v25 = vadd.f32 %v2318_v21, %v1340_v19  ;;  %v2128_v26 = vpop.f32.mrb[65].mxu0  ;;  %v2320_v27 = vpop.f32.mrb[65].mxu1  ;;  %v1300_v18 = vld [vmem:[#allocation2 + $0x140] sm:$0xff] }
 0x379   : > { %v2129_v28 = vpop.f32.mrb[66].mxu0  ;;  %v2321_v29 = vpop.f32.mrb[66].mxu1  ;;  %v1348_v19 = vld [vmem:[#allocation2 + $0x2c0] sm:$0xff] }
 0x37a   : > { %2509 = vst [vmem:[#allocation2 + $0x100] sm:$0xff] %v2413_v24  ;;  %2557 = vst [vmem:[#allocation2 + $0x280] sm:$0xff] %v2461_v25  ;;  %v2414_v30 = vadd.f32 %v2129_v28, %v1293_v22  ;;  %v2462_v31 = vadd.f32 %v2321_v29, %v1341_v23  ;;  %v2131_v32 = vpop.f32.mrb[67].mxu0  ;;  %v2323_v33 = vpop.f32.mrb[67].mxu1  ;;  %v1301_v22 = vld [vmem:[#allocation2 + $0x148] sm:$0xff] }
 0x37b   : > { %v1349_v23 = vld [vmem:[#allocation2 + $0x2c8] sm:$0xff] }
 0x37c   : > { %2510 = vst [vmem:[#allocation2 + $0x108] sm:$0xff] %v2414_v30  ;;  %2558 = vst [vmem:[#allocation2 + $0x288] sm:$0xff] %v2462_v31 }
 0x37f   : > { %v2134_v36 = vpop.f32.mrb[68].mxu0  ;;  %v2326_v37 = vpop.f32.mrb[68].mxu1 }
 0x380   : > { %v2415_v40 = vadd.f32 %v2134_v36, %v1294_v34  ;;  %v2463_v41 = vadd.f32 %v2326_v37, %v1342_v35  ;;  %v2136_v42 = vpop.f32.mrb[69].mxu0  ;;  %v2328_v43 = vpop.f32.mrb[69].mxu1  ;;  %v1302_v34 = vld [vmem:[#allocation2 + $0x150] sm:$0xff] }
 0x381   : > { %v2137_v44 = vpop.f32.mrb[70].mxu0  ;;  %v2329_v45 = vpop.f32.mrb[70].mxu1  ;;  %v1350_v35 = vld [vmem:[#allocation2 + $0x2d0] sm:$0xff] }
 0x382   : > { %2511 = vst [vmem:[#allocation2 + $0x110] sm:$0xff] %v2415_v40  ;;  %2559 = vst [vmem:[#allocation2 + $0x290] sm:$0xff] %v2463_v41  ;;  %v2416_v46 = vadd.f32 %v2137_v44, %v1295_v38  ;;  %v2464_v47 = vadd.f32 %v2329_v45, %v1343_v39  ;;  %v2139_v48 = vpop.f32.mrb[71].mxu0  ;;  %v2331_v49 = vpop.f32.mrb[71].mxu1  ;;  %v1303_v38 = vld [vmem:[#allocation2 + $0x158] sm:$0xff] }
 0x383   : > { %v1351_v39 = vld [vmem:[#allocation2 + $0x2d8] sm:$0xff] }
 0x384   : > { %2512 = vst [vmem:[#allocation2 + $0x118] sm:$0xff] %v2416_v46  ;;  %2560 = vst [vmem:[#allocation2 + $0x298] sm:$0xff] %v2464_v47 }
 0x387   : > { %v2142_v52 = vpop.f32.mrb[72].mxu0  ;;  %v2334_v53 = vpop.f32.mrb[72].mxu1 }
 0x388   : > { %v2417_v56 = vadd.f32 %v2142_v52, %v1296_v50  ;;  %v2465_v57 = vadd.f32 %v2334_v53, %v1344_v51  ;;  %v2144_v58 = vpop.f32.mrb[73].mxu0  ;;  %v2336_v59 = vpop.f32.mrb[73].mxu1  ;;  %v1304_v50 = vld [vmem:[#allocation2 + $0x160] sm:$0xff] }
 0x389   : > { %v2145_v60 = vpop.f32.mrb[74].mxu0  ;;  %v2337_v61 = vpop.f32.mrb[74].mxu1  ;;  %v1352_v51 = vld [vmem:[#allocation2 + $0x2e0] sm:$0xff] }
 0x38a   : > { %2513 = vst [vmem:[#allocation2 + $0x120] sm:$0xff] %v2417_v56  ;;  %2561 = vst [vmem:[#allocation2 + $0x2a0] sm:$0xff] %v2465_v57  ;;  %v2418_v62 = vadd.f32 %v2145_v60, %v1297_v54  ;;  %v2466_v63 = vadd.f32 %v2337_v61, %v1345_v55  ;;  %v2147_v0 = vpop.f32.mrb[75].mxu0  ;;  %v2339_v1 = vpop.f32.mrb[75].mxu1  ;;  %v1305_v54 = vld [vmem:[#allocation2 + $0x168] sm:$0xff] }
 0x38b   : > { %v1353_v55 = vld [vmem:[#allocation2 + $0x2e8] sm:$0xff] }
 0x38c   : > { %2514 = vst [vmem:[#allocation2 + $0x128] sm:$0xff] %v2418_v62  ;;  %2562 = vst [vmem:[#allocation2 + $0x2a8] sm:$0xff] %v2466_v63 }
 0x38f   : > { %v2150_v4 = vpop.f32.mrb[76].mxu0  ;;  %v2342_v5 = vpop.f32.mrb[76].mxu1 }
 0x390   : > { %v2419_v8 = vadd.f32 %v2150_v4, %v1298_v2  ;;  %v2467_v9 = vadd.f32 %v2342_v5, %v1346_v3  ;;  %v2152_v10 = vpop.f32.mrb[77].mxu0  ;;  %v2344_v11 = vpop.f32.mrb[77].mxu1  ;;  %v1306_v2 = vld [vmem:[#allocation2 + $0x170] sm:$0xff] }
 0x391   : > { %v2153_v12 = vpop.f32.mrb[78].mxu0  ;;  %v2345_v13 = vpop.f32.mrb[78].mxu1  ;;  %v1354_v3 = vld [vmem:[#allocation2 + $0x2f0] sm:$0xff] }
 0x392   : > { %2515 = vst [vmem:[#allocation2 + $0x130] sm:$0xff] %v2419_v8  ;;  %2563 = vst [vmem:[#allocation2 + $0x2b0] sm:$0xff] %v2467_v9  ;;  %v2420_v14 = vadd.f32 %v2153_v12, %v1299_v6  ;;  %v2468_v15 = vadd.f32 %v2345_v13, %v1347_v7  ;;  %v2155_v16 = vpop.f32.mrb[79].mxu0  ;;  %v2347_v17 = vpop.f32.mrb[79].mxu1  ;;  %v1307_v6 = vld [vmem:[#allocation2 + $0x178] sm:$0xff] }
 0x393   : > { %v1355_v7 = vld [vmem:[#allocation2 + $0x2f8] sm:$0xff] }
 0x394   : > { %2516 = vst [vmem:[#allocation2 + $0x138] sm:$0xff] %v2420_v14  ;;  %2564 = vst [vmem:[#allocation2 + $0x2b8] sm:$0xff] %v2468_v15 }
 0x397   : > { %v2158_v20 = vpop.f32.mrb[80].mxu0  ;;  %v2350_v21 = vpop.f32.mrb[80].mxu1 }
 0x398   : > { %v2421_v24 = vadd.f32 %v2158_v20, %v1300_v18  ;;  %v2469_v25 = vadd.f32 %v2350_v21, %v1348_v19  ;;  %v2160_v26 = vpop.f32.mrb[81].mxu0  ;;  %v2352_v27 = vpop.f32.mrb[81].mxu1 }
 0x399   : > { %v2161_v28 = vpop.f32.mrb[82].mxu0  ;;  %v2353_v29 = vpop.f32.mrb[82].mxu1 }
 0x39a   : > { %2517 = vst [vmem:[#allocation2 + $0x140] sm:$0xff] %v2421_v24  ;;  %2565 = vst [vmem:[#allocation2 + $0x2c0] sm:$0xff] %v2469_v25  ;;  %v2422_v30 = vadd.f32 %v2161_v28, %v1301_v22  ;;  %v2470_v31 = vadd.f32 %v2353_v29, %v1349_v23  ;;  %v2163_v32 = vpop.f32.mrb[83].mxu0  ;;  %v2355_v33 = vpop.f32.mrb[83].mxu1 }
 0x39c   : > { %2518 = vst [vmem:[#allocation2 + $0x148] sm:$0xff] %v2422_v30  ;;  %2566 = vst [vmem:[#allocation2 + $0x2c8] sm:$0xff] %v2470_v31 }
 0x39f   : > { %v2166_v36 = vpop.f32.mrb[84].mxu0  ;;  %v2358_v37 = vpop.f32.mrb[84].mxu1 }
 0x3a0   : > { %v2423_v40 = vadd.f32 %v2166_v36, %v1302_v34  ;;  %v2471_v41 = vadd.f32 %v2358_v37, %v1350_v35  ;;  %v2168_v42 = vpop.f32.mrb[85].mxu0  ;;  %v2360_v43 = vpop.f32.mrb[85].mxu1 }
 0x3a1   : > { %v2169_v44 = vpop.f32.mrb[86].mxu0  ;;  %v2361_v45 = vpop.f32.mrb[86].mxu1 }
 0x3a2   : > { %2519 = vst [vmem:[#allocation2 + $0x150] sm:$0xff] %v2423_v40  ;;  %2567 = vst [vmem:[#allocation2 + $0x2d0] sm:$0xff] %v2471_v41  ;;  %v2424_v46 = vadd.f32 %v2169_v44, %v1303_v38  ;;  %v2472_v47 = vadd.f32 %v2361_v45, %v1351_v39  ;;  %v2171_v48 = vpop.f32.mrb[87].mxu0  ;;  %v2363_v49 = vpop.f32.mrb[87].mxu1 }
 0x3a4   : > { %2520 = vst [vmem:[#allocation2 + $0x158] sm:$0xff] %v2424_v46  ;;  %2568 = vst [vmem:[#allocation2 + $0x2d8] sm:$0xff] %v2472_v47 }
 0x3a7   : > { %v2174_v52 = vpop.f32.mrb[88].mxu0  ;;  %v2366_v53 = vpop.f32.mrb[88].mxu1 }
 0x3a8   : > { %v2425_v56 = vadd.f32 %v2174_v52, %v1304_v50  ;;  %v2473_v57 = vadd.f32 %v2366_v53, %v1352_v51  ;;  %v2176_v58 = vpop.f32.mrb[89].mxu0  ;;  %v2368_v59 = vpop.f32.mrb[89].mxu1 }
 0x3a9   : > { %v2177_v60 = vpop.f32.mrb[90].mxu0  ;;  %v2369_v61 = vpop.f32.mrb[90].mxu1 }
 0x3aa   : > { %2521 = vst [vmem:[#allocation2 + $0x160] sm:$0xff] %v2425_v56  ;;  %2569 = vst [vmem:[#allocation2 + $0x2e0] sm:$0xff] %v2473_v57  ;;  %v2426_v62 = vadd.f32 %v2177_v60, %v1305_v54  ;;  %v2474_v63 = vadd.f32 %v2369_v61, %v1353_v55  ;;  %v2179_v0 = vpop.f32.mrb[91].mxu0  ;;  %v2371_v1 = vpop.f32.mrb[91].mxu1 }
 0x3ac   : > { %2522 = vst [vmem:[#allocation2 + $0x168] sm:$0xff] %v2426_v62  ;;  %2570 = vst [vmem:[#allocation2 + $0x2e8] sm:$0xff] %v2474_v63 }
 0x3ae   : > { %2576 = sbr.rel (%p6783_p5) target bundleno = 2062 (0x80e), region = 150 }
 0x3af   : > { %v2182_v4 = vpop.f32.mrb[92].mxu0  ;;  %v2374_v5 = vpop.f32.mrb[92].mxu1 }
 0x3b0   : > { %v2427_v8 = vadd.f32 %v2182_v4, %v1306_v2  ;;  %v2475_v9 = vadd.f32 %v2374_v5, %v1354_v3  ;;  %v2184_v10 = vpop.f32.mrb[93].mxu0  ;;  %v2376_v11 = vpop.f32.mrb[93].mxu1 }
 0x3b1   : > { %v2185_v12 = vpop.f32.mrb[94].mxu0  ;;  %v2377_v13 = vpop.f32.mrb[94].mxu1 }
 0x3b2   : > { %2523 = vst [vmem:[#allocation2 + $0x170] sm:$0xff] %v2427_v8  ;;  %2571 = vst [vmem:[#allocation2 + $0x2f0] sm:$0xff] %v2475_v9  ;;  %v2428_v14 = vadd.f32 %v2185_v12, %v1307_v6  ;;  %v2476_v15 = vadd.f32 %v2377_v13, %v1355_v7  ;;  %v2187_v16 = vpop.f32.mrb[95].mxu0  ;;  %v2379_v17 = vpop.f32.mrb[95].mxu1 }
 0x3b4   : > { %2524 = vst [vmem:[#allocation2 + $0x178] sm:$0xff] %v2428_v14  ;;  %2572 = vst [vmem:[#allocation2 + $0x2f8] sm:$0xff] %v2476_v15 }
 0x3b5   : > { %v2843_v18 = vld [vmem:[%s9413_s12 + $0x10] sm:$0xff]  ;;  %v2841_v19 = vld [vmem:[%s9413_s12] sm:$0xff]  ;;  %v8696_v20 = vmov 0   ;;  %v2844_v21 = vld [vmem:[%s9413_s12 + $0x18] sm:$0xff] }
 0x3b6   : > { %7919 = vset.pattern.permute.xlu1 %v8696_v20  ;;  %7918 = vset.pattern.permute.xlu0 %v8696_v20  ;;  %v2842_v22 = vld [vmem:[%s9413_s12 + $0x8] sm:$0xff]  ;;  %v2845_v24 = vld [vmem:[%s9413_s12 + $0x20] sm:$0xff]  ;;  %v2848_v27 = vld [vmem:[%s9413_s12 + $0x38] sm:$0xff] }
 0x3b7   : > { %2949 = vperm.xlu1 %7919, %v2843_v18   ;;  %2939 = vperm.xlu0 %7918, %v2841_v19   ;;  %v2846_v23 = vld [vmem:[%s9413_s12 + $0x28] sm:$0xff]  ;;  %v2847_v28 = vld [vmem:[%s9413_s12 + $0x30] sm:$0xff]  ;;  %v2849_v31 = vld [vmem:[%s9413_s12 + $0x40] sm:$0xff] }
 0x3b8   : > { %v7920_v25 = vld [vmem:[#allocation12] sm:$0xff]   ;;  %v7921_v26 = vld [vmem:[#allocation12 + $0x8] sm:$0xff]   ;;  %v7922_v29 = vld [vmem:[#allocation12 + $0x10] sm:$0xff]  }
 0x3b9   : > { %7052 = vmatprep.subr.bf16.mxu0 %v7920_v25  ;;  %v2850_v30 = vld [vmem:[%s9413_s12 + $0x48] sm:$0xff]  ;;  %v7923_v32 = vld [vmem:[#allocation12 + $0x18] sm:$0xff]   ;;  %v2851_v34 = vld [vmem:[%s9413_s12 + $0x50] sm:$0xff] }
 0x3ba   : > { %7053 = vmatpush3.bf16.msra.mxu0 %v7920_v25  ;;  %v2852_v33 = vld [vmem:[%s9413_s12 + $0x58] sm:$0xff]  ;;  %v7924_v35 = vld [vmem:[#allocation12 + $0x20] sm:$0xff]   ;;  %v7925_v42 = vld [vmem:[#allocation12 + $0x28] sm:$0xff]  }
 0x3bb   : > { %2954 = vperm.xlu1 %7919, %v2844_v21   ;;  %2944 = vperm.xlu0 %7918, %v2842_v22   ;;  %v2577_v36 = vld [vmem:[%s9406_s13] sm:$0xff]  ;;  %v2578_v37 = vld [vmem:[%s9406_s13 + $0x8] sm:$0xff]  ;;  %v2856_v44 = vld [vmem:[%s9413_s12 + $0x78] sm:$0xff] }
 0x3bc   : > { %7054 = vmatprep.subr.bf16.mxu0 %v7921_v26  ;;  %v3561_v38 = vpack.c.bf16 %v2578_v37, %v2577_v36  ;;  %v7928_v39 = vld [vmem:[#allocation13] sm:$0xff]   ;;  %v9691_v43 = vld [vmem:[#allocation13 + $0x8] sm:$0xff]   ;;  %v7926_v46 = vld [vmem:[#allocation12 + $0x30] sm:$0xff]  }
 0x3bd   : > { %v2854_v40 = vld [vmem:[%s9413_s12 + $0x68] sm:$0xff]  ;;  %v2853_v41 = vld [vmem:[%s9413_s12 + $0x60] sm:$0xff]  ;;  %7516 = vmatprep.subr.bf16.mxu1 %v7928_v39  ;;  %v2855_v45 = vld [vmem:[%s9413_s12 + $0x70] sm:$0xff] }
 0x3be   : > { %7055 = vmatpush3.bf16.msra.mxu0 %v7921_v26  ;;  %7068 = vmatprep.mubr.bf16.mxu0 %v3561_v38  ;;  %v9697_v47 = vld [vmem:[#allocation13 + $0x10] sm:$0xff]   ;;  %v2858_v48 = vld [vmem:[%s9413_s12 + $0x88] sm:$0xff]  ;;  %v2857_v49 = vld [vmem:[%s9413_s12 + $0x80] sm:$0xff] }
 0x3bf   : > { %2964 = vperm.xlu1 %7919, %v2846_v23   ;;  %2959 = vperm.xlu0 %7918, %v2845_v24   ;;  %v7927_v50 = vld [vmem:[#allocation12 + $0x38] sm:$0xff]   ;;  %v2859_v53 = vld [vmem:[%s9413_s12 + $0x90] sm:$0xff]  ;;  %v2582_v57 = vld [vmem:[%s9406_s13 + $0x28] sm:$0xff] }
 0x3c0   : > { %7056 = vmatprep.subr.bf16.mxu0 %v7922_v29  ;;  %7524 = vmatpush3.bf16.msra.mxu1 %v7928_v39  ;;  %v9702_v51 = vld [vmem:[#allocation13 + $0x18] sm:$0xff]   ;;  %v2579_v54 = vld [vmem:[%s9406_s13 + $0x10] sm:$0xff]  ;;  %v9712_v58 = vld [vmem:[#allocation13 + $0x20] sm:$0xff]  }
 0x3c1   : > { %7517 = vmatprep.subr.bf16.mxu1 %v9691_v43  ;;  %v2860_v52 = vld [vmem:[%s9413_s12 + $0x98] sm:$0xff]  ;;  %v2581_v56 = vld [vmem:[%s9406_s13 + $0x20] sm:$0xff]  ;;  %v2862_v59 = vld [vmem:[%s9413_s12 + $0xa8] sm:$0xff] }
 0x3c2   : > { %7057 = vmatpush3.bf16.msra.mxu0 %v7922_v29  ;;  %v2580_v55 = vld [vmem:[%s9406_s13 + $0x18] sm:$0xff]  ;;  %v2861_v60 = vld [vmem:[%s9413_s12 + $0xa0] sm:$0xff]  ;;  %v3563_v62 = vpack.c.bf16 %v2582_v57, %v2581_v56  ;;  %v9718_v63 = vld [vmem:[#allocation13 + $0x28] sm:$0xff]  }
 0x3c3   : > { %2974 = vperm.xlu1 %7919, %v2848_v27   ;;  %2969 = vperm.xlu0 %7918, %v2847_v28   ;;  %v3562_v61 = vpack.c.bf16 %v2580_v55, %v2579_v54  ;;  %v2864_v0 = vld [vmem:[%s9413_s12 + $0xb8] sm:$0xff]  ;;  %v2863_v1 = vld [vmem:[%s9413_s12 + $0xb0] sm:$0xff]  ;;  %v2585_v4 = vld [vmem:[%s9406_s13 + $0x40] sm:$0xff] }
 0x3c4   : > { %7058 = vmatprep.subr.bf16.mxu0 %v7923_v32  ;;  %7525 = vmatpush3.bf16.msra.mxu1 %v9691_v43  ;;  %v2583_v2 = vld [vmem:[%s9406_s13 + $0x30] sm:$0xff]  ;;  %v2584_v3 = vld [vmem:[%s9406_s13 + $0x38] sm:$0xff]  ;;  %v2586_v5 = vld [vmem:[%s9406_s13 + $0x48] sm:$0xff] }
 0x3c5   : > { %7518 = vmatprep.subr.bf16.mxu1 %v9697_v47  ;;  %v9729_v6 = vld [vmem:[#allocation13 + $0x30] sm:$0xff]   ;;  %v2866_v7 = vld [vmem:[%s9413_s12 + $0xc8] sm:$0xff]  ;;  %v2865_v8 = vld [vmem:[%s9413_s12 + $0xc0] sm:$0xff]  ;;  %v3564_v9 = vpack.c.bf16 %v2584_v3, %v2583_v2  ;;  %v3565_v10 = vpack.c.bf16 %v2586_v5, %v2585_v4 }
 0x3c6   : > { %7059 = vmatpush3.bf16.msra.mxu0 %v7923_v32  ;;  %v9737_v11 = vld [vmem:[#allocation13 + $0x38] sm:$0xff]   ;;  %v2867_v13 = vld [vmem:[%s9413_s12 + $0xd0] sm:$0xff]  ;;  %v2590_v17 = vld [vmem:[%s9406_s13 + $0x68] sm:$0xff] }
 0x3c7   : > { %2984 = vperm.xlu1 %7919, %v2850_v30   ;;  %2979 = vperm.xlu0 %7918, %v2849_v31   ;;  %v2868_v12 = vld [vmem:[%s9413_s12 + $0xd8] sm:$0xff]  ;;  %v2587_v14 = vld [vmem:[%s9406_s13 + $0x50] sm:$0xff]  ;;  %v2589_v16 = vld [vmem:[%s9406_s13 + $0x60] sm:$0xff] }
 0x3c8   : > { %7060 = vmatprep.subr.bf16.mxu0 %v7924_v35  ;;  %7526 = vmatpush3.bf16.msra.mxu1 %v9697_v47  ;;  %v2588_v15 = vld [vmem:[%s9406_s13 + $0x58] sm:$0xff]  ;;  %v2870_v18 = vld [vmem:[%s9413_s12 + $0xe8] sm:$0xff]  ;;  %v2869_v19 = vld [vmem:[%s9413_s12 + $0xe0] sm:$0xff]  ;;  %v3567_v21 = vpack.c.bf16 %v2590_v17, %v2589_v16 }
 0x3c9   : > { %7519 = vmatprep.subr.bf16.mxu1 %v9702_v51  ;;  %v3566_v20 = vpack.c.bf16 %v2588_v15, %v2587_v14  ;;  %v2872_v22 = vld [vmem:[%s9413_s12 + $0xf8] sm:$0xff]  ;;  %v2871_v23 = vld [vmem:[%s9413_s12 + $0xf0] sm:$0xff]  ;;  %v2593_v26 = vld [vmem:[%s9406_s13 + $0x80] sm:$0xff]  ;;  %v2718_v15 = vlaneseq }
 0x3ca   : > { %7061 = vmatpush3.bf16.msra.mxu0 %v7924_v35  ;;  %v2591_v24 = vld [vmem:[%s9406_s13 + $0x70] sm:$0xff]  ;;  %v2592_v25 = vld [vmem:[%s9406_s13 + $0x78] sm:$0xff]  ;;  %v2594_v27 = vld [vmem:[%s9406_s13 + $0x88] sm:$0xff] }
 0x3cb   : > { %2994 = vperm.xlu1 %7919, %v2852_v33   ;;  %2989 = vperm.xlu0 %7918, %v2851_v34   ;;  %v2874_v28 = vld [vmem:[%s9413_s12 + $0x108] sm:$0xff]  ;;  %v2873_v29 = vld [vmem:[%s9413_s12 + $0x100] sm:$0xff]  ;;  %v3568_v30 = vpack.c.bf16 %v2592_v25, %v2591_v24  ;;  %v3569_v31 = vpack.c.bf16 %v2594_v27, %v2593_v26  ;;  %v2876_v32 = vld [vmem:[%s9413_s12 + $0x118] sm:$0xff] }
 0x3cc   : > { %7062 = vmatprep.subr.bf16.mxu0 %v7925_v42  ;;  %7527 = vmatpush3.bf16.msra.mxu1 %v9702_v51  ;;  %v2875_v33 = vld [vmem:[%s9413_s12 + $0x110] sm:$0xff]  ;;  %v2596_v35 = vld [vmem:[%s9406_s13 + $0x98] sm:$0xff]  ;;  %v2597_v36 = vld [vmem:[%s9406_s13 + $0xa0] sm:$0xff] }
 0x3cd   : > { %7520 = vmatprep.subr.bf16.mxu1 %v9712_v58  ;;  %v2595_v34 = vld [vmem:[%s9406_s13 + $0x90] sm:$0xff]  ;;  %v2598_v37 = vld [vmem:[%s9406_s13 + $0xa8] sm:$0xff]  ;;  %v2884_v54 = vld [vmem:[%s9413_s12 + $0x158] sm:$0xff] }
 0x3ce   : > { %7063 = vmatpush3.bf16.msra.mxu0 %v7925_v42  ;;  %v9774_v38 = vld [vmem:[#allocation15] sm:$0xff]   ;;  %v3571_v42 = vpack.c.bf16 %v2598_v37, %v2597_v36  ;;  %v2883_v55 = vld [vmem:[%s9413_s12 + $0x150] sm:$0xff]  ;;  %v2604_v57 = vld [vmem:[%s9406_s13 + $0xd8] sm:$0xff] }
 0x3cf   : > { %3004 = vperm.xlu1 %7919, %v2854_v40   ;;  %2999 = vperm.xlu0 %7918, %v2853_v41   ;;  %v2877_v40 = vld [vmem:[%s9413_s12 + $0x120] sm:$0xff]  ;;  %v3570_v41 = vpack.c.bf16 %v2596_v35, %v2595_v34  ;;  %v2603_v56 = vld [vmem:[%s9406_s13 + $0xd0] sm:$0xff]  ;;  %v2608_v3 = vld [vmem:[%s9406_s13 + $0xf8] sm:$0xff] }
 0x3d0   : > { %7064 = vmatprep.subr.bf16.mxu0 %v7926_v46  ;;  %7528 = vmatpush3.bf16.msra.mxu1 %v9712_v58  ;;  %v2607_v2 = vld [vmem:[%s9406_s13 + $0xf0] sm:$0xff]  ;;  %v2890_v4 = vld [vmem:[%s9413_s12 + $0x188] sm:$0xff]  ;;  %v2889_v5 = vld [vmem:[%s9413_s12 + $0x180] sm:$0xff] }
 0x3d1   : > { %7521 = vmatprep.subr.bf16.mxu1 %v9718_v63  ;;  %v2898_v16 = vld [vmem:[%s9413_s12 + $0x1c8] sm:$0xff]  ;;  %v2897_v17 = vld [vmem:[%s9413_s12 + $0x1c0] sm:$0xff]  ;;  %v2612_v35 = vld [vmem:[#allocation2 + $0x18] sm:$0xff] }
 0x3d2   : > { %7065 = vmatpush3.bf16.msra.mxu0 %v7926_v46  ;;  %v2600_v46 = vld [vmem:[%s9406_s13 + $0xb8] sm:$0xff]  ;;  %v2902_v24 = vld [vmem:[%s9413_s12 + $0x1e8] sm:$0xff]  ;;  %v2901_v25 = vld [vmem:[%s9413_s12 + $0x1e0] sm:$0xff] }
 0x3d3   : > { %3014 = vperm.xlu1 %7919, %v2856_v44   ;;  %3009 = vperm.xlu0 %7918, %v2855_v45   ;;  %v2879_v44 = vld [vmem:[%s9413_s12 + $0x130] sm:$0xff]  ;;  %v2905_v34 = vld [vmem:[%s9413_s12 + $0x200] sm:$0xff]  ;;  %v2610_v36 = vld [vmem:[#allocation2 + $0x8] sm:$0xff] }
 0x3d4   : > { %7066 = vmatprep.subr.bf16.mxu0 %v7927_v50  ;;  %7529 = vmatpush3.bf16.msra.mxu1 %v9718_v63  ;;  %v2599_v45 = vld [vmem:[%s9406_s13 + $0xb0] sm:$0xff] }
 0x3d5   : > { %7522 = vmatprep.subr.bf16.mxu1 %v9729_v6 }
 0x3d6   : > { %7067 = vmatpush3.bf16.msra.mxu0 %v7927_v50  ;;  %v2881_v50 = vld [vmem:[%s9413_s12 + $0x140] sm:$0xff] }
 0x3d7   : > { %3024 = vperm.xlu1 %7919, %v2858_v48   ;;  %3019 = vperm.xlu0 %7918, %v2857_v49   ;;  %v2602_v48 = vld [vmem:[%s9406_s13 + $0xc8] sm:$0xff] }
 0x3d8   : > { %7100 = vmatprep.subr.bf16.mxu0 %v7928_v39  ;;  %7530 = vmatpush3.bf16.msra.mxu1 %v9729_v6  ;;  %v2882_v49 = vld [vmem:[%s9413_s12 + $0x148] sm:$0xff] }
 0x3d9   : > { %7069 = vmatmul.mubr.bf16.vlgmr.msra.gmra.mrb[0].mxu0 %v3562_v61  ;;  %7523 = vmatprep.subr.bf16.mxu1 %v9737_v11  ;;  %v2885_v61 = vld [vmem:[%s9413_s12 + $0x160] sm:$0xff] }
 0x3da   : > { %7101 = vmatpush3.bf16.msra.mxu0 %v7928_v39  ;;  %7072 = vmatprep.mubr.bf16.mxu0 %v3563_v62  ;;  %v2878_v39 = vld [vmem:[%s9413_s12 + $0x128] sm:$0xff]  ;;  %v3574_v62 = vpack.c.bf16 %v2604_v57, %v2603_v56  ;;  %v2616_v57 = vld [vmem:[#allocation2 + $0x38] sm:$0xff] }
 0x3db   : > { %3034 = vperm.xlu1 %7919, %v2860_v52   ;;  %3029 = vperm.xlu0 %7918, %v2859_v53   ;;  %v9788_v52 = vld [vmem:[#allocation16] sm:$0xff]  }
 0x3dc   : > { %7102 = vmatprep.subr.bf16.mxu0 %v9691_v43  ;;  %7531 = vmatpush3.bf16.msra.mxu1 %v9737_v11 }
 0x3dd   : > { %7324 = vmatprep.subr.bf16.mxu1 %v9788_v52 }
 0x3de   : > { %7103 = vmatpush3.bf16.msra.mxu0 %v9691_v43  ;;  %v2880_v43 = vld [vmem:[%s9413_s12 + $0x138] sm:$0xff] }
 0x3df   : > { %3044 = vperm.xlu1 %7919, %v2862_v59   ;;  %3039 = vperm.xlu0 %7918, %v2861_v60   ;;  %v2606_v59 = vld [vmem:[%s9406_s13 + $0xe8] sm:$0xff] }
 0x3e0   : > { %7104 = vmatprep.subr.bf16.mxu0 %v9697_v47  ;;  %v2886_v60 = vld [vmem:[%s9413_s12 + $0x168] sm:$0xff] }
 0x3e1   : > { %7073 = vmatmul.mubr.bf16.gmra.mrb[4].mxu0 %v3564_v9  ;;  %v2894_v9 = vld [vmem:[%s9413_s12 + $0x1a8] sm:$0xff] }
 0x3e2   : > { %7076 = vmatprep.mubr.bf16.mxu0 %v3565_v10  ;;  %7105 = vmatpush3.bf16.msra.mxu0 %v9697_v47  ;;  %v2601_v47 = vld [vmem:[%s9406_s13 + $0xc0] sm:$0xff] }
 0x3e3   : > { %3054 = vperm.xlu1 %7919, %v2864_v0   ;;  %3049 = vperm.xlu0 %7918, %v2863_v1   ;;  %v3573_v53 = vpack.c.bf16 %v2602_v48, %v2601_v47  ;;  %v2888_v0 = vld [vmem:[%s9413_s12 + $0x178] sm:$0xff]  ;;  %v2887_v1 = vld [vmem:[%s9413_s12 + $0x170] sm:$0xff]  ;;  %v2893_v10 = vld [vmem:[%s9413_s12 + $0x1a0] sm:$0xff] }
 0x3e4   : > { %7106 = vmatprep.subr.bf16.mxu0 %v9702_v51  ;;  %v2907_v47 = vld [vmem:[%s9413_s12 + $0x210] sm:$0xff] }
 0x3e6   : > { %7107 = vmatpush3.bf16.msra.mxu0 %v9702_v51  ;;  %v3572_v51 = vpack.c.bf16 %v2600_v46, %v2599_v45  ;;  %v2613_v45 = vld [vmem:[#allocation2 + $0x20] sm:$0xff]  ;;  %v2908_v46 = vld [vmem:[%s9413_s12 + $0x218] sm:$0xff] }
 0x3e7   : > { %3064 = vperm.xlu1 %7919, %v2866_v7   ;;  %3059 = vperm.xlu0 %7918, %v2865_v8   ;;  %v2892_v7 = vld [vmem:[%s9413_s12 + $0x198] sm:$0xff]  ;;  %v2891_v8 = vld [vmem:[%s9413_s12 + $0x190] sm:$0xff] }
 0x3e8   : > { %7108 = vmatprep.subr.bf16.mxu0 %v9712_v58 }
 0x3e9   : > { %7077 = vmatmul.mubr.bf16.gmra.mrb[8].mxu0 %v3566_v20  ;;  %v2900_v20 = vld [vmem:[%s9413_s12 + $0x1d8] sm:$0xff] }
 0x3ea   : > { %7080 = vmatprep.mubr.bf16.mxu0 %v3567_v21  ;;  %7109 = vmatpush3.bf16.msra.mxu0 %v9712_v58  ;;  %v2605_v58 = vld [vmem:[%s9406_s13 + $0xe0] sm:$0xff]  ;;  %v2899_v21 = vld [vmem:[%s9413_s12 + $0x1d0] sm:$0xff] }
 0x3eb   : > { %3074 = vperm.xlu1 %7919, %v2868_v12   ;;  %3069 = vperm.xlu0 %7918, %v2867_v13   ;;  %v2895_v12 = vld [vmem:[%s9413_s12 + $0x1b0] sm:$0xff]  ;;  %v8697_v13 = vmov 1966171168  }
 0x3ec   : > { %7110 = vmatprep.subr.bf16.mxu0 %v9718_v63  ;;  %v2716_v14 = vunpack.c.l.s4 %v8697_v13 }
 0x3ee   : > { %7111 = vmatpush3.bf16.msra.mxu0 %v9718_v63  ;;  %v3575_v63 = vpack.c.bf16 %v2606_v59, %v2605_v58  ;;  %v2910_v58 = vld [vmem:[%s9413_s12 + $0x228] sm:$0xff]  ;;  %v2909_v59 = vld [vmem:[%s9413_s12 + $0x220] sm:$0xff] }
 0x3ef   : > { %3084 = vperm.xlu1 %7919, %v2870_v18   ;;  %3079 = vperm.xlu0 %7918, %v2869_v19   ;;  %v2717_v18 = vunpack.c.0.s8 %v2716_v14  ;;  %v2719_v19 = vshrl.u32 %v2718_v15, 7 }
 0x3f0   : > { %7112 = vmatprep.subr.bf16.mxu0 %v9729_v6 }
 0x3f1   : > { %7081 = vmatmul.mubr.bf16.gmra.mrb[12].mxu0 %v3568_v30  ;;  %v9825_v27 = vsub.s32 0, %v2719_v19 }
 0x3f2   : > { %7084 = vmatprep.mubr.bf16.mxu0 %v3569_v31  ;;  %7113 = vmatpush3.bf16.msra.mxu0 %v9729_v6  ;;  %v3576_v6 = vpack.c.bf16 %v2608_v3, %v2607_v2  ;;  %v2611_v31 = vld [vmem:[#allocation2 + $0x10] sm:$0xff] }
 0x3f3   : > { %3094 = vperm.xlu1 %7919, %v2872_v22   ;;  %3089 = vperm.xlu0 %7918, %v2871_v23   ;;  %v9815_v22 = vsub.s32 %v2717_v18, %v2719_v19  ;;  %v9817_v23 = vld.sshfl [vmem:[#allocation10] sm:$0x13 pattern:$0x75316420]  ;;  %v2620_v18 = vld [vmem:[#allocation2 + $0x58] sm:$0xff] }
 0x3f4   : > { %7114 = vmatprep.subr.bf16.mxu0 %v9737_v11  ;;  %v2913_v19 = vld [vmem:[%s9413_s12 + $0x240] sm:$0xff] }
 0x3f5   : > { %v9823_v26 = vrot.slane %v9817_v23, %v9815_v22 }
 0x3f6   : > { %7115 = vmatpush3.bf16.msra.mxu0 %v9737_v11  ;;  %v2896_v11 = vld [vmem:[%s9413_s12 + $0x1b8] sm:$0xff] }
 0x3f7   : > { %3104 = vperm.xlu1 %7919, %v2874_v28   ;;  %3099 = vperm.xlu0 %7918, %v2873_v29   ;;  %v2904_v28 = vld [vmem:[%s9413_s12 + $0x1f8] sm:$0xff]  ;;  %v2903_v29 = vld [vmem:[%s9413_s12 + $0x1f0] sm:$0xff]  ;;  %v9831_v30 = vrot.slane %v9823_v26, %v9825_v27 }
 0x3f8   : > { %7212 = vmatprep.subr.bf16.mxu0 %v9774_v38 }
 0x3f9   : > { %7085 = vmatmul.mubr.bf16.gmra.mrb[16].mxu0 %v3570_v41 }
 0x3fa   : > { %7088 = vmatprep.mubr.bf16.mxu0 %v3571_v42  ;;  %v2748_v42 = vmul.f32 %v9831_v30, %v2612_v35  ;;  %v2915_v35 = vld [vmem:[%s9413_s12 + $0x250] sm:$0xff] }
 0x3fb   : > { %3114 = vperm.xlu1 %7919, %v2876_v32   ;;  %3109 = vperm.xlu0 %7918, %v2875_v33   ;;  %v2609_v32 = vld [vmem:[#allocation2] sm:$0xff]  ;;  %v2906_v33 = vld [vmem:[%s9413_s12 + $0x208] sm:$0xff] }
 0x3fc   : > { %v2745_v41 = vmul.f32 %v9831_v30, %v2609_v32 }
 0x3ff   : > { %3124 = vperm.xlu1 %7919, %v2878_v39   ;;  %3119 = vperm.xlu0 %7918, %v2877_v40   ;;  %v2747_v39 = vmul.f32 %v9831_v30, %v2611_v31 }
 0x401   : > { %7089 = vmatmul.mubr.bf16.gmra.mrb[20].mxu0 %v3572_v51 }
 0x402   : > { %7092 = vmatprep.mubr.bf16.mxu0 %v3573_v53  ;;  %v2749_v53 = vmul.f32 %v9831_v30, %v2613_v45 }
 0x403   : > { %3134 = vperm.xlu1 %7919, %v2880_v43   ;;  %3129 = vperm.xlu0 %7918, %v2879_v44   ;;  %v2746_v43 = vmul.f32 %v9831_v30, %v2610_v36  ;;  %v2614_v44 = vld [vmem:[#allocation2 + $0x28] sm:$0xff]  ;;  %v7939_v36 = vld [vmem:[#allocation15 + $0x18] sm:$0xff]  }
 0x404   : > { %v2750_v51 = vmul.f32 %v9831_v30, %v2614_v44 }
 0x407   : > { %3144 = vperm.xlu1 %7919, %v2882_v49   ;;  %3139 = vperm.xlu0 %7918, %v2881_v50  }
 0x409   : > { %7093 = vmatmul.mubr.bf16.gmra.mrb[24].mxu0 %v3574_v62 }
 0x40a   : > { %7096 = vmatprep.mubr.bf16.mxu0 %v3575_v63 }
 0x40b   : > { %3154 = vperm.xlu1 %7919, %v2884_v54   ;;  %3149 = vperm.xlu0 %7918, %v2883_v55  }
 0x40f   : > { %3164 = vperm.xlu1 %7919, %v2886_v60   ;;  %3159 = vperm.xlu0 %7918, %v2885_v61   ;;  %v2615_v60 = vld [vmem:[#allocation2 + $0x30] sm:$0xff] }
 0x411   : > { %7097 = vmatmul.mubr.bf16.gmra.mrb[28].mxu0 %v3576_v6  ;;  %v2618_v6 = vld [vmem:[#allocation2 + $0x48] sm:$0xff] }
 0x412   : > { %v2754_v13 = vmul.f32 %v9831_v30, %v2618_v6 }
 0x413   : > { %3174 = vperm.xlu1 %7919, %v2888_v0   ;;  %3169 = vperm.xlu0 %7918, %v2887_v1   ;;  %v2752_v1 = vmul.f32 %v9831_v30, %v2616_v57 }
 0x417   : > { %3184 = vperm.xlu1 %7919, %v2890_v4   ;;  %3179 = vperm.xlu0 %7918, %v2889_v5   ;;  %v2751_v4 = vmul.f32 %v9831_v30, %v2615_v60  ;;  %v2912_v5 = vld [vmem:[%s9413_s12 + $0x238] sm:$0xff]  ;;  %v2626_v60 = vld [vmem:[#allocation2 + $0x88] sm:$0xff] }
 0x41b   : > { %3194 = vperm.xlu1 %7919, %v2892_v7   ;;  %3189 = vperm.xlu0 %7918, %v2891_v8   ;;  %v2911_v7 = vld [vmem:[%s9413_s12 + $0x230] sm:$0xff] }
 0x41c   : > { %v7937_v8 = vld [vmem:[#allocation15 + $0x8] sm:$0xff]  }
 0x41f   : > { %3204 = vperm.xlu1 %7919, %v2894_v9   ;;  %3199 = vperm.xlu0 %7918, %v2893_v10   ;;  %v2617_v9 = vld [vmem:[#allocation2 + $0x40] sm:$0xff] }
 0x423   : > { %3214 = vperm.xlu1 %7919, %v2896_v11   ;;  %3209 = vperm.xlu0 %7918, %v2895_v12  }
 0x427   : > { %3224 = vperm.xlu1 %7919, %v2898_v16   ;;  %3219 = vperm.xlu0 %7918, %v2897_v17   ;;  %v2753_v16 = vmul.f32 %v9831_v30, %v2617_v9  ;;  %v2914_v17 = vld [vmem:[%s9413_s12 + $0x248] sm:$0xff] }
 0x428   : > { %v2922_v9 = vld [vmem:[%s9413_s12 + $0x288] sm:$0xff] }
 0x42b   : > { %3234 = vperm.xlu1 %7919, %v2900_v20   ;;  %3229 = vperm.xlu0 %7918, %v2899_v21   ;;  %v7938_v20 = vld [vmem:[#allocation15 + $0x10] sm:$0xff]  }
 0x42f   : > { %3244 = vperm.xlu1 %7919, %v2902_v24   ;;  %3239 = vperm.xlu0 %7918, %v2901_v25  }
 0x433   : > { %3254 = vperm.xlu1 %7919, %v2904_v28   ;;  %3249 = vperm.xlu0 %7918, %v2903_v29   ;;  %v2756_v28 = vmul.f32 %v9831_v30, %v2620_v18 }
 0x436   : > { %v2950_v37 = vpop.permute.xlu1 %2949  ;;  %v2940_v40 = vpop.permute.xlu0 %2939 }
 0x437   : > { %3264 = vperm.xlu1 %7919, %v2906_v33   ;;  %3259 = vperm.xlu0 %7918, %v2905_v34   ;;  %v3419_v48 = vmul.f32 %v2950_v37, %v2747_v39  ;;  %v3417_v54 = vmul.f32 %v2940_v40, %v2745_v41  ;;  %v2916_v33 = vld [vmem:[%s9413_s12 + $0x258] sm:$0xff]  ;;  %v2622_v34 = vld [vmem:[#allocation2 + $0x68] sm:$0xff]  ;;  %v2621_v37 = vld [vmem:[#allocation2 + $0x60] sm:$0xff] }
 0x438   : > { %v2757_v45 = vmul.f32 %v9831_v30, %v2621_v37 }
 0x43a   : > { %v2955_v49 = vpop.permute.xlu1 %2954  ;;  %v2945_v50 = vpop.permute.xlu0 %2944 }
 0x43b   : > { %v3420_v55 = vmul.f32 %v2955_v49, %v2748_v42  ;;  %v3418_v56 = vmul.f32 %v2945_v50, %v2746_v43  ;;  %3274 = vperm.xlu1 %7919, %v2908_v46   ;;  %3269 = vperm.xlu0 %7918, %v2907_v47   ;;  %v2758_v42 = vmul.f32 %v9831_v30, %v2622_v34  ;;  %v2918_v46 = vld [vmem:[%s9413_s12 + $0x268] sm:$0xff]  ;;  %v2624_v47 = vld [vmem:[#allocation2 + $0x78] sm:$0xff]  ;;  %v2623_v50 = vld [vmem:[#allocation2 + $0x70] sm:$0xff] }
 0x43c   : > { %v7940_v49 = vld [vmem:[#allocation15 + $0x20] sm:$0xff]  }
 0x43d   : > { %v9845_v61 = vpack.c.bf16 %v3420_v55, %v3419_v48  ;;  %v9847_v62 = vpack.c.bf16 %v3418_v56, %v3417_v54  ;;  %v2917_v48 = vld [vmem:[%s9413_s12 + $0x260] sm:$0xff]  ;;  %v2760_v55 = vmul.f32 %v9831_v30, %v2624_v47 }
 0x43e   : > { %v2965_v63 = vpop.permute.xlu1 %2964  ;;  %v2960_v0 = vpop.permute.xlu0 %2959 }
 0x43f   : > { %v3422_v2 = vmul.f32 %v2965_v63, %v2750_v51  ;;  %v3421_v3 = vmul.f32 %v2960_v0, %v2749_v53  ;;  %3284 = vperm.xlu1 %7919, %v2910_v58   ;;  %3279 = vperm.xlu0 %7918, %v2909_v59   ;;  %v2759_v58 = vmul.f32 %v9831_v30, %v2623_v50  ;;  %v2920_v59 = vld [vmem:[%s9413_s12 + $0x278] sm:$0xff]  ;;  %v2919_v63 = vld [vmem:[%s9413_s12 + $0x270] sm:$0xff] }
 0x440   : > { %7116 = vmatprep.mubr.bf16.mxu0 %v9847_v62  ;;  %v7941_v0 = vld [vmem:[#allocation15 + $0x28] sm:$0xff]  }
 0x441   : > { %v9854_v10 = vpack.c.bf16 %v3422_v2, %v3421_v3  ;;  %7117 = vmatmul.mubr.bf16.vlgmr.msra.gmra.mrb[32].mxu0 %v9845_v61 }
 0x442   : > { %7213 = vmatpush3.bf16.msra.mxu0 %v9774_v38  ;;  %v2975_v11 = vpop.permute.xlu1 %2974  ;;  %v2970_v12 = vpop.permute.xlu0 %2969  ;;  %v2619_v38 = vld [vmem:[#allocation2 + $0x50] sm:$0xff] }
 0x443   : > { %v3424_v14 = vmul.f32 %v2975_v11, %v2752_v1  ;;  %v3423_v15 = vmul.f32 %v2970_v12, %v2751_v4  ;;  %3294 = vperm.xlu1 %7919, %v2912_v5   ;;  %3289 = vperm.xlu0 %7918, %v2911_v7   ;;  %v2755_v32 = vmul.f32 %v9831_v30, %v2619_v38  ;;  %v2625_v1 = vld [vmem:[#allocation2 + $0x80] sm:$0xff]  ;;  %v2628_v11 = vld [vmem:[#allocation2 + $0x98] sm:$0xff] }
 0x444   : > { %7120 = vmatprep.mubr.bf16.mxu0 %v9854_v10  ;;  %7214 = vmatprep.subr.bf16.mxu0 %v7937_v8  ;;  %v2762_v5 = vmul.f32 %v9831_v30, %v2626_v60  ;;  %v2921_v12 = vld [vmem:[%s9413_s12 + $0x280] sm:$0xff]  ;;  %v2764_v18 = vmul.f32 %v9831_v30, %v2628_v11  ;;  %v2714_v11 = vcombine.high %v9817_v23, %v9817_v23 }
 0x445   : > { %v9863_v21 = vpack.c.bf16 %v3424_v14, %v3423_v15  ;;  %v2627_v14 = vld [vmem:[#allocation2 + $0x90] sm:$0xff] }
 0x446   : > { %7215 = vmatpush3.bf16.msra.mxu0 %v7937_v8  ;;  %v2985_v24 = vpop.permute.xlu1 %2984  ;;  %v2980_v25 = vpop.permute.xlu0 %2979  ;;  %v2761_v8 = vmul.f32 %v9831_v30, %v2625_v1  ;;  %v2763_v38 = vmul.f32 %v9831_v30, %v2627_v14 }
 0x447   : > { %v3426_v29 = vmul.f32 %v2985_v24, %v2754_v13  ;;  %v3425_v31 = vmul.f32 %v2980_v25, %v2753_v16  ;;  %3304 = vperm.xlu1 %7919, %v2914_v17   ;;  %3299 = vperm.xlu0 %7918, %v2913_v19   ;;  %v7942_v13 = vld [vmem:[#allocation15 + $0x30] sm:$0xff]   ;;  %v2630_v25 = vld [vmem:[#allocation2 + $0xa8] sm:$0xff] }
 0x448   : > { %7216 = vmatprep.subr.bf16.mxu0 %v7938_v20  ;;  %v2924_v24 = vld [vmem:[%s9413_s12 + $0x298] sm:$0xff] }
 0x449   : > { %v9869_v39 = vpack.c.bf16 %v3426_v29, %v3425_v31  ;;  %7121 = vmatmul.mubr.bf16.gmra.mrb[36].mxu0 %v9863_v21  ;;  %v7943_v29 = vld [vmem:[#allocation15 + $0x38] sm:$0xff]  }
 0x44a   : > { %7217 = vmatpush3.bf16.msra.mxu0 %v7938_v20  ;;  %v2995_v40 = vpop.permute.xlu1 %2994  ;;  %v2990_v41 = vpop.permute.xlu0 %2989  ;;  %v2629_v31 = vld [vmem:[#allocation2 + $0xa0] sm:$0xff] }
 0x44b   : > { %v3428_v43 = vmul.f32 %v2995_v40, %v2756_v28  ;;  %v3427_v44 = vmul.f32 %v2990_v41, %v2755_v32  ;;  %3314 = vperm.xlu1 %7919, %v2916_v33   ;;  %3309 = vperm.xlu0 %7918, %v2915_v35   ;;  %v2923_v28 = vld [vmem:[%s9413_s12 + $0x290] sm:$0xff]  ;;  %v2766_v35 = vmul.f32 %v9831_v30, %v2630_v25  ;;  %v2632_v41 = vld [vmem:[#allocation2 + $0xb8] sm:$0xff] }
 0x44c   : > { %7124 = vmatprep.mubr.bf16.mxu0 %v9869_v39  ;;  %7218 = vmatprep.subr.bf16.mxu0 %v7939_v36  ;;  %v2765_v40 = vmul.f32 %v9831_v30, %v2629_v31  ;;  %v2768_v47 = vmul.f32 %v9831_v30, %v2632_v41 }
 0x44d   : > { %v9877_v51 = vpack.c.bf16 %v3428_v43, %v3427_v44  ;;  %v2925_v43 = vld [vmem:[%s9413_s12 + $0x2a0] sm:$0xff]  ;;  %v2631_v44 = vld [vmem:[#allocation2 + $0xb0] sm:$0xff] }
 0x44e   : > { %7219 = vmatpush3.bf16.msra.mxu0 %v7939_v36  ;;  %v3005_v53 = vpop.permute.xlu1 %3004  ;;  %v3000_v54 = vpop.permute.xlu0 %2999 }
 0x44f   : > { %v3430_v56 = vmul.f32 %v3005_v53, %v2758_v42  ;;  %v3429_v57 = vmul.f32 %v3000_v54, %v2757_v45  ;;  %3324 = vperm.xlu1 %7919, %v2918_v46   ;;  %3319 = vperm.xlu0 %7918, %v2917_v48   ;;  %v2926_v42 = vld [vmem:[%s9413_s12 + $0x2a8] sm:$0xff]  ;;  %v2767_v53 = vmul.f32 %v9831_v30, %v2631_v44 }
 0x450   : > { %7220 = vmatprep.subr.bf16.mxu0 %v7940_v49  ;;  %v7945_v48 = vld [vmem:[#allocation16 + $0x8] sm:$0xff]  }
 0x451   : > { %v9883_v2 = vpack.c.bf16 %v3430_v56, %v3429_v57  ;;  %7125 = vmatmul.mubr.bf16.gmra.mrb[40].mxu0 %v9877_v51  ;;  %v2634_v54 = vld [vmem:[#allocation2 + $0xc8] sm:$0xff]  ;;  %v2927_v56 = vld [vmem:[%s9413_s12 + $0x2b0] sm:$0xff]  ;;  %v2633_v57 = vld [vmem:[#allocation2 + $0xc0] sm:$0xff] }
 0x452   : > { %7221 = vmatpush3.bf16.msra.mxu0 %v7940_v49  ;;  %v3015_v3 = vpop.permute.xlu1 %3014  ;;  %v3010_v4 = vpop.permute.xlu0 %3009 }
 0x453   : > { %v3432_v6 = vmul.f32 %v3015_v3, %v2760_v55  ;;  %v3431_v7 = vmul.f32 %v3010_v4, %v2759_v58  ;;  %3334 = vperm.xlu1 %7919, %v2920_v59   ;;  %3329 = vperm.xlu0 %7918, %v2919_v63   ;;  %v2928_v55 = vld [vmem:[%s9413_s12 + $0x2b8] sm:$0xff]  ;;  %v2770_v63 = vmul.f32 %v9831_v30, %v2634_v54 }
 0x454   : > { %7128 = vmatprep.mubr.bf16.mxu0 %v9883_v2  ;;  %7222 = vmatprep.subr.bf16.mxu0 %v7941_v0  ;;  %v2769_v4 = vmul.f32 %v9831_v30, %v2633_v57 }
 0x455   : > { %v9891_v15 = vpack.c.bf16 %v3432_v6, %v3431_v7  ;;  %v2929_v6 = vld [vmem:[%s9413_s12 + $0x2c0] sm:$0xff] }
 0x456   : > { %7223 = vmatpush3.bf16.msra.mxu0 %v7941_v0  ;;  %v3025_v16 = vpop.permute.xlu1 %3024  ;;  %v3020_v17 = vpop.permute.xlu0 %3019  ;;  %v7946_v0 = vld [vmem:[#allocation16 + $0x10] sm:$0xff]  }
 0x457   : > { %v3434_v19 = vmul.f32 %v3025_v16, %v2762_v5  ;;  %v3433_v20 = vmul.f32 %v3020_v17, %v2761_v8  ;;  %3344 = vperm.xlu1 %7919, %v2922_v9   ;;  %3339 = vperm.xlu0 %7918, %v2921_v12   ;;  %v2636_v5 = vld [vmem:[#allocation2 + $0xd8] sm:$0xff]  ;;  %v2638_v17 = vld [vmem:[#allocation2 + $0xe8] sm:$0xff] }
 0x458   : > { %7224 = vmatprep.subr.bf16.mxu0 %v7942_v13  ;;  %v2772_v9 = vmul.f32 %v9831_v30, %v2636_v5  ;;  %v7947_v12 = vld [vmem:[#allocation16 + $0x18] sm:$0xff]   ;;  %v2774_v25 = vmul.f32 %v9831_v30, %v2638_v17  ;;  %v2647_v17 = vld [vmem:[#allocation2 + $0x130] sm:$0xff] }
 0x459   : > { %7129 = vmatmul.mubr.bf16.gmra.mrb[44].mxu0 %v9891_v15  ;;  %v9898_v32 = vpack.c.bf16 %v3434_v19, %v3433_v20  ;;  %v2931_v19 = vld [vmem:[%s9413_s12 + $0x2d0] sm:$0xff]  ;;  %v2637_v20 = vld [vmem:[#allocation2 + $0xe0] sm:$0xff] }
 0x45a   : > { %7225 = vmatpush3.bf16.msra.mxu0 %v7942_v13  ;;  %7228 = vmatprep.mubr.bf16.mxu0 %v9847_v62  ;;  %v3035_v33 = vpop.permute.xlu1 %3034  ;;  %v3030_v34 = vpop.permute.xlu0 %3029 }
 0x45b   : > { %v3436_v36 = vmul.f32 %v3035_v33, %v2764_v18  ;;  %v3435_v37 = vmul.f32 %v3030_v34, %v2763_v38  ;;  %3354 = vperm.xlu1 %7919, %v2924_v24   ;;  %3349 = vperm.xlu0 %7918, %v2923_v28   ;;  %v2932_v18 = vld [vmem:[%s9413_s12 + $0x2d8] sm:$0xff]  ;;  %v2728_v28 = vrot.slane %v2714_v11, %v9815_v22 }
 0x45c   : > { %7132 = vmatprep.mubr.bf16.mxu1 %v9898_v32  ;;  %7226 = vmatprep.subr.bf16.mxu0 %v7943_v29  ;;  %v2773_v34 = vmul.f32 %v9831_v30, %v2637_v20 }
 0x45d   : > { %v9906_v62 = vpack.c.bf16 %v3436_v36, %v3435_v37  ;;  %v2933_v36 = vld [vmem:[%s9413_s12 + $0x2e0] sm:$0xff] }
 0x45e   : > { %7227 = vmatpush3.bf16.msra.mxu0 %v7943_v29  ;;  %v3045_v45 = vpop.permute.xlu1 %3044  ;;  %v3040_v46 = vpop.permute.xlu0 %3039  ;;  %v7948_v29 = vld [vmem:[#allocation16 + $0x20] sm:$0xff]  }
 0x45f   : > { %v3438_v49 = vmul.f32 %v3045_v45, %v2766_v35  ;;  %v3437_v50 = vmul.f32 %v3040_v46, %v2765_v40  ;;  %3364 = vperm.xlu1 %7919, %v2926_v42   ;;  %3359 = vperm.xlu0 %7918, %v2925_v43   ;;  %v2934_v35 = vld [vmem:[%s9413_s12 + $0x2e8] sm:$0xff]  ;;  %v9946_v42 = vrot.slane %v2728_v28, %v9825_v27  ;;  %v2649_v28 = vld [vmem:[#allocation2 + $0x140] sm:$0xff] }
 0x460   : > { %7133 = vmatmul.mubr.bf16.vlgmr.msra.gmra.mrb[0].mxu1 %v9906_v62  ;;  %v7949_v43 = vld [vmem:[#allocation16 + $0x28] sm:$0xff]  }
 0x461   : > { %v9913_v58 = vpack.c.bf16 %v3438_v49, %v3437_v50  ;;  %7229 = vmatmul.mubr.bf16.vlgmr.msra.gmra.mrb[48].mxu0 %v9845_v61  ;;  %7325 = vmatpush3.bf16.msra.mxu1 %v9788_v52  ;;  %v2930_v61 = vld [vmem:[%s9413_s12 + $0x2c8] sm:$0xff]  ;;  %v2635_v52 = vld [vmem:[#allocation2 + $0xd0] sm:$0xff]  ;;  %v2641_v50 = vld [vmem:[#allocation2 + $0x100] sm:$0xff] }
 0x462   : > { %7232 = vmatprep.mubr.bf16.mxu0 %v9854_v10  ;;  %v3055_v59 = vpop.permute.xlu1 %3054  ;;  %v3050_v60 = vpop.permute.xlu0 %3049  ;;  %7326 = vmatprep.subr.bf16.mxu1 %v7945_v48  ;;  %v2771_v16 = vmul.f32 %v9831_v30, %v2635_v52  ;;  %v2935_v49 = vld [vmem:[%s9413_s12 + $0x2f0] sm:$0xff]  ;;  %v2645_v52 = vld [vmem:[#allocation2 + $0x120] sm:$0xff] }
 0x463   : > { %v3440_v1 = vmul.f32 %v3055_v59, %v2768_v47  ;;  %v3439_v3 = vmul.f32 %v3050_v60, %v2767_v53  ;;  %3374 = vperm.xlu1 %7919, %v2928_v55   ;;  %3369 = vperm.xlu0 %7918, %v2927_v56   ;;  %v2642_v47 = vld [vmem:[#allocation2 + $0x108] sm:$0xff]  ;;  %v2777_v59 = vmul.f32 %v9946_v42, %v2641_v50  ;;  %v2644_v60 = vld [vmem:[#allocation2 + $0x118] sm:$0xff] }
 0x464   : > { %7136 = vmatprep.mubr.bf16.mxu1 %v9913_v58  ;;  %v2778_v56 = vmul.f32 %v9946_v42, %v2642_v47  ;;  %v2780_v5 = vmul.f32 %v9946_v42, %v2644_v60  ;;  %v2654_v47 = vld [vmem:[#allocation2 + $0x168] sm:$0xff]  ;;  %v2655_v60 = vld [vmem:[#allocation2 + $0x170] sm:$0xff] }
 0x465   : > { %v9923_v10 = vpack.c.bf16 %v3440_v1, %v3439_v3  ;;  %7327 = vmatpush3.bf16.msra.mxu1 %v7945_v48  ;;  %v2936_v48 = vld [vmem:[%s9413_s12 + $0x2f8] sm:$0xff] }
 0x466   : > { %v3065_v7 = vpop.permute.xlu1 %3064  ;;  %v3060_v8 = vpop.permute.xlu0 %3059  ;;  %7328 = vmatprep.subr.bf16.mxu1 %v7946_v0 }
 0x467   : > { %v3442_v13 = vmul.f32 %v3065_v7, %v2770_v63  ;;  %v3441_v14 = vmul.f32 %v3060_v8, %v2769_v4  ;;  %3384 = vperm.xlu1 %7919, %v2930_v61   ;;  %3379 = vperm.xlu0 %7918, %v2929_v6   ;;  %v2643_v63 = vld [vmem:[#allocation2 + $0x110] sm:$0xff]  ;;  %v2646_v6 = vld [vmem:[#allocation2 + $0x128] sm:$0xff] }
 0x468   : > { %7137 = vmatmul.mubr.bf16.gmra.mrb[4].mxu1 %v9923_v10  ;;  %v2779_v61 = vmul.f32 %v9946_v42, %v2643_v63 }
 0x469   : > { %v9932_v38 = vpack.c.bf16 %v3442_v13, %v3441_v14  ;;  %7233 = vmatmul.mubr.bf16.gmra.mrb[52].mxu0 %v9863_v21  ;;  %7329 = vmatpush3.bf16.msra.mxu1 %v7946_v0  ;;  %v2640_v21 = vld [vmem:[#allocation2 + $0xf8] sm:$0xff]  ;;  %v2782_v13 = vmul.f32 %v9946_v42, %v2646_v6  ;;  %v2781_v14 = vmul.f32 %v9946_v42, %v2645_v52 }
 0x46a   : > { %7236 = vmatprep.mubr.bf16.mxu0 %v9869_v39  ;;  %v3075_v23 = vpop.permute.xlu1 %3074  ;;  %v3070_v24 = vpop.permute.xlu0 %3069  ;;  %7330 = vmatprep.subr.bf16.mxu1 %v7947_v12  ;;  %v2639_v39 = vld [vmem:[#allocation2 + $0xf0] sm:$0xff]  ;;  %v2776_v41 = vmul.f32 %v9831_v30, %v2640_v21 }
 0x46b   : > { %v3444_v31 = vmul.f32 %v3075_v23, %v2772_v9  ;;  %v3443_v33 = vmul.f32 %v3070_v24, %v2771_v16  ;;  %3394 = vperm.xlu1 %7919, %v2932_v18   ;;  %3389 = vperm.xlu0 %7918, %v2931_v19   ;;  %v2775_v46 = vmul.f32 %v9831_v30, %v2639_v39  ;;  %v2648_v16 = vld [vmem:[#allocation2 + $0x138] sm:$0xff] }
 0x46c   : > { %7140 = vmatprep.mubr.bf16.mxu1 %v9932_v38  ;;  %v2783_v24 = vmul.f32 %v9946_v42, %v2647_v17  ;;  %v2785_v39 = vmul.f32 %v9946_v42, %v2649_v28 }
 0x46d   : > { %v9942_v37 = vpack.c.bf16 %v3444_v31, %v3443_v33  ;;  %7331 = vmatpush3.bf16.msra.mxu1 %v7947_v12 }
 0x46e   : > { %v3085_v22 = vpop.permute.xlu1 %3084  ;;  %v3080_v40 = vpop.permute.xlu0 %3079  ;;  %7332 = vmatprep.subr.bf16.mxu1 %v7948_v29 }
 0x46f   : > { %v3446_v44 = vmul.f32 %v3085_v22, %v2774_v25  ;;  %v3445_v45 = vmul.f32 %v3080_v40, %v2773_v34  ;;  %3404 = vperm.xlu1 %7919, %v2934_v35   ;;  %3399 = vperm.xlu0 %7918, %v2933_v36   ;;  %v2650_v25 = vld [vmem:[#allocation2 + $0x148] sm:$0xff]  ;;  %v7951_v34 = vld [vmem:[#allocation16 + $0x38] sm:$0xff]   ;;  %v2651_v40 = vld [vmem:[#allocation2 + $0x150] sm:$0xff] }
 0x470   : > { %7141 = vmatmul.mubr.bf16.gmra.mrb[8].mxu1 %v9942_v37  ;;  %v2786_v36 = vmul.f32 %v9946_v42, %v2650_v25  ;;  %v2652_v22 = vld [vmem:[#allocation2 + $0x158] sm:$0xff] }
 0x471   : > { %v9952_v53 = vpack.c.bf16 %v3446_v44, %v3445_v45  ;;  %7237 = vmatmul.mubr.bf16.gmra.mrb[56].mxu0 %v9877_v51  ;;  %7333 = vmatpush3.bf16.msra.mxu1 %v7948_v29  ;;  %v7950_v51 = vld [vmem:[#allocation16 + $0x30] sm:$0xff]   ;;  %v2788_v45 = vmul.f32 %v9946_v42, %v2652_v22 }
 0x472   : > { %7240 = vmatprep.mubr.bf16.mxu0 %v9883_v2  ;;  %v3095_v54 = vpop.permute.xlu1 %3094  ;;  %v3090_v55 = vpop.permute.xlu0 %3089  ;;  %7334 = vmatprep.subr.bf16.mxu1 %v7949_v43 }
 0x473   : > { %v3448_v57 = vmul.f32 %v3095_v54, %v2776_v41  ;;  %v3447_v30 = vmul.f32 %v3090_v55, %v2775_v46  ;;  %3414 = vperm.xlu1 %7919, %v2936_v48   ;;  %3409 = vperm.xlu0 %7918, %v2935_v49   ;;  %v2787_v46 = vmul.f32 %v9946_v42, %v2651_v40  ;;  %v2653_v48 = vld [vmem:[#allocation2 + $0x160] sm:$0xff] }
 0x474   : > { %7144 = vmatprep.mubr.bf16.mxu1 %v9952_v53 }
 0x475   : > { %v9959_v0 = vpack.c.bf16 %v3448_v57, %v3447_v30  ;;  %7335 = vmatpush3.bf16.msra.mxu1 %v7949_v43  ;;  %v2790_v57 = vmul.f32 %v9946_v42, %v2654_v47  ;;  %v2789_v30 = vmul.f32 %v9946_v42, %v2653_v48 }
 0x476   : > { %v3105_v2 = vpop.permute.xlu1 %3104  ;;  %v3100_v1 = vpop.permute.xlu0 %3099  ;;  %7336 = vmatprep.subr.bf16.mxu1 %v7950_v51 }
 0x477   : > { %v3450_v3 = vmul.f32 %v3105_v2, %v2778_v56  ;;  %v3449_v4 = vmul.f32 %v3100_v1, %v2777_v59  ;;  %v2656_v59 = vld [vmem:[#allocation2 + $0x178] sm:$0xff] }
 0x478   : > { %7145 = vmatmul.mubr.bf16.gmra.mrb[12].mxu1 %v9959_v0 }
 0x479   : > { %v9964_v7 = vpack.c.bf16 %v3450_v3, %v3449_v4  ;;  %7241 = vmatmul.mubr.bf16.gmra.mrb[60].mxu0 %v9891_v15  ;;  %7337 = vmatpush3.bf16.msra.mxu1 %v7950_v51  ;;  %v2791_v3 = vmul.f32 %v9946_v42, %v2655_v60  ;;  %v2658_v4 = vld [vmem:[#allocation2 + $0x188] sm:$0xff] }
 0x47a   : > { %7244 = vmatprep.mubr.bf16.mxu0 %v9898_v32  ;;  %v3115_v8 = vpop.permute.xlu1 %3114  ;;  %v3110_v9 = vpop.permute.xlu0 %3109  ;;  %v2784_v32 = vmul.f32 %v9946_v42, %v2648_v16  ;;  %7338 = vmatprep.subr.bf16.mxu1 %v7951_v34 }
 0x47b   : > { %v3452_v11 = vmul.f32 %v3115_v8, %v2780_v5  ;;  %v3451_v12 = vmul.f32 %v3110_v9, %v2779_v61  ;;  %7148 = vmatprep.mubr.bf16.mxu1 %v9964_v7  ;;  %v2657_v5 = vld [vmem:[#allocation2 + $0x180] sm:$0xff] }
 0x47d   : > { %v9971_v18 = vpack.c.bf16 %v3452_v11, %v3451_v12  ;;  %7339 = vmatpush3.bf16.msra.mxu1 %v7951_v34  ;;  %v2794_v11 = vmul.f32 %v9946_v42, %v2658_v4  ;;  %v2793_v12 = vmul.f32 %v9946_v42, %v2657_v5 }
 0x47e   : > { %v3125_v19 = vpop.permute.xlu1 %3124  ;;  %v3120_v20 = vpop.permute.xlu0 %3119 }
 0x47f   : > { %v3454_v15 = vmul.f32 %v3125_v19, %v2782_v13  ;;  %v3453_v23 = vmul.f32 %v3120_v20, %v2781_v14  ;;  %v2660_v13 = vld [vmem:[#allocation2 + $0x198] sm:$0xff]  ;;  %v2659_v14 = vld [vmem:[#allocation2 + $0x190] sm:$0xff] }
 0x480   : > { %7149 = vmatmul.mubr.bf16.gmra.mrb[16].mxu1 %v9971_v18 }
 0x481   : > { %v9976_v29 = vpack.c.bf16 %v3454_v15, %v3453_v23  ;;  %7245 = vmatmul.mubr.bf16.gmra.mrb[64].mxu0 %v9906_v62  ;;  %v2795_v15 = vmul.f32 %v9946_v42, %v2659_v14  ;;  %v2662_v23 = vld [vmem:[#allocation2 + $0x1a8] sm:$0xff] }
 0x482   : > { %7248 = vmatprep.mubr.bf16.mxu0 %v9913_v58  ;;  %v3135_v31 = vpop.permute.xlu1 %3134  ;;  %v3130_v33 = vpop.permute.xlu0 %3129  ;;  %v2798_v34 = vmul.f32 %v9946_v42, %v2662_v23 }
 0x483   : > { %v3456_v21 = vmul.f32 %v3135_v31, %v2784_v32  ;;  %v3455_v35 = vmul.f32 %v3130_v33, %v2783_v24  ;;  %7152 = vmatprep.mubr.bf16.mxu1 %v9976_v29  ;;  %v2661_v32 = vld [vmem:[#allocation2 + $0x1a0] sm:$0xff] }
 0x485   : > { %v9983_v41 = vpack.c.bf16 %v3456_v21, %v3455_v35  ;;  %v2797_v21 = vmul.f32 %v9946_v42, %v2661_v32  ;;  %v2664_v35 = vld [vmem:[#allocation2 + $0x1b8] sm:$0xff] }
 0x486   : > { %v3145_v62 = vpop.permute.xlu1 %3144  ;;  %v3140_v43 = vpop.permute.xlu0 %3139 }
 0x487   : > { %v3458_v58 = vmul.f32 %v3145_v62, %v2786_v36  ;;  %v3457_v44 = vmul.f32 %v3140_v43, %v2785_v39  ;;  %v2663_v36 = vld [vmem:[#allocation2 + $0x1b0] sm:$0xff] }
 0x488   : > { %7153 = vmatmul.mubr.bf16.gmra.mrb[20].mxu1 %v9983_v41  ;;  %v2799_v43 = vmul.f32 %v9946_v42, %v2663_v36 }
 0x489   : > { %v9988_v49 = vpack.c.bf16 %v3458_v58, %v3457_v44  ;;  %7249 = vmatmul.mubr.bf16.gmra.mrb[68].mxu0 %v9923_v10  ;;  %v2666_v58 = vld [vmem:[#allocation2 + $0x1c8] sm:$0xff]  ;;  %v2665_v44 = vld [vmem:[#allocation2 + $0x1c0] sm:$0xff] }
 0x48a   : > { %7252 = vmatprep.mubr.bf16.mxu0 %v9932_v38  ;;  %v3155_v50 = vpop.permute.xlu1 %3154  ;;  %v3150_v54 = vpop.permute.xlu0 %3149  ;;  %v2792_v38 = vmul.f32 %v9946_v42, %v2656_v59 }
 0x48b   : > { %v3460_v55 = vmul.f32 %v3155_v50, %v2788_v45  ;;  %v3459_v56 = vmul.f32 %v3150_v54, %v2787_v46  ;;  %7156 = vmatprep.mubr.bf16.mxu1 %v9988_v49  ;;  %v2802_v54 = vmul.f32 %v9946_v42, %v2666_v58  ;;  %v2677_v58 = vld [vmem:[#allocation2 + $0x220] sm:$0xff] }
 0x48d   : > { %v9995_v63 = vpack.c.bf16 %v3460_v55, %v3459_v56  ;;  %v2801_v55 = vmul.f32 %v9946_v42, %v2665_v44  ;;  %v2668_v56 = vld [vmem:[#allocation2 + $0x1d8] sm:$0xff] }
 0x48e   : > { %v3165_v51 = vpop.permute.xlu1 %3164  ;;  %v3160_v2 = vpop.permute.xlu0 %3159 }
 0x48f   : > { %v3462_v1 = vmul.f32 %v3165_v51, %v2790_v57  ;;  %v3461_v10 = vmul.f32 %v3160_v2, %v2789_v30  ;;  %v2667_v57 = vld [vmem:[#allocation2 + $0x1d0] sm:$0xff] }
 0x490   : > { %7157 = vmatmul.mubr.bf16.gmra.mrb[24].mxu1 %v9995_v63  ;;  %v2803_v2 = vmul.f32 %v9946_v42, %v2667_v57  ;;  %v2680_v57 = vld [vmem:[#allocation2 + $0x238] sm:$0xff] }
 0x491   : > { %v10000_v61 = vpack.c.bf16 %v3462_v1, %v3461_v10  ;;  %7253 = vmatmul.mubr.bf16.gmra.mrb[72].mxu0 %v9942_v37  ;;  %v2670_v1 = vld [vmem:[#allocation2 + $0x1e8] sm:$0xff]  ;;  %v2669_v10 = vld [vmem:[#allocation2 + $0x1e0] sm:$0xff] }
 0x492   : > { %7256 = vmatprep.mubr.bf16.mxu0 %v9952_v53  ;;  %v3175_v6 = vpop.permute.xlu1 %3174  ;;  %v3170_v52 = vpop.permute.xlu0 %3169  ;;  %v2796_v53 = vmul.f32 %v9946_v42, %v2660_v13  ;;  %v2806_v5 = vmul.f32 %v9946_v42, %v2670_v1 }
 0x493   : > { %v3464_v8 = vmul.f32 %v3175_v6, %v2792_v38  ;;  %v3463_v9 = vmul.f32 %v3170_v52, %v2791_v3  ;;  %7160 = vmatprep.mubr.bf16.mxu1 %v10000_v61 }
 0x495   : > { %v10007_v16 = vpack.c.bf16 %v3464_v8, %v3463_v9  ;;  %v2805_v8 = vmul.f32 %v9946_v42, %v2669_v10  ;;  %v2672_v9 = vld [vmem:[#allocation2 + $0x1f8] sm:$0xff] }
 0x496   : > { %v3185_v17 = vpop.permute.xlu1 %3184  ;;  %v3180_v19 = vpop.permute.xlu0 %3179 }
 0x497   : > { %v3466_v20 = vmul.f32 %v3185_v17, %v2794_v11  ;;  %v3465_v37 = vmul.f32 %v3180_v19, %v2793_v12  ;;  %v2729_v11 = vcombine.high %v9823_v26, %v9823_v26  ;;  %v2671_v12 = vld [vmem:[#allocation2 + $0x1f0] sm:$0xff] }
 0x498   : > { %7161 = vmatmul.mubr.bf16.gmra.mrb[28].mxu1 %v10007_v16 }
 0x499   : > { %v10012_v24 = vpack.c.bf16 %v3466_v20, %v3465_v37  ;;  %7257 = vmatmul.mubr.bf16.gmra.mrb[76].mxu0 %v9959_v0  ;;  %v2807_v20 = vmul.f32 %v9946_v42, %v2671_v12  ;;  %v10050_v37 = vrot.slane %v2729_v11, %v9825_v27 }
 0x49a   : > { %7260 = vmatprep.mubr.bf16.mxu0 %v9964_v7  ;;  %v3195_v25 = vpop.permute.xlu1 %3194  ;;  %v3190_v28 = vpop.permute.xlu0 %3189  ;;  %v2800_v7 = vmul.f32 %v9946_v42, %v2664_v35 }
 0x49b   : > { %v3468_v31 = vmul.f32 %v3195_v25, %v2796_v53  ;;  %v3467_v33 = vmul.f32 %v3190_v28, %v2795_v15  ;;  %7164 = vmatprep.mubr.bf16.mxu1 %v10012_v24  ;;  %v2674_v53 = vld [vmem:[#allocation2 + $0x208] sm:$0xff]  ;;  %v2673_v15 = vld [vmem:[#allocation2 + $0x200] sm:$0xff]  ;;  %v2816_v1 = vmul.f32 %v10050_v37, %v2680_v57 }
 0x49c   : > { %v2809_v27 = vmul.f32 %v10050_v37, %v2673_v15 }
 0x49d   : > { %v10019_v39 = vpack.c.bf16 %v3468_v31, %v3467_v33  ;;  %v2676_v33 = vld [vmem:[#allocation2 + $0x218] sm:$0xff] }
 0x49e   : > { %v3205_v22 = vpop.permute.xlu1 %3204  ;;  %v3200_v40 = vpop.permute.xlu0 %3199 }
 0x49f   : > { %v3470_v62 = vmul.f32 %v3205_v22, %v2798_v34  ;;  %v3469_v0 = vmul.f32 %v3200_v40, %v2797_v21  ;;  %v2675_v34 = vld [vmem:[#allocation2 + $0x210] sm:$0xff] }
 0x4a0   : > { %7165 = vmatmul.mubr.bf16.gmra.mrb[32].mxu1 %v10019_v39 }
 0x4a1   : > { %v10024_v45 = vpack.c.bf16 %v3470_v62, %v3469_v0  ;;  %7261 = vmatmul.mubr.bf16.gmra.mrb[80].mxu0 %v9971_v18  ;;  %v2812_v62 = vmul.f32 %v10050_v37, %v2676_v33  ;;  %v2811_v0 = vmul.f32 %v10050_v37, %v2675_v34 }
 0x4a2   : > { %7264 = vmatprep.mubr.bf16.mxu0 %v9976_v29  ;;  %v3215_v46 = vpop.permute.xlu1 %3214  ;;  %v3210_v47 = vpop.permute.xlu0 %3209  ;;  %v2804_v29 = vmul.f32 %v9946_v42, %v2668_v56 }
 0x4a3   : > { %v3472_v48 = vmul.f32 %v3215_v46, %v2800_v7  ;;  %v3471_v50 = vmul.f32 %v3210_v47, %v2799_v43  ;;  %7168 = vmatprep.mubr.bf16.mxu1 %v10024_v45  ;;  %v2678_v43 = vld [vmem:[#allocation2 + $0x228] sm:$0xff] }
 0x4a5   : > { %v10031_v30 = vpack.c.bf16 %v3472_v48, %v3471_v50 }
 0x4a6   : > { %v3225_v59 = vpop.permute.xlu1 %3224  ;;  %v3220_v60 = vpop.permute.xlu0 %3219 }
 0x4a7   : > { %v3474_v51 = vmul.f32 %v3225_v59, %v2802_v54  ;;  %v3473_v18 = vmul.f32 %v3220_v60, %v2801_v55  ;;  %v2814_v54 = vmul.f32 %v10050_v37, %v2678_v43  ;;  %v2813_v55 = vmul.f32 %v10050_v37, %v2677_v58  ;;  %v2679_v59 = vld [vmem:[#allocation2 + $0x230] sm:$0xff]  ;;  %v2688_v43 = vld [vmem:[#allocation2 + $0x278] sm:$0xff] }
 0x4a8   : > { %7169 = vmatmul.mubr.bf16.gmra.mrb[36].mxu1 %v10031_v30  ;;  %v2815_v10 = vmul.f32 %v10050_v37, %v2679_v59  ;;  %v2687_v58 = vld [vmem:[#allocation2 + $0x270] sm:$0xff] }
 0x4a9   : > { %v10036_v38 = vpack.c.bf16 %v3474_v51, %v3473_v18  ;;  %7265 = vmatmul.mubr.bf16.gmra.mrb[84].mxu0 %v9983_v41  ;;  %v2823_v57 = vmul.f32 %v10050_v37, %v2687_v58  ;;  %v2695_v58 = vld [vmem:[#allocation2 + $0x2b0] sm:$0xff] }
 0x4aa   : > { %7268 = vmatprep.mubr.bf16.mxu0 %v9988_v49  ;;  %v3235_v3 = vpop.permute.xlu1 %3234  ;;  %v3230_v4 = vpop.permute.xlu0 %3229  ;;  %v2808_v49 = vmul.f32 %v9946_v42, %v2672_v9  ;;  %v2810_v42 = vmul.f32 %v10050_v37, %v2674_v53 }
 0x4ab   : > { %v3476_v6 = vmul.f32 %v3235_v3, %v2804_v29  ;;  %v3475_v52 = vmul.f32 %v3230_v4, %v2803_v2  ;;  %7172 = vmatprep.mubr.bf16.mxu1 %v10036_v38  ;;  %v2682_v4 = vld [vmem:[#allocation2 + $0x248] sm:$0xff] }
 0x4ac   : > { %v10060_v31 = vpop.f32.mrb[0].mxu0  ;;  %v2818_v12 = vmul.f32 %v10050_v37, %v2682_v4 }
 0x4ad   : > { %v10045_v13 = vpack.c.bf16 %v3476_v6, %v3475_v52  ;;  %v10062_v21 = vpop.f32.mrb[1].mxu0 }
 0x4ae   : > { %v3245_v41 = vpop.permute.xlu1 %3244  ;;  %v3240_v14 = vpop.permute.xlu0 %3239 }
 0x4af   : > { %v3478_v17 = vmul.f32 %v3245_v41, %v2806_v5  ;;  %v3477_v19 = vmul.f32 %v3240_v14, %v2805_v8  ;;  %v2681_v5 = vld [vmem:[#allocation2 + $0x240] sm:$0xff] }
 0x4b0   : > { %7173 = vmatmul.mubr.bf16.gmra.mrb[40].mxu1 %v10045_v13  ;;  %v2817_v41 = vmul.f32 %v10050_v37, %v2681_v5 }
 0x4b1   : > { %v10053_v23 = vpack.c.bf16 %v3478_v17, %v3477_v19  ;;  %7269 = vmatmul.mubr.bf16.gmra.mrb[88].mxu0 %v9995_v63  ;;  %v10066_v63 = vpop.f32.mrb[2].mxu0  ;;  %v2683_v17 = vld [vmem:[#allocation2 + $0x250] sm:$0xff] }
 0x4b2   : > { %7272 = vmatprep.mubr.bf16.mxu0 %v10000_v61  ;;  %v3255_v26 = vpop.permute.xlu1 %3254  ;;  %v3250_v32 = vpop.permute.xlu0 %3249 }
 0x4b3   : > { %v3480_v25 = vmul.f32 %v3255_v26, %v2808_v49  ;;  %v3479_v28 = vmul.f32 %v3250_v32, %v2807_v20  ;;  %7176 = vmatprep.mubr.bf16.mxu1 %v10053_v23  ;;  %v10070_v7 = vpop.f32.mrb[3].mxu0  ;;  %v2684_v49 = vld [vmem:[#allocation2 + $0x258] sm:$0xff] }
 0x4b4   : > { %v10080_v56 = vpop.f32.mrb[4].mxu0  ;;  %v2820_v32 = vmul.f32 %v10050_v37, %v2684_v49 }
 0x4b5   : > { %v10064_v35 = vpack.c.bf16 %v3480_v25, %v3479_v28  ;;  %v10082_v60 = vpop.f32.mrb[5].mxu0  ;;  %v2819_v25 = vmul.f32 %v10050_v37, %v2683_v17 }
 0x4b6   : > { %v3265_v61 = vpop.permute.xlu1 %3264  ;;  %v3260_v36 = vpop.permute.xlu0 %3259 }
 0x4b7   : > { %v3482_v22 = vmul.f32 %v3265_v61, %v2810_v42  ;;  %v3481_v40 = vmul.f32 %v3260_v36, %v2809_v27  ;;  %v2686_v42 = vld [vmem:[#allocation2 + $0x268] sm:$0xff]  ;;  %v2685_v27 = vld [vmem:[#allocation2 + $0x260] sm:$0xff] }
 0x4b8   : > { %7177 = vmatmul.mubr.bf16.gmra.mrb[44].mxu1 %v10064_v35 }
 0x4b9   : > { %v10073_v44 = vpack.c.bf16 %v3482_v22, %v3481_v40  ;;  %7273 = vmatmul.mubr.bf16.gmra.mrb[92].mxu0 %v10007_v16  ;;  %v10086_v16 = vpop.f32.mrb[6].mxu0  ;;  %v2822_v40 = vmul.f32 %v10050_v37, %v2686_v42 }
 0x4ba   : > { %7276 = vmatprep.mubr.bf16.mxu0 %v10012_v24  ;;  %v3275_v46 = vpop.permute.xlu1 %3274  ;;  %v3270_v47 = vpop.permute.xlu0 %3269 }
 0x4bb   : > { %v3484_v48 = vmul.f32 %v3275_v46, %v2812_v62  ;;  %v3483_v50 = vmul.f32 %v3270_v47, %v2811_v0  ;;  %7180 = vmatprep.mubr.bf16.mxu1 %v10073_v44  ;;  %v10090_v3 = vpop.f32.mrb[7].mxu0  ;;  %v2821_v62 = vmul.f32 %v10050_v37, %v2685_v27 }
 0x4bc   : > { %v10100_v14 = vpop.f32.mrb[8].mxu0 }
 0x4bd   : > { %v10084_v51 = vpack.c.bf16 %v3484_v48, %v3483_v50  ;;  %v10102_v19 = vpop.f32.mrb[9].mxu0 }
 0x4be   : > { %v3285_v24 = vpop.permute.xlu1 %3284  ;;  %v3280_v18 = vpop.permute.xlu0 %3279 }
 0x4bf   : > { %v3486_v29 = vmul.f32 %v3285_v24, %v2814_v54  ;;  %v3485_v2 = vmul.f32 %v3280_v18, %v2813_v55  ;;  %v2824_v55 = vmul.f32 %v10050_v37, %v2688_v43  ;;  %v2690_v24 = vld [vmem:[#allocation2 + $0x288] sm:$0xff]  ;;  %v2689_v18 = vld [vmem:[#allocation2 + $0x280] sm:$0xff]  ;;  %v2696_v43 = vld [vmem:[#allocation2 + $0x2b8] sm:$0xff] }
 0x4c0   : > { %7181 = vmatmul.mubr.bf16.gmra.mrb[48].mxu1 %v10084_v51  ;;  %v2826_v5 = vmul.f32 %v10050_v37, %v2690_v24  ;;  %v2831_v24 = vmul.f32 %v10050_v37, %v2695_v58 }
 0x4c1   : > { %v10093_v6 = vpack.c.bf16 %v3486_v29, %v3485_v2  ;;  %7277 = vmatmul.mubr.bf16.gmra.mrb[96].mxu0 %v10019_v39  ;;  %v10106_v39 = vpop.f32.mrb[10].mxu0 }
 0x4c2   : > { %7280 = vmatprep.mubr.bf16.mxu0 %v10024_v45  ;;  %v3295_v52 = vpop.permute.xlu1 %3294  ;;  %v3290_v8 = vpop.permute.xlu0 %3289 }
 0x4c3   : > { %v3488_v9 = vmul.f32 %v3295_v52, %v2816_v1  ;;  %v3487_v11 = vmul.f32 %v3290_v8, %v2815_v10  ;;  %7184 = vmatprep.mubr.bf16.mxu1 %v10093_v6  ;;  %v10110_v28 = vpop.f32.mrb[11].mxu0  ;;  %v2825_v52 = vmul.f32 %v10050_v37, %v2689_v18 }
 0x4c4   : > { %v10120_v0 = vpop.f32.mrb[12].mxu0 }
 0x4c5   : > { %v10104_v20 = vpack.c.bf16 %v3488_v9, %v3487_v11  ;;  %v10122_v46 = vpop.f32.mrb[13].mxu0  ;;  %v2692_v9 = vld [vmem:[#allocation2 + $0x298] sm:$0xff]  ;;  %v2691_v11 = vld [vmem:[#allocation2 + $0x290] sm:$0xff] }
 0x4c6   : > { %v3305_v45 = vpop.permute.xlu1 %3304  ;;  %v3300_v53 = vpop.permute.xlu0 %3299 }
 0x4c7   : > { %v3490_v15 = vmul.f32 %v3305_v45, %v2818_v12  ;;  %v3489_v26 = vmul.f32 %v3300_v53, %v2817_v41  ;;  %v2828_v53 = vmul.f32 %v10050_v37, %v2692_v9 }
 0x4c8   : > { %7185 = vmatmul.mubr.bf16.gmra.mrb[52].mxu1 %v10104_v20 }
 0x4c9   : > { %v10113_v33 = vpack.c.bf16 %v3490_v15, %v3489_v26  ;;  %7281 = vmatmul.mubr.bf16.gmra.mrb[100].mxu0 %v10031_v30  ;;  %v10126_v30 = vpop.f32.mrb[14].mxu0  ;;  %v2827_v15 = vmul.f32 %v10050_v37, %v2691_v11 }
 0x4ca   : > { %7284 = vmatprep.mubr.bf16.mxu0 %v10036_v38  ;;  %v3315_v34 = vpop.permute.xlu1 %3314  ;;  %v3310_v61 = vpop.permute.xlu0 %3309 }
 0x4cb   : > { %v3492_v36 = vmul.f32 %v3315_v34, %v2820_v32  ;;  %v3491_v22 = vmul.f32 %v3310_v61, %v2819_v25  ;;  %7188 = vmatprep.mubr.bf16.mxu1 %v10113_v33  ;;  %v10130_v59 = vpop.f32.mrb[15].mxu0  ;;  %v2694_v32 = vld [vmem:[#allocation2 + $0x2a8] sm:$0xff]  ;;  %v2693_v25 = vld [vmem:[#allocation2 + $0x2a0] sm:$0xff] }
 0x4cc   : > { %v10140_v8 = vpop.f32.mrb[16].mxu0 }
 0x4cd   : > { %v10124_v47 = vpack.c.bf16 %v3492_v36, %v3491_v22  ;;  %v10142_v12 = vpop.f32.mrb[17].mxu0  ;;  %v2830_v22 = vmul.f32 %v10050_v37, %v2694_v32 }
 0x4ce   : > { %v3325_v38 = vpop.permute.xlu1 %3324  ;;  %v3320_v48 = vpop.permute.xlu0 %3319 }
 0x4cf   : > { %v3494_v50 = vmul.f32 %v3325_v38, %v2822_v40  ;;  %v3493_v54 = vmul.f32 %v3320_v48, %v2821_v62  ;;  %v2829_v40 = vmul.f32 %v10050_v37, %v2693_v25 }
 0x4d0   : > { %7189 = vmatmul.mubr.bf16.gmra.mrb[56].mxu1 %v10124_v47 }
 0x4d1   : > { %v10133_v29 = vpack.c.bf16 %v3494_v50, %v3493_v54  ;;  %7285 = vmatmul.mubr.bf16.gmra.mrb[104].mxu0 %v10045_v13  ;;  %v10146_v13 = vpop.f32.mrb[18].mxu0 }
 0x4d2   : > { %7288 = vmatprep.mubr.bf16.mxu0 %v10053_v23  ;;  %v3335_v2 = vpop.permute.xlu1 %3334  ;;  %v3330_v1 = vpop.permute.xlu0 %3329 }
 0x4d3   : > { %v3496_v10 = vmul.f32 %v3335_v2, %v2824_v55  ;;  %v3495_v4 = vmul.f32 %v3330_v1, %v2823_v57  ;;  %7192 = vmatprep.mubr.bf16.mxu1 %v10133_v29  ;;  %v10150_v26 = vpop.f32.mrb[19].mxu0  ;;  %v2832_v57 = vmul.f32 %v10050_v37, %v2696_v43  ;;  %v2698_v2 = vld [vmem:[#allocation2 + $0x2c8] sm:$0xff]  ;;  %v2697_v1 = vld [vmem:[#allocation2 + $0x2c0] sm:$0xff] }
 0x4d4   : > { %v10160_v62 = vpop.f32.mrb[20].mxu0  ;;  %v2834_v11 = vmul.f32 %v10050_v37, %v2698_v2  ;;  %v2704_v2 = vld [vmem:[#allocation2 + $0x2f8] sm:$0xff] }
 0x4d5   : > { %v10144_v41 = vpack.c.bf16 %v3496_v10, %v3495_v4  ;;  %v10162_v38 = vpop.f32.mrb[21].mxu0 }
 0x4d6   : > { %v3345_v23 = vpop.permute.xlu1 %3344  ;;  %v3340_v49 = vpop.permute.xlu0 %3339 }
 0x4d7   : > { %v3498_v17 = vmul.f32 %v3345_v23, %v2826_v5  ;;  %v3497_v45 = vmul.f32 %v3340_v49, %v2825_v52  ;;  %v2833_v23 = vmul.f32 %v10050_v37, %v2697_v1  ;;  %v2703_v1 = vld [vmem:[#allocation2 + $0x2f0] sm:$0xff] }
 0x4d8   : > { %7193 = vmatmul.mubr.bf16.gmra.mrb[60].mxu1 %v10144_v41 }
 0x4d9   : > { %v10153_v42 = vpack.c.bf16 %v3498_v17, %v3497_v45  ;;  %7289 = vmatmul.mubr.bf16.gmra.mrb[108].mxu0 %v10064_v35  ;;  %v10166_v35 = vpop.f32.mrb[22].mxu0  ;;  %v2700_v17 = vld [vmem:[#allocation2 + $0x2d8] sm:$0xff]  ;;  %v2699_v45 = vld [vmem:[#allocation2 + $0x2d0] sm:$0xff] }
 0x4da   : > { %7292 = vmatprep.mubr.bf16.mxu0 %v10073_v44  ;;  %v3355_v27 = vpop.permute.xlu1 %3354  ;;  %v3350_v34 = vpop.permute.xlu0 %3349 }
 0x4db   : > { %v3500_v61 = vmul.f32 %v3355_v27, %v2828_v53  ;;  %v3499_v36 = vmul.f32 %v3350_v34, %v2827_v15  ;;  %7196 = vmatprep.mubr.bf16.mxu1 %v10153_v42  ;;  %v10170_v18 = vpop.f32.mrb[23].mxu0  ;;  %v2836_v34 = vmul.f32 %v10050_v37, %v2700_v17  ;;  %v2839_v17 = vmul.f32 %v10050_v37, %v2703_v1 }
 0x4dc   : > { %v10177_v49 = vpop.f32.mrb[24].mxu0 }
 0x4dd   : > { %v10164_v48 = vpack.c.bf16 %v3500_v61, %v3499_v36  ;;  %v10179_v53 = vpop.f32.mrb[25].mxu0  ;;  %v2835_v61 = vmul.f32 %v10050_v37, %v2699_v45 }
 0x4de   : > { %v3365_v44 = vpop.permute.xlu1 %3364  ;;  %v3360_v50 = vpop.permute.xlu0 %3359 }
 0x4df   : > { %v3502_v54 = vmul.f32 %v3365_v44, %v2830_v22  ;;  %v3501_v55 = vmul.f32 %v3360_v50, %v2829_v40  ;;  %v10181_v32 = vpop.f32.mrb[26].mxu0  ;;  %v2702_v22 = vld [vmem:[#allocation2 + $0x2e8] sm:$0xff]  ;;  %v2701_v40 = vld [vmem:[#allocation2 + $0x2e0] sm:$0xff] }
 0x4e0   : > { %7197 = vmatmul.mubr.bf16.gmra.mrb[64].mxu1 %v10164_v48  ;;  %v10185_v36 = vpop.f32.mrb[27].mxu0 }
 0x4e1   : > { %v3555_v10 = vpack.c.bf16 %v3502_v54, %v3501_v55  ;;  %7293 = vmatmul.mubr.bf16.gmra.mrb[112].mxu0 %v10084_v51  ;;  %v2838_v55 = vmul.f32 %v10050_v37, %v2702_v22 }
 0x4e2   : > { %7296 = vmatprep.mubr.bf16.mxu0 %v10093_v6  ;;  %v3375_v4 = vpop.permute.xlu1 %3374  ;;  %v3370_v5 = vpop.permute.xlu0 %3369 }
 0x4e3   : > { %v3504_v52 = vmul.f32 %v3375_v4, %v2832_v57  ;;  %v3503_v9 = vmul.f32 %v3370_v5, %v2831_v24  ;;  %7200 = vmatprep.mubr.bf16.mxu1 %v3555_v10  ;;  %v2837_v57 = vmul.f32 %v10050_v37, %v2701_v40 }
 0x4e4   : > { %v10191_v24 = vpop.f32.mrb[28].mxu0 }
 0x4e5   : > { %v3556_v15 = vpack.c.bf16 %v3504_v52, %v3503_v9  ;;  %v10193_v4 = vpop.f32.mrb[29].mxu0 }
 0x4e6   : > { %v3385_v51 = vpop.permute.xlu1 %3384  ;;  %v3380_v6 = vpop.permute.xlu0 %3379 }
 0x4e7   : > { %v3506_v25 = vmul.f32 %v3385_v51, %v2834_v11  ;;  %v3505_v27 = vmul.f32 %v3380_v6, %v2833_v23  ;;  %v10195_v52 = vpop.f32.mrb[30].mxu0  ;;  %v2840_v23 = vmul.f32 %v10050_v37, %v2704_v2 }
 0x4e8   : > { %7201 = vmatmul.mubr.bf16.gmra.mrb[68].mxu1 %v3556_v15  ;;  %v10199_v45 = vpop.f32.mrb[31].mxu0 }
 0x4e9   : > { %v3557_v43 = vpack.c.bf16 %v3506_v25, %v3505_v27  ;;  %7297 = vmatmul.mubr.bf16.gmra.mrb[116].mxu0 %v10104_v20 }
 0x4ea   : > { %7300 = vmatprep.mubr.bf16.mxu0 %v10113_v33  ;;  %v3395_v58 = vpop.permute.xlu1 %3394  ;;  %v3390_v44 = vpop.permute.xlu0 %3389 }
 0x4eb   : > { %v3508_v50 = vmul.f32 %v3395_v58, %v2836_v34  ;;  %v3507_v54 = vmul.f32 %v3390_v44, %v2835_v61  ;;  %7204 = vmatprep.mubr.bf16.mxu1 %v3557_v43 }
 0x4ed   : > { %v3558_v5 = vpack.c.bf16 %v3508_v50, %v3507_v54 }
 0x4ee   : > { %v3405_v20 = vpop.permute.xlu1 %3404  ;;  %v3400_v33 = vpop.permute.xlu0 %3399 }
 0x4ef   : > { %v3510_v9 = vmul.f32 %v3405_v20, %v2838_v55  ;;  %v3509_v11 = vmul.f32 %v3400_v33, %v2837_v57 }
 0x4f0   : > { %7205 = vmatmul.mubr.bf16.gmra.mrb[72].mxu1 %v3558_v5 }
 0x4f1   : > { %v3559_v51 = vpack.c.bf16 %v3510_v9, %v3509_v11  ;;  %7301 = vmatmul.mubr.bf16.gmra.mrb[120].mxu0 %v10124_v47 }
 0x4f2   : > { %7304 = vmatprep.mubr.bf16.mxu0 %v10133_v29  ;;  %v3415_v6 = vpop.permute.xlu1 %3414  ;;  %v3410_v25 = vpop.permute.xlu0 %3409 }
 0x4f3   : > { %v3512_v27 = vmul.f32 %v3415_v6, %v2840_v23  ;;  %v3511_v34 = vmul.f32 %v3410_v25, %v2839_v17  ;;  %7208 = vmatprep.mubr.bf16.mxu1 %v3559_v51 }
 0x4f5   : > { %v3560_v61 = vpack.c.bf16 %v3512_v27, %v3511_v34 }
 0x4f8   : > { %7209 = vmatmul.mubr.bf16.gmra.mrb[76].mxu1 %v3560_v61 }
 0x4f9   : > { %7305 = vmatmul.mubr.bf16.gmra.mrb[124].mxu0 %v10144_v41 }
 0x4fa   : > { %7308 = vmatprep.mubr.bf16.mxu0 %v10153_v42 }
 0x501   : > { %7309 = vmatmul.mubr.bf16.gmra.mrb[128].mxu0 %v10164_v48 }
 0x502   : > { %7312 = vmatprep.mubr.bf16.mxu0 %v3555_v10 }
 0x509   : > { %7313 = vmatmul.mubr.bf16.gmra.mrb[132].mxu0 %v3556_v15 }
 0x50a   : > { %7316 = vmatprep.mubr.bf16.mxu0 %v3557_v43 }
 0x511   : > { %7317 = vmatmul.mubr.bf16.gmra.mrb[136].mxu0 %v3558_v5 }
 0x512   : > { %7320 = vmatprep.mubr.bf16.mxu0 %v3559_v51 }
 0x514   : > { %v7118_v37 = vpop.f32.mrb[32].mxu0 }
 0x515   : > { %v4766_v47 = vsub.f32 %v10060_v31, %v7118_v37  ;;  %v3900_v29 = vpop.f32.mrb[33].mxu0 }
 0x516   : > { %v4764_v22 = vsub.f32 %v10062_v21, %v3900_v29  ;;  %v7119_v40 = vpop.f32.mrb[34].mxu0 }
 0x517   : > { %v4767_v58 = vsub.f32 %v10066_v63, %v7119_v40  ;;  %v3903_v44 = vpop.f32.mrb[35].mxu0 }
 0x518   : > { %v4765_v41 = vsub.f32 %v10070_v7, %v3903_v44 }
 0x519   : > { %v4861_v42 = vpack.c.bf16 %v4767_v58, %v4766_v47  ;;  %7321 = vmatmul.mubr.bf16.gmra.mrb[140].mxu0 %v3560_v61 }
 0x51a   : > { %v4860_v48 = vpack.c.bf16 %v4765_v41, %v4764_v22 }
 0x51c   : > { %v7122_v10 = vpop.f32.mrb[36].mxu0  ;;  %7340 = vmatprep.mubr.bf16.mxu1 %v4860_v48 }
 0x51d   : > { %v4770_v15 = vsub.f32 %v10080_v56, %v7122_v10  ;;  %v3916_v43 = vpop.f32.mrb[37].mxu0  ;;  %7341 = vmatmul.mubr.bf16.vlgmr.msra.gmra.mrb[80].mxu1 %v4861_v42 }
 0x51e   : > { %v4768_v50 = vsub.f32 %v10082_v60, %v3916_v43  ;;  %v7123_v54 = vpop.f32.mrb[38].mxu0 }
 0x51f   : > { %v4771_v55 = vsub.f32 %v10086_v16, %v7123_v54  ;;  %v3919_v57 = vpop.f32.mrb[39].mxu0 }
 0x520   : > { %v4769_v2 = vsub.f32 %v10090_v3, %v3919_v57 }
 0x521   : > { %v4863_v1 = vpack.c.bf16 %v4771_v55, %v4770_v15 }
 0x522   : > { %v4862_v5 = vpack.c.bf16 %v4769_v2, %v4768_v50 }
 0x524   : > { %v7126_v20 = vpop.f32.mrb[40].mxu0  ;;  %7344 = vmatprep.mubr.bf16.mxu1 %v4862_v5 }
 0x525   : > { %v4774_v33 = vsub.f32 %v10100_v14, %v7126_v20  ;;  %v3932_v9 = vpop.f32.mrb[41].mxu0  ;;  %7345 = vmatmul.mubr.bf16.gmra.mrb[84].mxu1 %v4863_v1 }
 0x526   : > { %v4772_v11 = vsub.f32 %v10102_v19, %v3932_v9  ;;  %v7127_v23 = vpop.f32.mrb[42].mxu0 }
 0x527   : > { %v4775_v17 = vsub.f32 %v10106_v39, %v7127_v23  ;;  %v3935_v51 = vpop.f32.mrb[43].mxu0 }
 0x528   : > { %v4773_v6 = vsub.f32 %v10110_v28, %v3935_v51 }
 0x529   : > { %v4865_v25 = vpack.c.bf16 %v4775_v17, %v4774_v33 }
 0x52a   : > { %v4864_v27 = vpack.c.bf16 %v4773_v6, %v4772_v11 }
 0x52c   : > { %v7130_v34 = vpop.f32.mrb[44].mxu0  ;;  %7348 = vmatprep.mubr.bf16.mxu1 %v4864_v27 }
 0x52d   : > { %v4778_v61 = vsub.f32 %v10120_v0, %v7130_v34  ;;  %v3948_v37 = vpop.f32.mrb[45].mxu0  ;;  %7349 = vmatmul.mubr.bf16.gmra.mrb[88].mxu1 %v4865_v25 }
 0x52e   : > { %v4776_v47 = vsub.f32 %v10122_v46, %v3948_v37  ;;  %v7131_v29 = vpop.f32.mrb[46].mxu0 }
 0x52f   : > { %v4779_v22 = vsub.f32 %v10126_v30, %v7131_v29  ;;  %v3951_v40 = vpop.f32.mrb[47].mxu0 }
 0x530   : > { %v4777_v58 = vsub.f32 %v10130_v59, %v3951_v40 }
 0x531   : > { %v4867_v44 = vpack.c.bf16 %v4779_v22, %v4778_v61 }
 0x532   : > { %v4866_v41 = vpack.c.bf16 %v4777_v58, %v4776_v47 }
 0x533   : > { %v7134_v42 = vpop.f32.mrb[0].mxu1 }
 0x534   : > { %v4782_v48 = vsub.f32 %v10140_v8, %v7134_v42  ;;  %v3964_v10 = vpop.f32.mrb[1].mxu1  ;;  %v10223_v15 = vpop.f32.mrb[48].mxu0  ;;  %7352 = vmatprep.mubr.bf16.mxu1 %v4866_v41 }
 0x535   : > { %12161 = vst [vmem:[#allocation52_spill] sm:$0xff] %v10223_v15  ;;  %v4780_v43 = vsub.f32 %v10142_v12, %v3964_v10  ;;  %v7135_v50 = vpop.f32.mrb[2].mxu1  ;;  %v10226_v54 = vpop.f32.mrb[49].mxu0  ;;  %7353 = vmatmul.mubr.bf16.gmra.mrb[92].mxu1 %v4867_v44 }
 0x536   : > { %12162 = vst [vmem:[#allocation53_spill] sm:$0xff] %v10226_v54  ;;  %v4783_v55 = vsub.f32 %v10146_v13, %v7135_v50  ;;  %v3967_v57 = vpop.f32.mrb[3].mxu1  ;;  %v10229_v2 = vpop.f32.mrb[50].mxu0 }
 0x537   : > { %12163 = vst [vmem:[#allocation54_spill] sm:$0xff] %v10229_v2  ;;  %v4781_v1 = vsub.f32 %v10150_v26, %v3967_v57  ;;  %v10232_v5 = vpop.f32.mrb[51].mxu0 }
 0x538   : > { %12164 = vst [vmem:[#allocation55_spill] sm:$0xff] %v10232_v5  ;;  %v4869_v20 = vpack.c.bf16 %v4783_v55, %v4782_v48 }
 0x539   : > { %v4868_v33 = vpack.c.bf16 %v4781_v1, %v4780_v43 }
 0x53b   : > { %v7138_v9 = vpop.f32.mrb[4].mxu1  ;;  %7356 = vmatprep.mubr.bf16.mxu1 %v4868_v33 }
 0x53c   : > { %v4786_v11 = vsub.f32 %v10160_v62, %v7138_v9  ;;  %v3980_v23 = vpop.f32.mrb[5].mxu1  ;;  %v10235_v17 = vpop.f32.mrb[52].mxu0 }
 0x53d   : > { %12165 = vst [vmem:[#allocation56_spill] sm:$0xff] %v10235_v17  ;;  %v4784_v51 = vsub.f32 %v10162_v38, %v3980_v23  ;;  %v7139_v6 = vpop.f32.mrb[6].mxu1  ;;  %v10238_v25 = vpop.f32.mrb[53].mxu0  ;;  %7357 = vmatmul.mubr.bf16.gmra.mrb[96].mxu1 %v4869_v20 }
 0x53e   : > { %12166 = vst [vmem:[#allocation57_spill] sm:$0xff] %v10238_v25  ;;  %v4787_v27 = vsub.f32 %v10166_v35, %v7139_v6  ;;  %v3983_v34 = vpop.f32.mrb[7].mxu1  ;;  %v10241_v61 = vpop.f32.mrb[54].mxu0 }
 0x53f   : > { %12167 = vst [vmem:[#allocation58_spill] sm:$0xff] %v10241_v61  ;;  %v4785_v37 = vsub.f32 %v10170_v18, %v3983_v34  ;;  %v10244_v47 = vpop.f32.mrb[55].mxu0 }
 0x540   : > { %12168 = vst [vmem:[#allocation59_spill] sm:$0xff] %v10244_v47  ;;  %v4871_v29 = vpack.c.bf16 %v4787_v27, %v4786_v11 }
 0x541   : > { %v4870_v22 = vpack.c.bf16 %v4785_v37, %v4784_v51 }
 0x543   : > { %v7142_v40 = vpop.f32.mrb[8].mxu1  ;;  %7360 = vmatprep.mubr.bf16.mxu1 %v4870_v22 }
 0x544   : > { %v4790_v58 = vsub.f32 %v10177_v49, %v7142_v40  ;;  %v3996_v44 = vpop.f32.mrb[9].mxu1  ;;  %v10247_v41 = vpop.f32.mrb[56].mxu0 }
 0x545   : > { %12169 = vst [vmem:[#allocation60_spill] sm:$0xff] %v10247_v41  ;;  %v4788_v42 = vsub.f32 %v10179_v53, %v3996_v44  ;;  %v7143_v48 = vpop.f32.mrb[10].mxu1  ;;  %v10250_v10 = vpop.f32.mrb[57].mxu0  ;;  %7361 = vmatmul.mubr.bf16.gmra.mrb[100].mxu1 %v4871_v29 }
 0x546   : > { %12170 = vst [vmem:[#allocation61_spill] sm:$0xff] %v10250_v10  ;;  %v4791_v43 = vsub.f32 %v10181_v32, %v7143_v48  ;;  %v3999_v50 = vpop.f32.mrb[11].mxu1  ;;  %v10253_v55 = vpop.f32.mrb[58].mxu0 }
 0x547   : > { %12171 = vst [vmem:[#allocation62_spill] sm:$0xff] %v10253_v55  ;;  %v4789_v57 = vsub.f32 %v10185_v36, %v3999_v50  ;;  %v10256_v1 = vpop.f32.mrb[59].mxu0 }
 0x548   : > { %12172 = vst [vmem:[#allocation63_spill] sm:$0xff] %v10256_v1  ;;  %v4873_v20 = vpack.c.bf16 %v4791_v43, %v4790_v58 }
 0x549   : > { %v4872_v33 = vpack.c.bf16 %v4789_v57, %v4788_v42 }
 0x54b   : > { %v7146_v9 = vpop.f32.mrb[12].mxu1  ;;  %7364 = vmatprep.mubr.bf16.mxu1 %v4872_v33 }
 0x54c   : > { %v4794_v11 = vsub.f32 %v10191_v24, %v7146_v9  ;;  %v4012_v23 = vpop.f32.mrb[13].mxu1  ;;  %v10259_v51 = vpop.f32.mrb[60].mxu0 }
 0x54d   : > { %12173 = vst [vmem:[#allocation64_spill] sm:$0xff] %v10259_v51  ;;  %v4792_v6 = vsub.f32 %v10193_v4, %v4012_v23  ;;  %v7147_v27 = vpop.f32.mrb[14].mxu1  ;;  %v10262_v34 = vpop.f32.mrb[61].mxu0  ;;  %7365 = vmatmul.mubr.bf16.gmra.mrb[104].mxu1 %v4873_v20 }
 0x54e   : > { %12174 = vst [vmem:[#allocation65_spill] sm:$0xff] %v10262_v34  ;;  %v4795_v37 = vsub.f32 %v10195_v52, %v7147_v27  ;;  %v4015_v29 = vpop.f32.mrb[15].mxu1  ;;  %v10265_v22 = vpop.f32.mrb[62].mxu0 }
 0x54f   : > { %12175 = vst [vmem:[#allocation66_spill] sm:$0xff] %v10265_v22  ;;  %v4793_v40 = vsub.f32 %v10199_v45, %v4015_v29  ;;  %v10268_v58 = vpop.f32.mrb[63].mxu0 }
 0x550   : > { %12176 = vst [vmem:[#allocation67_spill] sm:$0xff] %v10268_v58  ;;  %v4875_v44 = vpack.c.bf16 %v4795_v37, %v4794_v11 }
 0x551   : > { %v4874_v42 = vpack.c.bf16 %v4793_v40, %v4792_v6 }
 0x553   : > { %v7150_v48 = vpop.f32.mrb[16].mxu1  ;;  %7368 = vmatprep.mubr.bf16.mxu1 %v4874_v42 }
 0x554   : > { %v4798_v43 = vsub.f32 %v10060_v31, %v7150_v48  ;;  %v4028_v50 = vpop.f32.mrb[17].mxu1  ;;  %v10271_v57 = vpop.f32.mrb[64].mxu0 }
 0x555   : > { %12177 = vst [vmem:[#allocation68_spill] sm:$0xff] %v10271_v57  ;;  %v4796_v20 = vsub.f32 %v10062_v21, %v4028_v50  ;;  %v7151_v33 = vpop.f32.mrb[18].mxu1  ;;  %v10274_v9 = vpop.f32.mrb[65].mxu0  ;;  %7369 = vmatmul.mubr.bf16.gmra.mrb[108].mxu1 %v4875_v44 }
 0x556   : > { %12178 = vst [vmem:[#allocation69_spill] sm:$0xff] %v10274_v9  ;;  %v4799_v23 = vsub.f32 %v10066_v63, %v7151_v33  ;;  %v4031_v27 = vpop.f32.mrb[19].mxu1  ;;  %v10277_v29 = vpop.f32.mrb[66].mxu0 }
 0x557   : > { %12179 = vst [vmem:[#allocation70_spill] sm:$0xff] %v10277_v29  ;;  %v4797_v11 = vsub.f32 %v10070_v7, %v4031_v27  ;;  %v10280_v6 = vpop.f32.mrb[67].mxu0 }
 0x558   : > { %12180 = vst [vmem:[#allocation71_spill] sm:$0xff] %v10280_v6  ;;  %v4877_v37 = vpack.c.bf16 %v4799_v23, %v4798_v43  ;;  %v7952_v43 = vld [vmem:[#allocation18] sm:$0xff]  }
 0x559   : > { %v4876_v40 = vpack.c.bf16 %v4797_v11, %v4796_v20  ;;  %7436 = vmatprep.subr.bf16.mxu0 %v7952_v43 }
 0x55a   : > { %7437 = vmatpush3.bf16.msra.mxu0 %v7952_v43 }
 0x55b   : > { %v7154_v42 = vpop.f32.mrb[20].mxu1  ;;  %7372 = vmatprep.mubr.bf16.mxu1 %v4876_v40 }
 0x55c   : > { %v4802_v48 = vsub.f32 %v10080_v56, %v7154_v42  ;;  %v4044_v50 = vpop.f32.mrb[21].mxu1  ;;  %v10283_v57 = vpop.f32.mrb[68].mxu0 }
 0x55d   : > { %12181 = vst [vmem:[#allocation72_spill] sm:$0xff] %v10283_v57  ;;  %v4800_v44 = vsub.f32 %v10082_v60, %v4044_v50  ;;  %v7155_v9 = vpop.f32.mrb[22].mxu1  ;;  %v10286_v33 = vpop.f32.mrb[69].mxu0  ;;  %7373 = vmatmul.mubr.bf16.gmra.mrb[112].mxu1 %v4877_v37 }
 0x55e   : > { %12182 = vst [vmem:[#allocation73_spill] sm:$0xff] %v10286_v33  ;;  %v4803_v29 = vsub.f32 %v10086_v16, %v7155_v9  ;;  %v4047_v27 = vpop.f32.mrb[23].mxu1  ;;  %v10289_v22 = vpop.f32.mrb[70].mxu0 }
 0x55f   : > { %12183 = vst [vmem:[#allocation74_spill] sm:$0xff] %v10289_v22  ;;  %v4801_v20 = vsub.f32 %v10090_v3, %v4047_v27  ;;  %v10292_v23 = vpop.f32.mrb[71].mxu0 }
 0x560   : > { %12184 = vst [vmem:[#allocation75_spill] sm:$0xff] %v10292_v23  ;;  %v4879_v11 = vpack.c.bf16 %v4803_v29, %v4802_v48 }
 0x561   : > { %v4878_v40 = vpack.c.bf16 %v4801_v20, %v4800_v44 }
 0x563   : > { %v7158_v42 = vpop.f32.mrb[24].mxu1  ;;  %7376 = vmatprep.mubr.bf16.mxu1 %v4878_v40 }
 0x564   : > { %v4806_v50 = vsub.f32 %v10100_v14, %v7158_v42  ;;  %v4060_v57 = vpop.f32.mrb[25].mxu1  ;;  %v10295_v37 = vpop.f32.mrb[72].mxu0 }
 0x565   : > { %12185 = vst [vmem:[#allocation76_spill] sm:$0xff] %v10295_v37  ;;  %v4804_v9 = vsub.f32 %v10102_v19, %v4060_v57  ;;  %v7159_v33 = vpop.f32.mrb[26].mxu1  ;;  %v10298_v22 = vpop.f32.mrb[73].mxu0  ;;  %7377 = vmatmul.mubr.bf16.gmra.mrb[116].mxu1 %v4879_v11 }
 0x566   : > { %12186 = vst [vmem:[#allocation77_spill] sm:$0xff] %v10298_v22  ;;  %v4807_v27 = vsub.f32 %v10106_v39, %v7159_v33  ;;  %v4063_v23 = vpop.f32.mrb[27].mxu1  ;;  %v10301_v29 = vpop.f32.mrb[74].mxu0 }
 0x567   : > { %12187 = vst [vmem:[#allocation78_spill] sm:$0xff] %v10301_v29  ;;  %v4805_v48 = vsub.f32 %v10110_v28, %v4063_v23  ;;  %v10304_v44 = vpop.f32.mrb[75].mxu0 }
 0x568   : > { %12188 = vst [vmem:[#allocation79_spill] sm:$0xff] %v10304_v44  ;;  %v4881_v43 = vpack.c.bf16 %v4807_v27, %v4806_v50 }
 0x569   : > { %v4880_v20 = vpack.c.bf16 %v4805_v48, %v4804_v9 }
 0x56b   : > { %v7162_v40 = vpop.f32.mrb[28].mxu1  ;;  %7380 = vmatprep.mubr.bf16.mxu1 %v4880_v20 }
 0x56c   : > { %v4810_v42 = vsub.f32 %v10120_v0, %v7162_v40  ;;  %v4076_v57 = vpop.f32.mrb[29].mxu1  ;;  %v10307_v37 = vpop.f32.mrb[76].mxu0  ;;  %v7953_v40 = vld [vmem:[#allocation18 + $0x8] sm:$0xff]  }
 0x56d   : > { %12189 = vst [vmem:[#allocation80_spill] sm:$0xff] %v10307_v37  ;;  %v4808_v11 = vsub.f32 %v10122_v46, %v4076_v57  ;;  %v7163_v22 = vpop.f32.mrb[30].mxu1  ;;  %v10310_v33 = vpop.f32.mrb[77].mxu0  ;;  %7381 = vmatmul.mubr.bf16.gmra.mrb[120].mxu1 %v4881_v43  ;;  %7438 = vmatprep.subr.bf16.mxu0 %v7953_v40 }
 0x56e   : > { %12190 = vst [vmem:[#allocation81_spill] sm:$0xff] %v10310_v33  ;;  %v4811_v29 = vsub.f32 %v10126_v30, %v7163_v22  ;;  %v4079_v23 = vpop.f32.mrb[31].mxu1  ;;  %v10313_v6 = vpop.f32.mrb[78].mxu0  ;;  %7439 = vmatpush3.bf16.msra.mxu0 %v7953_v40 }
 0x56f   : > { %12191 = vst [vmem:[#allocation82_spill] sm:$0xff] %v10313_v6  ;;  %v4809_v50 = vsub.f32 %v10130_v59, %v4079_v23  ;;  %v10316_v9 = vpop.f32.mrb[79].mxu0 }
 0x570   : > { %12192 = vst [vmem:[#allocation83_spill] sm:$0xff] %v10316_v9  ;;  %v4883_v27 = vpack.c.bf16 %v4811_v29, %v4810_v42 }
 0x571   : > { %v4882_v48 = vpack.c.bf16 %v4809_v50, %v4808_v11 }
 0x573   : > { %v7166_v20 = vpop.f32.mrb[32].mxu1  ;;  %7384 = vmatprep.mubr.bf16.mxu1 %v4882_v48 }
 0x574   : > { %v4814_v57 = vsub.f32 %v10140_v8, %v7166_v20  ;;  %v4092_v37 = vpop.f32.mrb[33].mxu1  ;;  %v10319_v44 = vpop.f32.mrb[80].mxu0 }
 0x575   : > { %12193 = vst [vmem:[#allocation84_spill] sm:$0xff] %v10319_v44  ;;  %v4812_v43 = vsub.f32 %v10142_v12, %v4092_v37  ;;  %v7167_v22 = vpop.f32.mrb[34].mxu1  ;;  %v10322_v33 = vpop.f32.mrb[81].mxu0  ;;  %7385 = vmatmul.mubr.bf16.gmra.mrb[124].mxu1 %v4883_v27 }
 0x576   : > { %12194 = vst [vmem:[#allocation85_spill] sm:$0xff] %v10322_v33  ;;  %v4815_v23 = vsub.f32 %v10146_v13, %v7167_v22  ;;  %v4095_v6 = vpop.f32.mrb[35].mxu1  ;;  %v10325_v29 = vpop.f32.mrb[82].mxu0 }
 0x577   : > { %12195 = vst [vmem:[#allocation86_spill] sm:$0xff] %v10325_v29  ;;  %v4813_v42 = vsub.f32 %v10150_v26, %v4095_v6  ;;  %v10328_v11 = vpop.f32.mrb[83].mxu0 }
 0x578   : > { %12196 = vst [vmem:[#allocation87_spill] sm:$0xff] %v10328_v11  ;;  %v4885_v50 = vpack.c.bf16 %v4815_v23, %v4814_v57 }
 0x579   : > { %v4884_v48 = vpack.c.bf16 %v4813_v42, %v4812_v43 }
 0x57b   : > { %v7170_v20 = vpop.f32.mrb[36].mxu1  ;;  %7388 = vmatprep.mubr.bf16.mxu1 %v4884_v48 }
 0x57c   : > { %v4818_v37 = vsub.f32 %v10160_v62, %v7170_v20  ;;  %v4108_v9 = vpop.f32.mrb[37].mxu1  ;;  %v10331_v51 = vpop.f32.mrb[84].mxu0 }
 0x57d   : > { %12197 = vst [vmem:[#allocation88_spill] sm:$0xff] %v10331_v51  ;;  %v4816_v27 = vsub.f32 %v10162_v38, %v4108_v9  ;;  %v7171_v22 = vpop.f32.mrb[38].mxu1  ;;  %v10334_v58 = vpop.f32.mrb[85].mxu0  ;;  %7389 = vmatmul.mubr.bf16.gmra.mrb[128].mxu1 %v4885_v50 }
 0x57e   : > { %12198 = vst [vmem:[#allocation89_spill] sm:$0xff] %v10334_v58  ;;  %v4819_v40 = vsub.f32 %v10166_v35, %v7171_v22  ;;  %v4111_v6 = vpop.f32.mrb[39].mxu1  ;;  %v10337_v34 = vpop.f32.mrb[86].mxu0 }
 0x57f   : > { %12199 = vst [vmem:[#allocation90_spill] sm:$0xff] %v10337_v34  ;;  %v4817_v57 = vsub.f32 %v10170_v18, %v4111_v6  ;;  %v10340_v43 = vpop.f32.mrb[87].mxu0 }
 0x580   : > { %12200 = vst [vmem:[#allocation91_spill] sm:$0xff] %v10340_v43  ;;  %v4887_v23 = vpack.c.bf16 %v4819_v40, %v4818_v37 }
 0x581   : > { %v4886_v42 = vpack.c.bf16 %v4817_v57, %v4816_v27 }
 0x583   : > { %v7174_v48 = vpop.f32.mrb[40].mxu1  ;;  %7392 = vmatprep.mubr.bf16.mxu1 %v4886_v42 }
 0x584   : > { %v4822_v20 = vsub.f32 %v10177_v49, %v7174_v48  ;;  %v4124_v9 = vpop.f32.mrb[41].mxu1  ;;  %v10343_v55 = vpop.f32.mrb[88].mxu0  ;;  %v7954_v48 = vld [vmem:[#allocation18 + $0x10] sm:$0xff]  }
 0x585   : > { %12201 = vst [vmem:[#allocation92_spill] sm:$0xff] %v10343_v55  ;;  %v4820_v50 = vsub.f32 %v10179_v53, %v4124_v9  ;;  %v7175_v41 = vpop.f32.mrb[42].mxu1  ;;  %v10346_v22 = vpop.f32.mrb[89].mxu0  ;;  %7393 = vmatmul.mubr.bf16.gmra.mrb[132].mxu1 %v4887_v23  ;;  %7440 = vmatprep.subr.bf16.mxu0 %v7954_v48 }
 0x586   : > { %12202 = vst [vmem:[#allocation93_spill] sm:$0xff] %v10346_v22  ;;  %v4823_v1 = vsub.f32 %v10181_v32, %v7175_v41  ;;  %v4127_v6 = vpop.f32.mrb[43].mxu1  ;;  %v10349_v10 = vpop.f32.mrb[90].mxu0  ;;  %7441 = vmatpush3.bf16.msra.mxu0 %v7954_v48 }
 0x587   : > { %12203 = vst [vmem:[#allocation94_spill] sm:$0xff] %v10349_v10  ;;  %v4821_v37 = vsub.f32 %v10185_v36, %v4127_v6  ;;  %v10352_v27 = vpop.f32.mrb[91].mxu0 }
 0x588   : > { %12204 = vst [vmem:[#allocation95_spill] sm:$0xff] %v10352_v27  ;;  %v4889_v40 = vpack.c.bf16 %v4823_v1, %v4822_v20 }
 0x589   : > { %v4888_v57 = vpack.c.bf16 %v4821_v37, %v4820_v50 }
 0x58b   : > { %v7178_v42 = vpop.f32.mrb[44].mxu1  ;;  %7396 = vmatprep.mubr.bf16.mxu1 %v4888_v57 }
 0x58c   : > { %v4826_v9 = vsub.f32 %v10191_v24, %v7178_v42  ;;  %v4140_v55 = vpop.f32.mrb[45].mxu1  ;;  %v10355_v34 = vpop.f32.mrb[92].mxu0 }
 0x58d   : > { %12205 = vst [vmem:[#allocation96_spill] sm:$0xff] %v10355_v34  ;;  %v4824_v23 = vsub.f32 %v10193_v4, %v4140_v55  ;;  %v7179_v41 = vpop.f32.mrb[46].mxu1  ;;  %v10358_v22 = vpop.f32.mrb[93].mxu0  ;;  %7397 = vmatmul.mubr.bf16.gmra.mrb[136].mxu1 %v4889_v40 }
 0x58e   : > { %12206 = vst [vmem:[#allocation97_spill] sm:$0xff] %v10358_v22  ;;  %v4827_v6 = vsub.f32 %v10195_v52, %v7179_v41  ;;  %v4143_v10 = vpop.f32.mrb[47].mxu1  ;;  %v10361_v1 = vpop.f32.mrb[94].mxu0 }
 0x58f   : > { %12207 = vst [vmem:[#allocation98_spill] sm:$0xff] %v10361_v1  ;;  %v4825_v20 = vsub.f32 %v10199_v45, %v4143_v10  ;;  %v10364_v50 = vpop.f32.mrb[95].mxu0 }
 0x590   : > { %12208 = vst [vmem:[#allocation99_spill] sm:$0xff] %v10364_v50  ;;  %v4891_v37 = vpack.c.bf16 %v4827_v6, %v4826_v9 }
 0x591   : > { %v4890_v57 = vpack.c.bf16 %v4825_v20, %v4824_v23 }
 0x593   : > { %v7182_v42 = vpop.f32.mrb[48].mxu1  ;;  %7400 = vmatprep.mubr.bf16.mxu1 %v4890_v57 }
 0x594   : > { %v4830_v55 = vsub.f32 %v10060_v31, %v7182_v42  ;;  %v4156_v34 = vpop.f32.mrb[49].mxu1  ;;  %v10367_v22 = vpop.f32.mrb[96].mxu0 }
 0x595   : > { %12209 = vst [vmem:[#allocation100_spill] sm:$0xff] %v10367_v22  ;;  %v4828_v40 = vsub.f32 %v10062_v21, %v4156_v34  ;;  %v7183_v41 = vpop.f32.mrb[50].mxu1  ;;  %v10370_v27 = vpop.f32.mrb[97].mxu0  ;;  %7401 = vmatmul.mubr.bf16.gmra.mrb[140].mxu1 %v4891_v37 }
 0x596   : > { %12210 = vst [vmem:[#allocation101_spill] sm:$0xff] %v10370_v27  ;;  %v4831_v48 = vsub.f32 %v10066_v63, %v7183_v41  ;;  %v4159_v10 = vpop.f32.mrb[51].mxu1  ;;  %v10373_v1 = vpop.f32.mrb[98].mxu0 }
 0x597   : > { %12211 = vst [vmem:[#allocation102_spill] sm:$0xff] %v10373_v1  ;;  %v4829_v9 = vsub.f32 %v10070_v7, %v4159_v10  ;;  %v10376_v23 = vpop.f32.mrb[99].mxu0 }
 0x598   : > { %12212 = vst [vmem:[#allocation103_spill] sm:$0xff] %v10376_v23  ;;  %v4893_v6 = vpack.c.bf16 %v4831_v48, %v4830_v55 }
 0x599   : > { %v4892_v31 = vpack.c.bf16 %v4829_v9, %v4828_v40 }
 0x59b   : > { %v7186_v20 = vpop.f32.mrb[52].mxu1  ;;  %7404 = vmatprep.mubr.bf16.mxu1 %v4892_v31  ;;  %v7955_v31 = vld [vmem:[#allocation18 + $0x18] sm:$0xff]  }
 0x59c   : > { %v4834_v57 = vsub.f32 %v10080_v56, %v7186_v20  ;;  %v4172_v21 = vpop.f32.mrb[53].mxu1  ;;  %v10379_v34 = vpop.f32.mrb[100].mxu0  ;;  %7442 = vmatprep.subr.bf16.mxu0 %v7955_v31 }
 0x59d   : > { %12213 = vst [vmem:[#allocation104_spill] sm:$0xff] %v10379_v34  ;;  %v4832_v37 = vsub.f32 %v10082_v60, %v4172_v21  ;;  %v7187_v42 = vpop.f32.mrb[54].mxu1  ;;  %v10382_v63 = vpop.f32.mrb[101].mxu0  ;;  %7405 = vmatmul.mubr.bf16.gmra.mrb[144].mxu1 %v4893_v6  ;;  %7443 = vmatpush3.bf16.msra.mxu0 %v7955_v31 }
 0x59e   : > { %12214 = vst [vmem:[#allocation105_spill] sm:$0xff] %v10382_v63  ;;  %v4835_v41 = vsub.f32 %v10086_v16, %v7187_v42  ;;  %v4175_v7 = vpop.f32.mrb[55].mxu1  ;;  %v10385_v10 = vpop.f32.mrb[102].mxu0 }
 0x59f   : > { %12215 = vst [vmem:[#allocation106_spill] sm:$0xff] %v10385_v10  ;;  %v4833_v55 = vsub.f32 %v10090_v3, %v4175_v7  ;;  %v10388_v40 = vpop.f32.mrb[103].mxu0 }
 0x5a0   : > { %12216 = vst [vmem:[#allocation107_spill] sm:$0xff] %v10388_v40  ;;  %v4895_v48 = vpack.c.bf16 %v4835_v41, %v4834_v57 }
 0x5a1   : > { %v4894_v56 = vpack.c.bf16 %v4833_v55, %v4832_v37 }
 0x5a3   : > { %v7190_v9 = vpop.f32.mrb[56].mxu1  ;;  %7408 = vmatprep.mubr.bf16.mxu1 %v4894_v56 }
 0x5a4   : > { %v4838_v60 = vsub.f32 %v10100_v14, %v7190_v9  ;;  %v4188_v20 = vpop.f32.mrb[57].mxu1  ;;  %v10391_v21 = vpop.f32.mrb[104].mxu0 }
 0x5a5   : > { %12217 = vst [vmem:[#allocation108_spill] sm:$0xff] %v10391_v21  ;;  %v4836_v6 = vsub.f32 %v10102_v19, %v4188_v20  ;;  %v7191_v16 = vpop.f32.mrb[58].mxu1  ;;  %v10394_v42 = vpop.f32.mrb[105].mxu0  ;;  %7409 = vmatmul.mubr.bf16.gmra.mrb[148].mxu1 %v4895_v48 }
 0x5a6   : > { %12218 = vst [vmem:[#allocation109_spill] sm:$0xff] %v10394_v42  ;;  %v4839_v3 = vsub.f32 %v10106_v39, %v7191_v16  ;;  %v4191_v7 = vpop.f32.mrb[59].mxu1  ;;  %v10397_v57 = vpop.f32.mrb[106].mxu0 }
 0x5a7   : > { %12219 = vst [vmem:[#allocation110_spill] sm:$0xff] %v10397_v57  ;;  %v4837_v37 = vsub.f32 %v10110_v28, %v4191_v7  ;;  %v10400_v41 = vpop.f32.mrb[107].mxu0 }
 0x5a8   : > { %12220 = vst [vmem:[#allocation111_spill] sm:$0xff] %v10400_v41  ;;  %v4897_v14 = vpack.c.bf16 %v4839_v3, %v4838_v60 }
 0x5a9   : > { %v4896_v55 = vpack.c.bf16 %v4837_v37, %v4836_v6 }
 0x5ab   : > { %v7194_v56 = vpop.f32.mrb[60].mxu1  ;;  %7412 = vmatprep.mubr.bf16.mxu1 %v4896_v55 }
 0x5ac   : > { %v4842_v19 = vsub.f32 %v10120_v0, %v7194_v56  ;;  %v4204_v9 = vpop.f32.mrb[61].mxu1  ;;  %v10403_v20 = vpop.f32.mrb[108].mxu0 }
 0x5ad   : > { %12221 = vst [vmem:[#allocation112_spill] sm:$0xff] %v10403_v20  ;;  %v4840_v48 = vsub.f32 %v10122_v46, %v4204_v9  ;;  %v7195_v39 = vpop.f32.mrb[62].mxu1  ;;  %v10406_v16 = vpop.f32.mrb[109].mxu0  ;;  %7413 = vmatmul.mubr.bf16.gmra.mrb[152].mxu1 %v4897_v14 }
 0x5ae   : > { %12222 = vst [vmem:[#allocation113_spill] sm:$0xff] %v10406_v16  ;;  %v4843_v31 = vsub.f32 %v10126_v30, %v7195_v39  ;;  %v4207_v28 = vpop.f32.mrb[63].mxu1  ;;  %v10409_v7 = vpop.f32.mrb[110].mxu0 }
 0x5af   : > { %12223 = vst [vmem:[#allocation114_spill] sm:$0xff] %v10409_v7  ;;  %v4841_v60 = vsub.f32 %v10130_v59, %v4207_v28  ;;  %v10412_v6 = vpop.f32.mrb[111].mxu0 }
 0x5b0   : > { %12224 = vst [vmem:[#allocation115_spill] sm:$0xff] %v10412_v6  ;;  %v4899_v3 = vpack.c.bf16 %v4843_v31, %v4842_v19 }
 0x5b1   : > { %v4898_v0 = vpack.c.bf16 %v4841_v60, %v4840_v48 }
 0x5b3   : > { %v7198_v37 = vpop.f32.mrb[64].mxu1  ;;  %7416 = vmatprep.mubr.bf16.mxu1 %v4898_v0 }
 0x5b4   : > { %v4846_v55 = vsub.f32 %v10140_v8, %v7198_v37  ;;  %v4220_v46 = vpop.f32.mrb[65].mxu1  ;;  %v10415_v56 = vpop.f32.mrb[112].mxu0 }
 0x5b5   : > { %v4844_v14 = vsub.f32 %v10142_v12, %v4220_v46  ;;  %v7199_v9 = vpop.f32.mrb[66].mxu1  ;;  %v10418_v30 = vpop.f32.mrb[113].mxu0  ;;  %7417 = vmatmul.mubr.bf16.gmra.mrb[156].mxu1 %v4899_v3  ;;  %v7956_v46 = vld [vmem:[#allocation18 + $0x20] sm:$0xff]  }
 0x5b6   : > { %12225 = vst [vmem:[#allocation116_spill] sm:$0xff] %v10418_v30  ;;  %v4847_v39 = vsub.f32 %v10146_v13, %v7199_v9  ;;  %v4223_v59 = vpop.f32.mrb[67].mxu1  ;;  %v10421_v28 = vpop.f32.mrb[114].mxu0  ;;  %7444 = vmatprep.subr.bf16.mxu0 %v7956_v46 }
 0x5b7   : > { %v4845_v19 = vsub.f32 %v10150_v26, %v4223_v59  ;;  %v10424_v48 = vpop.f32.mrb[115].mxu0  ;;  %7445 = vmatpush3.bf16.msra.mxu0 %v7956_v46 }
 0x5b8   : > { %12226 = vst [vmem:[#allocation117_spill] sm:$0xff] %v10424_v48  ;;  %v4901_v31 = vpack.c.bf16 %v4847_v39, %v4846_v55 }
 0x5b9   : > { %v4900_v8 = vpack.c.bf16 %v4845_v19, %v4844_v14 }
 0x5bb   : > { %v7202_v60 = vpop.f32.mrb[68].mxu1  ;;  %7420 = vmatprep.mubr.bf16.mxu1 %v4900_v8 }
 0x5bc   : > { %v4850_v0 = vsub.f32 %v10160_v62, %v7202_v60  ;;  %v4236_v12 = vpop.f32.mrb[69].mxu1  ;;  %v10427_v37 = vpop.f32.mrb[116].mxu0 }
 0x5bd   : > { %12227 = vst [vmem:[#allocation118_spill] sm:$0xff] %v10427_v37  ;;  %v4848_v3 = vsub.f32 %v10162_v38, %v4236_v12  ;;  %v7203_v13 = vpop.f32.mrb[70].mxu1  ;;  %v10430_v9 = vpop.f32.mrb[117].mxu0  ;;  %7421 = vmatmul.mubr.bf16.gmra.mrb[160].mxu1 %v4901_v31 }
 0x5be   : > { %12228 = vst [vmem:[#allocation119_spill] sm:$0xff] %v10430_v9  ;;  %v4851_v26 = vsub.f32 %v10166_v35, %v7203_v13  ;;  %v4239_v59 = vpop.f32.mrb[71].mxu1  ;;  %v10433_v7 = vpop.f32.mrb[118].mxu0 }
 0x5bf   : > { %12229 = vst [vmem:[#allocation120_spill] sm:$0xff] %v10433_v7  ;;  %v4849_v55 = vsub.f32 %v10170_v18, %v4239_v59  ;;  %v10436_v14 = vpop.f32.mrb[119].mxu0 }
 0x5c0   : > { %12230 = vst [vmem:[#allocation121_spill] sm:$0xff] %v10436_v14  ;;  %v4903_v62 = vpack.c.bf16 %v4851_v26, %v4850_v0 }
 0x5c1   : > { %v4902_v39 = vpack.c.bf16 %v4849_v55, %v4848_v3 }
 0x5c3   : > { %v7206_v19 = vpop.f32.mrb[72].mxu1  ;;  %7424 = vmatprep.mubr.bf16.mxu1 %v4902_v39 }
 0x5c4   : > { %v4854_v38 = vsub.f32 %v10177_v49, %v7206_v19  ;;  %v4252_v8 = vpop.f32.mrb[73].mxu1  ;;  %v10439_v60 = vpop.f32.mrb[120].mxu0 }
 0x5c5   : > { %12231 = vst [vmem:[#allocation122_spill] sm:$0xff] %v10439_v60  ;;  %v4852_v35 = vsub.f32 %v10179_v53, %v4252_v8  ;;  %v7207_v31 = vpop.f32.mrb[74].mxu1  ;;  %v10442_v12 = vpop.f32.mrb[121].mxu0  ;;  %7425 = vmatmul.mubr.bf16.gmra.mrb[164].mxu1 %v4903_v62 }
 0x5c6   : > { %12232 = vst [vmem:[#allocation123_spill] sm:$0xff] %v10442_v12  ;;  %v4855_v18 = vsub.f32 %v10181_v32, %v7207_v31  ;;  %v4255_v13 = vpop.f32.mrb[75].mxu1  ;;  %v10445_v59 = vpop.f32.mrb[122].mxu0 }
 0x5c7   : > { %12233 = vst [vmem:[#allocation124_spill] sm:$0xff] %v10445_v59  ;;  %v4853_v0 = vsub.f32 %v10185_v36, %v4255_v13  ;;  %v10448_v46 = vpop.f32.mrb[123].mxu0 }
 0x5c8   : > { %12234 = vst [vmem:[#allocation125_spill] sm:$0xff] %v10448_v46  ;;  %v4905_v3 = vpack.c.bf16 %v4855_v18, %v4854_v38 }
 0x5c9   : > { %v4904_v49 = vpack.c.bf16 %v4853_v0, %v4852_v35  ;;  %v7957_v0 = vld [vmem:[#allocation18 + $0x28] sm:$0xff]  }
 0x5ca   : > { %7446 = vmatprep.subr.bf16.mxu0 %v7957_v0 }
 0x5cb   : > { %v7210_v26 = vpop.f32.mrb[76].mxu1  ;;  %7428 = vmatprep.mubr.bf16.mxu1 %v4904_v49  ;;  %7447 = vmatpush3.bf16.msra.mxu0 %v7957_v0 }
 0x5cc   : > { %v4858_v55 = vsub.f32 %v10191_v24, %v7210_v26  ;;  %v4268_v53 = vpop.f32.mrb[77].mxu1  ;;  %v10451_v39 = vpop.f32.mrb[124].mxu0 }
 0x5cd   : > { %12235 = vst [vmem:[#allocation126_spill] sm:$0xff] %v10451_v39  ;;  %v4856_v62 = vsub.f32 %v10193_v4, %v4268_v53  ;;  %v7211_v19 = vpop.f32.mrb[78].mxu1  ;;  %v10454_v32 = vpop.f32.mrb[125].mxu0  ;;  %7429 = vmatmul.mubr.bf16.gmra.mrb[168].mxu1 %v4905_v3  ;;  %v7959_v39 = vld [vmem:[#allocation18 + $0x38] sm:$0xff]  }
 0x5ce   : > { %12236 = vst [vmem:[#allocation127_spill] sm:$0xff] %v10454_v32  ;;  %v4859_v8 = vsub.f32 %v10195_v52, %v7211_v19  ;;  %v4271_v36 = vpop.f32.mrb[79].mxu1  ;;  %v10457_v31 = vpop.f32.mrb[126].mxu0 }
 0x5cf   : > { %12237 = vst [vmem:[#allocation128_spill] sm:$0xff] %v10457_v31  ;;  %v4857_v38 = vsub.f32 %v10199_v45, %v4271_v36  ;;  %v10460_v35 = vpop.f32.mrb[127].mxu0 }
 0x5d0   : > { %12238 = vst [vmem:[#allocation129_spill] sm:$0xff] %v10460_v35  ;;  %v4907_v18 = vpack.c.bf16 %v4859_v8, %v4858_v55 }
 0x5d1   : > { %v4906_v24 = vpack.c.bf16 %v4857_v38, %v4856_v62  ;;  %v7958_v38 = vld [vmem:[#allocation18 + $0x30] sm:$0xff]  }
 0x5d2   : > { %7448 = vmatprep.subr.bf16.mxu0 %v7958_v38 }
 0x5d3   : > { %7432 = vmatprep.mubr.bf16.mxu1 %v4906_v24  ;;  %7449 = vmatpush3.bf16.msra.mxu0 %v7958_v38 }
 0x5d4   : > { %v10462_v13 = vpop.f32.mrb[128].mxu0  ;;  %7450 = vmatprep.subr.bf16.mxu0 %v7959_v39 }
 0x5d5   : > { %12239 = vst [vmem:[#allocation130_spill] sm:$0xff] %v10462_v13  ;;  %v10464_v4 = vpop.f32.mrb[129].mxu0  ;;  %7433 = vmatmul.mubr.bf16.gmra.mrb[172].mxu1 %v4907_v18 }
 0x5d6   : > { %12240 = vst [vmem:[#allocation131_spill] sm:$0xff] %v10464_v4  ;;  %v10466_v49 = vpop.f32.mrb[130].mxu0 }
 0x5d7   : > { %12241 = vst [vmem:[#allocation132_spill] sm:$0xff] %v10466_v49  ;;  %v10468_v52 = vpop.f32.mrb[131].mxu0  ;;  %7451 = vmatpush3.bf16.msra.mxu0 %v7959_v39 }
 0x5d8   : > { %12242 = vst [vmem:[#allocation133_spill] sm:$0xff] %v10468_v52 }
 0x5dc   : > { %v10470_v3 = vpop.f32.mrb[132].mxu0 }
 0x5dd   : > { %12243 = vst [vmem:[#allocation134_spill] sm:$0xff] %v10470_v3  ;;  %v10472_v45 = vpop.f32.mrb[133].mxu0 }
 0x5de   : > { %12244 = vst [vmem:[#allocation135_spill] sm:$0xff] %v10472_v45  ;;  %v10474_v26 = vpop.f32.mrb[134].mxu0 }
 0x5df   : > { %12245 = vst [vmem:[#allocation136_spill] sm:$0xff] %v10474_v26  ;;  %v10476_v55 = vpop.f32.mrb[135].mxu0 }
 0x5e0   : > { %12246 = vst [vmem:[#allocation137_spill] sm:$0xff] %v10476_v55 }
 0x5e4   : > { %v10478_v53 = vpop.f32.mrb[136].mxu0 }
 0x5e5   : > { %12247 = vst [vmem:[#allocation138_spill] sm:$0xff] %v10478_v53  ;;  %v10480_v62 = vpop.f32.mrb[137].mxu0 }
 0x5e6   : > { %12248 = vst [vmem:[#allocation139_spill] sm:$0xff] %v10480_v62  ;;  %v10482_v19 = vpop.f32.mrb[138].mxu0 }
 0x5e7   : > { %12249 = vst [vmem:[#allocation140_spill] sm:$0xff] %v10482_v19  ;;  %v10484_v8 = vpop.f32.mrb[139].mxu0 }
 0x5e8   : > { %12250 = vst [vmem:[#allocation141_spill] sm:$0xff] %v10484_v8 }
 0x5ec   : > { %v10486_v36 = vpop.f32.mrb[140].mxu0 }
 0x5ed   : > { %12251 = vst [vmem:[#allocation142_spill] sm:$0xff] %v10486_v36  ;;  %v10488_v18 = vpop.f32.mrb[141].mxu0 }
 0x5ee   : > { %12252 = vst [vmem:[#allocation143_spill] sm:$0xff] %v10488_v18  ;;  %v10490_v24 = vpop.f32.mrb[142].mxu0 }
 0x5ef   : > { %12253 = vst [vmem:[#allocation144_spill] sm:$0xff] %v10490_v24  ;;  %v10492_v0 = vpop.f32.mrb[143].mxu0 }
 0x5f0   : > { %12254 = vst [vmem:[#allocation145_spill] sm:$0xff] %v10492_v0  ;;  %v10494_v20 = vpop.f32.mrb[80].mxu1 }
 0x5f1   : > { %v10496_v6 = vpop.f32.mrb[81].mxu1 }
 0x5f2   : > { %v10498_v16 = vpop.f32.mrb[82].mxu1 }
 0x5f3   : > { %v10500_v19 = vpop.f32.mrb[83].mxu1 }
 0x5f8   : > { %v10502_v53 = vpop.f32.mrb[84].mxu1 }
 0x5f9   : > { %v10504_v36 = vpop.f32.mrb[85].mxu1 }
 0x5fa   : > { %v10506_v57 = vpop.f32.mrb[86].mxu1 }
 0x5fb   : > { %v10508_v18 = vpop.f32.mrb[87].mxu1 }
 0x600   : > { %v10510_v24 = vpop.f32.mrb[88].mxu1 }
 0x601   : > { %v10512_v0 = vpop.f32.mrb[89].mxu1 }
 0x602   : > { %v10514_v38 = vpop.f32.mrb[90].mxu1 }
 0x603   : > { %v10516_v21 = vpop.f32.mrb[91].mxu1 }
 0x608   : > { %v10518_v8 = vpop.f32.mrb[92].mxu1 }
 0x609   : > { %v10520_v62 = vpop.f32.mrb[93].mxu1 }
 0x60a   : > { %v10522_v41 = vpop.f32.mrb[94].mxu1 }
 0x60b   : > { %v10524_v42 = vpop.f32.mrb[95].mxu1 }
 0x610   : > { %v10526_v26 = vpop.f32.mrb[96].mxu1 }
 0x611   : > { %v10528_v3 = vpop.f32.mrb[97].mxu1 }
 0x612   : > { %v10530_v10 = vpop.f32.mrb[98].mxu1 }
 0x613   : > { %v10532_v34 = vpop.f32.mrb[99].mxu1 }
 0x618   : > { %v10534_v55 = vpop.f32.mrb[100].mxu1 }
 0x619   : > { %v10536_v45 = vpop.f32.mrb[101].mxu1 }
 0x61a   : > { %12255 = vst [vmem:[#allocation146_spill] sm:$0xff] %v10536_v45  ;;  %v10538_v40 = vpop.f32.mrb[102].mxu1 }
 0x61b   : > { %12256 = vst [vmem:[#allocation147_spill] sm:$0xff] %v10538_v40  ;;  %v10540_v63 = vpop.f32.mrb[103].mxu1 }
 0x61c   : > { %12257 = vst [vmem:[#allocation148_spill] sm:$0xff] %v10540_v63 }
 0x620   : > { %v10542_v49 = vpop.f32.mrb[104].mxu1 }
 0x621   : > { %12258 = vst [vmem:[#allocation149_spill] sm:$0xff] %v10542_v49  ;;  %v10544_v13 = vpop.f32.mrb[105].mxu1 }
 0x622   : > { %12259 = vst [vmem:[#allocation150_spill] sm:$0xff] %v10544_v13  ;;  %v10546_v1 = vpop.f32.mrb[106].mxu1 }
 0x623   : > { %12260 = vst [vmem:[#allocation151_spill] sm:$0xff] %v10546_v1  ;;  %v10548_v22 = vpop.f32.mrb[107].mxu1 }
 0x624   : > { %12261 = vst [vmem:[#allocation152_spill] sm:$0xff] %v10548_v22 }
 0x628   : > { %v10550_v52 = vpop.f32.mrb[108].mxu1 }
 0x629   : > { %12262 = vst [vmem:[#allocation153_spill] sm:$0xff] %v10550_v52  ;;  %v10552_v4 = vpop.f32.mrb[109].mxu1 }
 0x62a   : > { %12263 = vst [vmem:[#allocation154_spill] sm:$0xff] %v10552_v4  ;;  %v10554_v23 = vpop.f32.mrb[110].mxu1 }
 0x62b   : > { %12264 = vst [vmem:[#allocation155_spill] sm:$0xff] %v10554_v23  ;;  %v10556_v27 = vpop.f32.mrb[111].mxu1 }
 0x62c   : > { %12265 = vst [vmem:[#allocation156_spill] sm:$0xff] %v10556_v27 }
 0x630   : > { %v10558_v31 = vpop.f32.mrb[112].mxu1 }
 0x631   : > { %v10562_v32 = vpop.f32.mrb[113].mxu1  ;;  %v12277_v22 = vmax.f32 %v10494_v20, %v10558_v31 }
 0x632   : > { %v10566_v59 = vpop.f32.mrb[114].mxu1  ;;  %v12278_v52 = vmax.f32 %v10496_v6, %v10562_v32 }
 0x633   : > { %v10570_v46 = vpop.f32.mrb[115].mxu1  ;;  %v12279_v23 = vmax.f32 %v10498_v16, %v10566_v59 }
 0x634   : > { %v12280_v13 = vmax.f32 %v10500_v19, %v10570_v46 }
 0x638   : > { %v10574_v7 = vpop.f32.mrb[116].mxu1 }
 0x639   : > { %v10578_v37 = vpop.f32.mrb[117].mxu1 }
 0x63a   : > { %v10582_v51 = vpop.f32.mrb[118].mxu1 }
 0x63b   : > { %v10586_v61 = vpop.f32.mrb[119].mxu1 }
 0x640   : > { %v10590_v12 = vpop.f32.mrb[120].mxu1 }
 0x641   : > { %v10594_v17 = vpop.f32.mrb[121].mxu1 }
 0x642   : > { %v10598_v14 = vpop.f32.mrb[122].mxu1 }
 0x643   : > { %v10602_v9 = vpop.f32.mrb[123].mxu1 }
 0x648   : > { %v10606_v43 = vpop.f32.mrb[124].mxu1 }
 0x649   : > { %v10610_v58 = vpop.f32.mrb[125].mxu1 }
 0x64a   : > { %v10614_v47 = vpop.f32.mrb[126].mxu1 }
 0x64b   : > { %v10618_v25 = vpop.f32.mrb[127].mxu1 }
 0x650   : > { %v10622_v29 = vpop.f32.mrb[128].mxu1 }
 0x651   : > { %v10626_v44 = vpop.f32.mrb[129].mxu1 }
 0x652   : > { %v10630_v2 = vpop.f32.mrb[130].mxu1 }
 0x653   : > { %v10634_v15 = vpop.f32.mrb[131].mxu1 }
 0x658   : > { %v10638_v48 = vpop.f32.mrb[132].mxu1 }
 0x659   : > { %v10642_v30 = vpop.f32.mrb[133].mxu1 }
 0x65a   : > { %12266 = vst [vmem:[#allocation157_spill] sm:$0xff] %v10642_v30  ;;  %v10646_v11 = vpop.f32.mrb[134].mxu1 }
 0x65b   : > { %12267 = vst [vmem:[#allocation158_spill] sm:$0xff] %v10646_v11  ;;  %v10650_v33 = vpop.f32.mrb[135].mxu1 }
 0x65c   : > { %12268 = vst [vmem:[#allocation159_spill] sm:$0xff] %v10650_v33 }
 0x660   : > { %v10654_v5 = vpop.f32.mrb[136].mxu1 }
 0x661   : > { %12269 = vst [vmem:[#allocation160_spill] sm:$0xff] %v10654_v5  ;;  %v10658_v54 = vpop.f32.mrb[137].mxu1 }
 0x662   : > { %12270 = vst [vmem:[#allocation161_spill] sm:$0xff] %v10658_v54  ;;  %v10662_v30 = vpop.f32.mrb[138].mxu1 }
 0x663   : > { %12271 = vst [vmem:[#allocation162_spill] sm:$0xff] %v10662_v30  ;;  %v10666_v11 = vpop.f32.mrb[139].mxu1 }
 0x664   : > { %12272 = vst [vmem:[#allocation163_spill] sm:$0xff] %v10666_v11 }
 0x668   : > { %v10670_v33 = vpop.f32.mrb[140].mxu1 }
 0x669   : > { %12273 = vst [vmem:[#allocation164_spill] sm:$0xff] %v10670_v33  ;;  %v10674_v5 = vpop.f32.mrb[141].mxu1 }
 0x66a   : > { %12274 = vst [vmem:[#allocation165_spill] sm:$0xff] %v10674_v5  ;;  %v10678_v54 = vpop.f32.mrb[142].mxu1 }
 0x66b   : > { %12275 = vst [vmem:[#allocation166_spill] sm:$0xff] %v10678_v54  ;;  %v10682_v30 = vpop.f32.mrb[143].mxu1 }
 0x66c   : > { %12276 = vst [vmem:[#allocation167_spill] sm:$0xff] %v10682_v30 }
 0x670   : > { %v7406_v11 = vpop.f32.mrb[144].mxu1 }
 0x671   : > { %v5394_v35 = vmax.f32 %v12277_v22, %v7406_v11  ;;  %v5262_v33 = vpop.f32.mrb[145].mxu1 }
 0x672   : > { %v5390_v50 = vmax.f32 %v12278_v52, %v5262_v33  ;;  %v7407_v5 = vpop.f32.mrb[146].mxu1 }
 0x673   : > { %v5455_v4 = vsub.f32 %v10494_v20, %v5394_v35  ;;  %v5487_v60 = vsub.f32 %v10558_v31, %v5394_v35  ;;  %v5519_v54 = vsub.f32 %v7406_v11, %v5394_v35  ;;  %v5396_v39 = vmax.f32 %v12279_v23, %v7407_v5  ;;  %v5265_v30 = vpop.f32.mrb[147].mxu1 }
 0x674   : > { %v5453_v27 = vsub.f32 %v10496_v6, %v5390_v50  ;;  %v5485_v22 = vsub.f32 %v10562_v32, %v5390_v50  ;;  %v5517_v1 = vsub.f32 %v5262_v33, %v5390_v50  ;;  %v5392_v52 = vmax.f32 %v12280_v13, %v5265_v30 }
 0x675   : > { %v5553_v49 = vmul.f32 1.442695, %v5455_v4  ;;  %v5617_v63 = vmul.f32 1.442695, %v5487_v60  ;;  %v5681_v20 = vmul.f32 1.442695, %v5519_v54  ;;  %v5456_v31 = vsub.f32 %v10498_v16, %v5396_v39 }
 0x676   : > { %v5549_v11 = vmul.f32 1.442695, %v5453_v27  ;;  %v5488_v35 = vsub.f32 %v10566_v59, %v5396_v39  ;;  %v5613_v23 = vmul.f32 1.442695, %v5485_v22  ;;  %v5520_v40 = vsub.f32 %v7407_v5, %v5396_v39 }
 0x677   : > { %7960 = vpow2.f32 %v5553_v49  ;;  %v5454_v6 = vsub.f32 %v10500_v19, %v5392_v52  ;;  %v5677_v32 = vmul.f32 1.442695, %v5517_v1  ;;  %v5486_v33 = vsub.f32 %v10570_v46, %v5392_v52 }
 0x678   : > { %7962 = vpow2.f32 %v5617_v63  ;;  %v5518_v50 = vsub.f32 %v5265_v30, %v5392_v52  ;;  %v7410_v45 = vpop.f32.mrb[148].mxu1  ;;  %v5555_v13 = vmul.f32 1.442695, %v5456_v31  ;;  %v5619_v60 = vmul.f32 1.442695, %v5488_v35 }
 0x679   : > { %7964 = vpow2.f32 %v5681_v20  ;;  %v12281_v54 = vmax.f32 %v10502_v53, %v10574_v7  ;;  %v5278_v16 = vpop.f32.mrb[149].mxu1  ;;  %v5683_v59 = vmul.f32 1.442695, %v5520_v40  ;;  %v5551_v4 = vmul.f32 1.442695, %v5454_v6 }
 0x67a   : > { %7966 = vpow2.f32 %v5549_v11  ;;  %v12282_v5 = vmax.f32 %v10504_v36, %v10578_v37  ;;  %v7411_v1 = vpop.f32.mrb[150].mxu1  ;;  %v5615_v40 = vmul.f32 1.442695, %v5486_v33  ;;  %v5679_v20 = vmul.f32 1.442695, %v5518_v50 }
 0x67b   : > { %v5402_v27 = vmax.f32 %v12281_v54, %v7410_v45  ;;  %7968 = vpow2.f32 %v5613_v23  ;;  %v5281_v19 = vpop.f32.mrb[151].mxu1 }
 0x67c   : > { %v5398_v63 = vmax.f32 %v12282_v5, %v5278_v16  ;;  %7970 = vpow2.f32 %v5677_v32 }
 0x67d   : > { %v5459_v30 = vsub.f32 %v10502_v53, %v5402_v27  ;;  %v5491_v46 = vsub.f32 %v10574_v7, %v5402_v27  ;;  %v5523_v49 = vsub.f32 %v7410_v45, %v5402_v27  ;;  %7972 = vpow2.f32 %v5555_v13 }
 0x67e   : > { %v5457_v39 = vsub.f32 %v10504_v36, %v5398_v63  ;;  %v5489_v22 = vsub.f32 %v10578_v37, %v5398_v63  ;;  %v5521_v52 = vsub.f32 %v5278_v16, %v5398_v63  ;;  %7974 = vpow2.f32 %v5619_v60 }
 0x67f   : > { %v5561_v31 = vmul.f32 1.442695, %v5459_v30  ;;  %v5625_v11 = vmul.f32 1.442695, %v5491_v46  ;;  %v5689_v35 = vmul.f32 1.442695, %v5523_v49  ;;  %7976 = vpow2.f32 %v5683_v59 }
 0x680   : > { %v5557_v23 = vmul.f32 1.442695, %v5457_v39  ;;  %v12283_v7 = vmax.f32 %v10506_v57, %v10582_v51  ;;  %v12284_v53 = vmax.f32 %v10508_v18, %v10586_v61  ;;  %7978 = vpow2.f32 %v5551_v4  ;;  %v7414_v32 = vpop.f32.mrb[152].mxu1 }
 0x681   : > { %v5621_v37 = vmul.f32 1.442695, %v5489_v22  ;;  %v5685_v6 = vmul.f32 1.442695, %v5521_v52  ;;  %v10722_v33 = vpop.eup %7960  ;;  %7980 = vpow2.f32 %v5615_v40  ;;  %v5294_v54 = vpop.f32.mrb[153].mxu1  ;;  %v12285_v52 = vmax.f32 %v10510_v24, %v10590_v12 }
 0x682   : > { %v5404_v45 = vmax.f32 %v12283_v7, %v7411_v1  ;;  %v5400_v36 = vmax.f32 %v12284_v53, %v5281_v19  ;;  %v10726_v27 = vpop.eup %7962  ;;  %7982 = vpow2.f32 %v5679_v20  ;;  %v10730_v5 = vpop.f32.mrb[154].mxu1 }
 0x683   : > { %v10732_v63 = vpop.eup %7964  ;;  %v5745_v30 = vadd.f32 %v10726_v27, %v10722_v33  ;;  %7984 = vpow2.f32 %v5561_v31  ;;  %v5410_v40 = vmax.f32 %v12285_v52, %v7414_v32 }
 0x684   : > { %v5460_v50 = vsub.f32 %v10506_v57, %v5404_v45  ;;  %v5492_v13 = vsub.f32 %v10582_v51, %v5404_v45  ;;  %v5524_v60 = vsub.f32 %v7411_v1, %v5404_v45  ;;  %v5458_v16 = vsub.f32 %v10508_v18, %v5400_v36  ;;  %v10736_v1 = vpop.f32.mrb[155].mxu1  ;;  %v10738_v46 = vpop.eup %7966 }
 0x685   : > { %v5490_v59 = vsub.f32 %v10586_v61, %v5400_v36  ;;  %v5522_v4 = vsub.f32 %v5281_v19, %v5400_v36  ;;  %7986 = vpow2.f32 %v5625_v11  ;;  %v10742_v61 = vpop.eup %7968  ;;  %v5746_v19 = vadd.f32 %v10732_v63, %v5745_v30 }
 0x686   : > { %v5563_v57 = vmul.f32 1.442695, %v5460_v50  ;;  %v5627_v51 = vmul.f32 1.442695, %v5492_v13  ;;  %v5691_v49 = vmul.f32 1.442695, %v5524_v60  ;;  %7988 = vpow2.f32 %v5689_v35  ;;  %v10750_v20 = vpop.eup %7970 }
 0x687   : > { %v5559_v18 = vmul.f32 1.442695, %v5458_v16  ;;  %v10740_v39 = vmul.f32 1.442695, %v5490_v59  ;;  %v10745_v22 = vmul.f32 1.442695, %v5522_v4  ;;  %v5741_v31 = vadd.f32 %v10742_v61, %v10738_v46  ;;  %v10761_v53 = vpop.eup %7972 }
 0x688   : > { %12286 = vst [vmem:[#allocation168_spill] sm:$0xff] %v10750_v20  ;;  %7990 = vpow2.f32 %v5557_v23  ;;  %v12287_v11 = vmax.f32 %v10512_v0, %v10594_v17  ;;  %v12288_v35 = vmax.f32 %v10514_v38, %v10598_v14  ;;  %v5463_v36 = vsub.f32 %v10510_v24, %v5410_v40  ;;  %v10765_v60 = vpop.eup %7974  ;;  %v10770_v4 = vpop.f32.mrb[156].mxu1 }
 0x689   : > { %7992 = vrcp.f32 %v5746_v19  ;;  %v5495_v50 = vsub.f32 %v10590_v12, %v5410_v40  ;;  %v5527_v13 = vsub.f32 %v7414_v32, %v5410_v40  ;;  %v5742_v23 = vadd.f32 %v10750_v20, %v5741_v31  ;;  %v10772_v30 = vpop.eup %7976  ;;  %v10778_v32 = vpop.f32.mrb[157].mxu1 }
 0x68a   : > { %v5406_v7 = vmax.f32 %v12287_v11, %v5294_v54  ;;  %v5412_v45 = vmax.f32 %v12288_v35, %v10730_v5  ;;  %7994 = vpow2.f32 %v5621_v37  ;;  %v5747_v19 = vadd.f32 %v10765_v60, %v10761_v53  ;;  %v10780_v52 = vpop.eup %7978  ;;  %v10786_v40 = vpop.f32.mrb[158].mxu1 }
 0x68b   : > { %7996 = vpow2.f32 %v5685_v6  ;;  %v5569_v24 = vmul.f32 1.442695, %v5463_v36  ;;  %v10776_v12 = vmul.f32 1.442695, %v5495_v50  ;;  %v10782_v37 = vmul.f32 1.442695, %v5527_v13  ;;  %v10788_v31 = vpop.eup %7980 }
 0x68c   : > { %v5461_v16 = vsub.f32 %v10512_v0, %v5406_v7  ;;  %v5493_v59 = vsub.f32 %v10594_v17, %v5406_v7  ;;  %7998 = vrcp.f32 %v5742_v23  ;;  %v5525_v0 = vsub.f32 %v5294_v54, %v5406_v7  ;;  %12289 = vst [vmem:[#allocation169_spill] sm:$0xff] %v10788_v31  ;;  %v10794_v36 = vpop.f32.mrb[159].mxu1  ;;  %v10796_v50 = vpop.eup %7982 }
 0x68d   : > { %v5748_v11 = vadd.f32 %v10772_v30, %v5747_v19  ;;  %8000 = vpow2.f32 %v5563_v57  ;;  %v5464_v35 = vsub.f32 %v10514_v38, %v5412_v45  ;;  %12290 = vst [vmem:[#allocation170_spill] sm:$0xff] %v10796_v50  ;;  %v5743_v54 = vadd.f32 %v10788_v31, %v10780_v52  ;;  %v10803_v23 = vpop.eup %7984 }
 0x68e   : > { %v10784_v17 = vmul.f32 1.442695, %v5461_v16  ;;  %v10791_v6 = vmul.f32 1.442695, %v5493_v59  ;;  %8002 = vpow2.f32 %v5627_v51  ;;  %v10800_v7 = vmul.f32 1.442695, %v5525_v0 }
 0x68f   : > { %v5496_v13 = vsub.f32 %v10598_v14, %v5412_v45  ;;  %12291 = vst [vmem:[#allocation171_spill] sm:$0xff] %v10803_v23  ;;  %8004 = vrcp.f32 %v5748_v11  ;;  %v5528_v57 = vsub.f32 %v10730_v5, %v5412_v45  ;;  %v10806_v16 = vmul.f32 1.442695, %v5464_v35  ;;  %v10812_v19 = vpop.eup %7986 }
 0x690   : > { %v12292_v38 = vmax.f32 %v10516_v21, %v10602_v9  ;;  %12293 = vst [vmem:[#allocation172_spill] sm:$0xff] %v10812_v19  ;;  %v5744_v51 = vadd.f32 %v10796_v50, %v5743_v54  ;;  %8006 = vpow2.f32 %v5691_v49  ;;  %v12294_v14 = vmax.f32 %v10518_v8, %v10606_v43  ;;  %v10821_v5 = vpop.eup %7988 }
 0x691   : > { %v10815_v0 = vmul.f32 1.442695, %v5496_v13  ;;  %12295 = vst [vmem:[#allocation173_spill] sm:$0xff] %v10821_v5  ;;  %v5753_v45 = vadd.f32 %v10812_v19, %v10803_v23  ;;  %8008 = vpow2.f32 %v5559_v18  ;;  %v10825_v35 = vmul.f32 1.442695, %v5528_v57 }
 0x692   : > { %v5408_v59 = vmax.f32 %v12292_v38, %v10736_v1  ;;  %v5418_v11 = vmax.f32 %v12294_v14, %v10770_v4  ;;  %v10828_v20 = vpop.eup %7990  ;;  %8010 = vrcp.f32 %v5744_v51  ;;  %v10833_v14 = vpop.f32.mrb[160].mxu1 }
 0x693   : > { %v7993_v50 = vpop.eup %7992  ;;  %v5754_v31 = vadd.f32 %v10821_v5, %v5753_v45  ;;  %8012 = vpow2.f32 %v10740_v39  ;;  %v10840_v57 = vpop.f32.mrb[161].mxu1 }
 0x694   : > { %v5462_v38 = vsub.f32 %v10516_v21, %v5408_v59  ;;  %v5494_v49 = vsub.f32 %v10602_v9, %v5408_v59  ;;  %v5526_v54 = vsub.f32 %v10736_v1, %v5408_v59  ;;  %v5467_v13 = vsub.f32 %v10518_v8, %v5418_v11  ;;  %v10842_v51 = vpop.eup %7994  ;;  %v10852_v59 = vpop.f32.mrb[162].mxu1 }
 0x695   : > { %v5499_v21 = vsub.f32 %v10606_v43, %v5418_v11  ;;  %v10845_v9 = vmul.f32 %v7993_v50, %v10722_v33  ;;  %v10848_v8 = vmul.f32 %v7993_v50, %v10726_v27  ;;  %v5903_v1 = vmul.f32 %v7993_v50, %v10732_v63  ;;  %v10854_v39 = vpop.eup %7996  ;;  %v10862_v33 = vpop.f32.mrb[163].mxu1 }
 0x696   : > { %v10837_v18 = vmul.f32 1.442695, %v5462_v38  ;;  %8014 = vpow2.f32 %v10745_v22  ;;  %v5749_v43 = vadd.f32 %v10842_v51, %v10828_v20  ;;  %v10858_v45 = vmul.f32 1.442695, %v5494_v49  ;;  %v10864_v27 = vpop.eup %7998 }
 0x697   : > { %8016 = vrcp.f32 %v5754_v31  ;;  %v10860_v38 = vmul.f32 1.442695, %v5526_v54  ;;  %v10867_v63 = vmul.f32 %v10415_v56, %v5903_v1  ;;  %v5531_v22 = vsub.f32 %v10770_v4, %v5418_v11  ;;  %v10872_v31 = vpop.eup %8000 }
 0x698   : > { %8018 = vpow2.f32 %v5569_v24  ;;  %v10870_v50 = vmul.f32 1.442695, %v5467_v13  ;;  %12296 = vst [vmem:[#allocation174_spill] sm:$0xff] %v10872_v31  ;;  %v5750_v5 = vadd.f32 %v10854_v39, %v5749_v43  ;;  %v10876_v49 = vmul.f32 1.442695, %v5499_v21  ;;  %v10882_v56 = vpop.eup %8002 }
 0x699   : > { %8020 = vpow2.f32 %v10776_v12  ;;  %v12297_v54 = vmax.f32 %v10520_v62, %v10610_v58  ;;  %12298 = vst [vmem:[#allocation175_spill] sm:$0xff] %v10882_v56  ;;  %v10885_v4 = vmul.f32 1.442695, %v5531_v22  ;;  %v12299_v24 = vmax.f32 %v10522_v41, %v10614_v47  ;;  %v8005_v21 = vpop.eup %8004 }
 0x69a   : > { %8022 = vpow2.f32 %v10782_v37  ;;  %v12300_v12 = vmax.f32 %v10524_v42, %v10618_v25  ;;  %v5755_v1 = vadd.f32 %v10882_v56, %v10872_v31  ;;  %v10899_v22 = vpop.eup %8006  ;;  %v5904_v23 = vmul.f32 %v8005_v21, %v10772_v30 }
 0x69b   : > { %v5414_v19 = vmax.f32 %v12297_v54, %v10778_v32  ;;  %v5420_v11 = vmax.f32 %v12299_v24, %v10786_v40  ;;  %8024 = vrcp.f32 %v5750_v5  ;;  %12301 = vst [vmem:[#allocation176_spill] sm:$0xff] %v10899_v22  ;;  %v10902_v54 = vmul.f32 %v8005_v21, %v10761_v53  ;;  %v10909_v5 = vpop.f32.mrb[164].mxu1 }
 0x69c   : > { %v5416_v13 = vmax.f32 %v12300_v12, %v10794_v36  ;;  %v10905_v24 = vmul.f32 %v8005_v21, %v10765_v60  ;;  %8026 = vpow2.f32 %v10784_v17  ;;  %v10911_v12 = vpop.eup %8008  ;;  %v10918_v53 = vpop.f32.mrb[165].mxu1  ;;  %v10923_v30 = vmul.f32 %v10421_v28, %v5904_v23 }
 0x69d   : > { %v5465_v43 = vsub.f32 %v10520_v62, %v5414_v19  ;;  %v5497_v37 = vsub.f32 %v10610_v58, %v5414_v19  ;;  %v5756_v62 = vadd.f32 %v10899_v22, %v5755_v1  ;;  %8028 = vpow2.f32 %v10791_v6  ;;  %v10920_v60 = vpop.eup %8010  ;;  %v10929_v1 = vpop.f32.mrb[166].mxu1 }
 0x69e   : > { %v5529_v58 = vsub.f32 %v10778_v32, %v5414_v19  ;;  %8030 = vpow2.f32 %v10800_v7  ;;  %v5468_v21 = vsub.f32 %v10522_v41, %v5420_v11  ;;  %v10931_v6 = vpop.eup %8012  ;;  %v5500_v19 = vsub.f32 %v10614_v47, %v5420_v11  ;;  %v10937_v22 = vpop.f32.mrb[167].mxu1 }
 0x69f   : > { %v10916_v56 = vmul.f32 1.442695, %v5465_v43  ;;  %v10926_v17 = vmul.f32 1.442695, %v5497_v37  ;;  %8032 = vrcp.f32 %v5756_v62  ;;  %v5532_v43 = vsub.f32 %v10786_v40, %v5420_v11 }
 0x6a0   : > { %v10933_v32 = vmul.f32 1.442695, %v5529_v58  ;;  %v10939_v28 = vpop.eup %8014  ;;  %v5751_v7 = vadd.f32 %v10931_v6, %v10911_v12  ;;  %8034 = vpow2.f32 %v10806_v16  ;;  %v10944_v41 = vmul.f32 1.442695, %v5468_v21 }
 0x6a1   : > { %12302 = vst [vmem:[#allocation177_spill] sm:$0xff] %v10939_v28  ;;  %v5466_v23 = vsub.f32 %v10524_v42, %v5416_v13  ;;  %v10947_v37 = vpop.eup %8016  ;;  %8036 = vpow2.f32 %v10815_v0  ;;  %v10950_v47 = vmul.f32 1.442695, %v5500_v19  ;;  %v10952_v40 = vmul.f32 1.442695, %v5532_v43 }
 0x6a2   : > { %12303 = vst [vmem:[#allocation178_spill] sm:$0xff] %v10947_v37  ;;  %v5498_v11 = vsub.f32 %v10618_v25, %v5416_v13  ;;  %v10955_v62 = vpop.eup %8018  ;;  %v5752_v58 = vadd.f32 %v10939_v28, %v5751_v7  ;;  %8038 = vpow2.f32 %v10825_v35  ;;  %v5530_v16 = vsub.f32 %v10794_v36, %v5416_v13 }
 0x6a3   : > { %12304 = vst [vmem:[#allocation179_spill] sm:$0xff] %v10955_v62  ;;  %v10960_v21 = vmul.f32 1.442695, %v5466_v23  ;;  %v10962_v42 = vpop.eup %8020  ;;  %8040 = vpow2.f32 %v10837_v18  ;;  %v12306_v25 = vmax.f32 %v10526_v26, %v10622_v29  ;;  %v12307_v43 = vmax.f32 %v10528_v3, %v10626_v44 }
 0x6a4   : > { %12305 = vst [vmem:[#allocation180_spill] sm:$0xff] %v10962_v42  ;;  %v10965_v0 = vmul.f32 1.442695, %v5498_v11  ;;  %v10975_v7 = vpop.eup %8022  ;;  %8042 = vrcp.f32 %v5752_v58  ;;  %v5761_v36 = vadd.f32 %v10962_v42, %v10955_v62  ;;  %v10979_v13 = vmul.f32 1.442695, %v5530_v16  ;;  %v10985_v11 = vpop.f32.mrb[168].mxu1 }
 0x6a5   : > { %v5426_v19 = vmax.f32 %v12306_v25, %v10833_v14  ;;  %v5422_v35 = vmax.f32 %v12307_v43, %v10840_v57  ;;  %12308 = vst [vmem:[#allocation181_spill] sm:$0xff] %v10975_v7  ;;  %v12309_v18 = vmax.f32 %v10530_v10, %v10630_v2  ;;  %v10987_v25 = vpop.eup %8024  ;;  %8044 = vpow2.f32 %v10858_v45  ;;  %v10993_v42 = vpop.f32.mrb[169].mxu1 }
 0x6a6   : > { %v10995_v16 = vpop.eup %8026  ;;  %v5762_v62 = vadd.f32 %v10975_v7, %v5761_v36  ;;  %8046 = vpow2.f32 %v10860_v38  ;;  %v11001_v28 = vpop.f32.mrb[170].mxu1 }
 0x6a7   : > { %v5428_v23 = vmax.f32 %v12309_v18, %v10852_v59  ;;  %v5471_v43 = vsub.f32 %v10526_v26, %v5426_v19  ;;  %v5503_v58 = vsub.f32 %v10622_v29, %v5426_v19  ;;  %v5535_v31 = vsub.f32 %v10833_v14, %v5426_v19  ;;  %12310 = vst [vmem:[#allocation182_spill] sm:$0xff] %v10995_v16  ;;  %v11003_v45 = vpop.eup %8028  ;;  %v11019_v36 = vpop.f32.mrb[171].mxu1 }
 0x6a8   : > { %v5469_v18 = vsub.f32 %v10528_v3, %v5422_v35  ;;  %v5501_v37 = vsub.f32 %v10626_v44, %v5422_v35  ;;  %12311 = vst [vmem:[#allocation183_spill] sm:$0xff] %v11003_v45  ;;  %8048 = vpow2.f32 %v10870_v50  ;;  %v11012_v19 = vpop.eup %8030  ;;  %v5757_v3 = vadd.f32 %v11003_v45, %v10995_v16  ;;  %v12329_v16 = vld [vmem:[#allocation147_spill] sm:$0xff] }
 0x6a9   : > { %v11006_v29 = vmul.f32 1.442695, %v5471_v43  ;;  %v11008_v26 = vmul.f32 1.442695, %v5503_v58  ;;  %v11010_v14 = vmul.f32 1.442695, %v5535_v31  ;;  %8050 = vrcp.f32 %v5762_v62  ;;  %v11021_v7 = vpop.eup %8032 }
 0x6aa   : > { %12312 = vst [vmem:[#allocation184_spill] sm:$0xff] %v11012_v19  ;;  %v5533_v44 = vsub.f32 %v10840_v57, %v5422_v35  ;;  %v11017_v38 = vmul.f32 1.442695, %v5469_v18  ;;  %8052 = vpow2.f32 %v10876_v49  ;;  %v11024_v50 = vmul.f32 1.442695, %v5501_v37  ;;  %v11028_v62 = vpop.eup %8034 }
 0x6ab   : > { %v5472_v31 = vsub.f32 %v10530_v10, %v5428_v23  ;;  %v5504_v43 = vsub.f32 %v10630_v2, %v5428_v23  ;;  %12313 = vst [vmem:[#allocation185_spill] sm:$0xff] %v11028_v62  ;;  %v5758_v58 = vadd.f32 %v11012_v19, %v5757_v3  ;;  %8054 = vpow2.f32 %v10885_v4  ;;  %v11035_v18 = vpop.eup %8036 }
 0x6ac   : > { %v11032_v57 = vmul.f32 1.442695, %v5533_v44  ;;  %v5536_v35 = vsub.f32 %v10852_v59, %v5428_v23  ;;  %12314 = vst [vmem:[#allocation186_spill] sm:$0xff] %v11035_v18  ;;  %8056 = vpow2.f32 %v10916_v56  ;;  %v12315_v2 = vmax.f32 %v10532_v34, %v10634_v15  ;;  %v11046_v3 = vpop.eup %8038  ;;  %v11056_v44 = vpop.f32.mrb[172].mxu1 }
 0x6ad   : > { %v11038_v49 = vmul.f32 1.442695, %v5472_v31  ;;  %v11040_v37 = vmul.f32 1.442695, %v5504_v43  ;;  %12316 = vst [vmem:[#allocation187_spill] sm:$0xff] %v11046_v3  ;;  %8058 = vrcp.f32 %v5758_v58  ;;  %v5763_v4 = vadd.f32 %v11035_v18, %v11028_v62  ;;  %12318 = vst [vmem:[#allocation188_spill] sm:$0xff] %v11056_v44  ;;  %v11058_v31 = vpop.eup %8040 }
 0x6ae   : > { %v5424_v10 = vmax.f32 %v12315_v2, %v10862_v33  ;;  %v11050_v59 = vmul.f32 1.442695, %v5536_v35  ;;  %v12317_v56 = vmax.f32 %v10534_v55, %v10638_v48  ;;  %12319 = vst [vmem:[#allocation189_spill] sm:$0xff] %v11058_v31  ;;  %8060 = vpow2.f32 %v10926_v17  ;;  %v11064_v18 = vpop.f32.mrb[173].mxu1  ;;  %v11066_v35 = vpop.eup %8042 }
 0x6af   : > { %12320 = vst [vmem:[#allocation190_spill] sm:$0xff] %v11064_v18  ;;  %v5764_v62 = vadd.f32 %v11046_v3, %v5763_v4  ;;  %8062 = vpow2.f32 %v10933_v32  ;;  %v11072_v45 = vpop.f32.mrb[174].mxu1  ;;  %v11074_v17 = vpop.eup %8044 }
 0x6b0   : > { %v5434_v23 = vmax.f32 %v12317_v56, %v10909_v5  ;;  %v5470_v43 = vsub.f32 %v10532_v34, %v5424_v10  ;;  %v5502_v58 = vsub.f32 %v10634_v15, %v5424_v10  ;;  %v5534_v2 = vsub.f32 %v10862_v33, %v5424_v10  ;;  %12321 = vst [vmem:[#allocation191_spill] sm:$0xff] %v11072_v45  ;;  %v11083_v10 = vpop.eup %8046  ;;  %v11090_v4 = vpop.f32.mrb[175].mxu1 }
 0x6b1   : > { %12322 = vst [vmem:[#allocation192_spill] sm:$0xff] %v11074_v17  ;;  %8064 = vpow2.f32 %v10944_v41  ;;  %12323 = vst [vmem:[#allocation193_spill] sm:$0xff] %v11083_v10 }
 0x6b2   : > { %v5475_v56 = vsub.f32 %v10534_v55, %v5434_v23  ;;  %v5507_v19 = vsub.f32 %v10638_v48, %v5434_v23  ;;  %v11077_v15 = vmul.f32 1.442695, %v5470_v43  ;;  %v11079_v34 = vmul.f32 1.442695, %v5502_v58  ;;  %12324 = vst [vmem:[#allocation194_spill] sm:$0xff] %v11090_v4  ;;  %v11092_v3 = vpop.eup %8048  ;;  %v12326_v43 = vld [vmem:[#allocation146_spill] sm:$0xff] }
 0x6b3   : > { %v11081_v33 = vmul.f32 1.442695, %v5534_v2  ;;  %8066 = vrcp.f32 %v5764_v62  ;;  %v5759_v55 = vadd.f32 %v11074_v17, %v11058_v31  ;;  %v5539_v48 = vsub.f32 %v10909_v5, %v5434_v23  ;;  %12325 = vst [vmem:[#allocation195_spill] sm:$0xff] %v11092_v3  ;;  %v12327_v58 = vld [vmem:[#allocation157_spill] sm:$0xff]  ;;  %v12330_v17 = vld [vmem:[#allocation158_spill] sm:$0xff]  ;;  %v11105_v23 = vpop.eup %8050 }
 0x6b4   : > { %v11088_v32 = vmul.f32 1.442695, %v5475_v56  ;;  %8068 = vpow2.f32 %v10950_v47  ;;  %v11095_v41 = vmul.f32 1.442695, %v5507_v19  ;;  %v12328_v2 = vmax.f32 %v12326_v43, %v12327_v58  ;;  %12332 = vst [vmem:[#allocation146_spill] sm:$0xff] %v11105_v23  ;;  %v12333_v47 = vld [vmem:[#allocation148_spill] sm:$0xff]  ;;  %v11115_v44 = vpop.eup %8052 }
 0x6b5   : > { %v12331_v31 = vmax.f32 %v12329_v16, %v12330_v17  ;;  %v5760_v56 = vadd.f32 %v11083_v10, %v5759_v55  ;;  %8070 = vpow2.f32 %v10952_v40  ;;  %v11109_v4 = vmul.f32 1.442695, %v5539_v48  ;;  %v12334_v19 = vld [vmem:[#allocation159_spill] sm:$0xff]  ;;  %12336 = vst [vmem:[#allocation157_spill] sm:$0xff] %v11115_v44  ;;  %v11121_v55 = vpop.eup %8054 }
 0x6b6   : > { %v5430_v62 = vmax.f32 %v12328_v2, %v10918_v53  ;;  %v12335_v45 = vmax.f32 %v12333_v47, %v12334_v19  ;;  %8072 = vpow2.f32 %v10960_v21  ;;  %12337 = vst [vmem:[#allocation147_spill] sm:$0xff] %v11121_v55  ;;  %v5769_v40 = vadd.f32 %v11115_v44, %v11092_v3  ;;  %v11127_v10 = vpop.eup %8056  ;;  %v12346_v3 = vld [vmem:[#allocation85_spill] sm:$0xff] }
 0x6b7   : > { %v5436_v5 = vmax.f32 %v12331_v31, %v10929_v1  ;;  %8074 = vrcp.f32 %v5760_v56 }
 0x6b8   : > { %v5432_v18 = vmax.f32 %v12335_v45, %v10937_v22  ;;  %v5473_v2 = vsub.f32 %v12326_v43, %v5430_v62  ;;  %v5505_v31 = vsub.f32 %v12327_v58, %v5430_v62  ;;  %v5537_v23 = vsub.f32 %v10918_v53, %v5430_v62  ;;  %v11136_v53 = vpop.eup %8058 }
 0x6b9   : > { %v5476_v48 = vsub.f32 %v12329_v16, %v5436_v5  ;;  %v5508_v45 = vsub.f32 %v12330_v17, %v5436_v5  ;;  %8076 = vpow2.f32 %v10965_v0  ;;  %v5770_v62 = vadd.f32 %v11121_v55, %v5769_v40  ;;  %v11143_v17 = vpop.eup %8060  ;;  %v12344_v55 = vld [vmem:[#allocation53_spill] sm:$0xff] }
 0x6ba   : > { %v11130_v21 = vmul.f32 1.442695, %v5473_v2  ;;  %v11132_v43 = vmul.f32 1.442695, %v5505_v31  ;;  %v11134_v58 = vmul.f32 1.442695, %v5537_v23  ;;  %8078 = vpow2.f32 %v10979_v13  ;;  %v11150_v31 = vpop.eup %8062 }
 0x6bb   : > { %v5540_v16 = vsub.f32 %v10929_v1, %v5436_v5  ;;  %v11141_v56 = vmul.f32 1.442695, %v5476_v48  ;;  %12338 = vst [vmem:[#allocation158_spill] sm:$0xff] %v11143_v17  ;;  %8080 = vpow2.f32 %v11006_v29  ;;  %v11146_v0 = vmul.f32 1.442695, %v5508_v45  ;;  %12339 = vst [vmem:[#allocation148_spill] sm:$0xff] %v11150_v31  ;;  %v11157_v5 = vpop.eup %8064 }
 0x6bc   : > { %v5474_v2 = vsub.f32 %v12333_v47, %v5432_v18  ;;  %v5506_v23 = vsub.f32 %v12334_v19, %v5432_v18  ;;  %8082 = vrcp.f32 %v5770_v62  ;;  %v5765_v13 = vadd.f32 %v11143_v17, %v11127_v10 }
 0x6bd   : > { %v11154_v40 = vmul.f32 1.442695, %v5540_v16  ;;  %v5538_v1 = vsub.f32 %v10937_v22, %v5432_v18  ;;  %8084 = vpow2.f32 %v11008_v26  ;;  %v5806_v47 = vmul.f32 %v10864_v27, %v10738_v46  ;;  %v11166_v19 = vpop.eup %8066  ;;  %v12341_v16 = vld [vmem:[#allocation169_spill] sm:$0xff] }
 0x6be   : > { %v11160_v29 = vmul.f32 1.442695, %v5474_v2  ;;  %v11162_v48 = vmul.f32 1.442695, %v5506_v23  ;;  %v5766_v45 = vadd.f32 %v11150_v31, %v5765_v13  ;;  %8086 = vpow2.f32 %v11010_v14  ;;  %v11174_v18 = vpop.eup %8068  ;;  %v12342_v2 = vld [vmem:[#allocation168_spill] sm:$0xff] }
 0x6bf   : > { %v11170_v62 = vmul.f32 1.442695, %v5538_v1  ;;  %v5808_v22 = vmul.f32 %v10920_v60, %v10780_v52  ;;  %12340 = vst [vmem:[#allocation159_spill] sm:$0xff] %v11174_v18  ;;  %8088 = vpow2.f32 %v11017_v38  ;;  %v5869_v26 = vmul.f32 %v10864_v27, %v10742_v61  ;;  %v11183_v13 = vpop.eup %8070  ;;  %v12343_v52 = vld [vmem:[#allocation170_spill] sm:$0xff]  ;;  %v12345_v61 = vld [vmem:[#allocation55_spill] sm:$0xff] }
 0x6c0   : > { %v5870_v46 = vmul.f32 %v10920_v60, %v12341_v16  ;;  %v5901_v23 = vmul.f32 %v10864_v27, %v12342_v2  ;;  %8090 = vrcp.f32 %v5766_v45  ;;  %v5771_v14 = vadd.f32 %v11174_v18, %v11157_v5  ;;  %v11190_v44 = vpop.eup %8072  ;;  %v12347_v27 = vld [vmem:[#allocation87_spill] sm:$0xff]  ;;  %v12348_v18 = vld [vmem:[#allocation116_spill] sm:$0xff] }
 0x6c1   : > { %v5902_v1 = vmul.f32 %v10920_v60, %v12343_v52  ;;  %v5933_v38 = vmul.f32 %v5806_v47, %v12344_v55  ;;  %8092 = vpow2.f32 %v11024_v50  ;;  %v5934_v16 = vmul.f32 %v5808_v22, %v12345_v61  ;;  %v11196_v17 = vpop.eup %8074  ;;  %v12349_v52 = vld [vmem:[#allocation117_spill] sm:$0xff] }
 0x6c2   : > { %v5965_v31 = vmul.f32 %v5869_v26, %v12346_v3  ;;  %v5966_v2 = vmul.f32 %v5870_v46, %v12347_v27  ;;  %v5772_v45 = vadd.f32 %v11183_v13, %v5771_v14  ;;  %8094 = vpow2.f32 %v11032_v57  ;;  %v12350_v3 = vld [vmem:[#allocation52_spill] sm:$0xff]  ;;  %v12351_v57 = vld [vmem:[#allocation54_spill] sm:$0xff] }
 0x6c3   : > { %v5997_v60 = vmul.f32 %v5901_v23, %v12348_v18  ;;  %v5998_v55 = vmul.f32 %v5902_v1, %v12349_v52  ;;  %v11202_v47 = vpop.eup %8076  ;;  %8096 = vpow2.f32 %v11038_v49  ;;  %v5935_v26 = vmul.f32 %v12350_v3, %v10845_v9  ;;  %v12352_v23 = vld [vmem:[#allocation84_spill] sm:$0xff]  ;;  %v12353_v9 = vld [vmem:[#allocation86_spill] sm:$0xff] }
 0x6c4   : > { %v6029_v50 = vadd.f32 %v5965_v31, %v5933_v38  ;;  %v6031_v22 = vadd.f32 %v5966_v2, %v5934_v16  ;;  %v11207_v46 = vpop.eup %8078  ;;  %8098 = vrcp.f32 %v5772_v45  ;;  %v5767_v14 = vadd.f32 %v11202_v47, %v11190_v44  ;;  %v12355_v45 = vld [vmem:[#allocation160_spill] sm:$0xff] }
 0x6c5   : > { %v5936_v18 = vmul.f32 %v12351_v57, %v10902_v54  ;;  %v5967_v1 = vmul.f32 %v12352_v23, %v10848_v8  ;;  %v11215_v61 = vpop.eup %8080  ;;  %8100 = vpow2.f32 %v11040_v37  ;;  %v5968_v38 = vmul.f32 %v12353_v9, %v10905_v24  ;;  %v12354_v54 = vld [vmem:[#allocation149_spill] sm:$0xff]  ;;  %v12357_v24 = vld [vmem:[#allocation150_spill] sm:$0xff] }
 0x6c6   : > { %v6030_v49 = vadd.f32 %v6029_v50, %v5997_v60  ;;  %v6032_v31 = vadd.f32 %v6031_v22, %v5998_v55  ;;  %v11220_v16 = vpop.eup %8082  ;;  %v5768_v27 = vadd.f32 %v11207_v46, %v5767_v14  ;;  %8102 = vpow2.f32 %v11050_v59  ;;  %v12358_v55 = vld [vmem:[#allocation161_spill] sm:$0xff] }
 0x6c7   : > { %v6033_v2 = vadd.f32 %v5967_v1, %v5935_v26  ;;  %v12356_v8 = vmax.f32 %v12354_v54, %v12355_v45  ;;  %v11228_v3 = vpop.eup %8084  ;;  %8104 = vpow2.f32 %v11077_v15  ;;  %v6035_v60 = vadd.f32 %v5968_v38, %v5936_v18 }
 0x6c8   : > { %v6093_v37 = vpack.c.bf16 %v6032_v31, %v6030_v49  ;;  %v12359_v50 = vmax.f32 %v12357_v24, %v12358_v55  ;;  %v11235_v14 = vpop.eup %8086  ;;  %8106 = vrcp.f32 %v5768_v27  ;;  %v5777_v59 = vadd.f32 %v11228_v3, %v11215_v61 }
 0x6c9   : > { %v5442_v52 = vmax.f32 %v12356_v8, %v10985_v11  ;;  %v6034_v26 = vadd.f32 %v6033_v2, %v10867_v63  ;;  %v11241_v23 = vpop.eup %8088  ;;  %8108 = vpow2.f32 %v11079_v34  ;;  %v6036_v15 = vadd.f32 %v6035_v60, %v10923_v30  ;;  %v12360_v8 = vld [vmem:[#allocation151_spill] sm:$0xff] }
 0x6ca   : > { %v5438_v22 = vmax.f32 %v12359_v50, %v10993_v42  ;;  %7452 = vmatprep.mubr.bf16.mxu0 %v6093_v37  ;;  %v11247_v49 = vpop.eup %8090  ;;  %v5778_v31 = vadd.f32 %v11235_v14, %v5777_v59  ;;  %8110 = vpow2.f32 %v11081_v33  ;;  %v12364_v50 = vld [vmem:[#allocation163_spill] sm:$0xff] }
 0x6cb   : > { %v5479_v57 = vsub.f32 %v12354_v54, %v5442_v52  ;;  %v5511_v18 = vsub.f32 %v12355_v45, %v5442_v52  ;;  %v5543_v1 = vsub.f32 %v10985_v11, %v5442_v52  ;;  %v11254_v38 = vpop.eup %8092  ;;  %8112 = vpow2.f32 %v11088_v32  ;;  %v12361_v52 = vld [vmem:[#allocation162_spill] sm:$0xff] }
 0x6cc   : > { %v5477_v9 = vsub.f32 %v12357_v24, %v5438_v22  ;;  %v6094_v34 = vpack.c.bf16 %v6036_v15, %v6034_v26  ;;  %v11261_v11 = vpop.eup %8094  ;;  %8114 = vrcp.f32 %v5778_v31  ;;  %v5773_v2 = vadd.f32 %v11254_v38, %v11241_v23  ;;  %v12363_v24 = vld [vmem:[#allocation152_spill] sm:$0xff] }
 0x6cd   : > { %v11251_v63 = vmul.f32 1.442695, %v5479_v57  ;;  %v11257_v30 = vmul.f32 1.442695, %v5511_v18  ;;  %v11259_v27 = vmul.f32 1.442695, %v5543_v1  ;;  %v5509_v33 = vsub.f32 %v12358_v55, %v5438_v22  ;;  %v11267_v45 = vpop.eup %8096 }
 0x6ce   : > { %v5541_v54 = vsub.f32 %v10993_v42, %v5438_v22  ;;  %8116 = vpow2.f32 %v11095_v41  ;;  %7453 = vmatmul.mubr.bf16.vlgmr.msra.gmra.mrb[144].mxu0 %v6094_v34  ;;  %v11270_v32 = vmul.f32 1.442695, %v5477_v9  ;;  %v12362_v37 = vmax.f32 %v12360_v8, %v12361_v52  ;;  %v11280_v55 = vpop.eup %8098 }
 0x6cf   : > { %v12365_v59 = vmax.f32 %v12363_v24, %v12364_v50  ;;  %v5774_v42 = vadd.f32 %v11261_v11, %v5773_v2  ;;  %8118 = vpow2.f32 %v11109_v4  ;;  %v11284_v41 = vmul.f32 1.442695, %v5509_v33  ;;  %v11288_v57 = vpop.eup %8100 }
 0x6d0   : > { %v5444_v60 = vmax.f32 %v12362_v37, %v11001_v28  ;;  %v11286_v22 = vmul.f32 1.442695, %v5541_v54  ;;  %8120 = vpow2.f32 %v11130_v21  ;;  %v11294_v31 = vpop.eup %8102  ;;  %v5779_v4 = vadd.f32 %v11288_v57, %v11267_v45 }
 0x6d1   : > { %v5440_v26 = vmax.f32 %v12365_v59, %v11019_v36  ;;  %12366 = vst [vmem:[#allocation169_spill] sm:$0xff] %v11294_v31  ;;  %8122 = vrcp.f32 %v5774_v42  ;;  %v11300_v2 = vpop.eup %8104  ;;  %v12368_v42 = vld [vmem:[#allocation177_spill] sm:$0xff] }
 0x6d2   : > { %v5480_v15 = vsub.f32 %v12360_v8, %v5444_v60  ;;  %v5512_v18 = vsub.f32 %v12361_v52, %v5444_v60  ;;  %v5544_v1 = vsub.f32 %v11001_v28, %v5444_v60  ;;  %8124 = vpow2.f32 %v11132_v43  ;;  %v11309_v28 = vpop.eup %8106 }
 0x6d3   : > { %v5478_v9 = vsub.f32 %v12363_v24, %v5440_v26  ;;  %v5510_v34 = vsub.f32 %v12364_v50, %v5440_v26  ;;  %v5780_v8 = vadd.f32 %v11294_v31, %v5779_v4  ;;  %8126 = vpow2.f32 %v11134_v58  ;;  %v11316_v60 = vpop.eup %8108 }
 0x6d4   : > { %v11303_v21 = vmul.f32 1.442695, %v5480_v15  ;;  %v11305_v33 = vmul.f32 1.442695, %v5512_v18  ;;  %v11307_v54 = vmul.f32 1.442695, %v5544_v1  ;;  %v5542_v52 = vsub.f32 %v11019_v36, %v5440_v26  ;;  %v11325_v59 = vpop.eup %8110 }
 0x6d5   : > { %v11314_v37 = vmul.f32 1.442695, %v5478_v9  ;;  %8128 = vpow2.f32 %v11141_v56  ;;  %v11319_v43 = vmul.f32 1.442695, %v5510_v34  ;;  %v5814_v24 = vmul.f32 %v10987_v25, %v10828_v20  ;;  %v11333_v56 = vpop.eup %8112  ;;  %v12370_v9 = vld [vmem:[#allocation59_spill] sm:$0xff] }
 0x6d6   : > { %v5816_v50 = vmul.f32 %v11066_v35, %v10911_v12  ;;  %8130 = vrcp.f32 %v5780_v8  ;;  %v5775_v36 = vadd.f32 %v11316_v60, %v11300_v2  ;;  %v11329_v58 = vmul.f32 1.442695, %v5542_v52  ;;  %12367 = vst [vmem:[#allocation168_spill] sm:$0xff] %v11333_v56  ;;  %v11342_v18 = vpop.eup %8114  ;;  %v12374_v52 = vld [vmem:[#allocation119_spill] sm:$0xff] }
 0x6d7   : > { %v5873_v26 = vmul.f32 %v10987_v25, %v10842_v51  ;;  %8132 = vpow2.f32 %v11146_v0  ;;  %v5874_v20 = vmul.f32 %v11066_v35, %v10931_v6  ;;  %v5905_v12 = vmul.f32 %v10987_v25, %v10854_v39  ;;  %v12369_v51 = vld [vmem:[#allocation57_spill] sm:$0xff]  ;;  %v12373_v39 = vld [vmem:[#allocation91_spill] sm:$0xff] }
 0x6d8   : > { %v5906_v15 = vmul.f32 %v11066_v35, %v12368_v42  ;;  %v5776_v1 = vadd.f32 %v11325_v59, %v5775_v36  ;;  %8134 = vpow2.f32 %v11154_v40  ;;  %v5937_v4 = vmul.f32 %v5814_v24, %v12369_v51  ;;  %v11348_v0 = vpop.eup %8116  ;;  %v12372_v6 = vld [vmem:[#allocation89_spill] sm:$0xff]  ;;  %v12377_v51 = vld [vmem:[#allocation171_spill] sm:$0xff] }
 0x6d9   : > { %v5938_v34 = vmul.f32 %v5816_v50, %v12370_v9  ;;  %12371 = vst [vmem:[#allocation170_spill] sm:$0xff] %v11348_v0  ;;  %8136 = vpow2.f32 %v11160_v29  ;;  %v5969_v8 = vmul.f32 %v5873_v26, %v12372_v6  ;;  %v5970_v25 = vmul.f32 %v5874_v20, %v12373_v39  ;;  %v11354_v42 = vpop.eup %8118  ;;  %v12376_v36 = vld [vmem:[#allocation121_spill] sm:$0xff]  ;;  %v12378_v50 = vld [vmem:[#allocation178_spill] sm:$0xff]  ;;  %v12380_v39 = vld [vmem:[#allocation172_spill] sm:$0xff] }
 0x6da   : > { %v6001_v35 = vmul.f32 %v5905_v12, %v12374_v52  ;;  %12375 = vst [vmem:[#allocation53_spill] sm:$0xff] %v11354_v42  ;;  %8138 = vrcp.f32 %v5776_v1  ;;  %v5785_v40 = vadd.f32 %v11348_v0, %v11333_v56  ;;  %v6002_v24 = vmul.f32 %v5906_v15, %v12376_v36  ;;  %v11361_v31 = vpop.eup %8120  ;;  %v12379_v20 = vld [vmem:[#allocation174_spill] sm:$0xff]  ;;  %v12381_v52 = vld [vmem:[#allocation175_spill] sm:$0xff] }
 0x6db   : > { %v5818_v9 = vmul.f32 %v12378_v50, %v12377_v51  ;;  %8140 = vpow2.f32 %v11162_v48  ;;  %v6037_v29 = vadd.f32 %v5969_v8, %v5937_v4  ;;  %v6039_v26 = vadd.f32 %v5970_v25, %v5938_v34  ;;  %v11366_v6 = vpop.eup %8122  ;;  %v12382_v34 = vld [vmem:[#allocation173_spill] sm:$0xff] }
 0x6dc   : > { %v5820_v12 = vmul.f32 %v11021_v7, %v12379_v20  ;;  %v5786_v1 = vadd.f32 %v11354_v42, %v5785_v40  ;;  %8142 = vpow2.f32 %v11170_v62  ;;  %v5875_v15 = vmul.f32 %v12378_v50, %v12380_v39  ;;  %v11374_v51 = vpop.eup %8124  ;;  %v12384_v40 = vld [vmem:[#allocation176_spill] sm:$0xff] }
 0x6dd   : > { %v5876_v36 = vmul.f32 %v11021_v7, %v12381_v52  ;;  %8144 = vpow2.f32 %v11251_v63  ;;  %v6038_v48 = vadd.f32 %v6037_v29, %v6001_v35  ;;  %v6040_v4 = vadd.f32 %v6039_v26, %v6002_v24  ;;  %v11379_v25 = vpop.eup %8126  ;;  %v12385_v39 = vld [vmem:[#allocation56_spill] sm:$0xff]  ;;  %v12387_v35 = vld [vmem:[#allocation58_spill] sm:$0xff] }
 0x6de   : > { %v5907_v8 = vmul.f32 %v12378_v50, %v12382_v34  ;;  %12383 = vst [vmem:[#allocation55_spill] sm:$0xff] %v11379_v25  ;;  %8146 = vrcp.f32 %v5786_v1  ;;  %v5781_v62 = vadd.f32 %v11374_v51, %v11361_v31  ;;  %v5908_v20 = vmul.f32 %v11021_v7, %v12384_v40  ;;  %v12388_v29 = vld [vmem:[#allocation88_spill] sm:$0xff]  ;;  %v12389_v34 = vld [vmem:[#allocation90_spill] sm:$0xff] }
 0x6df   : > { %v5939_v52 = vmul.f32 %v12385_v39, %v5818_v9  ;;  %v11386_v42 = vpop.eup %8128  ;;  %8148 = vpow2.f32 %v11257_v30  ;;  %v6095_v63 = vpack.c.bf16 %v6040_v4, %v6038_v48  ;;  %v5940_v24 = vmul.f32 %v12387_v35, %v5820_v12  ;;  %v12390_v7 = vld [vmem:[#allocation118_spill] sm:$0xff]  ;;  %v12392_v30 = vld [vmem:[#allocation120_spill] sm:$0xff] }
 0x6e0   : > { %12386 = vst [vmem:[#allocation85_spill] sm:$0xff] %v11386_v42  ;;  %v5971_v50 = vmul.f32 %v12388_v29, %v5875_v15  ;;  %v11391_v26 = vpop.eup %8130  ;;  %v5782_v1 = vadd.f32 %v11379_v25, %v5781_v62  ;;  %8150 = vpow2.f32 %v11259_v27  ;;  %v5972_v0 = vmul.f32 %v12389_v34, %v5876_v36  ;;  %v12393_v4 = vld [vmem:[#allocation188_spill] sm:$0xff]  ;;  %v12394_v15 = vld [vmem:[#allocation153_spill] sm:$0xff]  ;;  %v12399_v34 = vld [vmem:[#allocation154_spill] sm:$0xff] }
 0x6e1   : > { %v6003_v40 = vmul.f32 %v12390_v7, %v5907_v8  ;;  %v11397_v9 = vpop.eup %8132  ;;  %8152 = vpow2.f32 %v11270_v32  ;;  %7456 = vmatprep.mubr.bf16.mxu0 %v6095_v63  ;;  %v6004_v48 = vmul.f32 %v12392_v30, %v5908_v20  ;;  %v12395_v39 = vld [vmem:[#allocation164_spill] sm:$0xff]  ;;  %v12398_v8 = vld [vmem:[#allocation190_spill] sm:$0xff]  ;;  %v12400_v7 = vld [vmem:[#allocation165_spill] sm:$0xff] }
 0x6e2   : > { %12391 = vst [vmem:[#allocation87_spill] sm:$0xff] %v11397_v9  ;;  %v6041_v12 = vadd.f32 %v5971_v50, %v5939_v52  ;;  %v12396_v35 = vmax.f32 %v12394_v15, %v12395_v39  ;;  %v11405_v62 = vpop.eup %8134  ;;  %8154 = vrcp.f32 %v5782_v1  ;;  %v5787_v27 = vadd.f32 %v11397_v9, %v11386_v42 }
 0x6e3   : > { %12397 = vst [vmem:[#allocation116_spill] sm:$0xff] %v11405_v62  ;;  %v6043_v36 = vadd.f32 %v5972_v0, %v5940_v24  ;;  %v12401_v32 = vmax.f32 %v12399_v34, %v12400_v7  ;;  %v11413_v56 = vpop.eup %8136  ;;  %8156 = vpow2.f32 %v11284_v41 }
 0x6e4   : > { %v5450_v29 = vmax.f32 %v12396_v35, %v12393_v4  ;;  %v6042_v20 = vadd.f32 %v6041_v12, %v6003_v40  ;;  %v11418_v30 = vpop.eup %8138  ;;  %v5788_v1 = vadd.f32 %v11405_v62, %v5787_v27  ;;  %8158 = vpow2.f32 %v11286_v22 }
 0x6e5   : > { %v5446_v63 = vmax.f32 %v12401_v32, %v12398_v8  ;;  %v6044_v0 = vadd.f32 %v6043_v36, %v6004_v48  ;;  %v11423_v35 = vpop.eup %8140  ;;  %8160 = vpow2.f32 %v11303_v21 }
 0x6e6   : > { %v5483_v52 = vsub.f32 %v12394_v15, %v5450_v29  ;;  %v5515_v50 = vsub.f32 %v12395_v39, %v5450_v29  ;;  %v5547_v24 = vsub.f32 %v12393_v4, %v5450_v29  ;;  %v11427_v12 = vpop.eup %8142  ;;  %8162 = vrcp.f32 %v5788_v1 }
 0x6e7   : > { %v5481_v40 = vsub.f32 %v12399_v34, %v5446_v63  ;;  %12402 = vst [vmem:[#allocation117_spill] sm:$0xff] %v11427_v12  ;;  %v5783_v15 = vadd.f32 %v11423_v35, %v11413_v56  ;;  %v6096_v39 = vpack.c.bf16 %v6044_v0, %v6042_v20  ;;  %v11431_v22 = vpop.eup %8144  ;;  %8164 = vpow2.f32 %v11305_v33  ;;  %v12405_v34 = vld [vmem:[#allocation191_spill] sm:$0xff]  ;;  %v12407_v20 = vld [vmem:[#allocation166_spill] sm:$0xff] }
 0x6e8   : > { %v5609_v32 = vmul.f32 1.442695, %v5483_v52  ;;  %v5673_v41 = vmul.f32 1.442695, %v5515_v50  ;;  %v5737_v27 = vmul.f32 1.442695, %v5547_v24  ;;  %v5513_v48 = vsub.f32 %v12400_v7, %v5446_v63  ;;  %v11436_v29 = vpop.eup %8146 }
 0x6e9   : > { %12403 = vst [vmem:[#allocation52_spill] sm:$0xff] %v11431_v22  ;;  %v5545_v21 = vsub.f32 %v12398_v8, %v5446_v63  ;;  %v5605_v4 = vmul.f32 1.442695, %v5481_v40  ;;  %12404 = vst [vmem:[#allocation54_spill] sm:$0xff] %v11436_v29  ;;  %v5784_v36 = vadd.f32 %v11427_v12, %v5783_v15  ;;  %8166 = vpow2.f32 %v11307_v54  ;;  %7457 = vmatmul.mubr.bf16.gmra.mrb[148].mxu0 %v6096_v39  ;;  %v12406_v52 = vld [vmem:[#allocation155_spill] sm:$0xff]  ;;  %v12409_v0 = vld [vmem:[#allocation194_spill] sm:$0xff]  ;;  %v11448_v9 = vpop.eup %8148 }
 0x6ea   : > { %v12408_v50 = vmax.f32 %v12406_v52, %v12407_v20  ;;  %v12410_v24 = vld [vmem:[#allocation156_spill] sm:$0xff]  ;;  %v12411_v33 = vld [vmem:[#allocation167_spill] sm:$0xff]  ;;  %12413 = vst [vmem:[#allocation84_spill] sm:$0xff] %v11448_v9  ;;  %8168 = vpow2.f32 %v11314_v37  ;;  %v5669_v8 = vmul.f32 1.442695, %v5513_v48  ;;  %v12414_v40 = vld [vmem:[#allocation182_spill] sm:$0xff]  ;;  %v11453_v15 = vpop.eup %8150  ;;  %v5793_v39 = vadd.f32 %v11448_v9, %v11431_v22 }
 0x6eb   : > { %v12412_v62 = vmax.f32 %v12410_v24, %v12411_v33  ;;  %v5733_v63 = vmul.f32 1.442695, %v5545_v21  ;;  %v5822_v54 = vmul.f32 %v11136_v53, %v12414_v40  ;;  %12415 = vst [vmem:[#allocation86_spill] sm:$0xff] %v11453_v15  ;;  %8170 = vrcp.f32 %v5784_v36  ;;  %v12428_v12 = vld [vmem:[#allocation93_spill] sm:$0xff] }
 0x6ec   : > { %v5452_v1 = vmax.f32 %v12408_v50, %v12405_v34  ;;  %8172 = vpow2.f32 %v11319_v43  ;;  %v5794_v36 = vadd.f32 %v11453_v15, %v5793_v39 }
 0x6ed   : > { %v5448_v7 = vmax.f32 %v12412_v62, %v12409_v0  ;;  %v11459_v62 = vpop.eup %8152  ;;  %8174 = vpow2.f32 %v11329_v58 }
 0x6ee   : > { %v5484_v50 = vsub.f32 %v12406_v52, %v5452_v1  ;;  %v5516_v42 = vsub.f32 %v12407_v20, %v5452_v1  ;;  %12416 = vst [vmem:[#allocation149_spill] sm:$0xff] %v11459_v62  ;;  %v5548_v37 = vsub.f32 %v12405_v34, %v5452_v1  ;;  %v11465_v40 = vpop.eup %8154  ;;  %8176 = vpow2.f32 %v5609_v32  ;;  %v12421_v32 = vld [vmem:[#allocation183_spill] sm:$0xff] }
 0x6ef   : > { %v5482_v48 = vsub.f32 %v12410_v24, %v5448_v7  ;;  %v5514_v21 = vsub.f32 %v12411_v33, %v5448_v7  ;;  %v11469_v22 = vpop.eup %8156  ;;  %v5546_v43 = vsub.f32 %v12409_v0, %v5448_v7  ;;  %8178 = vrcp.f32 %v5794_v36  ;;  %v12419_v33 = vld [vmem:[#allocation189_spill] sm:$0xff]  ;;  %v12422_v7 = vld [vmem:[#allocation192_spill] sm:$0xff] }
 0x6f0   : > { %v5611_v9 = vmul.f32 1.442695, %v5484_v50  ;;  %v5675_v52 = vmul.f32 1.442695, %v5516_v42  ;;  %12417 = vst [vmem:[#allocation160_spill] sm:$0xff] %v11469_v22  ;;  %v11472_v34 = vpop.eup %8158  ;;  %v5789_v1 = vadd.f32 %v11469_v22, %v11459_v62  ;;  %v5824_v58 = vmul.f32 %v11196_v17, %v12419_v33  ;;  %v12424_v33 = vld [vmem:[#allocation193_spill] sm:$0xff] }
 0x6f1   : > { %v5739_v20 = vmul.f32 1.442695, %v5548_v37  ;;  %v5607_v29 = vmul.f32 1.442695, %v5482_v48  ;;  %12418 = vst [vmem:[#allocation150_spill] sm:$0xff] %v11472_v34  ;;  %v11480_v39 = vpop.eup %8160  ;;  %8180 = vpow2.f32 %v5673_v41  ;;  %v5877_v0 = vmul.f32 %v11136_v53, %v12421_v32  ;;  %v12427_v32 = vld [vmem:[#allocation63_spill] sm:$0xff] }
 0x6f2   : > { %v11476_v24 = vmul.f32 1.442695, %v5514_v21  ;;  %12420 = vst [vmem:[#allocation161_spill] sm:$0xff] %v11480_v39  ;;  %v11482_v42 = vmul.f32 1.442695, %v5546_v43  ;;  %v5878_v50 = vmul.f32 %v11196_v17, %v12422_v7  ;;  %v11488_v37 = vpop.eup %8162  ;;  %v5790_v48 = vadd.f32 %v11472_v34, %v5789_v1  ;;  %v12423_v21 = vld [vmem:[#allocation184_spill] sm:$0xff] }
 0x6f3   : > { %8182 = vpow2.f32 %v5737_v27  ;;  %v5909_v36 = vmul.f32 %v11136_v53, %v12423_v21  ;;  %v5910_v15 = vmul.f32 %v11196_v17, %v12424_v33  ;;  %v11495_v41 = vpop.eup %8164  ;;  %v12426_v43 = vld [vmem:[#allocation61_spill] sm:$0xff]  ;;  %v5942_v62 = vmul.f32 %v5824_v58, %v12427_v32  ;;  %v12430_v1 = vld [vmem:[#allocation95_spill] sm:$0xff]  ;;  %v12434_v58 = vld [vmem:[#allocation146_spill] sm:$0xff] }
 0x6f4   : > { %12425 = vst [vmem:[#allocation151_spill] sm:$0xff] %v11495_v41  ;;  %8184 = vpow2.f32 %v5605_v4  ;;  %v5941_v22 = vmul.f32 %v5822_v54, %v12426_v43  ;;  %v5973_v7 = vmul.f32 %v5877_v0, %v12428_v12  ;;  %v11500_v25 = vpop.eup %8166  ;;  %v5795_v27 = vadd.f32 %v11495_v41, %v11480_v39  ;;  %v12431_v21 = vld [vmem:[#allocation123_spill] sm:$0xff]  ;;  %v12432_v4 = vld [vmem:[#allocation125_spill] sm:$0xff] }
 0x6f5   : > { %12429 = vst [vmem:[#allocation162_spill] sm:$0xff] %v11500_v25  ;;  %8186 = vrcp.f32 %v5790_v48  ;;  %v5974_v53 = vmul.f32 %v5878_v50, %v12430_v1  ;;  %v6005_v34 = vmul.f32 %v5909_v36, %v12431_v21  ;;  %v11506_v17 = vpop.eup %8168  ;;  %v6006_v33 = vmul.f32 %v5910_v15, %v12432_v4  ;;  %v12433_v43 = vld [vmem:[#allocation179_spill] sm:$0xff]  ;;  %v12435_v41 = vld [vmem:[#allocation185_spill] sm:$0xff]  ;;  %v12441_v4 = vld [vmem:[#allocation60_spill] sm:$0xff] }
 0x6f6   : > { %8188 = vpow2.f32 %v5669_v8  ;;  %v6045_v54 = vadd.f32 %v5973_v7, %v5941_v22  ;;  %v5826_v32 = vmul.f32 %v12434_v58, %v12433_v43  ;;  %v11511_v12 = vpop.eup %8170  ;;  %v5796_v0 = vadd.f32 %v11500_v25, %v5795_v27  ;;  %v12437_v8 = vld [vmem:[#allocation180_spill] sm:$0xff]  ;;  %v12438_v22 = vld [vmem:[#allocation186_spill] sm:$0xff]  ;;  %v12439_v27 = vld [vmem:[#allocation181_spill] sm:$0xff] }
 0x6f7   : > { %8190 = vpow2.f32 %v5733_v63  ;;  %v6047_v48 = vadd.f32 %v5974_v53, %v5942_v62  ;;  %v5828_v50 = vmul.f32 %v11166_v19, %v12435_v41  ;;  %v11516_v1 = vpop.eup %8172  ;;  %v5879_v15 = vmul.f32 %v12434_v58, %v12437_v8  ;;  %v12442_v43 = vld [vmem:[#allocation62_spill] sm:$0xff] }
 0x6f8   : > { %12436 = vst [vmem:[#allocation152_spill] sm:$0xff] %v11516_v1  ;;  %8192 = vpow2.f32 %v5611_v9  ;;  %v6046_v36 = vadd.f32 %v6045_v54, %v6005_v34  ;;  %v5880_v7 = vmul.f32 %v11166_v19, %v12438_v22  ;;  %v11522_v21 = vpop.eup %8174  ;;  %v5791_v63 = vadd.f32 %v11516_v1, %v11506_v17  ;;  %v12440_v9 = vld [vmem:[#allocation187_spill] sm:$0xff] }
 0x6f9   : > { %8194 = vrcp.f32 %v5796_v0  ;;  %v6048_v62 = vadd.f32 %v6047_v48, %v6006_v33  ;;  %v5911_v41 = vmul.f32 %v12434_v58, %v12439_v27  ;;  %v11528_v53 = vpop.eup %8176  ;;  %v5912_v34 = vmul.f32 %v11166_v19, %v12440_v9  ;;  %v12443_v33 = vld [vmem:[#allocation92_spill] sm:$0xff]  ;;  %v12444_v58 = vld [vmem:[#allocation94_spill] sm:$0xff] }
 0x6fa   : > { %8196 = vpow2.f32 %v5675_v52  ;;  %v5943_v54 = vmul.f32 %v12441_v4, %v5826_v32  ;;  %v5944_v8 = vmul.f32 %v12442_v43, %v5828_v50  ;;  %v11534_v22 = vpop.eup %8178  ;;  %v5792_v0 = vadd.f32 %v11522_v21, %v5791_v63  ;;  %v12445_v27 = vld [vmem:[#allocation122_spill] sm:$0xff]  ;;  %v12446_v19 = vld [vmem:[#allocation124_spill] sm:$0xff] }
 0x6fb   : > { %8198 = vpow2.f32 %v5739_v20  ;;  %v6097_v25 = vpack.c.bf16 %v6048_v62, %v6046_v36  ;;  %v5975_v48 = vmul.f32 %v12443_v33, %v5879_v15  ;;  %v11538_v39 = vpop.eup %8180  ;;  %v5976_v52 = vmul.f32 %v12444_v58, %v5880_v7  ;;  %v12447_v63 = vld [vmem:[#allocation158_spill] sm:$0xff] }
 0x6fc   : > { %8200 = vpow2.f32 %v5607_v29  ;;  %v6007_v1 = vmul.f32 %v12445_v27, %v5911_v41  ;;  %v6008_v9 = vmul.f32 %v12446_v19, %v5912_v34  ;;  %v5801_v50 = vadd.f32 %v11538_v39, %v11528_v53  ;;  %v12452_v19 = vld [vmem:[#allocation99_spill] sm:$0xff] }
 0x6fd   : > { %v11543_v32 = vpop.eup %8182  ;;  %8202 = vrcp.f32 %v5792_v0  ;;  %7460 = vmatprep.mubr.bf16.mxu0 %v6097_v25  ;;  %v6049_v20 = vadd.f32 %v5975_v48, %v5943_v54  ;;  %v5830_v36 = vmul.f32 %v11247_v49, %v11127_v10  ;;  %v6051_v29 = vadd.f32 %v5976_v52, %v5944_v8  ;;  %v12448_v54 = vld [vmem:[#allocation148_spill] sm:$0xff]  ;;  %v12449_v8 = vld [vmem:[#allocation65_spill] sm:$0xff] }
 0x6fe   : > { %v11549_v15 = vpop.eup %8184  ;;  %8204 = vpow2.f32 %v11476_v24  ;;  %v5832_v7 = vmul.f32 %v11309_v28, %v11190_v44  ;;  %v5881_v62 = vmul.f32 %v11247_v49, %v12447_v63  ;;  %v5802_v34 = vadd.f32 %v11543_v32, %v5801_v50  ;;  %v12455_v63 = vld [vmem:[#allocation195_spill] sm:$0xff] }
 0x6ff   : > { %v11556_v41 = vpop.eup %8186  ;;  %8206 = vpow2.f32 %v11482_v42  ;;  %v6050_v25 = vadd.f32 %v6049_v20, %v6007_v1  ;;  %v5882_v10 = vmul.f32 %v11309_v28, %v11202_v47  ;;  %v6052_v24 = vadd.f32 %v6051_v29, %v6008_v9  ;;  %v12450_v1 = vld [vmem:[#allocation67_spill] sm:$0xff]  ;;  %v12451_v47 = vld [vmem:[#allocation97_spill] sm:$0xff] }
 0x700   : > { %v11562_v4 = vpop.eup %8188  ;;  %v5913_v43 = vmul.f32 %v11247_v49, %v12448_v54  ;;  %v5914_v44 = vmul.f32 %v11309_v28, %v11207_v46  ;;  %v5945_v0 = vmul.f32 %v5830_v36, %v12449_v8  ;;  %8208 = vrcp.f32 %v5802_v34  ;;  %v12453_v9 = vld [vmem:[#allocation127_spill] sm:$0xff]  ;;  %v12454_v46 = vld [vmem:[#allocation129_spill] sm:$0xff] }
 0x701   : > { %v11569_v33 = vpop.eup %8190  ;;  %v5797_v42 = vadd.f32 %v11562_v4, %v11549_v15  ;;  %v5946_v48 = vmul.f32 %v5832_v7, %v12450_v1  ;;  %v5977_v58 = vmul.f32 %v5881_v62, %v12451_v47  ;;  %v6098_v27 = vpack.c.bf16 %v6052_v24, %v6050_v25  ;;  %v12457_v54 = vld [vmem:[#allocation159_spill] sm:$0xff] }
 0x702   : > { %v11575_v52 = vpop.eup %8192  ;;  %v5978_v49 = vmul.f32 %v5882_v10, %v12452_v19  ;;  %v6009_v50 = vmul.f32 %v5913_v43, %v12453_v9  ;;  %v6010_v28 = vmul.f32 %v5914_v44, %v12454_v46  ;;  %v5834_v34 = vmul.f32 %v11220_v16, %v12455_v63  ;;  %v12456_v10 = vld [vmem:[#allocation157_spill] sm:$0xff]  ;;  %v12458_v44 = vld [vmem:[#allocation147_spill] sm:$0xff]  ;;  %v12460_v19 = vld [vmem:[#allocation66_spill] sm:$0xff] }
 0x703   : > { %v11580_v20 = vpop.eup %8194  ;;  %v5798_v36 = vadd.f32 %v11569_v33, %v5797_v42  ;;  %v6053_v29 = vadd.f32 %v5977_v58, %v5945_v0  ;;  %v5836_v7 = vmul.f32 %v11280_v55, %v11157_v5  ;;  %7461 = vmatmul.mubr.bf16.gmra.mrb[152].mxu0 %v6098_v27  ;;  %v5883_v24 = vmul.f32 %v11220_v16, %v12456_v10  ;;  %v12459_v58 = vld [vmem:[#allocation64_spill] sm:$0xff]  ;;  %v12462_v63 = vld [vmem:[#allocation98_spill] sm:$0xff] }
 0x704   : > { %v11587_v62 = vpop.eup %8196  ;;  %v6055_v25 = vadd.f32 %v5978_v49, %v5946_v48  ;;  %v5884_v43 = vmul.f32 %v11280_v55, %v12457_v54  ;;  %v5915_v8 = vmul.f32 %v11220_v16, %v12458_v44  ;;  %v5916_v1 = vmul.f32 %v11280_v55, %v11183_v13  ;;  %v12461_v9 = vld [vmem:[#allocation96_spill] sm:$0xff]  ;;  %v12463_v54 = vld [vmem:[#allocation126_spill] sm:$0xff] }
 0x705   : > { %v11595_v0 = vpop.eup %8198  ;;  %8210 = vrcp.f32 %v5798_v36  ;;  %v5803_v42 = vadd.f32 %v11587_v62, %v11575_v52  ;;  %v6054_v5 = vadd.f32 %v6053_v29, %v6009_v50  ;;  %v5947_v27 = vmul.f32 %v12459_v58, %v5834_v34  ;;  %v12464_v29 = vld [vmem:[#allocation128_spill] sm:$0xff] }
 0x706   : > { %v11601_v48 = vpop.eup %8200  ;;  %v6056_v47 = vadd.f32 %v6055_v25, %v6010_v28  ;;  %v5948_v49 = vmul.f32 %v12460_v19, %v5836_v7  ;;  %v5979_v46 = vmul.f32 %v12461_v9, %v5883_v24  ;;  %v5980_v10 = vmul.f32 %v12462_v63, %v5884_v43  ;;  %v12467_v9 = vld [vmem:[#allocation101_spill] sm:$0xff] }
 0x707   : > { %v11606_v16 = vpop.eup %8202  ;;  %v5804_v36 = vadd.f32 %v11595_v0, %v5803_v42  ;;  %v6011_v50 = vmul.f32 %v12463_v54, %v5915_v8  ;;  %v6012_v44 = vmul.f32 %v12464_v29, %v5916_v1  ;;  %v5838_v34 = vmul.f32 %v11366_v6, %v11241_v23  ;;  %v12470_v54 = vld [vmem:[#allocation133_spill] sm:$0xff] }
 0x708   : > { %v11612_v13 = vpop.eup %8204  ;;  %v6099_v55 = vpack.c.bf16 %v6056_v47, %v6054_v5  ;;  %v6057_v28 = vadd.f32 %v5979_v46, %v5947_v27  ;;  %v5840_v7 = vmul.f32 %v11418_v30, %v11300_v2  ;;  %v6059_v43 = vadd.f32 %v5980_v10, %v5948_v49  ;;  %v12465_v27 = vld [vmem:[#allocation69_spill] sm:$0xff]  ;;  %v12466_v49 = vld [vmem:[#allocation71_spill] sm:$0xff] }
 0x709   : > { %v11618_v25 = vpop.eup %8206  ;;  %8212 = vrcp.f32 %v5804_v36  ;;  %v5799_v24 = vadd.f32 %v11612_v13, %v11601_v48  ;;  %v5885_v8 = vmul.f32 %v11366_v6, %v11254_v38  ;;  %v5886_v5 = vmul.f32 %v11418_v30, %v11316_v60  ;;  %v12468_v36 = vld [vmem:[#allocation103_spill] sm:$0xff] }
 0x70a   : > { %7464 = vmatprep.mubr.bf16.mxu0 %v6099_v55  ;;  %v6058_v42 = vadd.f32 %v6057_v28, %v6011_v50  ;;  %v5917_v23 = vmul.f32 %v11366_v6, %v11261_v11  ;;  %v5918_v2 = vmul.f32 %v11418_v30, %v11325_v59  ;;  %v11630_v1 = vpop.eup %8208  ;;  %v6060_v58 = vadd.f32 %v6059_v43, %v6012_v44  ;;  %v12469_v60 = vld [vmem:[#allocation131_spill] sm:$0xff] }
 0x70b   : > { %v5800_v47 = vadd.f32 %v11618_v25, %v5799_v24  ;;  %v5949_v19 = vmul.f32 %v5838_v34, %v12465_v27  ;;  %v5950_v38 = vmul.f32 %v5840_v7, %v12466_v49  ;;  %v5981_v46 = vmul.f32 %v5885_v8, %v12467_v9  ;;  %v12471_v7 = vld [vmem:[#allocation169_spill] sm:$0xff]  ;;  %v12472_v24 = vld [vmem:[#allocation68_spill] sm:$0xff] }
 0x70c   : > { %v5982_v63 = vmul.f32 %v5886_v5, %v12468_v36  ;;  %v6013_v10 = vmul.f32 %v5917_v23, %v12469_v60  ;;  %v6014_v11 = vmul.f32 %v5918_v2, %v12470_v54  ;;  %v6100_v6 = vpack.c.bf16 %v6060_v58, %v6058_v42  ;;  %v12474_v23 = vld [vmem:[#allocation100_spill] sm:$0xff]  ;;  %v12475_v2 = vld [vmem:[#allocation102_spill] sm:$0xff]  ;;  %v12480_v54 = vld [vmem:[#allocation73_spill] sm:$0xff] }
 0x70d   : > { %8214 = vrcp.f32 %v5800_v47  ;;  %v5842_v59 = vmul.f32 %v11342_v18, %v11215_v61  ;;  %v5844_v30 = vmul.f32 %v11391_v26, %v11267_v45  ;;  %v6061_v50 = vadd.f32 %v5981_v46, %v5949_v19  ;;  %v12473_v45 = vld [vmem:[#allocation70_spill] sm:$0xff]  ;;  %v12477_v27 = vld [vmem:[#allocation132_spill] sm:$0xff] }
 0x70e   : > { %v6063_v29 = vadd.f32 %v5982_v63, %v5950_v38  ;;  %v5887_v44 = vmul.f32 %v11342_v18, %v11228_v3  ;;  %v5888_v55 = vmul.f32 %v11391_v26, %v11288_v57  ;;  %7465 = vmatmul.mubr.bf16.gmra.mrb[156].mxu0 %v6100_v6  ;;  %v5919_v34 = vmul.f32 %v11342_v18, %v11235_v14  ;;  %v12476_v57 = vld [vmem:[#allocation130_spill] sm:$0xff]  ;;  %v12478_v63 = vld [vmem:[#allocation55_spill] sm:$0xff] }
 0x70f   : > { %v11647_v28 = vpop.eup %8210  ;;  %v5920_v61 = vmul.f32 %v11391_v26, %v12471_v7  ;;  %v5951_v43 = vmul.f32 %v12472_v24, %v5842_v59  ;;  %v5952_v8 = vmul.f32 %v12473_v45, %v5844_v30  ;;  %v6062_v42 = vadd.f32 %v6061_v50, %v6013_v10  ;;  %v12479_v10 = vld [vmem:[#allocation117_spill] sm:$0xff]  ;;  %v12481_v59 = vld [vmem:[#allocation75_spill] sm:$0xff] }
 0x710   : > { %v6064_v5 = vadd.f32 %v6063_v29, %v6014_v11  ;;  %v5983_v3 = vmul.f32 %v12474_v23, %v5887_v44  ;;  %v5984_v47 = vmul.f32 %v12475_v2, %v5888_v55  ;;  %v6015_v58 = vmul.f32 %v12476_v57, %v5919_v34  ;;  %v12482_v50 = vld [vmem:[#allocation105_spill] sm:$0xff]  ;;  %v12483_v29 = vld [vmem:[#allocation107_spill] sm:$0xff] }
 0x711   : > { %v6016_v19 = vmul.f32 %v12477_v27, %v5920_v61  ;;  %v5846_v14 = vmul.f32 %v11465_v40, %v11361_v31  ;;  %v5848_v18 = vmul.f32 %v11511_v12, %v11413_v56  ;;  %v5889_v9 = vmul.f32 %v11465_v40, %v11374_v51  ;;  %v12484_v55 = vld [vmem:[#allocation135_spill] sm:$0xff]  ;;  %v12486_v61 = vld [vmem:[#allocation168_spill] sm:$0xff]  ;;  %v12488_v45 = vld [vmem:[#allocation85_spill] sm:$0xff] }
 0x712   : > { %v6101_v26 = vpack.c.bf16 %v6064_v5, %v6062_v42  ;;  %v6065_v49 = vadd.f32 %v5983_v3, %v5951_v43  ;;  %v6067_v38 = vadd.f32 %v5984_v47, %v5952_v8  ;;  %v5890_v36 = vmul.f32 %v11511_v12, %v11423_v35  ;;  %v12485_v35 = vld [vmem:[#allocation137_spill] sm:$0xff]  ;;  %v12489_v42 = vld [vmem:[#allocation170_spill] sm:$0xff]  ;;  %v12490_v2 = vld [vmem:[#allocation87_spill] sm:$0xff] }
 0x713   : > { %v11665_v46 = vpop.eup %8212  ;;  %v5921_v60 = vmul.f32 %v11465_v40, %v12478_v63  ;;  %v5922_v31 = vmul.f32 %v11511_v12, %v12479_v10  ;;  %v5953_v11 = vmul.f32 %v5846_v14, %v12480_v54  ;;  %v5954_v30 = vmul.f32 %v5848_v18, %v12481_v59  ;;  %v12487_v40 = vld [vmem:[#allocation54_spill] sm:$0xff]  ;;  %v12491_v57 = vld [vmem:[#allocation53_spill] sm:$0xff]  ;;  %v12492_v27 = vld [vmem:[#allocation116_spill] sm:$0xff] }
 0x714   : > { %7468 = vmatprep.mubr.bf16.mxu0 %v6101_v26  ;;  %v6066_v56 = vadd.f32 %v6065_v49, %v6015_v58  ;;  %v6068_v6 = vadd.f32 %v6067_v38, %v6016_v19  ;;  %v5985_v51 = vmul.f32 %v5889_v9, %v12482_v50  ;;  %v5986_v44 = vmul.f32 %v5890_v36, %v12483_v29  ;;  %v12493_v18 = vld [vmem:[#allocation72_spill] sm:$0xff]  ;;  %v12494_v49 = vld [vmem:[#allocation74_spill] sm:$0xff]  ;;  %v12499_v59 = vld [vmem:[#allocation149_spill] sm:$0xff] }
 0x715   : > { %v6017_v34 = vmul.f32 %v5921_v60, %v12484_v55  ;;  %v6018_v7 = vmul.f32 %v5922_v31, %v12485_v35  ;;  %v5850_v24 = vmul.f32 %v12487_v40, %v12486_v61  ;;  %v5852_v8 = vmul.f32 %v11488_v37, %v12488_v45  ;;  %v12495_v9 = vld [vmem:[#allocation104_spill] sm:$0xff]  ;;  %v12496_v60 = vld [vmem:[#allocation106_spill] sm:$0xff] }
 0x716   : > { %v6102_v43 = vpack.c.bf16 %v6068_v6, %v6066_v56  ;;  %v6069_v12 = vadd.f32 %v5985_v51, %v5953_v11  ;;  %v5891_v5 = vmul.f32 %v12487_v40, %v12489_v42  ;;  %v6071_v3 = vadd.f32 %v5986_v44, %v5954_v30  ;;  %v12497_v31 = vld [vmem:[#allocation134_spill] sm:$0xff]  ;;  %v12498_v11 = vld [vmem:[#allocation136_spill] sm:$0xff] }
 0x717   : > { %v8215_v23 = vpop.eup %8214  ;;  %v5892_v47 = vmul.f32 %v11488_v37, %v12490_v2  ;;  %v5923_v58 = vmul.f32 %v12487_v40, %v12491_v57  ;;  %v5924_v19 = vmul.f32 %v11488_v37, %v12492_v27  ;;  %v5955_v26 = vmul.f32 %v12493_v18, %v5850_v24  ;;  %v12500_v50 = vld [vmem:[#allocation160_spill] sm:$0xff]  ;;  %v12502_v35 = vld [vmem:[#allocation150_spill] sm:$0xff]  ;;  %v12503_v24 = vld [vmem:[#allocation77_spill] sm:$0xff] }
 0x718   : > { %7469 = vmatmul.mubr.bf16.gmra.mrb[160].mxu0 %v6102_v43  ;;  %v6070_v14 = vadd.f32 %v6069_v12, %v6017_v34  ;;  %v5956_v38 = vmul.f32 %v12494_v49, %v5852_v8  ;;  %v5987_v36 = vmul.f32 %v12495_v9, %v5891_v5  ;;  %v6072_v63 = vadd.f32 %v6071_v3, %v6018_v7  ;;  %v12501_v55 = vld [vmem:[#allocation152_spill] sm:$0xff]  ;;  %v12504_v12 = vld [vmem:[#allocation79_spill] sm:$0xff]  ;;  %v12505_v8 = vld [vmem:[#allocation109_spill] sm:$0xff] }
 0x719   : > { %v5988_v10 = vmul.f32 %v12496_v60, %v5892_v47  ;;  %v6019_v54 = vmul.f32 %v12497_v31, %v5923_v58  ;;  %v6020_v56 = vmul.f32 %v12498_v11, %v5924_v19  ;;  %v5854_v30 = vmul.f32 %v11556_v41, %v12499_v59  ;;  %v12506_v5 = vld [vmem:[#allocation111_spill] sm:$0xff]  ;;  %v12508_v57 = vld [vmem:[#allocation141_spill] sm:$0xff]  ;;  %v12509_v27 = vld [vmem:[#allocation52_spill] sm:$0xff] }
 0x71a   : > { %v6073_v6 = vadd.f32 %v5987_v36, %v5955_v26  ;;  %v5856_v37 = vmul.f32 %v11606_v16, %v11506_v17  ;;  %v5893_v51 = vmul.f32 %v11556_v41, %v12500_v50  ;;  %v6103_v29 = vpack.c.bf16 %v6072_v63, %v6070_v14  ;;  %v12507_v2 = vld [vmem:[#allocation139_spill] sm:$0xff]  ;;  %v12510_v19 = vld [vmem:[#allocation161_spill] sm:$0xff]  ;;  %v12513_v36 = vld [vmem:[#allocation86_spill] sm:$0xff] }
 0x71b   : > { %v6075_v44 = vadd.f32 %v5988_v10, %v5956_v38  ;;  %v5894_v34 = vmul.f32 %v11606_v16, %v12501_v55  ;;  %v5925_v7 = vmul.f32 %v11556_v41, %v12502_v35  ;;  %v5926_v40 = vmul.f32 %v11606_v16, %v11522_v21  ;;  %v12511_v16 = vld [vmem:[#allocation84_spill] sm:$0xff]  ;;  %v12512_v38 = vld [vmem:[#allocation151_spill] sm:$0xff]  ;;  %v12514_v60 = vld [vmem:[#allocation162_spill] sm:$0xff] }
 0x71c   : > { %v6074_v61 = vadd.f32 %v6073_v6, %v6019_v54  ;;  %v5957_v43 = vmul.f32 %v5854_v30, %v12503_v24  ;;  %v5958_v45 = vmul.f32 %v5856_v37, %v12504_v12  ;;  %7472 = vmatprep.mubr.bf16.mxu0 %v6103_v29  ;;  %v5989_v42 = vmul.f32 %v5893_v51, %v12505_v8  ;;  %v12515_v31 = vld [vmem:[#allocation76_spill] sm:$0xff]  ;;  %v12516_v11 = vld [vmem:[#allocation78_spill] sm:$0xff] }
 0x71d   : > { %v6076_v17 = vadd.f32 %v6075_v44, %v6020_v56  ;;  %v5990_v3 = vmul.f32 %v5894_v34, %v12506_v5  ;;  %v6021_v47 = vmul.f32 %v5925_v7, %v12507_v2  ;;  %v6022_v58 = vmul.f32 %v5926_v40, %v12508_v57  ;;  %v12517_v30 = vld [vmem:[#allocation108_spill] sm:$0xff]  ;;  %v12518_v50 = vld [vmem:[#allocation110_spill] sm:$0xff]  ;;  %v12523_v5 = vld [vmem:[#allocation113_spill] sm:$0xff] }
 0x71e   : > { %v5858_v41 = vmul.f32 %v11534_v22, %v12509_v27  ;;  %v5860_v21 = vmul.f32 %v11580_v20, %v12510_v19  ;;  %v5895_v14 = vmul.f32 %v11534_v22, %v12511_v16  ;;  %v6077_v26 = vadd.f32 %v5989_v42, %v5957_v43  ;;  %v12519_v29 = vld [vmem:[#allocation138_spill] sm:$0xff]  ;;  %v12520_v55 = vld [vmem:[#allocation140_spill] sm:$0xff]  ;;  %v12522_v42 = vld [vmem:[#allocation83_spill] sm:$0xff] }
 0x71f   : > { %v6104_v18 = vpack.c.bf16 %v6076_v17, %v6074_v61  ;;  %v6079_v49 = vadd.f32 %v5990_v3, %v5958_v45  ;;  %v5896_v9 = vmul.f32 %v11580_v20, %v12512_v38  ;;  %v5927_v63 = vmul.f32 %v11534_v22, %v12513_v36  ;;  %v12521_v45 = vld [vmem:[#allocation81_spill] sm:$0xff]  ;;  %v12524_v2 = vld [vmem:[#allocation115_spill] sm:$0xff] }
 0x720   : > { %v5928_v10 = vmul.f32 %v11580_v20, %v12514_v60  ;;  %v5959_v54 = vmul.f32 %v12515_v31, %v5858_v41  ;;  %v5960_v56 = vmul.f32 %v12516_v11, %v5860_v21  ;;  %v6078_v6 = vadd.f32 %v6077_v26, %v6021_v47  ;;  %v12525_v57 = vld [vmem:[#allocation143_spill] sm:$0xff]  ;;  %v12528_v26 = vld [vmem:[#allocation82_spill] sm:$0xff] }
 0x721   : > { %7473 = vmatmul.mubr.bf16.gmra.mrb[164].mxu0 %v6104_v18  ;;  %v6080_v59 = vadd.f32 %v6079_v49, %v6022_v58  ;;  %v5991_v37 = vmul.f32 %v12517_v30, %v5895_v14  ;;  %v5992_v51 = vmul.f32 %v12518_v50, %v5896_v9  ;;  %v6023_v44 = vmul.f32 %v12519_v29, %v5927_v63  ;;  %v12526_v58 = vld [vmem:[#allocation145_spill] sm:$0xff]  ;;  %v12527_v14 = vld [vmem:[#allocation80_spill] sm:$0xff]  ;;  %v12531_v63 = vld [vmem:[#allocation142_spill] sm:$0xff] }
 0x722   : > { %v6024_v34 = vmul.f32 %v12520_v55, %v5928_v10  ;;  %v5862_v22 = vmul.f32 %v11647_v28, %v11549_v15  ;;  %v5864_v20 = vmul.f32 %v8215_v23, %v11601_v48  ;;  %v5897_v40 = vmul.f32 %v11647_v28, %v11562_v4  ;;  %v11766_v11 = vld [vmem:[#allocation19] ss:$0 sm:$0xff]  ;;  %v8216_v50 = vld [vmem:[%s9406_s13 + $0x10] sm:$0xff] }
 0x723   : > { %v6105_v35 = vpack.c.bf16 %v6080_v59, %v6078_v6  ;;  %v6081_v7 = vadd.f32 %v5991_v37, %v5959_v54  ;;  %v6083_v61 = vadd.f32 %v5992_v51, %v5960_v56  ;;  %v5898_v24 = vmul.f32 %v8215_v23, %v11612_v13  ;;  %v8217_v55 = vld [vmem:[%s9406_s13] sm:$0xff] }
 0x724   : > { %v5929_v43 = vmul.f32 %v11647_v28, %v11569_v33  ;;  %v5930_v12 = vmul.f32 %v8215_v23, %v11618_v25  ;;  %v5961_v17 = vmul.f32 %v5862_v22, %v12521_v45  ;;  %v5962_v48 = vmul.f32 %v5864_v20, %v12522_v42  ;;  %v8218_v20 = vld [vmem:[%s9406_s13 + $0x18] sm:$0xff] }
 0x725   : > { %7476 = vmatprep.mubr.bf16.mxu0 %v6105_v35  ;;  %v6082_v8 = vadd.f32 %v6081_v7, %v6023_v44  ;;  %v6084_v15 = vadd.f32 %v6083_v61, %v6024_v34  ;;  %v5993_v3 = vmul.f32 %v5897_v40, %v12523_v5  ;;  %v5994_v47 = vmul.f32 %v5898_v24, %v12524_v2  ;;  %v8219_v7 = vld [vmem:[%s9406_s13 + $0x8] sm:$0xff]  ;;  %v8222_v2 = vld [vmem:[%s9406_s13 + $0x38] sm:$0xff] }
 0x726   : > { %v6025_v4 = vmul.f32 %v5929_v43, %v12525_v57  ;;  %v6026_v13 = vmul.f32 %v5930_v12, %v12526_v58  ;;  %v5866_v33 = vmul.f32 %v11630_v1, %v11528_v53  ;;  %v5868_v23 = vmul.f32 %v11665_v46, %v11575_v52  ;;  %v12529_v52 = vld [vmem:[#allocation112_spill] sm:$0xff] }
 0x727   : > { %v6106_v28 = vpack.c.bf16 %v6084_v15, %v6082_v8  ;;  %v6085_v25 = vadd.f32 %v5993_v3, %v5961_v17  ;;  %v5899_v27 = vmul.f32 %v11630_v1, %v11538_v39  ;;  %v6087_v41 = vadd.f32 %v5994_v47, %v5962_v48  ;;  %v12530_v39 = vld [vmem:[#allocation114_spill] sm:$0xff]  ;;  %v8221_v48 = vld [vmem:[%s9406_s13 + $0x20] sm:$0xff]  ;;  %v8223_v57 = vld [vmem:[%s9406_s13 + $0x28] sm:$0xff] }
 0x728   : > { %v5900_v19 = vmul.f32 %v11665_v46, %v11587_v62  ;;  %v5931_v21 = vmul.f32 %v11630_v1, %v11543_v32  ;;  %v5932_v16 = vmul.f32 %v11665_v46, %v11595_v0  ;;  %v5963_v18 = vmul.f32 %v12527_v14, %v5866_v33  ;;  %v12532_v62 = vld [vmem:[#allocation144_spill] sm:$0xff]  ;;  %v8220_v17 = vld [vmem:[%s9406_s13 + $0x30] sm:$0xff]  ;;  %v8226_v14 = vld [vmem:[%s9406_s13 + $0x58] sm:$0xff] }
 0x729   : > { %7477 = vmatmul.mubr.bf16.gmra.mrb[168].mxu0 %v6106_v28  ;;  %v6086_v53 = vadd.f32 %v6085_v25, %v6025_v4  ;;  %v5964_v49 = vmul.f32 %v12528_v26, %v5868_v23  ;;  %v5995_v38 = vmul.f32 %v12529_v52, %v5899_v27  ;;  %v6088_v9 = vadd.f32 %v6087_v41, %v6026_v13  ;;  %v8224_v23 = vld [vmem:[%s9406_s13 + $0x50] sm:$0xff]  ;;  %v8227_v26 = vld [vmem:[%s9406_s13 + $0x48] sm:$0xff] }
 0x72a   : > { %v5996_v36 = vmul.f32 %v12530_v39, %v5900_v19  ;;  %v6027_v60 = vmul.f32 %v12531_v63, %v5931_v21  ;;  %v6028_v10 = vmul.f32 %v12532_v62, %v5932_v16  ;;  %v8225_v21 = vld [vmem:[%s9406_s13 + $0x40] sm:$0xff]  ;;  %v8228_v63 = vld [vmem:[%s9406_s13 + $0x70] sm:$0xff] }
 0x72b   : > { %v6089_v32 = vadd.f32 %v5995_v38, %v5963_v18  ;;  %v6107_v1 = vpack.c.bf16 %v6088_v9, %v6086_v53 }
 0x72c   : > { %v6091_v31 = vadd.f32 %v5996_v36, %v5964_v49 }
 0x72d   : > { %v6090_v0 = vadd.f32 %v6089_v32, %v6027_v60  ;;  %7480 = vmatprep.mubr.bf16.mxu0 %v6107_v1  ;;  %v8229_v32 = vld [vmem:[%s9406_s13 + $0x60] sm:$0xff] }
 0x72e   : > { %v6092_v46 = vadd.f32 %v6091_v31, %v6028_v10 }
 0x730   : > { %v6108_v54 = vpack.c.bf16 %v6092_v46, %v6090_v0  ;;  %v8230_v0 = vld [vmem:[%s9406_s13 + $0x78] sm:$0xff] }
 0x732   : > { %7481 = vmatmul.mubr.bf16.gmra.mrb[172].mxu0 %v6108_v54  ;;  %v8231_v54 = vld [vmem:[%s9406_s13 + $0x68] sm:$0xff] }
 0x7a1   : > { %v7454_v56 = vpop.f32.mrb[144].mxu0 }
 0x7a2   : > { %v6223_v6 = vadd.f32 %v7454_v56, %v11766_v11  ;;  %v6214_v59 = vpop.f32.mrb[145].mxu0 }
 0x7a3   : > { %v6215_v30 = vadd.f32 %v11766_v11, %v6214_v59  ;;  %v7455_v37 = vpop.f32.mrb[146].mxu0 }
 0x7a4   : > { %v6343_v51 = vadd.f32 %v8216_v50, %v6223_v6  ;;  %v6226_v29 = vadd.f32 %v7455_v37, %v11766_v11  ;;  %v6217_v44 = vpop.f32.mrb[147].mxu0 }
 0x7a5   : > { %v6341_v34 = vadd.f32 %v8217_v55, %v6215_v30  ;;  %v6218_v22 = vadd.f32 %v11766_v11, %v6217_v44 }
 0x7a6   : > { %6375 = vst [vmem:[%s9431_s16 + $0x10] sm:$0xff] %v6343_v51  ;;  %v6344_v35 = vadd.f32 %v8218_v20, %v6226_v29  ;;  %v8232_v51 = vld [vmem:[%s9406_s13 + $0x90] sm:$0xff] }
 0x7a7   : > { %6373 = vst [vmem:[%s9431_s16] sm:$0xff] %v6341_v34  ;;  %v6342_v61 = vadd.f32 %v8219_v7, %v6218_v22  ;;  %v8233_v34 = vld [vmem:[%s9406_s13 + $0x80] sm:$0xff] }
 0x7a8   : > { %6376 = vst [vmem:[%s9431_s16 + $0x18] sm:$0xff] %v6344_v35  ;;  %v8234_v35 = vld [vmem:[%s9406_s13 + $0x98] sm:$0xff] }
 0x7a9   : > { %6374 = vst [vmem:[%s9431_s16 + $0x8] sm:$0xff] %v6342_v61  ;;  %v8235_v61 = vld [vmem:[%s9406_s13 + $0x88] sm:$0xff] }
 0x7bc   : > { %v7458_v40 = vpop.f32.mrb[148].mxu0 }
 0x7bd   : > { %v6239_v24 = vadd.f32 %v7458_v40, %v11766_v11  ;;  %v6230_v43 = vpop.f32.mrb[149].mxu0 }
 0x7be   : > { %v6231_v12 = vadd.f32 %v11766_v11, %v6230_v43  ;;  %v7459_v45 = vpop.f32.mrb[150].mxu0 }
 0x7bf   : > { %v6347_v8 = vadd.f32 %v8220_v17, %v6239_v24  ;;  %v6242_v15 = vadd.f32 %v7459_v45, %v11766_v11  ;;  %v6233_v42 = vpop.f32.mrb[151].mxu0 }
 0x7c0   : > { %v6345_v5 = vadd.f32 %v8221_v48, %v6231_v12  ;;  %v6234_v3 = vadd.f32 %v11766_v11, %v6233_v42 }
 0x7c1   : > { %6379 = vst [vmem:[%s9431_s16 + $0x30] sm:$0xff] %v6347_v8  ;;  %v6348_v47 = vadd.f32 %v8222_v2, %v6242_v15  ;;  %v8236_v8 = vld [vmem:[%s9406_s13 + $0xb0] sm:$0xff] }
 0x7c2   : > { %6377 = vst [vmem:[%s9431_s16 + $0x20] sm:$0xff] %v6345_v5  ;;  %v6346_v4 = vadd.f32 %v8223_v57, %v6234_v3  ;;  %v8237_v5 = vld [vmem:[%s9406_s13 + $0xa0] sm:$0xff] }
 0x7c3   : > { %6380 = vst [vmem:[%s9431_s16 + $0x38] sm:$0xff] %v6348_v47  ;;  %v8238_v47 = vld [vmem:[%s9406_s13 + $0xb8] sm:$0xff] }
 0x7c4   : > { %6378 = vst [vmem:[%s9431_s16 + $0x28] sm:$0xff] %v6346_v4  ;;  %v8239_v4 = vld [vmem:[%s9406_s13 + $0xa8] sm:$0xff] }
 0x7d6   : > { %v7462_v58 = vpop.f32.mrb[152].mxu0 }
 0x7d7   : > { %v6255_v13 = vadd.f32 %v7462_v58, %v11766_v11  ;;  %v6246_v33 = vpop.f32.mrb[153].mxu0 }
 0x7d8   : > { %v6247_v28 = vadd.f32 %v11766_v11, %v6246_v33  ;;  %v7463_v25 = vpop.f32.mrb[154].mxu0 }
 0x7d9   : > { %v6351_v27 = vadd.f32 %v8224_v23, %v6255_v13  ;;  %v6258_v41 = vadd.f32 %v7463_v25, %v11766_v11  ;;  %v6249_v19 = vpop.f32.mrb[155].mxu0 }
 0x7da   : > { %v6349_v16 = vadd.f32 %v8225_v21, %v6247_v28  ;;  %v6250_v53 = vadd.f32 %v11766_v11, %v6249_v19 }
 0x7db   : > { %6383 = vst [vmem:[%s9431_s16 + $0x50] sm:$0xff] %v6351_v27  ;;  %v6352_v18 = vadd.f32 %v8226_v14, %v6258_v41  ;;  %v8240_v27 = vld [vmem:[%s9406_s13 + $0xd0] sm:$0xff] }
 0x7dc   : > { %6381 = vst [vmem:[%s9431_s16 + $0x40] sm:$0xff] %v6349_v16  ;;  %v6350_v49 = vadd.f32 %v8227_v26, %v6250_v53  ;;  %v8241_v16 = vld [vmem:[%s9406_s13 + $0xc0] sm:$0xff] }
 0x7dd   : > { %6384 = vst [vmem:[%s9431_s16 + $0x58] sm:$0xff] %v6352_v18  ;;  %v8242_v18 = vld [vmem:[%s9406_s13 + $0xd8] sm:$0xff] }
 0x7de   : > { %6382 = vst [vmem:[%s9431_s16 + $0x48] sm:$0xff] %v6350_v49  ;;  %v8243_v49 = vld [vmem:[%s9406_s13 + $0xc8] sm:$0xff] }
 0x7e1   : > { %v7466_v52 = vpop.f32.mrb[156].mxu0 }
 0x7e2   : > { %v6271_v38 = vadd.f32 %v7466_v52, %v11766_v11  ;;  %v6262_v9 = vpop.f32.mrb[157].mxu0 }
 0x7e3   : > { %v6263_v39 = vadd.f32 %v11766_v11, %v6262_v9  ;;  %v7467_v36 = vpop.f32.mrb[158].mxu0 }
 0x7e4   : > { %v6355_v60 = vadd.f32 %v8228_v63, %v6271_v38  ;;  %v6274_v62 = vadd.f32 %v7467_v36, %v11766_v11  ;;  %v6265_v10 = vpop.f32.mrb[159].mxu0 }
 0x7e5   : > { %v6353_v1 = vadd.f32 %v8229_v32, %v6263_v39  ;;  %v6266_v31 = vadd.f32 %v11766_v11, %v6265_v10 }
 0x7e6   : > { %6387 = vst [vmem:[%s9431_s16 + $0x70] sm:$0xff] %v6355_v60  ;;  %v6356_v46 = vadd.f32 %v8230_v0, %v6274_v62  ;;  %v8244_v60 = vld [vmem:[%s9406_s13 + $0xf0] sm:$0xff] }
 0x7e7   : > { %6385 = vst [vmem:[%s9431_s16 + $0x60] sm:$0xff] %v6353_v1  ;;  %v6354_v56 = vadd.f32 %v8231_v54, %v6266_v31  ;;  %v8245_v1 = vld [vmem:[%s9406_s13 + $0xe0] sm:$0xff] }
 0x7e8   : > { %6388 = vst [vmem:[%s9431_s16 + $0x78] sm:$0xff] %v6356_v46  ;;  %v8246_v46 = vld [vmem:[%s9406_s13 + $0xf8] sm:$0xff] }
 0x7e9   : > { %6386 = vst [vmem:[%s9431_s16 + $0x68] sm:$0xff] %v6354_v56  ;;  %v8247_v56 = vld [vmem:[%s9406_s13 + $0xe8] sm:$0xff] }
 0x7eb   : > { %v7470_v6 = vpop.f32.mrb[160].mxu0 }
 0x7ec   : > { %v6287_v59 = vadd.f32 %v7470_v6, %v11766_v11  ;;  %v6278_v30 = vpop.f32.mrb[161].mxu0 }
 0x7ed   : > { %v6279_v37 = vadd.f32 %v11766_v11, %v6278_v30  ;;  %v7471_v50 = vpop.f32.mrb[162].mxu0 }
 0x7ee   : > { %v6359_v29 = vadd.f32 %v8232_v51, %v6287_v59  ;;  %v6290_v44 = vadd.f32 %v7471_v50, %v11766_v11  ;;  %v6281_v55 = vpop.f32.mrb[163].mxu0 }
 0x7ef   : > { %v6357_v22 = vadd.f32 %v8233_v34, %v6279_v37  ;;  %v6282_v20 = vadd.f32 %v11766_v11, %v6281_v55 }
 0x7f0   : > { %6391 = vst [vmem:[%s9431_s16 + $0x90] sm:$0xff] %v6359_v29  ;;  %v6360_v7 = vadd.f32 %v8234_v35, %v6290_v44 }
 0x7f1   : > { %6389 = vst [vmem:[%s9431_s16 + $0x80] sm:$0xff] %v6357_v22  ;;  %v6358_v40 = vadd.f32 %v8235_v61, %v6282_v20 }
 0x7f2   : > { %6392 = vst [vmem:[%s9431_s16 + $0x98] sm:$0xff] %v6360_v7 }
 0x7f3   : > { %6390 = vst [vmem:[%s9431_s16 + $0x88] sm:$0xff] %v6358_v40 }
 0x7f4   : > { %v7474_v24 = vpop.f32.mrb[164].mxu0 }
 0x7f5   : > { %v6303_v43 = vadd.f32 %v7474_v24, %v11766_v11  ;;  %v6294_v12 = vpop.f32.mrb[165].mxu0 }
 0x7f6   : > { %v6295_v45 = vadd.f32 %v11766_v11, %v6294_v12  ;;  %v7475_v17 = vpop.f32.mrb[166].mxu0 }
 0x7f7   : > { %v6363_v15 = vadd.f32 %v8236_v8, %v6303_v43  ;;  %v6306_v42 = vadd.f32 %v7475_v17, %v11766_v11  ;;  %v6297_v48 = vpop.f32.mrb[167].mxu0 }
 0x7f8   : > { %v6361_v3 = vadd.f32 %v8237_v5, %v6295_v45  ;;  %v6298_v2 = vadd.f32 %v11766_v11, %v6297_v48 }
 0x7f9   : > { %6395 = vst [vmem:[%s9431_s16 + $0xb0] sm:$0xff] %v6363_v15  ;;  %v6364_v57 = vadd.f32 %v8238_v47, %v6306_v42 }
 0x7fa   : > { %6393 = vst [vmem:[%s9431_s16 + $0xa0] sm:$0xff] %v6361_v3  ;;  %v6362_v58 = vadd.f32 %v8239_v4, %v6298_v2 }
 0x7fb   : > { %6396 = vst [vmem:[%s9431_s16 + $0xb8] sm:$0xff] %v6364_v57 }
 0x7fc   : > { %6394 = vst [vmem:[%s9431_s16 + $0xa8] sm:$0xff] %v6362_v58  ;;  %v7478_v13 = vpop.f32.mrb[168].mxu0 }
 0x7fd   : > { %v6319_v33 = vadd.f32 %v7478_v13, %v11766_v11  ;;  %v6310_v28 = vpop.f32.mrb[169].mxu0 }
 0x7fe   : > { %v6311_v25 = vadd.f32 %v11766_v11, %v6310_v28  ;;  %v7479_v23 = vpop.f32.mrb[170].mxu0 }
 0x7ff   : > { %v6367_v41 = vadd.f32 %v8240_v27, %v6319_v33  ;;  %v6322_v19 = vadd.f32 %v7479_v23, %v11766_v11  ;;  %v6313_v21 = vpop.f32.mrb[171].mxu0 }
 0x800   : > { %v6365_v53 = vadd.f32 %v8241_v16, %v6311_v25  ;;  %v6314_v14 = vadd.f32 %v11766_v11, %v6313_v21 }
 0x801   : > { %6399 = vst [vmem:[%s9431_s16 + $0xd0] sm:$0xff] %v6367_v41  ;;  %v6368_v26 = vadd.f32 %v8242_v18, %v6322_v19 }
 0x802   : > { %6397 = vst [vmem:[%s9431_s16 + $0xc0] sm:$0xff] %v6365_v53  ;;  %v6366_v52 = vadd.f32 %v8243_v49, %v6314_v14 }
 0x803   : > { %6400 = vst [vmem:[%s9431_s16 + $0xd8] sm:$0xff] %v6368_v26 }
 0x804   : > { %6398 = vst [vmem:[%s9431_s16 + $0xc8] sm:$0xff] %v6366_v52 }
 0x805   : > { %v7482_v38 = vpop.f32.mrb[172].mxu0 }
 0x806   : > { %v6335_v9 = vadd.f32 %v7482_v38, %v11766_v11  ;;  %v6326_v39 = vpop.f32.mrb[173].mxu0 }
 0x807   : > { %v6327_v36 = vadd.f32 %v11766_v11, %v6326_v39  ;;  %v7483_v63 = vpop.f32.mrb[174].mxu0 }
 0x808   : > { %v6371_v62 = vadd.f32 %v8244_v60, %v6335_v9  ;;  %v6338_v10 = vadd.f32 %v7483_v63, %v11766_v11  ;;  %v6329_v32 = vpop.f32.mrb[175].mxu0 }
 0x809   : > { %v6369_v31 = vadd.f32 %v8245_v1, %v6327_v36  ;;  %v6330_v0 = vadd.f32 %v11766_v11, %v6329_v32 }
 0x80a   : > { %6403 = vst [vmem:[%s9431_s16 + $0xf0] sm:$0xff] %v6371_v62  ;;  %v6372_v54 = vadd.f32 %v8246_v46, %v6338_v10 }
 0x80b   : > { %6401 = vst [vmem:[%s9431_s16 + $0xe0] sm:$0xff] %v6369_v31  ;;  %v6370_v6 = vadd.f32 %v8247_v56, %v6330_v0 }
 0x80c   : > { %6404 = vst [vmem:[%s9431_s16 + $0xf8] sm:$0xff] %v6372_v54 }
 0x80d   : > { %6402 = vst [vmem:[%s9431_s16 + $0xe8] sm:$0xff] %v6370_v6 }
 0x80e PF: > { %s12533_s23 = sld [smem:[#allocation38_spill]]  ;;  %s12534_s18 = sld [smem:[#allocation49_spill]] }
 0x80f   : > { %s12535_s20 = sld [smem:[#allocation201_spill]]  ;;  %s6419_s3 = sshll.u32 %s9431_s16, 4  ;;  %s11871_s3 = int_to_ptr.vmem [resolvable:$true] %s6419_s3 }
 0x810   : > { %s6406_s26 = scalar_lea.sflag [#allocation5], %s9403_s14  ;;  %s8500_s13 = scalar_lea.vmem %s11871_s3, 4096 }
 0x811   : > { %p8501_p4 = scmp.ne.s32.totalorder %s11871_s3, %s8500_s13  ;;  %s8698_s17 = smov [#allocation21]  }
 0x812   : > { %s8504_s12 = sshll.u32 %s8698_s17, 4  ;;  %s8505_s12 = int_to_ptr.vmem [resolvable:$false] %s8504_s12 }
 0x813   : > { %s8506_s21 = scalar_lea.vmem %s8505_s12, 8192  ;;  %p8507_p2 = scmp.lt.s32.totalorder %s11871_s3, %s8505_s12 }
 0x814   : > { %s6835_s4 = sshll.u32 %s12533_s23, 12  ;;  %p12537_p10 = scmp.ne.s32.totalorder %s12534_s18, 0 }
 0x815   : > { %s12536_s2 = smov %s12535_s20  ;;  %s11868_s11 = scalar_lea.hbm %s12535_s20, %s6835_s4 }
 0x816   : > { %p8502_p9 = pnand %p8501_p4, %p12537_p10  ;;  %p8508_p1 = scmp.lt.s32.totalorder %s8506_s21, %s8500_s13 }
 0x818   : > { %p8503_p11 = pneg %p8502_p9  ;;  %p8509_p13 = por %p8508_p1, %p8507_p2 }
 0x81a   : > { %p8510_p7 = pnand %p8509_p13, %p8503_p11 }
 0x81c   : > { %8513 = shalt.err (!%p8510_p7)
}
 0x81d   : > { %s8514_s16 = scalar_lea.hbm %s11868_s11, 4096  ;;  %s8518_s4 = scalar_lea.hbm %s12536_s2, 8192 }
 0x81e   : > { %p8515_p6 = scmp.ne.s32.totalorder %s11868_s11, %s8514_s16  ;;  %p8519_p3 = scmp.lt.u32.totalorder %s11868_s11, %s12536_s2 }
 0x81f   : > { %p8520_p0 = scmp.lt.u32.totalorder %s8518_s4, %s8514_s16  ;;  %p8522_p4 = scmp.lt.u32.totalorder %s8514_s16, %s11868_s11 }
 0x820   : > { %p8516_p8 = pnand %p8515_p6, %p12537_p10 }
 0x821   : > { %p8521_p5 = por %p8520_p0, %p8519_p3 }
 0x822   : > { %p8517_p12 = pneg %p8516_p8 }
 0x823   : > { %p8523_p9 = por %p8522_p4, %p8521_p5 }
 0x825   : > { %p8524_p11 = pnand %p8523_p9, %p8517_p12 }
 0x827   : > { %8527 = shalt.err (!%p8524_p11)
}
 0x828   : > { %s8699_s20 = smov 128   ;;  %s8700_s13 = smov 8  }
 0x829   : > { %7577 = dma.vmem_to_hbm [thread:$0]  (%p12537_p10), %s11871_s3, 4096, %s11868_s11, %s6406_s26, %s8699_s20, %s8699_s20, %s8700_s13  }
 0x82a PF: > { %s12538_s17 = sld [smem:[#allocation33_spill]]  ;;  %s12539_s12 = sld [smem:[#allocation50_spill]] }
 0x82b   : > { %p7619_p2 = scmp.ge.s32.totalorder %s8670_s30, 2 }
 0x830   : > { %s6434_s21 = sand.u32 1, %s12538_s17   ;;  %p12540_p1 = scmp.ne.s32.totalorder %s12539_s12, 0 }
 0x831   : > { %s6435_s16 = scalar_lea.sflag [#allocation5], %s6434_s21 }
 0x832   : > { %p7602_p13 = pnand %p7619_p2, %p12540_p1 }
 0x834   : > { %8613 = dma.done.wait (!%p7602_p13), %s6435_s16, 4096  }
 0x835   : > { %8615 = vsyncadd (!%p7602_p13), %s6435_s16, 4294963200  ;;  %s34_s30 = sadd.s32 1, %s8670_s30   ;;  %s12542_s17 = sld [smem:[#allocation34_spill]] }
 0x836   : > { %p11902_p7 = scmp.ge.s32.totalorder %s34_s30, 6   ;;  %s12543_s14 = sld [smem:[#allocation46_spill]] }
 0x837   : > { %s12544_s20 = sld [smem:[#allocation35_spill]]  ;;  %s12545_s11 = sld [smem:[#allocation43_spill]] }
 0x838   : > { %s12546_s23 = sld [smem:[#allocation36_spill]]  ;;  %s12547_s3 = sld [smem:[#allocation44_spill]] }
 0x839   : > { %s12548_s4 = sld [smem:[#allocation40_spill]]  ;;  %s12549_s13 = sld [smem:[#allocation41_spill]] }
 0x83a   : > { %s12550_s18 = smov %s8626_s19  ;;  %s12552_s21 = smov %s8638_s22 }
 0x83b   : > { %s12554_s24 = smov %s8650_s25  ;;  %s12556_s26 = smov %s8662_s28 }
 0x83c   : > { %s12551_s19 = smov %s12543_s14  ;;  %s12557_s27 = smov %s8666_s29 }
 0x83d   : > { %s12553_s22 = smov %s12545_s11  ;;  %33 = sbr.rel (!%p11902_p7) target bundleno = 23 (0x17), region = 220 }
 0x83e   : > { %s12555_s25 = smov %s12547_s3 }
 0x83f   : > { %s12558_s28 = smov %s12548_s4  ;;  %s12559_s29 = smov %s12549_s13 }
 0x844   :  { %6440 = vsyncpa [#allocation4], 1 }
 0x845   :  { %6442 = vsyncpa [#allocation4 + $0x1], 1 }
 0x846   :  { %6443 = vsyncpa [#allocation7], 1 }
 0x847   :  { %6445 = vsyncpa [#allocation7 + $0x1], 1 }
 0x848   :  { %6446 = vsyncpa [#allocation11], 1 }
 0x849   :  { %6447 = vsyncpa [#allocation14], 1 }
 0x84a   :  { %6448 = vsyncpa [#allocation17], 1 }
 0x84b   :  { %6449 = vsyncpa [#allocation20], 1 }
 0x84c   :  { %6450 = vsyncpa [#allocation5], 1 }
 0x84d   :  { %6452 = vsyncpa [#allocation5 + $0x1], 1 }

</bundles_post_ra>
